<compile_context>
chip_gen: v6e
topology: v6e:2x2x1
jax: 0.10.0
libtpu: 0.0.40
codegen_flags: <defaults>
</compile_context>

<pallas_src>
import jax
import jax.numpy as jnp
from jax import lax
from jax.experimental import pallas as pl
from jax.experimental.pallas import tpu as pltpu


# ------------------------------ fused Pallas kernel ------------------------------

def _fused_net_kernel(pat_ref, w1_ref, b1_ref, w2_ref, b2_ref,
                      wf1_ref, bf1_ref, wf2_ref, bf2_ref,
                      out_ref, c2p_ref, fp_ref):
    f32 = jnp.float32
    bf16 = jnp.bfloat16
    TB = out_ref.shape[0]                    # batch tile

    # ---- conv1 + bias + ReLU + 2x2 max-pool -------------------------------------
    # patches lane layout: lane = g*32 + k, g = pool-window member (ph*2+pw), k = 5x5 tap.
    # w1 is block-diagonal [128, 512]; output lane group g holds member g's conv1 channels.
    patm = pat_ref[...].reshape(TB * 12 * 16, 128)                    # bf16 rows=(b,oh2,ow2pad16)
    o1 = jnp.dot(patm, w1_ref[...], preferred_element_type=f32)       # [TB*192, 512] f32
    o1 = jnp.maximum(o1 + b1_ref[...], 0.0)
    p1 = jnp.maximum(jnp.maximum(o1[:, 0:128], o1[:, 128:256]),       # max over 4 lane groups
                     jnp.maximum(o1[:, 256:384], o1[:, 384:512]))     # [TB*192, 128]
    p1t = p1.reshape(TB, 12, 16, 128)                                 # (b, h, w_pad16, c)
    # zero the ow2-padding columns (zero patch rows still picked up relu(bias))
    wi = lax.broadcasted_iota(jnp.int32, p1t.shape, 2)
    p1t = jnp.where(wi < 12, p1t, 0.0).astype(bf16)

    # ---- conv2: build [TB*64, 25*128] im2col in VMEM, then ONE 3200-deep matmul --
    for di in range(5):
        for dj in range(5):
            k = di * 5 + dj
            sl = p1t[:, di:di + 8, dj:dj + 8, :].reshape(TB * 64, 128)
            c2p_ref[:, k * 128:(k + 1) * 128] = sl                    # 128-lane-aligned store
    a2 = jnp.dot(c2p_ref[...], w2_ref[...], preferred_element_type=f32)   # [TB*64, 128]
    a2 = jnp.maximum(a2 + b2_ref[...], 0.0)

    # ---- 2x2 max-pool, packed lane-densely into the fc1 input scratch ------------
    a2r = a2.reshape(TB, 4, 2, 8, 128)                 # (b, h2, hp, ow, c)
    hmax = jnp.maximum(a2r[:, :, 0], a2r[:, :, 1])     # [TB, 4, 8, 128]
    for h2 in range(4):
        band = hmax[:, h2]                             # [TB, 8, 128]
        for w2 in range(4):
            v = jnp.max(band[:, 2 * w2:2 * w2 + 2, :], axis=1)        # [TB, 128]
            s = h2 * 4 + w2
            fp_ref[:, s * 128:(s + 1) * 128] = v.astype(bf16)

    # ---- fc1: ONE 2048-deep contraction + bias + ReLU ----------------------------
    h1 = jnp.dot(fp_ref[...], wf1_ref[...], preferred_element_type=f32)   # [TB, 512]
    h1 = jnp.maximum(h1 + bf1_ref[...], 0.0)

    # ---- fc2 + log_softmax over the 10 real classes (lanes >= 10 are padding) ----
    logits = jnp.dot(h1.astype(bf16), wf2_ref[...], preferred_element_type=f32) + bf2_ref[...]
    lane = lax.broadcasted_iota(jnp.int32, logits.shape, 1)
    logits = jnp.where(lane < 10, logits, -1e30)
    m = jnp.max(logits, axis=-1, keepdims=True)
    s0 = logits - m
    lse = jnp.log(jnp.sum(jnp.exp(s0), axis=-1, keepdims=True))
    out_ref[...] = s0 - lse                                            # [TB, 128] f32


# ------------------------------- per-forward glue ---------------------------------

def _conv1_patches(x):
    """x: [B, 1, 28, 28] -> lane-packed conv1 im2col patches [B, 12, 16, 128] bf16.

    lane = g*32 + k with g = ph*2 + pw (2x2 pool-window member) and k = di*5 + dj (5x5 tap),
    value = x[b, 0, 2*oh2 + ph + di, 2*ow2 + pw + dj].  ow2 is zero-padded 12 -> 16."""
    B = x.shape[0]
    xs = x[:, 0]                                                          # [B, 28, 28]
    cols = [xs[:, di:di + 24, dj:dj + 24] for di in range(5) for dj in range(5)]
    p = jnp.stack(cols, axis=-1)                                          # [B, 24, 24, 25]
    p = p.reshape(B, 12, 2, 12, 2, 25)                                    # (b,oh2,ph,ow2,pw,k)
    p = jnp.pad(p, ((0, 0), (0, 0), (0, 0), (0, 4), (0, 0), (0, 7)))      # ow2->16, k->32
    p = p.transpose(0, 1, 3, 2, 4, 5)                                     # (b,oh2,ow2,ph,pw,k)
    return p.reshape(B, 12, 16, 128).astype(jnp.bfloat16)


@jax.jit
def net_forward(pp, x):
    B = x.shape[0]
    TB = 8 if B % 8 == 0 else B            # batch tile (full batch if not 8-divisible)
    grid = (B // TB,)
    patches = _conv1_patches(x)

    cst = lambda *shape: pl.BlockSpec(shape, lambda i: (0,) * len(shape))  # resident weights
    in_specs = [
        pl.BlockSpec((TB, 12, 16, 128), lambda i: (i, 0, 0, 0)),   # patches (batch-tiled)
        cst(128, 512), cst(1, 512),                                # conv1 block-diag W, bias
        cst(3200, 128), cst(1, 128),                               # conv2 flat W, bias
        cst(2048, 512), cst(1, 512),                               # fc1 flat W, bias
        cst(512, 128), cst(1, 128),                                # fc2 W, bias
    ]
    out_spec = pl.BlockSpec((TB, 128), lambda i: (i, 0))

    out_pad = pl.pallas_call(
        _fused_net_kernel,
        out_shape=jax.ShapeDtypeStruct((B, 128), jnp.float32),
        grid=grid,
        in_specs=in_specs,
        out_specs=out_spec,
        scratch_shapes=[pltpu.VMEM((TB * 64, 25 * 128), jnp.bfloat16),   # conv2 im2col
                        pltpu.VMEM((TB, 16 * 128), jnp.bfloat16)],       # pooled fc1 input
        compiler_params=pltpu.CompilerParams(
            dimension_semantics=("parallel",),
            vmem_limit_bytes=32 * 1024 * 1024),
    )(patches, pp["w1g"], pp["b1g"], pp["w2f"], pp["b2p"],
      pp["wf1f"], pp["bf1p"], pp["wf2p"], pp["bf2p"])
    return out_pad[:, :10]


# ---------------------- one-time weight preparation (at init) ----------------------

def prepare_params(params):
    f32, bf16 = jnp.float32, jnp.bfloat16
    # conv1: [20,1,5,5] -> block-diagonal im2col matrix [128, 512] (4 pool-member groups)
    w1m = params["w1"].reshape(20, 25).T                                  # (k, cout)
    w1g = jnp.zeros((128, 512), f32)
    b1g = jnp.zeros((1, 512), f32)
    for g in range(4):
        w1g = w1g.at[g * 32:g * 32 + 25, g * 128:g * 128 + 20].set(w1m)
        b1g = b1g.at[0, g * 128:g * 128 + 20].set(params["b1"])
    # conv2: [50,20,5,5] -> flattened [25*128, 128], row = k*128 + cin
    w2 = params["w2"].transpose(2, 3, 1, 0).reshape(25, 20, 50)           # (k, cin, cout)
    w2f = jnp.zeros((25, 128, 128), f32).at[:, :20, :50].set(w2).reshape(3200, 128)
    b2p = jnp.zeros((1, 128), f32).at[0, :50].set(params["b2"])
    # fc1: [500, 800] -> flattened [16*128, 512], row = s*128 + c (torch flat index = c*16 + s)
    wf1 = params["wf1"].reshape(500, 50, 16).transpose(2, 1, 0)           # (s, c, n)
    wf1f = jnp.zeros((16, 128, 512), f32).at[:, :50, :500].set(wf1).reshape(2048, 512)
    bf1p = jnp.zeros((1, 512), f32).at[0, :500].set(params["bf1"])
    # fc2: [10, 500] -> [512, 128]
    wf2p = jnp.zeros((512, 128), f32).at[:500, :10].set(params["wf2"].T)
    bf2p = jnp.zeros((1, 128), f32).at[0, :10].set(params["bf2"])
    return dict(w1g=w1g.astype(bf16), b1g=b1g,
                w2f=w2f.astype(bf16), b2p=b2p,
                wf1f=wf1f.astype(bf16), bf1p=bf1p,
                wf2p=wf2p.astype(bf16), bf2p=bf2p)


# --------------------------- reference (pure JAX, f32) ------------------------------

def net_forward_ref(params, x):
    y = lax.conv_general_dilated(x, params["w1"], (1, 1), "VALID",
                                 dimension_numbers=("NCHW", "OIHW", "NCHW"))
    y = jax.nn.relu(y + params["b1"][None, :, None, None])
    y = lax.reduce_window(y, -jnp.inf, lax.max, (1, 1, 2, 2), (1, 1, 2, 2), "VALID")
    y = lax.conv_general_dilated(y, params["w2"], (1, 1), "VALID",
                                 dimension_numbers=("NCHW", "OIHW", "NCHW"))
    y = jax.nn.relu(y + params["b2"][None, :, None, None])
    y = lax.reduce_window(y, -jnp.inf, lax.max, (1, 1, 2, 2), (1, 1, 2, 2), "VALID")
    y = y.reshape(y.shape[0], -1)
    y = jax.nn.relu(y @ params["wf1"].T + params["bf1"])
    y = y @ params["wf2"].T + params["bf2"]
    return jax.nn.log_softmax(y, axis=1)


# ----------------------------------- params -----------------------------------------

def init_params(key):
    def uni(k, shape, fan_in):
        bound = 1.0 / jnp.sqrt(jnp.float32(fan_in))
        return jax.random.uniform(k, shape, jnp.float32, -bound, bound)

    ks = jax.random.split(key, 8)
    return {
        "w1": uni(ks[0], (20, 1, 5, 5), 1 * 5 * 5),
        "b1": uni(ks[1], (20,), 1 * 5 * 5),
        "w2": uni(ks[2], (50, 20, 5, 5), 20 * 5 * 5),
        "b2": uni(ks[3], (50,), 20 * 5 * 5),
        "wf1": uni(ks[4], (500, 800), 800),       # torch Linear weight layout [out, in]
        "bf1": uni(ks[5], (500,), 800),
        "wf2": uni(ks[6], (10, 500), 500),
        "bf2": uni(ks[7], (10,), 500),
    }


if __name__ == "__main__":
    key = jax.random.PRNGKey(0)
    pkey, xkey = jax.random.split(key)
    params = init_params(pkey)
    prepped = prepare_params(params)          # one-time weight repack (not per-forward)
    x = jax.random.normal(xkey, (2, 1, 28, 28), jnp.float32)

    out = jax.block_until_ready(net_forward(prepped, x))
    ref = jax.block_until_ready(net_forward_ref(params, x))

    assert out.shape == (2, 10), out.shape
    # bf16 matmul operands with f32 accumulation -> slightly looser tolerance than pure f32
    if not jnp.allclose(out, ref, atol=3e-2, rtol=3e-2):
        raise AssertionError("Pallas output does not match JAX reference")
    print("KERNEL_OK")
</pallas_src>

<mosaic_0001>
module attributes {stable_mosaic.version = 11 : i64} {
  func.func @_fused_net_kernel(%arg0: i32, %arg1: memref<2x12x16x128xbf16, #tpu.memory_space<vmem>>, %arg2: memref<128x512xbf16, #tpu.memory_space<vmem>>, %arg3: memref<1x512xf32, #tpu.memory_space<vmem>>, %arg4: memref<3200x128xbf16, #tpu.memory_space<vmem>>, %arg5: memref<1x128xf32, #tpu.memory_space<vmem>>, %arg6: memref<2048x512xbf16, #tpu.memory_space<vmem>>, %arg7: memref<1x512xf32, #tpu.memory_space<vmem>>, %arg8: memref<512x128xbf16, #tpu.memory_space<vmem>>, %arg9: memref<1x128xf32, #tpu.memory_space<vmem>>, %arg10: memref<2x128xf32, #tpu.memory_space<vmem>>, %arg11: memref<128x3200xbf16, #tpu.memory_space<vmem>>, %arg12: memref<2x2048xbf16, #tpu.memory_space<vmem>>) attributes {dimension_semantics = [#tpu.dimension_semantics<parallel>], iteration_bounds = array<i64: 1>, scalar_prefetch = 0 : i64, scratch_operands = 2 : i64, tpu.core_type = #tpu.core_type<tc>, window_params = [{transform_indices = @transform_0, window_bounds = array<i64: 2, 12, 16, 128>}, {pipeline_mode = #tpu.pipeline_mode<synchronous>, transform_indices = @transform_1, window_bounds = array<i64: 128, 512>}, {pipeline_mode = #tpu.pipeline_mode<synchronous>, transform_indices = @transform_2, window_bounds = array<i64: 1, 512>}, {pipeline_mode = #tpu.pipeline_mode<synchronous>, transform_indices = @transform_3, window_bounds = array<i64: 3200, 128>}, {pipeline_mode = #tpu.pipeline_mode<synchronous>, transform_indices = @transform_4, window_bounds = array<i64: 1, 128>}, {pipeline_mode = #tpu.pipeline_mode<synchronous>, transform_indices = @transform_5, window_bounds = array<i64: 2048, 512>}, {pipeline_mode = #tpu.pipeline_mode<synchronous>, transform_indices = @transform_6, window_bounds = array<i64: 1, 512>}, {pipeline_mode = #tpu.pipeline_mode<synchronous>, transform_indices = @transform_7, window_bounds = array<i64: 512, 128>}, {pipeline_mode = #tpu.pipeline_mode<synchronous>, transform_indices = @transform_8, window_bounds = array<i64: 1, 128>}, {transform_indices = @transform_9, window_bounds = array<i64: 2, 128>}]} {
    %c0 = arith.constant 0 : index
    %c0_0 = arith.constant 0 : index
    %c0_1 = arith.constant 0 : index
    %c0_2 = arith.constant 0 : index
    %0 = vector.load %arg1[%c0, %c0_0, %c0_1, %c0_2] : memref<2x12x16x128xbf16, #tpu.memory_space<vmem>>, vector<2x12x16x128xbf16>
    %1 = vector.shape_cast %0 : vector<2x12x16x128xbf16> to vector<384x128xbf16>
    %c0_3 = arith.constant 0 : index
    %c0_4 = arith.constant 0 : index
    %2 = vector.load %arg2[%c0_3, %c0_4] : memref<128x512xbf16, #tpu.memory_space<vmem>>, vector<128x512xbf16>
    %cst = arith.constant dense<0.000000e+00> : vector<384x512xf32>
    %3 = tpu.matmul %1, %2, %cst {dimension_numbers = #tpu.dot_dimension_numbers<[1], [0], [0], [1], [0, 0, 1, 1], [], []>} : vector<384x128xbf16>, vector<128x512xbf16>, vector<384x512xf32> -> vector<384x512xf32>
    %c0_5 = arith.constant 0 : index
    %c0_6 = arith.constant 0 : index
    %4 = vector.load %arg3[%c0_5, %c0_6] : memref<1x512xf32, #tpu.memory_space<vmem>>, vector<1x512xf32>
    %5 = vector.broadcast %4 : vector<1x512xf32> to vector<384x512xf32>
    %6 = arith.addf %3, %5 : vector<384x512xf32>
    %cst_7 = arith.constant 0.000000e+00 : f32
    %7 = vector.broadcast %cst_7 : f32 to vector<384x512xf32>
    %8 = arith.maximumf %6, %7 : vector<384x512xf32>
    %9 = vector.extract_strided_slice %8 {offsets = [0, 0], sizes = [384, 128], strides = [1, 1]} : vector<384x512xf32> to vector<384x128xf32>
    %10 = vector.extract_strided_slice %8 {offsets = [0, 128], sizes = [384, 128], strides = [1, 1]} : vector<384x512xf32> to vector<384x128xf32>
    %11 = arith.maximumf %9, %10 : vector<384x128xf32>
    %12 = vector.extract_strided_slice %8 {offsets = [0, 256], sizes = [384, 128], strides = [1, 1]} : vector<384x512xf32> to vector<384x128xf32>
    %13 = vector.extract_strided_slice %8 {offsets = [0, 384], sizes = [384, 128], strides = [1, 1]} : vector<384x512xf32> to vector<384x128xf32>
    %14 = arith.maximumf %12, %13 : vector<384x128xf32>
    %15 = arith.maximumf %11, %14 : vector<384x128xf32>
    %16 = vector.shape_cast %15 : vector<384x128xf32> to vector<2x12x16x128xf32>
    %17 = tpu.iota {dimensions = array<i32: 2>} : vector<2x12x16x128xi32>
    %c12_i32 = arith.constant 12 : i32
    %18 = vector.broadcast %c12_i32 : i32 to vector<2x12x16x128xi32>
    %19 = arith.cmpi slt, %17, %18 : vector<2x12x16x128xi32>
    %cst_8 = arith.constant 0.000000e+00 : f32
    %20 = vector.broadcast %cst_8 : f32 to vector<2x12x16x128xf32>
    %21 = arith.select %19, %16, %20 : vector<2x12x16x128xi1>, vector<2x12x16x128xf32>
    %22 = arith.truncf %21 : vector<2x12x16x128xf32> to vector<2x12x16x128xbf16>
    %23 = vector.extract_strided_slice %22 {offsets = [0, 0, 0, 0], sizes = [2, 8, 8, 128], strides = [1, 1, 1, 1]} : vector<2x12x16x128xbf16> to vector<2x8x8x128xbf16>
    %24 = vector.shape_cast %23 : vector<2x8x8x128xbf16> to vector<128x128xbf16>
    %c0_9 = arith.constant 0 : index
    %c0_10 = arith.constant 0 : index
    %25 = vector.load %arg11[%c0_9, %c0_10] : memref<128x3200xbf16, #tpu.memory_space<vmem>>, vector<128x128xbf16>
    tpu.vector_store %arg11[%c0_9, %c0_10], %24 {strides = array<i32>} : memref<128x3200xbf16, #tpu.memory_space<vmem>>, vector<128x128xbf16>,
    %26 = vector.extract_strided_slice %22 {offsets = [0, 0, 1, 0], sizes = [2, 8, 8, 128], strides = [1, 1, 1, 1]} : vector<2x12x16x128xbf16> to vector<2x8x8x128xbf16>
    %27 = vector.shape_cast %26 : vector<2x8x8x128xbf16> to vector<128x128xbf16>
    %c0_11 = arith.constant 0 : index
    %c128 = arith.constant 128 : index
    %28 = vector.load %arg11[%c0_11, %c128] : memref<128x3200xbf16, #tpu.memory_space<vmem>>, vector<128x128xbf16>
    tpu.vector_store %arg11[%c0_11, %c128], %27 {strides = array<i32>} : memref<128x3200xbf16, #tpu.memory_space<vmem>>, vector<128x128xbf16>,
    %29 = vector.extract_strided_slice %22 {offsets = [0, 0, 2, 0], sizes = [2, 8, 8, 128], strides = [1, 1, 1, 1]} : vector<2x12x16x128xbf16> to vector<2x8x8x128xbf16>
    %30 = vector.shape_cast %29 : vector<2x8x8x128xbf16> to vector<128x128xbf16>
    %c0_12 = arith.constant 0 : index
    %c256 = arith.constant 256 : index
    %31 = vector.load %arg11[%c0_12, %c256] : memref<128x3200xbf16, #tpu.memory_space<vmem>>, vector<128x128xbf16>
    tpu.vector_store %arg11[%c0_12, %c256], %30 {strides = array<i32>} : memref<128x3200xbf16, #tpu.memory_space<vmem>>, vector<128x128xbf16>,
    %32 = vector.extract_strided_slice %22 {offsets = [0, 0, 3, 0], sizes = [2, 8, 8, 128], strides = [1, 1, 1, 1]} : vector<2x12x16x128xbf16> to vector<2x8x8x128xbf16>
    %33 = vector.shape_cast %32 : vector<2x8x8x128xbf16> to vector<128x128xbf16>
    %c0_13 = arith.constant 0 : index
    %c384 = arith.constant 384 : index
    %34 = vector.load %arg11[%c0_13, %c384] : memref<128x3200xbf16, #tpu.memory_space<vmem>>, vector<128x128xbf16>
    tpu.vector_store %arg11[%c0_13, %c384], %33 {strides = array<i32>} : memref<128x3200xbf16, #tpu.memory_space<vmem>>, vector<128x128xbf16>,
    %35 = vector.extract_strided_slice %22 {offsets = [0, 0, 4, 0], sizes = [2, 8, 8, 128], strides = [1, 1, 1, 1]} : vector<2x12x16x128xbf16> to vector<2x8x8x128xbf16>
    %36 = vector.shape_cast %35 : vector<2x8x8x128xbf16> to vector<128x128xbf16>
    %c0_14 = arith.constant 0 : index
    %c512 = arith.constant 512 : index
    %37 = vector.load %arg11[%c0_14, %c512] : memref<128x3200xbf16, #tpu.memory_space<vmem>>, vector<128x128xbf16>
    tpu.vector_store %arg11[%c0_14, %c512], %36 {strides = array<i32>} : memref<128x3200xbf16, #tpu.memory_space<vmem>>, vector<128x128xbf16>,
    %38 = vector.extract_strided_slice %22 {offsets = [0, 1, 0, 0], sizes = [2, 8, 8, 128], strides = [1, 1, 1, 1]} : vector<2x12x16x128xbf16> to vector<2x8x8x128xbf16>
    %39 = vector.shape_cast %38 : vector<2x8x8x128xbf16> to vector<128x128xbf16>
    %c0_15 = arith.constant 0 : index
    %c640 = arith.constant 640 : index
    %40 = vector.load %arg11[%c0_15, %c640] : memref<128x3200xbf16, #tpu.memory_space<vmem>>, vector<128x128xbf16>
    tpu.vector_store %arg11[%c0_15, %c640], %39 {strides = array<i32>} : memref<128x3200xbf16, #tpu.memory_space<vmem>>, vector<128x128xbf16>,
    %41 = vector.extract_strided_slice %22 {offsets = [0, 1, 1, 0], sizes = [2, 8, 8, 128], strides = [1, 1, 1, 1]} : vector<2x12x16x128xbf16> to vector<2x8x8x128xbf16>
    %42 = vector.shape_cast %41 : vector<2x8x8x128xbf16> to vector<128x128xbf16>
    %c0_16 = arith.constant 0 : index
    %c768 = arith.constant 768 : index
    %43 = vector.load %arg11[%c0_16, %c768] : memref<128x3200xbf16, #tpu.memory_space<vmem>>, vector<128x128xbf16>
    tpu.vector_store %arg11[%c0_16, %c768], %42 {strides = array<i32>} : memref<128x3200xbf16, #tpu.memory_space<vmem>>, vector<128x128xbf16>,
    %44 = vector.extract_strided_slice %22 {offsets = [0, 1, 2, 0], sizes = [2, 8, 8, 128], strides = [1, 1, 1, 1]} : vector<2x12x16x128xbf16> to vector<2x8x8x128xbf16>
    %45 = vector.shape_cast %44 : vector<2x8x8x128xbf16> to vector<128x128xbf16>
    %c0_17 = arith.constant 0 : index
    %c896 = arith.constant 896 : index
    %46 = vector.load %arg11[%c0_17, %c896] : memref<128x3200xbf16, #tpu.memory_space<vmem>>, vector<128x128xbf16>
    tpu.vector_store %arg11[%c0_17, %c896], %45 {strides = array<i32>} : memref<128x3200xbf16, #tpu.memory_space<vmem>>, vector<128x128xbf16>,
    %47 = vector.extract_strided_slice %22 {offsets = [0, 1, 3, 0], sizes = [2, 8, 8, 128], strides = [1, 1, 1, 1]} : vector<2x12x16x128xbf16> to vector<2x8x8x128xbf16>
    %48 = vector.shape_cast %47 : vector<2x8x8x128xbf16> to vector<128x128xbf16>
    %c0_18 = arith.constant 0 : index
    %c1024 = arith.constant 1024 : index
    %49 = vector.load %arg11[%c0_18, %c1024] : memref<128x3200xbf16, #tpu.memory_space<vmem>>, vector<128x128xbf16>
    tpu.vector_store %arg11[%c0_18, %c1024], %48 {strides = array<i32>} : memref<128x3200xbf16, #tpu.memory_space<vmem>>, vector<128x128xbf16>,
    %50 = vector.extract_strided_slice %22 {offsets = [0, 1, 4, 0], sizes = [2, 8, 8, 128], strides = [1, 1, 1, 1]} : vector<2x12x16x128xbf16> to vector<2x8x8x128xbf16>
    %51 = vector.shape_cast %50 : vector<2x8x8x128xbf16> to vector<128x128xbf16>
    %c0_19 = arith.constant 0 : index
    %c1152 = arith.constant 1152 : index
    %52 = vector.load %arg11[%c0_19, %c1152] : memref<128x3200xbf16, #tpu.memory_space<vmem>>, vector<128x128xbf16>
    tpu.vector_store %arg11[%c0_19, %c1152], %51 {strides = array<i32>} : memref<128x3200xbf16, #tpu.memory_space<vmem>>, vector<128x128xbf16>,
    %53 = vector.extract_strided_slice %22 {offsets = [0, 2, 0, 0], sizes = [2, 8, 8, 128], strides = [1, 1, 1, 1]} : vector<2x12x16x128xbf16> to vector<2x8x8x128xbf16>
    %54 = vector.shape_cast %53 : vector<2x8x8x128xbf16> to vector<128x128xbf16>
    %c0_20 = arith.constant 0 : index
    %c1280 = arith.constant 1280 : index
    %55 = vector.load %arg11[%c0_20, %c1280] : memref<128x3200xbf16, #tpu.memory_space<vmem>>, vector<128x128xbf16>
    tpu.vector_store %arg11[%c0_20, %c1280], %54 {strides = array<i32>} : memref<128x3200xbf16, #tpu.memory_space<vmem>>, vector<128x128xbf16>,
    %56 = vector.extract_strided_slice %22 {offsets = [0, 2, 1, 0], sizes = [2, 8, 8, 128], strides = [1, 1, 1, 1]} : vector<2x12x16x128xbf16> to vector<2x8x8x128xbf16>
    %57 = vector.shape_cast %56 : vector<2x8x8x128xbf16> to vector<128x128xbf16>
    %c0_21 = arith.constant 0 : index
    %c1408 = arith.constant 1408 : index
    %58 = vector.load %arg11[%c0_21, %c1408] : memref<128x3200xbf16, #tpu.memory_space<vmem>>, vector<128x128xbf16>
    tpu.vector_store %arg11[%c0_21, %c1408], %57 {strides = array<i32>} : memref<128x3200xbf16, #tpu.memory_space<vmem>>, vector<128x128xbf16>,
    %59 = vector.extract_strided_slice %22 {offsets = [0, 2, 2, 0], sizes = [2, 8, 8, 128], strides = [1, 1, 1, 1]} : vector<2x12x16x128xbf16> to vector<2x8x8x128xbf16>
    %60 = vector.shape_cast %59 : vector<2x8x8x128xbf16> to vector<128x128xbf16>
    %c0_22 = arith.constant 0 : index
    %c1536 = arith.constant 1536 : index
    %61 = vector.load %arg11[%c0_22, %c1536] : memref<128x3200xbf16, #tpu.memory_space<vmem>>, vector<128x128xbf16>
    tpu.vector_store %arg11[%c0_22, %c1536], %60 {strides = array<i32>} : memref<128x3200xbf16, #tpu.memory_space<vmem>>, vector<128x128xbf16>,
    %62 = vector.extract_strided_slice %22 {offsets = [0, 2, 3, 0], sizes = [2, 8, 8, 128], strides = [1, 1, 1, 1]} : vector<2x12x16x128xbf16> to vector<2x8x8x128xbf16>
    %63 = vector.shape_cast %62 : vector<2x8x8x128xbf16> to vector<128x128xbf16>
    %c0_23 = arith.constant 0 : index
    %c1664 = arith.constant 1664 : index
    %64 = vector.load %arg11[%c0_23, %c1664] : memref<128x3200xbf16, #tpu.memory_space<vmem>>, vector<128x128xbf16>
    tpu.vector_store %arg11[%c0_23, %c1664], %63 {strides = array<i32>} : memref<128x3200xbf16, #tpu.memory_space<vmem>>, vector<128x128xbf16>,
    %65 = vector.extract_strided_slice %22 {offsets = [0, 2, 4, 0], sizes = [2, 8, 8, 128], strides = [1, 1, 1, 1]} : vector<2x12x16x128xbf16> to vector<2x8x8x128xbf16>
    %66 = vector.shape_cast %65 : vector<2x8x8x128xbf16> to vector<128x128xbf16>
    %c0_24 = arith.constant 0 : index
    %c1792 = arith.constant 1792 : index
    %67 = vector.load %arg11[%c0_24, %c1792] : memref<128x3200xbf16, #tpu.memory_space<vmem>>, vector<128x128xbf16>
    tpu.vector_store %arg11[%c0_24, %c1792], %66 {strides = array<i32>} : memref<128x3200xbf16, #tpu.memory_space<vmem>>, vector<128x128xbf16>,
    %68 = vector.extract_strided_slice %22 {offsets = [0, 3, 0, 0], sizes = [2, 8, 8, 128], strides = [1, 1, 1, 1]} : vector<2x12x16x128xbf16> to vector<2x8x8x128xbf16>
    %69 = vector.shape_cast %68 : vector<2x8x8x128xbf16> to vector<128x128xbf16>
    %c0_25 = arith.constant 0 : index
    %c1920 = arith.constant 1920 : index
    %70 = vector.load %arg11[%c0_25, %c1920] : memref<128x3200xbf16, #tpu.memory_space<vmem>>, vector<128x128xbf16>
    tpu.vector_store %arg11[%c0_25, %c1920], %69 {strides = array<i32>} : memref<128x3200xbf16, #tpu.memory_space<vmem>>, vector<128x128xbf16>,
    %71 = vector.extract_strided_slice %22 {offsets = [0, 3, 1, 0], sizes = [2, 8, 8, 128], strides = [1, 1, 1, 1]} : vector<2x12x16x128xbf16> to vector<2x8x8x128xbf16>
    %72 = vector.shape_cast %71 : vector<2x8x8x128xbf16> to vector<128x128xbf16>
    %c0_26 = arith.constant 0 : index
    %c2048 = arith.constant 2048 : index
    %73 = vector.load %arg11[%c0_26, %c2048] : memref<128x3200xbf16, #tpu.memory_space<vmem>>, vector<128x128xbf16>
    tpu.vector_store %arg11[%c0_26, %c2048], %72 {strides = array<i32>} : memref<128x3200xbf16, #tpu.memory_space<vmem>>, vector<128x128xbf16>,
    %74 = vector.extract_strided_slice %22 {offsets = [0, 3, 2, 0], sizes = [2, 8, 8, 128], strides = [1, 1, 1, 1]} : vector<2x12x16x128xbf16> to vector<2x8x8x128xbf16>
    %75 = vector.shape_cast %74 : vector<2x8x8x128xbf16> to vector<128x128xbf16>
    %c0_27 = arith.constant 0 : index
    %c2176 = arith.constant 2176 : index
    %76 = vector.load %arg11[%c0_27, %c2176] : memref<128x3200xbf16, #tpu.memory_space<vmem>>, vector<128x128xbf16>
    tpu.vector_store %arg11[%c0_27, %c2176], %75 {strides = array<i32>} : memref<128x3200xbf16, #tpu.memory_space<vmem>>, vector<128x128xbf16>,
    %77 = vector.extract_strided_slice %22 {offsets = [0, 3, 3, 0], sizes = [2, 8, 8, 128], strides = [1, 1, 1, 1]} : vector<2x12x16x128xbf16> to vector<2x8x8x128xbf16>
    %78 = vector.shape_cast %77 : vector<2x8x8x128xbf16> to vector<128x128xbf16>
    %c0_28 = arith.constant 0 : index
    %c2304 = arith.constant 2304 : index
    %79 = vector.load %arg11[%c0_28, %c2304] : memref<128x3200xbf16, #tpu.memory_space<vmem>>, vector<128x128xbf16>
    tpu.vector_store %arg11[%c0_28, %c2304], %78 {strides = array<i32>} : memref<128x3200xbf16, #tpu.memory_space<vmem>>, vector<128x128xbf16>,
    %80 = vector.extract_strided_slice %22 {offsets = [0, 3, 4, 0], sizes = [2, 8, 8, 128], strides = [1, 1, 1, 1]} : vector<2x12x16x128xbf16> to vector<2x8x8x128xbf16>
    %81 = vector.shape_cast %80 : vector<2x8x8x128xbf16> to vector<128x128xbf16>
    %c0_29 = arith.constant 0 : index
    %c2432 = arith.constant 2432 : index
    %82 = vector.load %arg11[%c0_29, %c2432] : memref<128x3200xbf16, #tpu.memory_space<vmem>>, vector<128x128xbf16>
    tpu.vector_store %arg11[%c0_29, %c2432], %81 {strides = array<i32>} : memref<128x3200xbf16, #tpu.memory_space<vmem>>, vector<128x128xbf16>,
    %83 = vector.extract_strided_slice %22 {offsets = [0, 4, 0, 0], sizes = [2, 8, 8, 128], strides = [1, 1, 1, 1]} : vector<2x12x16x128xbf16> to vector<2x8x8x128xbf16>
    %84 = vector.shape_cast %83 : vector<2x8x8x128xbf16> to vector<128x128xbf16>
    %c0_30 = arith.constant 0 : index
    %c2560 = arith.constant 2560 : index
    %85 = vector.load %arg11[%c0_30, %c2560] : memref<128x3200xbf16, #tpu.memory_space<vmem>>, vector<128x128xbf16>
    tpu.vector_store %arg11[%c0_30, %c2560], %84 {strides = array<i32>} : memref<128x3200xbf16, #tpu.memory_space<vmem>>, vector<128x128xbf16>,
    %86 = vector.extract_strided_slice %22 {offsets = [0, 4, 1, 0], sizes = [2, 8, 8, 128], strides = [1, 1, 1, 1]} : vector<2x12x16x128xbf16> to vector<2x8x8x128xbf16>
    %87 = vector.shape_cast %86 : vector<2x8x8x128xbf16> to vector<128x128xbf16>
    %c0_31 = arith.constant 0 : index
    %c2688 = arith.constant 2688 : index
    %88 = vector.load %arg11[%c0_31, %c2688] : memref<128x3200xbf16, #tpu.memory_space<vmem>>, vector<128x128xbf16>
    tpu.vector_store %arg11[%c0_31, %c2688], %87 {strides = array<i32>} : memref<128x3200xbf16, #tpu.memory_space<vmem>>, vector<128x128xbf16>,
    %89 = vector.extract_strided_slice %22 {offsets = [0, 4, 2, 0], sizes = [2, 8, 8, 128], strides = [1, 1, 1, 1]} : vector<2x12x16x128xbf16> to vector<2x8x8x128xbf16>
    %90 = vector.shape_cast %89 : vector<2x8x8x128xbf16> to vector<128x128xbf16>
    %c0_32 = arith.constant 0 : index
    %c2816 = arith.constant 2816 : index
    %91 = vector.load %arg11[%c0_32, %c2816] : memref<128x3200xbf16, #tpu.memory_space<vmem>>, vector<128x128xbf16>
    tpu.vector_store %arg11[%c0_32, %c2816], %90 {strides = array<i32>} : memref<128x3200xbf16, #tpu.memory_space<vmem>>, vector<128x128xbf16>,
    %92 = vector.extract_strided_slice %22 {offsets = [0, 4, 3, 0], sizes = [2, 8, 8, 128], strides = [1, 1, 1, 1]} : vector<2x12x16x128xbf16> to vector<2x8x8x128xbf16>
    %93 = vector.shape_cast %92 : vector<2x8x8x128xbf16> to vector<128x128xbf16>
    %c0_33 = arith.constant 0 : index
    %c2944 = arith.constant 2944 : index
    %94 = vector.load %arg11[%c0_33, %c2944] : memref<128x3200xbf16, #tpu.memory_space<vmem>>, vector<128x128xbf16>
    tpu.vector_store %arg11[%c0_33, %c2944], %93 {strides = array<i32>} : memref<128x3200xbf16, #tpu.memory_space<vmem>>, vector<128x128xbf16>,
    %95 = vector.extract_strided_slice %22 {offsets = [0, 4, 4, 0], sizes = [2, 8, 8, 128], strides = [1, 1, 1, 1]} : vector<2x12x16x128xbf16> to vector<2x8x8x128xbf16>
    %96 = vector.shape_cast %95 : vector<2x8x8x128xbf16> to vector<128x128xbf16>
    %c0_34 = arith.constant 0 : index
    %c3072 = arith.constant 3072 : index
    %97 = vector.load %arg11[%c0_34, %c3072] : memref<128x3200xbf16, #tpu.memory_space<vmem>>, vector<128x128xbf16>
    tpu.vector_store %arg11[%c0_34, %c3072], %96 {strides = array<i32>} : memref<128x3200xbf16, #tpu.memory_space<vmem>>, vector<128x128xbf16>,
    %c0_35 = arith.constant 0 : index
    %c0_36 = arith.constant 0 : index
    %98 = vector.load %arg11[%c0_35, %c0_36] : memref<128x3200xbf16, #tpu.memory_space<vmem>>, vector<128x3200xbf16>
    %c0_37 = arith.constant 0 : index
    %c0_38 = arith.constant 0 : index
    %99 = vector.load %arg4[%c0_37, %c0_38] : memref<3200x128xbf16, #tpu.memory_space<vmem>>, vector<3200x128xbf16>
    %cst_39 = arith.constant dense<0.000000e+00> : vector<128x128xf32>
    %100 = tpu.matmul %98, %99, %cst_39 {dimension_numbers = #tpu.dot_dimension_numbers<[1], [0], [0], [1], [0, 0, 1, 1], [], []>} : vector<128x3200xbf16>, vector<3200x128xbf16>, vector<128x128xf32> -> vector<128x128xf32>
    %c0_40 = arith.constant 0 : index
    %c0_41 = arith.constant 0 : index
    %101 = vector.load %arg5[%c0_40, %c0_41] : memref<1x128xf32, #tpu.memory_space<vmem>>, vector<1x128xf32>
    %102 = vector.broadcast %101 : vector<1x128xf32> to vector<128x128xf32>
    %103 = arith.addf %100, %102 : vector<128x128xf32>
    %cst_42 = arith.constant 0.000000e+00 : f32
    %104 = vector.broadcast %cst_42 : f32 to vector<128x128xf32>
    %105 = arith.maximumf %103, %104 : vector<128x128xf32>
    %106 = vector.shape_cast %105 : vector<128x128xf32> to vector<2x4x2x8x128xf32>
    %107 = vector.extract_strided_slice %106 {offsets = [0, 0, 0, 0, 0], sizes = [2, 4, 1, 8, 128], strides = [1, 1, 1, 1, 1]} : vector<2x4x2x8x128xf32> to vector<2x4x1x8x128xf32>
    %108 = vector.shape_cast %107 : vector<2x4x1x8x128xf32> to vector<2x4x8x128xf32>
    %109 = vector.extract_strided_slice %106 {offsets = [0, 0, 1, 0, 0], sizes = [2, 4, 1, 8, 128], strides = [1, 1, 1, 1, 1]} : vector<2x4x2x8x128xf32> to vector<2x4x1x8x128xf32>
    %110 = vector.shape_cast %109 : vector<2x4x1x8x128xf32> to vector<2x4x8x128xf32>
    %111 = arith.maximumf %108, %110 : vector<2x4x8x128xf32>
    %112 = vector.extract_strided_slice %111 {offsets = [0, 0, 0, 0], sizes = [2, 1, 8, 128], strides = [1, 1, 1, 1]} : vector<2x4x8x128xf32> to vector<2x1x8x128xf32>
    %113 = vector.shape_cast %112 : vector<2x1x8x128xf32> to vector<2x8x128xf32>
    %114 = vector.extract_strided_slice %113 {offsets = [0, 0, 0], sizes = [2, 2, 128], strides = [1, 1, 1]} : vector<2x8x128xf32> to vector<2x2x128xf32>
    %cst_43 = arith.constant dense<0xFF800000> : vector<2x128xf32>
    %115 = vector.multi_reduction <maximumf>, %114, %cst_43 [1] : vector<2x2x128xf32> to vector<2x128xf32>
    %116 = arith.truncf %115 : vector<2x128xf32> to vector<2x128xbf16>
    %c0_44 = arith.constant 0 : index
    %c0_45 = arith.constant 0 : index
    %117 = vector.load %arg12[%c0_44, %c0_45] : memref<2x2048xbf16, #tpu.memory_space<vmem>>, vector<2x128xbf16>
    tpu.vector_store %arg12[%c0_44, %c0_45], %116 {strides = array<i32>} : memref<2x2048xbf16, #tpu.memory_space<vmem>>, vector<2x128xbf16>,
    %118 = vector.extract_strided_slice %113 {offsets = [0, 2, 0], sizes = [2, 2, 128], strides = [1, 1, 1]} : vector<2x8x128xf32> to vector<2x2x128xf32>
    %cst_46 = arith.constant dense<0xFF800000> : vector<2x128xf32>
    %119 = vector.multi_reduction <maximumf>, %118, %cst_46 [1] : vector<2x2x128xf32> to vector<2x128xf32>
    %120 = arith.truncf %119 : vector<2x128xf32> to vector<2x128xbf16>
    %c0_47 = arith.constant 0 : index
    %c128_48 = arith.constant 128 : index
    %121 = vector.load %arg12[%c0_47, %c128_48] : memref<2x2048xbf16, #tpu.memory_space<vmem>>, vector<2x128xbf16>
    tpu.vector_store %arg12[%c0_47, %c128_48], %120 {strides = array<i32>} : memref<2x2048xbf16, #tpu.memory_space<vmem>>, vector<2x128xbf16>,
    %122 = vector.extract_strided_slice %113 {offsets = [0, 4, 0], sizes = [2, 2, 128], strides = [1, 1, 1]} : vector<2x8x128xf32> to vector<2x2x128xf32>
    %cst_49 = arith.constant dense<0xFF800000> : vector<2x128xf32>
    %123 = vector.multi_reduction <maximumf>, %122, %cst_49 [1] : vector<2x2x128xf32> to vector<2x128xf32>
    %124 = arith.truncf %123 : vector<2x128xf32> to vector<2x128xbf16>
    %c0_50 = arith.constant 0 : index
    %c256_51 = arith.constant 256 : index
    %125 = vector.load %arg12[%c0_50, %c256_51] : memref<2x2048xbf16, #tpu.memory_space<vmem>>, vector<2x128xbf16>
    tpu.vector_store %arg12[%c0_50, %c256_51], %124 {strides = array<i32>} : memref<2x2048xbf16, #tpu.memory_space<vmem>>, vector<2x128xbf16>,
    %126 = vector.extract_strided_slice %113 {offsets = [0, 6, 0], sizes = [2, 2, 128], strides = [1, 1, 1]} : vector<2x8x128xf32> to vector<2x2x128xf32>
    %cst_52 = arith.constant dense<0xFF800000> : vector<2x128xf32>
    %127 = vector.multi_reduction <maximumf>, %126, %cst_52 [1] : vector<2x2x128xf32> to vector<2x128xf32>
    %128 = arith.truncf %127 : vector<2x128xf32> to vector<2x128xbf16>
    %c0_53 = arith.constant 0 : index
    %c384_54 = arith.constant 384 : index
    %129 = vector.load %arg12[%c0_53, %c384_54] : memref<2x2048xbf16, #tpu.memory_space<vmem>>, vector<2x128xbf16>
    tpu.vector_store %arg12[%c0_53, %c384_54], %128 {strides = array<i32>} : memref<2x2048xbf16, #tpu.memory_space<vmem>>, vector<2x128xbf16>,
    %130 = vector.extract_strided_slice %111 {offsets = [0, 1, 0, 0], sizes = [2, 1, 8, 128], strides = [1, 1, 1, 1]} : vector<2x4x8x128xf32> to vector<2x1x8x128xf32>
    %131 = vector.shape_cast %130 : vector<2x1x8x128xf32> to vector<2x8x128xf32>
    %132 = vector.extract_strided_slice %131 {offsets = [0, 0, 0], sizes = [2, 2, 128], strides = [1, 1, 1]} : vector<2x8x128xf32> to vector<2x2x128xf32>
    %cst_55 = arith.constant dense<0xFF800000> : vector<2x128xf32>
    %133 = vector.multi_reduction <maximumf>, %132, %cst_55 [1] : vector<2x2x128xf32> to vector<2x128xf32>
    %134 = arith.truncf %133 : vector<2x128xf32> to vector<2x128xbf16>
    %c0_56 = arith.constant 0 : index
    %c512_57 = arith.constant 512 : index
    %135 = vector.load %arg12[%c0_56, %c512_57] : memref<2x2048xbf16, #tpu.memory_space<vmem>>, vector<2x128xbf16>
    tpu.vector_store %arg12[%c0_56, %c512_57], %134 {strides = array<i32>} : memref<2x2048xbf16, #tpu.memory_space<vmem>>, vector<2x128xbf16>,
    %136 = vector.extract_strided_slice %131 {offsets = [0, 2, 0], sizes = [2, 2, 128], strides = [1, 1, 1]} : vector<2x8x128xf32> to vector<2x2x128xf32>
    %cst_58 = arith.constant dense<0xFF800000> : vector<2x128xf32>
    %137 = vector.multi_reduction <maximumf>, %136, %cst_58 [1] : vector<2x2x128xf32> to vector<2x128xf32>
    %138 = arith.truncf %137 : vector<2x128xf32> to vector<2x128xbf16>
    %c0_59 = arith.constant 0 : index
    %c640_60 = arith.constant 640 : index
    %139 = vector.load %arg12[%c0_59, %c640_60] : memref<2x2048xbf16, #tpu.memory_space<vmem>>, vector<2x128xbf16>
    tpu.vector_store %arg12[%c0_59, %c640_60], %138 {strides = array<i32>} : memref<2x2048xbf16, #tpu.memory_space<vmem>>, vector<2x128xbf16>,
    %140 = vector.extract_strided_slice %131 {offsets = [0, 4, 0], sizes = [2, 2, 128], strides = [1, 1, 1]} : vector<2x8x128xf32> to vector<2x2x128xf32>
    %cst_61 = arith.constant dense<0xFF800000> : vector<2x128xf32>
    %141 = vector.multi_reduction <maximumf>, %140, %cst_61 [1] : vector<2x2x128xf32> to vector<2x128xf32>
    %142 = arith.truncf %141 : vector<2x128xf32> to vector<2x128xbf16>
    %c0_62 = arith.constant 0 : index
    %c768_63 = arith.constant 768 : index
    %143 = vector.load %arg12[%c0_62, %c768_63] : memref<2x2048xbf16, #tpu.memory_space<vmem>>, vector<2x128xbf16>
    tpu.vector_store %arg12[%c0_62, %c768_63], %142 {strides = array<i32>} : memref<2x2048xbf16, #tpu.memory_space<vmem>>, vector<2x128xbf16>,
    %144 = vector.extract_strided_slice %131 {offsets = [0, 6, 0], sizes = [2, 2, 128], strides = [1, 1, 1]} : vector<2x8x128xf32> to vector<2x2x128xf32>
    %cst_64 = arith.constant dense<0xFF800000> : vector<2x128xf32>
    %145 = vector.multi_reduction <maximumf>, %144, %cst_64 [1] : vector<2x2x128xf32> to vector<2x128xf32>
    %146 = arith.truncf %145 : vector<2x128xf32> to vector<2x128xbf16>
    %c0_65 = arith.constant 0 : index
    %c896_66 = arith.constant 896 : index
    %147 = vector.load %arg12[%c0_65, %c896_66] : memref<2x2048xbf16, #tpu.memory_space<vmem>>, vector<2x128xbf16>
    tpu.vector_store %arg12[%c0_65, %c896_66], %146 {strides = array<i32>} : memref<2x2048xbf16, #tpu.memory_space<vmem>>, vector<2x128xbf16>,
    %148 = vector.extract_strided_slice %111 {offsets = [0, 2, 0, 0], sizes = [2, 1, 8, 128], strides = [1, 1, 1, 1]} : vector<2x4x8x128xf32> to vector<2x1x8x128xf32>
    %149 = vector.shape_cast %148 : vector<2x1x8x128xf32> to vector<2x8x128xf32>
    %150 = vector.extract_strided_slice %149 {offsets = [0, 0, 0], sizes = [2, 2, 128], strides = [1, 1, 1]} : vector<2x8x128xf32> to vector<2x2x128xf32>
    %cst_67 = arith.constant dense<0xFF800000> : vector<2x128xf32>
    %151 = vector.multi_reduction <maximumf>, %150, %cst_67 [1] : vector<2x2x128xf32> to vector<2x128xf32>
    %152 = arith.truncf %151 : vector<2x128xf32> to vector<2x128xbf16>
    %c0_68 = arith.constant 0 : index
    %c1024_69 = arith.constant 1024 : index
    %153 = vector.load %arg12[%c0_68, %c1024_69] : memref<2x2048xbf16, #tpu.memory_space<vmem>>, vector<2x128xbf16>
    tpu.vector_store %arg12[%c0_68, %c1024_69], %152 {strides = array<i32>} : memref<2x2048xbf16, #tpu.memory_space<vmem>>, vector<2x128xbf16>,
    %154 = vector.extract_strided_slice %149 {offsets = [0, 2, 0], sizes = [2, 2, 128], strides = [1, 1, 1]} : vector<2x8x128xf32> to vector<2x2x128xf32>
    %cst_70 = arith.constant dense<0xFF800000> : vector<2x128xf32>
    %155 = vector.multi_reduction <maximumf>, %154, %cst_70 [1] : vector<2x2x128xf32> to vector<2x128xf32>
    %156 = arith.truncf %155 : vector<2x128xf32> to vector<2x128xbf16>
    %c0_71 = arith.constant 0 : index
    %c1152_72 = arith.constant 1152 : index
    %157 = vector.load %arg12[%c0_71, %c1152_72] : memref<2x2048xbf16, #tpu.memory_space<vmem>>, vector<2x128xbf16>
    tpu.vector_store %arg12[%c0_71, %c1152_72], %156 {strides = array<i32>} : memref<2x2048xbf16, #tpu.memory_space<vmem>>, vector<2x128xbf16>,
    %158 = vector.extract_strided_slice %149 {offsets = [0, 4, 0], sizes = [2, 2, 128], strides = [1, 1, 1]} : vector<2x8x128xf32> to vector<2x2x128xf32>
    %cst_73 = arith.constant dense<0xFF800000> : vector<2x128xf32>
    %159 = vector.multi_reduction <maximumf>, %158, %cst_73 [1] : vector<2x2x128xf32> to vector<2x128xf32>
    %160 = arith.truncf %159 : vector<2x128xf32> to vector<2x128xbf16>
    %c0_74 = arith.constant 0 : index
    %c1280_75 = arith.constant 1280 : index
    %161 = vector.load %arg12[%c0_74, %c1280_75] : memref<2x2048xbf16, #tpu.memory_space<vmem>>, vector<2x128xbf16>
    tpu.vector_store %arg12[%c0_74, %c1280_75], %160 {strides = array<i32>} : memref<2x2048xbf16, #tpu.memory_space<vmem>>, vector<2x128xbf16>,
    %162 = vector.extract_strided_slice %149 {offsets = [0, 6, 0], sizes = [2, 2, 128], strides = [1, 1, 1]} : vector<2x8x128xf32> to vector<2x2x128xf32>
    %cst_76 = arith.constant dense<0xFF800000> : vector<2x128xf32>
    %163 = vector.multi_reduction <maximumf>, %162, %cst_76 [1] : vector<2x2x128xf32> to vector<2x128xf32>
    %164 = arith.truncf %163 : vector<2x128xf32> to vector<2x128xbf16>
    %c0_77 = arith.constant 0 : index
    %c1408_78 = arith.constant 1408 : index
    %165 = vector.load %arg12[%c0_77, %c1408_78] : memref<2x2048xbf16, #tpu.memory_space<vmem>>, vector<2x128xbf16>
    tpu.vector_store %arg12[%c0_77, %c1408_78], %164 {strides = array<i32>} : memref<2x2048xbf16, #tpu.memory_space<vmem>>, vector<2x128xbf16>,
    %166 = vector.extract_strided_slice %111 {offsets = [0, 3, 0, 0], sizes = [2, 1, 8, 128], strides = [1, 1, 1, 1]} : vector<2x4x8x128xf32> to vector<2x1x8x128xf32>
    %167 = vector.shape_cast %166 : vector<2x1x8x128xf32> to vector<2x8x128xf32>
    %168 = vector.extract_strided_slice %167 {offsets = [0, 0, 0], sizes = [2, 2, 128], strides = [1, 1, 1]} : vector<2x8x128xf32> to vector<2x2x128xf32>
    %cst_79 = arith.constant dense<0xFF800000> : vector<2x128xf32>
    %169 = vector.multi_reduction <maximumf>, %168, %cst_79 [1] : vector<2x2x128xf32> to vector<2x128xf32>
    %170 = arith.truncf %169 : vector<2x128xf32> to vector<2x128xbf16>
    %c0_80 = arith.constant 0 : index
    %c1536_81 = arith.constant 1536 : index
    %171 = vector.load %arg12[%c0_80, %c1536_81] : memref<2x2048xbf16, #tpu.memory_space<vmem>>, vector<2x128xbf16>
    tpu.vector_store %arg12[%c0_80, %c1536_81], %170 {strides = array<i32>} : memref<2x2048xbf16, #tpu.memory_space<vmem>>, vector<2x128xbf16>,
    %172 = vector.extract_strided_slice %167 {offsets = [0, 2, 0], sizes = [2, 2, 128], strides = [1, 1, 1]} : vector<2x8x128xf32> to vector<2x2x128xf32>
    %cst_82 = arith.constant dense<0xFF800000> : vector<2x128xf32>
    %173 = vector.multi_reduction <maximumf>, %172, %cst_82 [1] : vector<2x2x128xf32> to vector<2x128xf32>
    %174 = arith.truncf %173 : vector<2x128xf32> to vector<2x128xbf16>
    %c0_83 = arith.constant 0 : index
    %c1664_84 = arith.constant 1664 : index
    %175 = vector.load %arg12[%c0_83, %c1664_84] : memref<2x2048xbf16, #tpu.memory_space<vmem>>, vector<2x128xbf16>
    tpu.vector_store %arg12[%c0_83, %c1664_84], %174 {strides = array<i32>} : memref<2x2048xbf16, #tpu.memory_space<vmem>>, vector<2x128xbf16>,
    %176 = vector.extract_strided_slice %167 {offsets = [0, 4, 0], sizes = [2, 2, 128], strides = [1, 1, 1]} : vector<2x8x128xf32> to vector<2x2x128xf32>
    %cst_85 = arith.constant dense<0xFF800000> : vector<2x128xf32>
    %177 = vector.multi_reduction <maximumf>, %176, %cst_85 [1] : vector<2x2x128xf32> to vector<2x128xf32>
    %178 = arith.truncf %177 : vector<2x128xf32> to vector<2x128xbf16>
    %c0_86 = arith.constant 0 : index
    %c1792_87 = arith.constant 1792 : index
    %179 = vector.load %arg12[%c0_86, %c1792_87] : memref<2x2048xbf16, #tpu.memory_space<vmem>>, vector<2x128xbf16>
    tpu.vector_store %arg12[%c0_86, %c1792_87], %178 {strides = array<i32>} : memref<2x2048xbf16, #tpu.memory_space<vmem>>, vector<2x128xbf16>,
    %180 = vector.extract_strided_slice %167 {offsets = [0, 6, 0], sizes = [2, 2, 128], strides = [1, 1, 1]} : vector<2x8x128xf32> to vector<2x2x128xf32>
    %cst_88 = arith.constant dense<0xFF800000> : vector<2x128xf32>
    %181 = vector.multi_reduction <maximumf>, %180, %cst_88 [1] : vector<2x2x128xf32> to vector<2x128xf32>
    %182 = arith.truncf %181 : vector<2x128xf32> to vector<2x128xbf16>
    %c0_89 = arith.constant 0 : index
    %c1920_90 = arith.constant 1920 : index
    %183 = vector.load %arg12[%c0_89, %c1920_90] : memref<2x2048xbf16, #tpu.memory_space<vmem>>, vector<2x128xbf16>
    tpu.vector_store %arg12[%c0_89, %c1920_90], %182 {strides = array<i32>} : memref<2x2048xbf16, #tpu.memory_space<vmem>>, vector<2x128xbf16>,
    %c0_91 = arith.constant 0 : index
    %c0_92 = arith.constant 0 : index
    %184 = vector.load %arg12[%c0_91, %c0_92] : memref<2x2048xbf16, #tpu.memory_space<vmem>>, vector<2x2048xbf16>
    %c0_93 = arith.constant 0 : index
    %c0_94 = arith.constant 0 : index
    %185 = vector.load %arg6[%c0_93, %c0_94] : memref<2048x512xbf16, #tpu.memory_space<vmem>>, vector<2048x512xbf16>
    %cst_95 = arith.constant dense<0.000000e+00> : vector<2x512xf32>
    %186 = tpu.matmul %184, %185, %cst_95 {dimension_numbers = #tpu.dot_dimension_numbers<[1], [0], [0], [1], [0, 0, 1, 1], [], []>} : vector<2x2048xbf16>, vector<2048x512xbf16>, vector<2x512xf32> -> vector<2x512xf32>
    %c0_96 = arith.constant 0 : index
    %c0_97 = arith.constant 0 : index
    %187 = vector.load %arg7[%c0_96, %c0_97] : memref<1x512xf32, #tpu.memory_space<vmem>>, vector<1x512xf32>
    %188 = vector.broadcast %187 : vector<1x512xf32> to vector<2x512xf32>
    %189 = arith.addf %186, %188 : vector<2x512xf32>
    %cst_98 = arith.constant 0.000000e+00 : f32
    %190 = vector.broadcast %cst_98 : f32 to vector<2x512xf32>
    %191 = arith.maximumf %189, %190 : vector<2x512xf32>
    %192 = arith.truncf %191 : vector<2x512xf32> to vector<2x512xbf16>
    %c0_99 = arith.constant 0 : index
    %c0_100 = arith.constant 0 : index
    %193 = vector.load %arg8[%c0_99, %c0_100] : memref<512x128xbf16, #tpu.memory_space<vmem>>, vector<512x128xbf16>
    %cst_101 = arith.constant dense<0.000000e+00> : vector<2x128xf32>
    %194 = tpu.matmul %192, %193, %cst_101 {dimension_numbers = #tpu.dot_dimension_numbers<[1], [0], [0], [1], [0, 0, 1, 1], [], []>} : vector<2x512xbf16>, vector<512x128xbf16>, vector<2x128xf32> -> vector<2x128xf32>
    %c0_102 = arith.constant 0 : index
    %c0_103 = arith.constant 0 : index
    %195 = vector.load %arg9[%c0_102, %c0_103] : memref<1x128xf32, #tpu.memory_space<vmem>>, vector<1x128xf32>
    %196 = vector.broadcast %195 : vector<1x128xf32> to vector<2x128xf32>
    %197 = arith.addf %194, %196 : vector<2x128xf32>
    %198 = tpu.iota {dimensions = array<i32: 1>} : vector<2x128xi32>
    %c10_i32 = arith.constant 10 : i32
    %199 = vector.broadcast %c10_i32 : i32 to vector<2x128xi32>
    %200 = arith.cmpi slt, %198, %199 : vector<2x128xi32>
    %cst_104 = arith.constant -1.000000e+30 : f32
    %201 = vector.broadcast %cst_104 : f32 to vector<2x128xf32>
    %202 = arith.select %200, %197, %201 : vector<2x128xi1>, vector<2x128xf32>
    %cst_105 = arith.constant dense<0xFF800000> : vector<2xf32>
    %203 = vector.multi_reduction <maximumf>, %202, %cst_105 [1] : vector<2x128xf32> to vector<2xf32>
    %204 = vector.shape_cast %203 : vector<2xf32> to vector<2x1xf32>
    %205 = vector.broadcast %204 : vector<2x1xf32> to vector<2x128xf32>
    %206 = arith.subf %202, %205 : vector<2x128xf32>
    %207 = math.exp %206 : vector<2x128xf32>
    %cst_106 = arith.constant dense<0.000000e+00> : vector<2xf32>
    %208 = vector.multi_reduction <add>, %207, %cst_106 [1] : vector<2x128xf32> to vector<2xf32>
    %209 = vector.shape_cast %208 : vector<2xf32> to vector<2x1xf32>
    %210 = math.log %209 : vector<2x1xf32>
    %211 = vector.broadcast %210 : vector<2x1xf32> to vector<2x128xf32>
    %212 = arith.subf %206, %211 : vector<2x128xf32>
    %c0_107 = arith.constant 0 : index
    %c0_108 = arith.constant 0 : index
    %213 = vector.load %arg10[%c0_107, %c0_108] : memref<2x128xf32, #tpu.memory_space<vmem>>, vector<2x128xf32>
    tpu.vector_store %arg10[%c0_107, %c0_108], %212 {strides = array<i32>} : memref<2x128xf32, #tpu.memory_space<vmem>>, vector<2x128xf32>,
    return
  }
  func.func @transform_0(%arg0: i32) -> (i32, i32, i32, i32) {
    %c0_i32 = arith.constant 0 : i32
    %c0_i32_0 = arith.constant 0 : i32
    %c0_i32_1 = arith.constant 0 : i32
    %c0_i32_2 = arith.constant 0 : i32
    return %arg0, %c0_i32, %c0_i32_0, %c0_i32_1 : i32, i32, i32, i32
  }
  func.func @transform_1(%arg0: i32) -> (i32, i32) {
    %c0_i32 = arith.constant 0 : i32
    %c0_i32_0 = arith.constant 0 : i32
    %c0_i32_1 = arith.constant 0 : i32
    return %c0_i32, %c0_i32_0 : i32, i32
  }
  func.func @transform_2(%arg0: i32) -> (i32, i32) {
    %c0_i32 = arith.constant 0 : i32
    %c0_i32_0 = arith.constant 0 : i32
    %c0_i32_1 = arith.constant 0 : i32
    return %c0_i32, %c0_i32_0 : i32, i32
  }
  func.func @transform_3(%arg0: i32) -> (i32, i32) {
    %c0_i32 = arith.constant 0 : i32
    %c0_i32_0 = arith.constant 0 : i32
    %c0_i32_1 = arith.constant 0 : i32
    return %c0_i32, %c0_i32_0 : i32, i32
  }
  func.func @transform_4(%arg0: i32) -> (i32, i32) {
    %c0_i32 = arith.constant 0 : i32
    %c0_i32_0 = arith.constant 0 : i32
    %c0_i32_1 = arith.constant 0 : i32
    return %c0_i32, %c0_i32_0 : i32, i32
  }
  func.func @transform_5(%arg0: i32) -> (i32, i32) {
    %c0_i32 = arith.constant 0 : i32
    %c0_i32_0 = arith.constant 0 : i32
    %c0_i32_1 = arith.constant 0 : i32
    return %c0_i32, %c0_i32_0 : i32, i32
  }
  func.func @transform_6(%arg0: i32) -> (i32, i32) {
    %c0_i32 = arith.constant 0 : i32
    %c0_i32_0 = arith.constant 0 : i32
    %c0_i32_1 = arith.constant 0 : i32
    return %c0_i32, %c0_i32_0 : i32, i32
  }
  func.func @transform_7(%arg0: i32) -> (i32, i32) {
    %c0_i32 = arith.constant 0 : i32
    %c0_i32_0 = arith.constant 0 : i32
    %c0_i32_1 = arith.constant 0 : i32
    return %c0_i32, %c0_i32_0 : i32, i32
  }
  func.func @transform_8(%arg0: i32) -> (i32, i32) {
    %c0_i32 = arith.constant 0 : i32
    %c0_i32_0 = arith.constant 0 : i32
    %c0_i32_1 = arith.constant 0 : i32
    return %c0_i32, %c0_i32_0 : i32, i32
  }
  func.func @transform_9(%arg0: i32) -> (i32, i32) {
    %c0_i32 = arith.constant 0 : i32
    %c0_i32_0 = arith.constant 0 : i32
    return %arg0, %c0_i32 : i32, i32
  }
}

</mosaic_0001>

<bundles_post_ra>
// kernel: net_forward.1
= control target key start
LH: loop header
LB: loop body
LE: loop exit
PB: predicated region body
PF: predicated region fallthrough
CT: control target
= control target key end

     0   :  { %v16102_v2 = vmov 0   ;;  %vm1495_vm0 = vsmask.f32 3328  ;;  %vm1496_vm2 = vsmask.f32 7440  ;;  %vm1754_vm3 = vcmask 1042432   ;;  %s20958_s0 = inlined_call_operand.vmem [shape: bf16[2,12,16,128], index: 0, kind: input, shape index: {}]   ;;  %s20959_s1 = inlined_call_operand.vmem [shape: bf16[128,512], index: 1, kind: input, shape index: {}]   ;;  %s20960_s2 = inlined_call_operand.vmem [shape: f32[1,512], index: 2, kind: input, shape index: {}]   ;;  %s20961_s3 = inlined_call_operand.vmem [shape: bf16[3200,128], index: 3, kind: input, shape index: {}]   ;;  %s20962_s4 = inlined_call_operand.vmem [shape: f32[1,128], index: 4, kind: input, shape index: {}]   ;;  %s20963_s5 = inlined_call_operand.vmem [shape: bf16[2048,512], index: 5, kind: input, shape index: {}]   ;;  %s20964_s6 = inlined_call_operand.vmem [shape: f32[1,512], index: 6, kind: input, shape index: {}]   ;;  %s20965_s7 = inlined_call_operand.vmem [shape: bf16[512,128], index: 7, kind: input, shape index: {}]   ;;  %s20966_s8 = inlined_call_operand.vmem [shape: f32[1,128], index: 8, kind: input, shape index: {}]   ;;  %s20967_s9 = inlined_call_operand.hbm [shape: f32[2,128], index: 9, kind: output, shape index: {}]  }
   0x1   :  { %v14704_v0 = vld [vmem:[%s20959_s1 + $0xe4] ss:$16 sps:$4 sm:$0xff]   ;;  %v14706_v1 = vld [vmem:[%s20959_s1 + $0xec] ss:$16 sps:$4 sm:$0xff]   ;;  %472 = vmatprep.mubr.bf16.mxu0 %v16102_v2  ;;  %745 = vmatprep.mubr.bf16.mxu1 %v16102_v2  ;;  %v14708_v3 = vld [vmem:[%s20959_s1 + $0xe0] ss:$16 sps:$4 sm:$0xff]  }
   0x2   :  { %440 = vmatprep.subr.bf16.mxu0 %v14704_v0  ;;  %v14709_v4 = vld [vmem:[%s20959_s1 + $0xe8] ss:$16 sps:$4 sm:$0xff]   ;;  %713 = vmatprep.subr.bf16.mxu1 %v14706_v1  ;;  %v14710_v5 = vld [vmem:[%s20959_s1 + $0xc4] ss:$16 sps:$4 sm:$0xff]   ;;  %v14712_v6 = vld [vmem:[%s20959_s1 + $0xcc] ss:$16 sps:$4 sm:$0xff]  }
   0x3   :  { %441 = vmatpush1.bf16.msra.mxu0 %v14708_v3  ;;  %714 = vmatpush1.bf16.msra.mxu1 %v14709_v4  ;;  %v14714_v7 = vld [vmem:[%s20959_s1 + $0xc0] ss:$16 sps:$4 sm:$0xff]   ;;  %v14715_v8 = vld [vmem:[%s20959_s1 + $0xc8] ss:$16 sps:$4 sm:$0xff]   ;;  %v14716_v9 = vld [vmem:[%s20959_s1 + $0xa4] ss:$16 sps:$4 sm:$0xff]  }
   0x4   :  { %442 = vmatprep.subr.bf16.mxu0 %v14710_v5  ;;  %715 = vmatprep.subr.bf16.mxu1 %v14712_v6  ;;  %v14718_v10 = vld [vmem:[%s20959_s1 + $0xac] ss:$16 sps:$4 sm:$0xff]   ;;  %v14720_v11 = vld [vmem:[%s20959_s1 + $0xa0] ss:$16 sps:$4 sm:$0xff]   ;;  %v14721_v12 = vld [vmem:[%s20959_s1 + $0xa8] ss:$16 sps:$4 sm:$0xff]  }
   0x5   :  { %v14722_v13 = vld [vmem:[%s20959_s1 + $0x84] ss:$16 sps:$4 sm:$0xff]   ;;  %v14724_v14 = vld [vmem:[%s20959_s1 + $0x8c] ss:$16 sps:$4 sm:$0xff]   ;;  %v14726_v15 = vld [vmem:[%s20959_s1 + $0x80] ss:$16 sps:$4 sm:$0xff]  }
   0x6   :  { %v14727_v16 = vld [vmem:[%s20959_s1 + $0x88] ss:$16 sps:$4 sm:$0xff]   ;;  %v14728_v17 = vld [vmem:[%s20959_s1 + $0x64] ss:$16 sps:$4 sm:$0xff]   ;;  %v14730_v18 = vld [vmem:[%s20959_s1 + $0x6c] ss:$16 sps:$4 sm:$0xff]  }
   0x7   :  { %443 = vmatpush1.bf16.msra.mxu0 %v14714_v7  ;;  %716 = vmatpush1.bf16.msra.mxu1 %v14715_v8  ;;  %v14732_v19 = vld [vmem:[%s20959_s1 + $0x60] ss:$16 sps:$4 sm:$0xff]   ;;  %v14733_v20 = vld [vmem:[%s20959_s1 + $0x68] ss:$16 sps:$4 sm:$0xff]   ;;  %v14734_v21 = vld [vmem:[%s20959_s1 + $0x44] ss:$16 sps:$4 sm:$0xff]  }
   0x8   :  { %444 = vmatprep.subr.bf16.mxu0 %v14716_v9  ;;  %717 = vmatprep.subr.bf16.mxu1 %v14718_v10  ;;  %v14736_v22 = vld [vmem:[%s20959_s1 + $0x4c] ss:$16 sps:$4 sm:$0xff]   ;;  %v14738_v23 = vld [vmem:[%s20959_s1 + $0x40] ss:$16 sps:$4 sm:$0xff]   ;;  %v14739_v24 = vld [vmem:[%s20959_s1 + $0x48] ss:$16 sps:$4 sm:$0xff]  }
   0x9   :  { %v14740_v25 = vld [vmem:[%s20959_s1 + $0x24] ss:$16 sps:$4 sm:$0xff]   ;;  %v14742_v26 = vld [vmem:[%s20959_s1 + $0x2c] ss:$16 sps:$4 sm:$0xff]   ;;  %v14744_v27 = vld [vmem:[%s20959_s1 + $0x20] ss:$16 sps:$4 sm:$0xff]  }
   0xa   :  { %v14745_v28 = vld [vmem:[%s20959_s1 + $0x28] ss:$16 sps:$4 sm:$0xff]   ;;  %v14746_v29 = vld [vmem:[%s20959_s1 + $0x4] ss:$16 sps:$4 sm:$0xff]   ;;  %v14748_v30 = vld [vmem:[%s20959_s1 + $0xc] ss:$16 sps:$4 sm:$0xff]  }
   0xb   :  { %445 = vmatpush1.bf16.msra.mxu0 %v14720_v11  ;;  %718 = vmatpush1.bf16.msra.mxu1 %v14721_v12  ;;  %v14750_v31 = vld [vmem:[%s20959_s1] ss:$16 sps:$4 sm:$0xff]   ;;  %v14751_v32 = vld [vmem:[%s20959_s1 + $0x8] ss:$16 sps:$4 sm:$0xff]   ;;  %vm1755_vm4 = vcmask 1046532   ;;  %vm2048_vm5 = vcmask 1041408   ;;  %vm16513_vm9 = vmor %vm1495_vm0, %vm1496_vm2 }
   0xc   :  { %446 = vmatprep.subr.bf16.mxu0 %v14722_v13  ;;  %719 = vmatprep.subr.bf16.mxu1 %v14724_v14  ;;  %v14752_v33 = vld [vmem:[%s20958_s0] sm:$0xff]   ;;  %v14753_v34 = vld [vmem:[%s20958_s0 + $0x8] sm:$0xff]   ;;  %v14769_v35 = vld [vmem:[%s20961_s3 + $0x78] sm:$0xff]   ;;  %vm1853_vm6 = vsmask.f32 2304  ;;  %vm2049_vm7 = vcmask 1045508  }
   0xd   :  { %v14770_v36 = vld [vmem:[%s20961_s3 + $0x38] sm:$0xff]   ;;  %v14754_v37 = vld [vmem:[%s20958_s0 + $0x10] sm:$0xff]   ;;  %v14756_v41 = vld [vmem:[%s20958_s0 + $0x20] sm:$0xff]   ;;  %vm1854_vm8 = vsmask.f32 6416 }
   0xe   :  { %v14755_v38 = vld [vmem:[%s20958_s0 + $0x18] sm:$0xff]   ;;  %v14774_v39 = vld [vmem:[%s20961_s3 + $0x70] sm:$0xff]   ;;  %v14779_v44 = vld [vmem:[%s20961_s3 + $0x68] sm:$0xff]  }
   0xf   :  { %447 = vmatpush1.bf16.msra.mxu0 %v14726_v15  ;;  %720 = vmatpush1.bf16.msra.mxu1 %v14727_v16  ;;  %v14775_v40 = vld [vmem:[%s20961_s3 + $0x30] sm:$0xff]   ;;  %v14777_v42 = vld [vmem:[%s20961_s3 + $0xf8] sm:$0xff]   ;;  %v14780_v45 = vld [vmem:[%s20961_s3 + $0x28] sm:$0xff]  }
  0x10   :  { %448 = vmatprep.subr.bf16.mxu0 %v14728_v17  ;;  %721 = vmatprep.subr.bf16.mxu1 %v14730_v18  ;;  %v14778_v43 = vld [vmem:[%s20961_s3 + $0xb8] sm:$0xff]   ;;  %v14781_v46 = vld [vmem:[%s20961_s3 + $0xf0] sm:$0xff]   ;;  %v14757_v47 = vld [vmem:[%s20958_s0 + $0x28] sm:$0xff]  }
  0x11   :  { %v14782_v48 = vld [vmem:[%s20961_s3 + $0xb0] sm:$0xff]   ;;  %v14759_v50 = vld [vmem:[%s20958_s0 + $0x38] sm:$0xff]   ;;  %v14760_v51 = vld [vmem:[%s20958_s0 + $0x40] sm:$0xff]  }
  0x12   :  { %v14758_v49 = vld [vmem:[%s20958_s0 + $0x30] sm:$0xff]   ;;  %v14761_v52 = vld [vmem:[%s20958_s0 + $0x48] sm:$0xff]   ;;  %v14763_v54 = vld [vmem:[%s20958_s0 + $0x58] sm:$0xff]  }
  0x13   :  { %449 = vmatpush1.bf16.msra.mxu0 %v14732_v19  ;;  %722 = vmatpush1.bf16.msra.mxu1 %v14733_v20  ;;  %v14762_v53 = vld [vmem:[%s20958_s0 + $0x50] sm:$0xff]   ;;  %v14783_v55 = vld [vmem:[%s20961_s3 + $0x60] sm:$0xff]   ;;  %v14786_v58 = vld [vmem:[%s20961_s3 + $0xe8] sm:$0xff]  }
  0x14   :  { %450 = vmatprep.subr.bf16.mxu0 %v14734_v21  ;;  %723 = vmatprep.subr.bf16.mxu1 %v14736_v22  ;;  %v14784_v56 = vld [vmem:[%s20961_s3 + $0x20] sm:$0xff]   ;;  %v14787_v59 = vld [vmem:[%s20961_s3 + $0xa8] sm:$0xff]   ;;  %v14791_v63 = vld [vmem:[%s20961_s3 + $0x58] sm:$0xff]  }
  0x15   :  { %v14764_v57 = vld [vmem:[%s20958_s0 + $0x60] sm:$0xff]   ;;  %v14765_v62 = vld [vmem:[%s20958_s0 + $0x68] sm:$0xff]   ;;  %v14792_v0 = vld [vmem:[%s20961_s3 + $0x18] sm:$0xff]  }
  0x16   :  { %v14788_v60 = vld [vmem:[%s20961_s3 + $0xe0] sm:$0xff]   ;;  %v14793_v1 = vld [vmem:[%s20961_s3 + $0xd8] sm:$0xff]   ;;  %v14766_v4 = vld [vmem:[%s20958_s0 + $0x70] sm:$0xff]  }
  0x17   :  { %451 = vmatpush1.bf16.msra.mxu0 %v14738_v23  ;;  %724 = vmatpush1.bf16.msra.mxu1 %v14739_v24  ;;  %v14790_v61 = vld [vmem:[%s20961_s3 + $0xa0] sm:$0xff]   ;;  %v14794_v3 = vld [vmem:[%s20961_s3 + $0x98] sm:$0xff]   ;;  %v14795_v5 = vld [vmem:[%s20961_s3 + $0x50] sm:$0xff]  }
  0x18   :  { %452 = vmatprep.subr.bf16.mxu0 %v14740_v25  ;;  %725 = vmatprep.subr.bf16.mxu1 %v14742_v26  ;;  %v14796_v6 = vld [vmem:[%s20961_s3 + $0x10] sm:$0xff]   ;;  %v14800_v9 = vld [vmem:[%s20961_s3 + $0x48] sm:$0xff]   ;;  %v14767_v11 = vld [vmem:[%s20958_s0 + $0x78] sm:$0xff]   ;;  %v20968_v25 = vlaneseq }
  0x19   :  { %v14797_v7 = vld [vmem:[%s20961_s3 + $0xd0] sm:$0xff]   ;;  %v14801_v10 = vld [vmem:[%s20961_s3 + $0x8] sm:$0xff]   ;;  %v14804_v14 = vld [vmem:[%s20961_s3 + $0x40] sm:$0xff]  }
  0x1a   :  { %v14798_v8 = vld [vmem:[%s20961_s3 + $0x90] sm:$0xff]   ;;  %v14802_v12 = vld [vmem:[%s20961_s3 + $0xc8] sm:$0xff]   ;;  %v14805_v15 = vld [vmem:[%s20961_s3] sm:$0xff]  }
  0x1b   :  { %453 = vmatpush1.bf16.msra.mxu0 %v14744_v27  ;;  %726 = vmatpush1.bf16.msra.mxu1 %v14745_v28  ;;  %v14803_v13 = vld [vmem:[%s20961_s3 + $0x88] sm:$0xff]   ;;  %v14768_v16 = vld [vmem:[%s20958_s0 + $0x80] sm:$0xff]   ;;  %v14772_v20 = vld [vmem:[%s20958_s0 + $0x90] sm:$0xff]   ;;  %v16469_v27 = vshrl.u32 %v20968_v25, 7 }
  0x1c   :  { %454 = vmatprep.subr.bf16.mxu0 %v14746_v29  ;;  %727 = vmatprep.subr.bf16.mxu1 %v14748_v30  ;;  %v14806_v17 = vld [vmem:[%s20961_s3 + $0xc0] sm:$0xff]   ;;  %v14771_v19 = vld [vmem:[%s20958_s0 + $0x88] sm:$0xff]   ;;  %v14773_v21 = vld [vmem:[%s20958_s0 + $0x98] sm:$0xff]  }
  0x1d   :  { %v14810_v18 = vld [vmem:[%s20961_s3 + $0x80] sm:$0xff]   ;;  %v14785_v23 = vld [vmem:[%s20958_s0 + $0xa8] sm:$0xff]   ;;  %v14789_v24 = vld [vmem:[%s20958_s0 + $0xb0] sm:$0xff]   ;;  %20975 = vst [vmem:[#allocation7_spill] sm:$0xff] %v16469_v27  ;;  %v20972_v29 = vsub.s32 0, %v16469_v27  ;;  %v20970_v30 = vsub.s32 2, %v16469_v27 }
  0x1e   :  { %v14776_v22 = vld [vmem:[%s20958_s0 + $0xa0] sm:$0xff]   ;;  %v14799_v26 = vld [vmem:[%s20958_s0 + $0xb8] sm:$0xff]   ;;  %vm16524_vm10 = vmor %vm1754_vm3, %vm1755_vm4 }
  0x1f   :  { %455 = vmatpush1.bf16.msra.mxu0 %v14750_v31  ;;  %728 = vmatpush1.bf16.msra.mxu1 %v14751_v32  ;;  %v114_v28 = vld [vmem:[%s20960_s2] sm:$0xf]  ;;  %v20971_v31 = vsub.s32 1, %v16469_v27  ;;  %vm16531_vm11 = vmor %vm2048_vm5, %vm2049_vm7 }
  0x20   :  { %13840 = vmatprep.subr.bf16.mxu0 %v14769_v35  ;;  %13904 = vmatprep.subr.bf16.mxu1 %v14777_v42  ;;  %v16480_v32 = vrot.slane %v114_v28, %v20972_v29  ;;  %vm16544_vm12 = vmor %vm1853_vm6, %vm1854_vm8 }
  0x22   :  { %473 = vmatmul.mubr.bf16.vlgmr.msra.gmra.mxu0 %v14752_v33  ;;  %746 = vmatmul.mubr.bf16.vlgmr.msra.gmra.mxu1 %v14752_v33  ;;  %v16484_v33 = vrot.slane %v114_v28, %v20970_v30 }
  0x23   :  { %482 = vmatprep.mubr.bf16.mxu0 %v16102_v2  ;;  %755 = vmatprep.mubr.bf16.mxu1 %v16102_v2 }
  0x24   :  { %13841 = vmatpush3.bf16.msra.mxu0 %v14770_v36  ;;  %13905 = vmatpush3.bf16.msra.mxu1 %v14778_v43 }
  0x25   :  { %13842 = vmatprep.subr.bf16.mxu0 %v14774_v39  ;;  %13906 = vmatprep.subr.bf16.mxu1 %v14781_v46 }
  0x28   :  { %13843 = vmatpush3.bf16.msra.mxu0 %v14775_v40  ;;  %13907 = vmatpush3.bf16.msra.mxu1 %v14782_v48  ;;  %v16497_v40 = vadd.s32 8, %v16469_v27 }
  0x29   :  { %13844 = vmatprep.subr.bf16.mxu0 %v14779_v44  ;;  %13908 = vmatprep.subr.bf16.mxu1 %v14786_v58 }
  0x2a   :  { %483 = vmatmul.mubr.bf16.gmra.mxu0 %v14753_v34  ;;  %756 = vmatmul.mubr.bf16.gmra.mxu1 %v14753_v34  ;;  %v16488_v34 = vrot.slane %v114_v28, %v20971_v31  ;;  %vm1326_vm1 = vcmp.lt.s32.totalorder %v16497_v40, 12 }
  0x2b   :  { %492 = vmatprep.mubr.bf16.mxu0 %v16102_v2  ;;  %765 = vmatprep.mubr.bf16.mxu1 %v16102_v2 }
  0x2c   :  { %13845 = vmatpush3.bf16.msra.mxu0 %v14780_v45  ;;  %13909 = vmatpush3.bf16.msra.mxu1 %v14787_v59 }
  0x2d   :  { %13846 = vmatprep.subr.bf16.mxu0 %v14783_v55  ;;  %13910 = vmatprep.subr.bf16.mxu1 %v14788_v60 }
  0x30   :  { %13847 = vmatpush3.bf16.msra.mxu0 %v14784_v56  ;;  %13911 = vmatpush3.bf16.msra.mxu1 %v14790_v61 }
  0x31   :  { %13848 = vmatprep.subr.bf16.mxu0 %v14791_v63  ;;  %13912 = vmatprep.subr.bf16.mxu1 %v14793_v1 }
  0x32   :  { %493 = vmatmul.mubr.bf16.gmra.mxu0 %v14754_v37  ;;  %766 = vmatmul.mubr.bf16.gmra.mxu1 %v14754_v37 }
  0x33   :  { %502 = vmatprep.mubr.bf16.mxu0 %v16102_v2  ;;  %775 = vmatprep.mubr.bf16.mxu1 %v16102_v2 }
  0x34   :  { %13849 = vmatpush3.bf16.msra.mxu0 %v14792_v0  ;;  %13913 = vmatpush3.bf16.msra.mxu1 %v14794_v3 }
  0x35   :  { %13850 = vmatprep.subr.bf16.mxu0 %v14795_v5  ;;  %13914 = vmatprep.subr.bf16.mxu1 %v14797_v7 }
  0x38   :  { %13851 = vmatpush3.bf16.msra.mxu0 %v14796_v6  ;;  %13915 = vmatpush3.bf16.msra.mxu1 %v14798_v8 }
  0x39   :  { %13852 = vmatprep.subr.bf16.mxu0 %v14800_v9  ;;  %13916 = vmatprep.subr.bf16.mxu1 %v14802_v12 }
  0x3a   :  { %503 = vmatmul.mubr.bf16.gmra.mxu0 %v14755_v38  ;;  %776 = vmatmul.mubr.bf16.gmra.mxu1 %v14755_v38 }
  0x3b   :  { %512 = vmatprep.mubr.bf16.mxu0 %v16102_v2  ;;  %785 = vmatprep.mubr.bf16.mxu1 %v16102_v2 }
  0x3c   :  { %13853 = vmatpush3.bf16.msra.mxu0 %v14801_v10  ;;  %13917 = vmatpush3.bf16.msra.mxu1 %v14803_v13 }
  0x3d   :  { %13854 = vmatprep.subr.bf16.mxu0 %v14804_v14  ;;  %13918 = vmatprep.subr.bf16.mxu1 %v14806_v17 }
  0x40   :  { %13855 = vmatpush3.bf16.msra.mxu0 %v14805_v15  ;;  %13919 = vmatpush3.bf16.msra.mxu1 %v14810_v18 }
  0x42   :  { %513 = vmatmul.mubr.bf16.gmra.mxu0 %v14756_v41  ;;  %786 = vmatmul.mubr.bf16.gmra.mxu1 %v14756_v41 }
  0x43   :  { %522 = vmatprep.mubr.bf16.mxu0 %v16102_v2  ;;  %795 = vmatprep.mubr.bf16.mxu1 %v16102_v2 }
  0x4a   :  { %523 = vmatmul.mubr.bf16.gmra.mxu0 %v14757_v47  ;;  %796 = vmatmul.mubr.bf16.gmra.mxu1 %v14757_v47 }
  0x4b   :  { %532 = vmatprep.mubr.bf16.mxu0 %v16102_v2  ;;  %805 = vmatprep.mubr.bf16.mxu1 %v16102_v2 }
  0x52   :  { %533 = vmatmul.mubr.bf16.gmra.mxu0 %v14758_v49  ;;  %806 = vmatmul.mubr.bf16.gmra.mxu1 %v14758_v49 }
  0x53   :  { %542 = vmatprep.mubr.bf16.mxu0 %v16102_v2  ;;  %815 = vmatprep.mubr.bf16.mxu1 %v16102_v2 }
  0x5a   :  { %543 = vmatmul.mubr.bf16.gmra.mxu0 %v14759_v50  ;;  %816 = vmatmul.mubr.bf16.gmra.mxu1 %v14759_v50 }
  0x5b   :  { %552 = vmatprep.mubr.bf16.mxu0 %v16102_v2  ;;  %825 = vmatprep.mubr.bf16.mxu1 %v16102_v2 }
  0x62   :  { %553 = vmatmul.mubr.bf16.gmra.mxu0 %v14760_v51  ;;  %826 = vmatmul.mubr.bf16.gmra.mxu1 %v14760_v51 }
  0x63   :  { %562 = vmatprep.mubr.bf16.mxu0 %v16102_v2  ;;  %835 = vmatprep.mubr.bf16.mxu1 %v16102_v2 }
  0x6a   :  { %563 = vmatmul.mubr.bf16.gmra.mxu0 %v14761_v52  ;;  %836 = vmatmul.mubr.bf16.gmra.mxu1 %v14761_v52 }
  0x6b   :  { %572 = vmatprep.mubr.bf16.mxu0 %v16102_v2  ;;  %845 = vmatprep.mubr.bf16.mxu1 %v16102_v2 }
  0x72   :  { %573 = vmatmul.mubr.bf16.gmra.mxu0 %v14762_v53  ;;  %846 = vmatmul.mubr.bf16.gmra.mxu1 %v14762_v53 }
  0x73   :  { %582 = vmatprep.mubr.bf16.mxu0 %v16102_v2  ;;  %855 = vmatprep.mubr.bf16.mxu1 %v16102_v2 }
  0x7a   :  { %583 = vmatmul.mubr.bf16.gmra.mxu0 %v14763_v54  ;;  %856 = vmatmul.mubr.bf16.gmra.mxu1 %v14763_v54 }
  0x7b   :  { %592 = vmatprep.mubr.bf16.mxu0 %v16102_v2  ;;  %865 = vmatprep.mubr.bf16.mxu1 %v16102_v2 }
  0x82   :  { %593 = vmatmul.mubr.bf16.gmra.mxu0 %v14764_v57  ;;  %866 = vmatmul.mubr.bf16.gmra.mxu1 %v14764_v57 }
  0x83   :  { %602 = vmatprep.mubr.bf16.mxu0 %v16102_v2  ;;  %875 = vmatprep.mubr.bf16.mxu1 %v16102_v2 }
  0x8a   :  { %603 = vmatmul.mubr.bf16.gmra.mxu0 %v14765_v62  ;;  %876 = vmatmul.mubr.bf16.gmra.mxu1 %v14765_v62 }
  0x8b   :  { %612 = vmatprep.mubr.bf16.mxu0 %v16102_v2  ;;  %885 = vmatprep.mubr.bf16.mxu1 %v16102_v2 }
  0x92   :  { %613 = vmatmul.mubr.bf16.gmra.mxu0 %v14766_v4  ;;  %886 = vmatmul.mubr.bf16.gmra.mxu1 %v14766_v4 }
  0x93   :  { %622 = vmatprep.mubr.bf16.mxu0 %v16102_v2  ;;  %895 = vmatprep.mubr.bf16.mxu1 %v16102_v2 }
  0x9a   :  { %623 = vmatmul.mubr.bf16.gmra.mxu0 %v14767_v11  ;;  %896 = vmatmul.mubr.bf16.gmra.mxu1 %v14767_v11 }
  0x9b   :  { %632 = vmatprep.mubr.bf16.mxu0 %v16102_v2  ;;  %905 = vmatprep.mubr.bf16.mxu1 %v16102_v2 }
  0xa2   :  { %633 = vmatmul.mubr.bf16.gmra.mxu0 %v14768_v16  ;;  %906 = vmatmul.mubr.bf16.gmra.mxu1 %v14768_v16 }
  0xa3   :  { %642 = vmatprep.mubr.bf16.mxu0 %v16102_v2  ;;  %915 = vmatprep.mubr.bf16.mxu1 %v16102_v2 }
  0xaa   :  { %643 = vmatmul.mubr.bf16.gmra.mxu0 %v14771_v19  ;;  %916 = vmatmul.mubr.bf16.gmra.mxu1 %v14771_v19 }
  0xab   :  { %652 = vmatprep.mubr.bf16.mxu0 %v16102_v2  ;;  %925 = vmatprep.mubr.bf16.mxu1 %v16102_v2 }
  0xb2   :  { %653 = vmatmul.mubr.bf16.gmra.mxu0 %v14772_v20  ;;  %926 = vmatmul.mubr.bf16.gmra.mxu1 %v14772_v20 }
  0xb3   :  { %662 = vmatprep.mubr.bf16.mxu0 %v16102_v2  ;;  %935 = vmatprep.mubr.bf16.mxu1 %v16102_v2 }
  0xba   :  { %663 = vmatmul.mubr.bf16.gmra.mxu0 %v14773_v21  ;;  %936 = vmatmul.mubr.bf16.gmra.mxu1 %v14773_v21 }
  0xbb   :  { %672 = vmatprep.mubr.bf16.mxu0 %v16102_v2  ;;  %945 = vmatprep.mubr.bf16.mxu1 %v16102_v2 }
  0xc2   :  { %673 = vmatmul.mubr.bf16.gmra.mxu0 %v14776_v22  ;;  %946 = vmatmul.mubr.bf16.gmra.mxu1 %v14776_v22 }
  0xc3   :  { %682 = vmatprep.mubr.bf16.mxu0 %v16102_v2  ;;  %955 = vmatprep.mubr.bf16.mxu1 %v16102_v2 }
  0xca   :  { %683 = vmatmul.mubr.bf16.gmra.mxu0 %v14785_v23  ;;  %956 = vmatmul.mubr.bf16.gmra.mxu1 %v14785_v23 }
  0xcb   :  { %692 = vmatprep.mubr.bf16.mxu0 %v16102_v2  ;;  %965 = vmatprep.mubr.bf16.mxu1 %v16102_v2 }
  0xd2   :  { %693 = vmatmul.mubr.bf16.gmra.mxu0 %v14789_v24  ;;  %966 = vmatmul.mubr.bf16.gmra.mxu1 %v14789_v24 }
  0xd3   :  { %702 = vmatprep.mubr.bf16.mxu0 %v16102_v2  ;;  %975 = vmatprep.mubr.bf16.mxu1 %v16102_v2  ;;  %v20969_v2 = vsub.s32 3, %v16469_v27 }
  0xd5   :  { %v16492_v35 = vrot.slane %v114_v28, %v20969_v2 }
  0xda   :  { %703 = vmatmul.mubr.bf16.gmra.mxu0 %v14799_v26  ;;  %976 = vmatmul.mubr.bf16.gmra.mxu1 %v14799_v26 }
  0xe2   :  { %v474_v36 = vpop.f32.mrf.mxu0  ;;  %v747_v37 = vpop.f32.mrf.mxu1 }
  0xe3   :  { %v475_v38 = vadd.f32 %v474_v36, %v16480_v32  ;;  %v748_v39 = vadd.f32 %v747_v37, %v16484_v33 }
  0xe4   :  { %v476_v41 = vpop.f32.mrf.mxu0  ;;  %v749_v42 = vpop.f32.mrf.mxu1 }
  0xe5   :  { %v477_v43 = vadd.f32 %v476_v41, %v16488_v34  ;;  %v750_v44 = vadd.f32 %v749_v42, %v16492_v35  ;;  %v986_v45 = vmax.f32 %v475_v38, 0.0  ;;  %v988_v48 = vmax.f32 %v748_v39, 0.0 }
  0xe6   :  { %v478_v46 = vpop.f32.mrf.mxu0  ;;  %v751_v47 = vpop.f32.mrf.mxu1 }
  0xe7   :  { %v987_v49 = vmax.f32 %v477_v43, 0.0  ;;  %v989_v50 = vmax.f32 %v750_v44, 0.0  ;;  %v479_v51 = vadd.f32 %v478_v46, %v16480_v32  ;;  %v752_v52 = vadd.f32 %v751_v47, %v16484_v33 }
  0xe8   :  { %v480_v53 = vpop.f32.mrf.mxu0  ;;  %v753_v54 = vpop.f32.mrf.mxu1 }
  0xe9   :  { %v1178_v55 = vmax.f32 %v986_v45, %v987_v49  ;;  %v1226_v56 = vmax.f32 %v988_v48, %v989_v50  ;;  %v481_v57 = vadd.f32 %v480_v53, %v16488_v34  ;;  %v754_v58 = vadd.f32 %v753_v54, %v16492_v35 }
  0xea   :  { %v484_v59 = vpop.f32.mrf.mxu0  ;;  %v757_v60 = vpop.f32.mrf.mxu1  ;;  %v990_v62 = vmax.f32 %v479_v51, 0.0  ;;  %v992_v1 = vmax.f32 %v752_v52, 0.0 }
  0xeb   :  { %v1274_v61 = vmax.f32 %v1178_v55, %v1226_v56  ;;  %v485_v63 = vadd.f32 %v484_v59, %v16480_v32  ;;  %v758_v0 = vadd.f32 %v757_v60, %v16484_v33  ;;  %v991_v3 = vmax.f32 %v481_v57, 0.0 }
  0xec   :  { %v993_v4 = vmax.f32 %v754_v58, 0.0  ;;  %v486_v5 = vpop.f32.mrf.mxu0  ;;  %v759_v6 = vpop.f32.mrf.mxu1 }
  0xed   :  { %v16508_v7 = vpack.c.bf16 %v1274_v61, %v1274_v61  ;;  %v994_v8 = vmax.f32 %v485_v63, 0.0  ;;  %v487_v9 = vadd.f32 %v486_v5, %v16488_v34  ;;  %v1179_v10 = vmax.f32 %v990_v62, %v991_v3 }
  0xee   :  { %v1227_v11 = vmax.f32 %v992_v1, %v993_v4  ;;  %v996_v13 = vmax.f32 %v758_v0, 0.0  ;;  %v760_v14 = vadd.f32 %v759_v6, %v16492_v35  ;;  %v488_v15 = vpop.f32.mrf.mxu0  ;;  %v761_v16 = vpop.f32.mrf.mxu1 }
  0xef   :  { %v1499_v17 = vshrl.u32 %v16508_v7, 16  ;;  %v1502_v18 = vshll.u32 %v16508_v7, 16  ;;  %v12766_v19 = vrot.slane %v16508_v7, 9  ;;  %v12782_v20 = vrot.slane %v16508_v7, 10 }
  0xf0   :  { %v1275_v22 = vmax.f32 %v1179_v10, %v1227_v11  ;;  %v995_v23 = vmax.f32 %v487_v9, 0.0  ;;  %v997_v24 = vmax.f32 %v760_v14, 0.0  ;;  %v489_v26 = vadd.f32 %v488_v15, %v16480_v32  ;;  %v490_v28 = vpop.f32.mrf.mxu0  ;;  %v763_v36 = vpop.f32.mrf.mxu1 }
  0xf1   :  { %v1501_v37 = vrot.slane %v1499_v17, 4  ;;  %v1504_v38 = vrot.slane %v1502_v18, 5  ;;  %v1856_v39 = vrot.slane %v1499_v17, 5  ;;  %v1857_v41 = vrot.slane %v1502_v18, 6 }
  0xf2   :  { %v1328_v43 = vsel %vm1326_vm1, %v1275_v22, 0.0  ;;  %v1180_v44 = vmax.f32 %v994_v8, %v995_v23  ;;  %v1228_v45 = vmax.f32 %v996_v13, %v997_v24  ;;  %v998_v46 = vmax.f32 %v489_v26, 0.0  ;;  %v494_v47 = vpop.f32.mrf.mxu0  ;;  %v767_v48 = vpop.f32.mrf.mxu1 }
  0xf3   :  { %v1505_v49 = vor.u32 %v1504_v38, %v1501_v37  ;;  %v1858_v50 = vor.u32 %v1857_v41, %v1856_v39  ;;  %v1375_v51 = vpack.c.bf16 %v1328_v43, %v1274_v61  ;;  %v13793_v52 = vpack.c.bf16 %v1328_v43, %v1328_v43 }
  0xf4   :  { %v16537_v53 = vmax.f32 %v1180_v44, %v1228_v45  ;;  %v762_v54 = vadd.f32 %v761_v16, %v16484_v33  ;;  %v491_v55 = vadd.f32 %v490_v28, %v16488_v34  ;;  %v764_v56 = vadd.f32 %v763_v36, %v16492_v35  ;;  %v496_v57 = vpop.f32.mrf.mxu0  ;;  %v769_v58 = vpop.f32.mrf.mxu1 }
  0xf5   :  { %v1506_v59 = vrot.slane %v1505_v49, 4  ;;  %v1859_v60 = vrot.slane %v1858_v50, 4  ;;  %1399 = vst [vmem:[#allocation2] sm:$0xf] %v1375_v51  ;;  %v1508_v62 = vshll.u32 %v13793_v52, 16  ;;  %v1759_v63 = vrot.slane %v13793_v52, 5 }
  0xf6   :  { %v1860_v0 = vshrl.u32 %v13793_v52, 16  ;;  %v2053_v1 = vrot.slane %v13793_v52, 6  ;;  %v16550_v3 = vpack.c.bf16 %v16537_v53, %v16537_v53  ;;  %v1000_v4 = vmax.f32 %v762_v54, 0.0  ;;  %v498_v5 = vpop.f32.mrf.mxu0  ;;  %v771_v6 = vpop.f32.mrf.mxu1 }
  0xf7   :  { %v1510_v7 = vrot.slane %v1508_v62, 5  ;;  %v1760_v8 = vsel %vm16524_vm10, %v12766_v19, %v1759_v63  ;;  %v1863_v9 = vrot.slane %v1508_v62, 6  ;;  %v999_v10 = vmax.f32 %v491_v55, 0.0 }
  0xf8   :  { %1837 = vst [vmem:[#allocation2 + $0x8] sm:$0xf] %v1760_v8  ;;  %v1862_v11 = vrot.slane %v1860_v0, 5  ;;  %v2054_v13 = vsel %vm16531_vm11, %v12782_v20, %v2053_v1  ;;  %v1513_v14 = vshrl.u32 %v16550_v3, 16  ;;  %v1516_v15 = vshll.u32 %v16550_v3, 16  ;;  %v500_v16 = vpop.f32.mrf.mxu0  ;;  %v773_v17 = vpop.f32.mrf.mxu1 }
  0xf9   :  { %v1511_v18 = vsel %vm16513_vm9, %v1506_v59, %v1510_v7  ;;  %2131 = vst [vmem:[#allocation2 + $0x10] sm:$0xf] %v2054_v13  ;;  %v12767_v22 = vrot.slane %v16550_v3, 9  ;;  %v12783_v19 = vrot.slane %v16550_v3, 10  ;;  %v1181_v23 = vmax.f32 %v998_v46, %v999_v10 }
  0xfa   :  { %1738 = vst [vmem:[#allocation2 + $0x4] sm:$0xf] %v1511_v18  ;;  %v1864_v24 = vor.u32 %v1863_v9, %v1862_v11  ;;  %v1515_v26 = vrot.slane %v1513_v14, 4  ;;  %v1518_v28 = vrot.slane %v1516_v15, 5  ;;  %v1866_v20 = vrot.slane %v1513_v14, 5  ;;  %v504_v36 = vpop.f32.mrf.mxu0  ;;  %v777_v37 = vpop.f32.mrf.mxu1 }
  0xfb   :  { %v1867_v38 = vrot.slane %v1516_v15, 6  ;;  %v1001_v39 = vmax.f32 %v764_v56, 0.0  ;;  %v495_v41 = vadd.f32 %v494_v47, %v16480_v32  ;;  %v768_v43 = vadd.f32 %v767_v48, %v16484_v33 }
  0xfc   :  { %v1865_v44 = vsel %vm16544_vm12, %v1859_v60, %v1864_v24  ;;  %v1519_v45 = vor.u32 %v1518_v28, %v1515_v26  ;;  %v497_v49 = vadd.f32 %v496_v57, %v16488_v34  ;;  %v770_v46 = vadd.f32 %v769_v58, %v16492_v35  ;;  %v506_v50 = vpop.f32.mrf.mxu0  ;;  %v16568_v51 = vpop.f32.mrf.mxu1 }
  0xfd   :  { %2032 = vst [vmem:[#allocation2 + $0xc] sm:$0xf] %v1865_v44  ;;  %v1868_v52 = vor.u32 %v1867_v38, %v1866_v20  ;;  %v1229_v54 = vmax.f32 %v1000_v4, %v1001_v39  ;;  %v1002_v55 = vmax.f32 %v495_v41, 0.0  ;;  %v1004_v56 = vmax.f32 %v768_v43, 0.0 }
  0xfe   :  { %v1520_v59 = vrot.slane %v1519_v45, 4  ;;  %v1003_v47 = vmax.f32 %v497_v49, 0.0  ;;  %v1005_v62 = vmax.f32 %v770_v46, 0.0  ;;  %v499_v48 = vadd.f32 %v498_v5, %v16480_v32  ;;  %v16571_v63 = vpop.f32.mrf.mxu0  ;;  %v16573_v60 = vpop.f32.mrf.mxu1 }
  0xff   :  { %v16575_v57 = vrot.slane %v1868_v52, 4  ;;  %v1277_v58 = vmax.f32 %v1181_v23, %v1229_v54  ;;  %v772_v0 = vadd.f32 %v771_v6, %v16484_v33  ;;  %v501_v1 = vadd.f32 %v500_v16, %v16488_v34 }
 0x100   :  { %v1182_v7 = vmax.f32 %v1002_v55, %v1003_v47  ;;  %v1230_v4 = vmax.f32 %v1004_v56, %v1005_v62  ;;  %v1006_v8 = vmax.f32 %v499_v48, 0.0  ;;  %v774_v9 = vadd.f32 %v773_v17, %v16492_v35  ;;  %v16580_v10 = vpop.f32.mrf.mxu0  ;;  %v16582_v11 = vpop.f32.mrf.mxu1 }
 0x101   :  { %v1330_v5 = vsel %vm1326_vm1, %v1277_v58, 0.0  ;;  %v1008_v13 = vmax.f32 %v772_v0, 0.0  ;;  %v1007_v14 = vmax.f32 %v501_v1, 0.0  ;;  %v505_v15 = vadd.f32 %v504_v36, %v16480_v32 }
 0x102   :  { %v1376_v6 = vpack.c.bf16 %v1330_v5, %v16537_v53  ;;  %v13795_v18 = vpack.c.bf16 %v1330_v5, %v1330_v5  ;;  %v1278_v16 = vmax.f32 %v1182_v7, %v1230_v4  ;;  %v1009_v23 = vmax.f32 %v774_v9, 0.0  ;;  %v16588_v24 = vpop.f32.mrf.mxu0  ;;  %v16590_v26 = vpop.f32.mrf.mxu1 }
 0x103   :  { %v1183_v17 = vmax.f32 %v1006_v8, %v1007_v14  ;;  %v1010_v28 = vmax.f32 %v505_v15, 0.0  ;;  %v16593_v20 = vadd.f32 %v777_v37, %v16484_v33  ;;  %v507_v38 = vadd.f32 %v506_v50, %v16488_v34 }
 0x104   :  { %1400 = vst [vmem:[#allocation2 + $0x64] sm:$0xf] %v1376_v6  ;;  %v1522_v39 = vshll.u32 %v13795_v18, 16  ;;  %v1763_v41 = vrot.slane %v13795_v18, 5  ;;  %v1870_v36 = vshrl.u32 %v13795_v18, 16  ;;  %v2057_v43 = vrot.slane %v13795_v18, 6  ;;  %v16596_v53 = vpop.f32.mrf.mxu0  ;;  %v16598_v44 = vpop.f32.mrf.mxu1 }
 0x105   :  { %2147 = vst [vmem:[#allocation2 + $0x14] sm:$0xf] %v1376_v6  ;;  %v16600_v45 = vpack.c.bf16 %v1278_v16, %v1278_v16  ;;  %v1231_v49 = vmax.f32 %v1008_v13, %v1009_v23  ;;  %v1012_v46 = vmax.f32 %v16593_v20, 0.0  ;;  %v1011_v52 = vmax.f32 %v507_v38, 0.0 }
 0x106   :  { %v1524_v37 = vrot.slane %v1522_v39, 5  ;;  %v1764_v50 = vsel %vm16524_vm10, %v12767_v22, %v1763_v41  ;;  %v1872_v54 = vrot.slane %v1870_v36, 5  ;;  %v1873_v55 = vrot.slane %v1522_v39, 6  ;;  %v16607_v56 = vpop.f32.mrf.mxu0  ;;  %v16609_v47 = vpop.f32.mrf.mxu1 }
 0x107   :  { %1838 = vst [vmem:[#allocation2 + $0x6c] sm:$0xf] %v1764_v50  ;;  %v2058_v62 = vsel %vm16531_vm11, %v12783_v19, %v2057_v43  ;;  %2229 = vst [vmem:[#allocation2 + $0x1c] sm:$0xf] %v1764_v50  ;;  %v1527_v48 = vshrl.u32 %v16600_v45, 16  ;;  %v1530_v58 = vshll.u32 %v16600_v45, 16  ;;  %v1279_v4 = vmax.f32 %v1183_v17, %v1231_v49 }
 0x108   :  { %v12768_v0 = vrot.slane %v16600_v45, 9  ;;  %v1525_v22 = vsel %vm16513_vm9, %v1520_v59, %v1524_v37  ;;  %v1874_v1 = vor.u32 %v1873_v55, %v1872_v54  ;;  %2132 = vst [vmem:[#allocation2 + $0x74] sm:$0xf] %v2058_v62  ;;  %2293 = vst [vmem:[#allocation2 + $0x24] sm:$0xf] %v2058_v62  ;;  %v12784_v7 = vrot.slane %v16600_v45, 10  ;;  %v16621_v3 = vpop.f32.mrf.mxu0  ;;  %v16623_v8 = vpop.f32.mrf.mxu1 }
 0x109   :  { %1739 = vst [vmem:[#allocation2 + $0x68] sm:$0xf] %v1525_v22  ;;  %2203 = vst [vmem:[#allocation2 + $0x18] sm:$0xf] %v1525_v22  ;;  %v1529_v19 = vrot.slane %v1527_v48, 4  ;;  %v1532_v9 = vrot.slane %v1530_v58, 5  ;;  %v1184_v15 = vmax.f32 %v1010_v28, %v1011_v52  ;;  %v780_v6 = vadd.f32 %v16568_v51, %v16492_v35 }
 0x10a   :  { %v1876_v5 = vrot.slane %v1527_v48, 5  ;;  %v1877_v13 = vrot.slane %v1530_v58, 6  ;;  %v1875_v59 = vsel %vm16544_vm12, %v16575_v57, %v1874_v1  ;;  %v1332_v14 = vsel %vm1326_vm1, %v1279_v4, 0.0  ;;  %v16632_v18 = vpop.f32.mrf.mxu0  ;;  %v16634_v23 = vpop.f32.mrf.mxu1 }
 0x10b   :  { %2033 = vst [vmem:[#allocation2 + $0x70] sm:$0xf] %v1875_v59  ;;  %2267 = vst [vmem:[#allocation2 + $0x20] sm:$0xf] %v1875_v59  ;;  %v1533_v17 = vor.u32 %v1532_v9, %v1529_v19  ;;  %v1377_v38 = vpack.c.bf16 %v1332_v14, %v1278_v16  ;;  %v13797_v39 = vpack.c.bf16 %v1332_v14, %v1332_v14  ;;  %v1013_v41 = vmax.f32 %v780_v6, 0.0 }
 0x10c   :  { %v1878_v20 = vor.u32 %v1877_v13, %v1876_v5  ;;  %v509_v57 = vadd.f32 %v16571_v63, %v16480_v32  ;;  %v16640_v28 = vadd.f32 %v16573_v60, %v16484_v33  ;;  %v511_v51 = vadd.f32 %v16580_v10, %v16488_v34  ;;  %v16644_v36 = vpop.f32.mrf.mxu0  ;;  %v16646_v43 = vpop.f32.mrf.mxu1  ;;  %v14807_v19 = vld [vmem:[#allocation2] ss:$100 sps:$4 sm:$0xff]  }
 0x10d   :  { %v1534_v45 = vrot.slane %v1533_v17, 4  ;;  %1401 = vst [vmem:[#allocation2 + $0xc8] sm:$0xf] %v1377_v38  ;;  %v1536_v16 = vshll.u32 %v13797_v39, 16  ;;  %v1767_v52 = vrot.slane %v13797_v39, 5  ;;  %v1880_v37 = vshrl.u32 %v13797_v39, 16 }
 0x10e   :  { %v1879_v49 = vrot.slane %v1878_v20, 4  ;;  %2148 = vst [vmem:[#allocation2 + $0x78] sm:$0xf] %v1377_v38  ;;  %2309 = vst [vmem:[#allocation2 + $0x28] sm:$0xf] %v1377_v38  ;;  %v2061_v63 = vrot.slane %v13797_v39, 6  ;;  %v1232_v50 = vmax.f32 %v1012_v46, %v1013_v41  ;;  %v16648_v60 = vpop.f32.mrf.mxu0  ;;  %v16650_v55 = vpop.f32.mrf.mxu1  ;;  %v784_v13 = vadd.f32 %v16582_v11, %v16492_v35 }
 0x10f   :  { %v1014_v54 = vmax.f32 %v509_v57, 0.0  ;;  %v1538_v10 = vrot.slane %v1536_v16, 5  ;;  %v1768_v62 = vsel %vm16524_vm10, %v12768_v0, %v1767_v52  ;;  %v1883_v48 = vrot.slane %v1536_v16, 6  ;;  %v14811_v11 = vld [vmem:[#allocation2 + $0x8] ss:$100 sps:$4 sm:$0xff]  }
 0x110   :  { %v1016_v58 = vmax.f32 %v16640_v28, 0.0  ;;  %1839 = vst [vmem:[#allocation2 + $0xd0] sm:$0xf] %v1768_v62  ;;  %v1882_v22 = vrot.slane %v1880_v37, 5  ;;  %v2062_v1 = vsel %vm16531_vm11, %v12784_v7, %v2061_v63  ;;  %2230 = vst [vmem:[#allocation2 + $0x80] sm:$0xf] %v1768_v62  ;;  %v16657_v46 = vmax.f32 %v1184_v15, %v1232_v50  ;;  %v16659_v9 = vpop.f32.mrf.mxu0  ;;  %v16661_v5 = vpop.f32.mrf.mxu1 }
 0x111   :  { %2391 = vst [vmem:[#allocation2 + $0x30] sm:$0xf] %v1768_v62  ;;  %v1015_v4 = vmax.f32 %v511_v51, 0.0  ;;  %v1539_v0 = vsel %vm16513_vm9, %v1534_v45, %v1538_v10  ;;  %2133 = vst [vmem:[#allocation2 + $0xd8] sm:$0xf] %v2062_v1  ;;  %v515_v7 = vadd.f32 %v16588_v24, %v16480_v32  ;;  %v788_v59 = vadd.f32 %v16590_v26, %v16484_v33 }
 0x112   :  { %2294 = vst [vmem:[#allocation2 + $0x88] sm:$0xf] %v2062_v1  ;;  %2455 = vst [vmem:[#allocation2 + $0x38] sm:$0xf] %v2062_v1  ;;  %v14809_v14 = vld [vmem:[#allocation2 + $0x4] ss:$100 sps:$4 sm:$0xff]   ;;  %v1884_v15 = vor.u32 %v1883_v48, %v1882_v22  ;;  %v16673_v6 = vpack.c.bf16 %v16657_v46, %v16657_v46  ;;  %v517_v20 = vadd.f32 %v16596_v53, %v16488_v34  ;;  %v16677_v39 = vpop.f32.mrf.mxu0  ;;  %v16679_v24 = vpop.f32.mrf.mxu1 }
 0x113   :  { %1740 = vst [vmem:[#allocation2 + $0xcc] sm:$0xf] %v1539_v0  ;;  %2204 = vst [vmem:[#allocation2 + $0x7c] sm:$0xf] %v1539_v0  ;;  %v1185_v17 = vmax.f32 %v1014_v54, %v1015_v4  ;;  %v14813_v38 = vld [vmem:[#allocation2 + $0xc] ss:$100 sps:$4 sm:$0xff]   ;;  %v790_v28 = vadd.f32 %v16598_v44, %v16492_v35  ;;  %5650 = vmatprep.mubr.bf16.mxu0 %v14809_v14  ;;  %v521_v14 = vadd.f32 %v16621_v3, %v16488_v34 }
 0x114   :  { %2365 = vst [vmem:[#allocation2 + $0x2c] sm:$0xf] %v1539_v0  ;;  %v1017_v26 = vmax.f32 %v784_v13, 0.0  ;;  %v1018_v41 = vmax.f32 %v515_v7, 0.0  ;;  %v1020_v57 = vmax.f32 %v788_v59, 0.0  ;;  %v1885_v51 = vsel %vm16544_vm12, %v1879_v49, %v1884_v15  ;;  %5651 = vmatmul.mubr.bf16.vlgmr.msra.gmra.mxu0 %v14807_v19  ;;  %5747 = vmatprep.mubr.bf16.mxu1 %v14813_v38  ;;  %v16688_v52 = vpop.f32.mrf.mxu0  ;;  %v16690_v37 = vpop.f32.mrf.mxu1 }
 0x115   :  { %v1541_v45 = vshrl.u32 %v16673_v6, 16  ;;  %v1544_v53 = vshll.u32 %v16673_v6, 16  ;;  %v12769_v16 = vrot.slane %v16673_v6, 9  ;;  %2034 = vst [vmem:[#allocation2 + $0xd4] sm:$0xf] %v1885_v51  ;;  %v12785_v44 = vrot.slane %v16673_v6, 10  ;;  %5748 = vmatmul.mubr.bf16.vlgmr.msra.gmra.mxu1 %v14811_v11 }
 0x116   :  { %2268 = vst [vmem:[#allocation2 + $0x84] sm:$0xf] %v1885_v51  ;;  %2429 = vst [vmem:[#allocation2 + $0x34] sm:$0xf] %v1885_v51  ;;  %v1233_v63 = vmax.f32 %v1016_v58, %v1017_v26  ;;  %v1019_v50 = vmax.f32 %v517_v20, 0.0  ;;  %v1021_v49 = vmax.f32 %v790_v28, 0.0  ;;  %v16693_v22 = vpop.f32.mrf.mxu0  ;;  %v16695_v1 = vpop.f32.mrf.mxu1  ;;  %v519_v13 = vadd.f32 %v16607_v56, %v16480_v32 }
 0x117   :  { %v1543_v54 = vrot.slane %v1541_v45, 4  ;;  %v1546_v10 = vrot.slane %v1544_v53, 5  ;;  %v1886_v62 = vrot.slane %v1541_v45, 5  ;;  %v1887_v48 = vrot.slane %v1544_v53, 6 }
 0x118   :  { %v1281_v4 = vmax.f32 %v1185_v17, %v1233_v63  ;;  %v1186_v19 = vmax.f32 %v1018_v41, %v1019_v50  ;;  %v1234_v0 = vmax.f32 %v1020_v57, %v1021_v49  ;;  %v792_v58 = vadd.f32 %v16609_v47, %v16484_v33  ;;  %v16703_v15 = vpop.f32.mrf.mxu0  ;;  %v16705_v6 = vpop.f32.mrf.mxu1 }
 0x119   :  { %v1547_v7 = vor.u32 %v1546_v10, %v1543_v54  ;;  %v1888_v59 = vor.u32 %v1887_v48, %v1886_v62  ;;  %v1022_v11 = vmax.f32 %v519_v13, 0.0  ;;  %v794_v56 = vadd.f32 %v16623_v8, %v16492_v35 }
 0x11a   :  { %v1334_v17 = vsel %vm1326_vm1, %v1281_v4, 0.0  ;;  %v16709_v20 = vmax.f32 %v1186_v19, %v1234_v0  ;;  %v16714_v57 = vpop.f32.mrf.mxu0  ;;  %v16716_v3 = vpop.f32.mrf.mxu1  ;;  %v1024_v51 = vmax.f32 %v792_v58, 0.0  ;;  %v1023_v45 = vmax.f32 %v521_v14, 0.0 }
 0x11b   :  { %v1548_v38 = vrot.slane %v1547_v7, 4  ;;  %v1889_v26 = vrot.slane %v1888_v59, 4  ;;  %v1378_v47 = vpack.c.bf16 %v1334_v17, %v16657_v46  ;;  %v13799_v41 = vpack.c.bf16 %v1334_v17, %v1334_v17 }
 0x11c   :  { %v16720_v28 = vpack.c.bf16 %v16709_v20, %v16709_v20  ;;  %v1025_v53 = vmax.f32 %v794_v56, 0.0  ;;  %v16722_v46 = vpop.f32.mrf.mxu0  ;;  %v16724_v54 = vpop.f32.mrf.mxu1 }
 0x11d   :  { %1402 = vst [vmem:[#allocation2 + $0x12c] sm:$0xf] %v1378_v47  ;;  %v1550_v63 = vshll.u32 %v13799_v41, 16  ;;  %v1771_v50 = vrot.slane %v13799_v41, 5  ;;  %v1890_v8 = vshrl.u32 %v13799_v41, 16  ;;  %v2065_v49 = vrot.slane %v13799_v41, 6 }
 0x11e   :  { %2149 = vst [vmem:[#allocation2 + $0xdc] sm:$0xf] %v1378_v47  ;;  %2310 = vst [vmem:[#allocation2 + $0x8c] sm:$0xf] %v1378_v47  ;;  %v1555_v10 = vshrl.u32 %v16720_v28, 16  ;;  %v1558_v62 = vshll.u32 %v16720_v28, 16  ;;  %v16732_v59 = vpop.f32.mrf.mxu0  ;;  %v16734_v58 = vpop.f32.mrf.mxu1 }
 0x11f   :  { %2471 = vst [vmem:[#allocation2 + $0x3c] sm:$0xf] %v1378_v47  ;;  %v12770_v48 = vrot.slane %v16720_v28, 9  ;;  %v12786_v4 = vrot.slane %v16720_v28, 10  ;;  %v1552_v19 = vrot.slane %v1550_v63, 5  ;;  %v1772_v0 = vsel %vm16524_vm10, %v12769_v16, %v1771_v50 }
 0x120   :  { %v1892_v13 = vrot.slane %v1890_v8, 5  ;;  %v1893_v7 = vrot.slane %v1550_v63, 6  ;;  %1840 = vst [vmem:[#allocation2 + $0x134] sm:$0xf] %v1772_v0  ;;  %v2066_v14 = vsel %vm16531_vm11, %v12785_v44, %v2065_v49  ;;  %2231 = vst [vmem:[#allocation2 + $0xe4] sm:$0xf] %v1772_v0  ;;  %v1187_v50 = vmax.f32 %v1022_v11, %v1023_v45  ;;  %v16740_v8 = vpop.f32.mrf.mxu0  ;;  %v16742_v25 = vpop.f32.mrf.mxu1 }
 0x121   :  { %2392 = vst [vmem:[#allocation2 + $0x94] sm:$0xf] %v1772_v0  ;;  %2553 = vst [vmem:[#allocation2 + $0x44] sm:$0xf] %v1772_v0  ;;  %v1557_v17 = vrot.slane %v1555_v10, 4  ;;  %v1560_v56 = vrot.slane %v1558_v62, 5  ;;  %v1553_v41 = vsel %vm16513_vm9, %v1548_v38, %v1552_v19  ;;  %v1235_v49 = vmax.f32 %v1024_v51, %v1025_v53 }
 0x122   :  { %v1896_v47 = vrot.slane %v1555_v10, 5  ;;  %v1894_v16 = vor.u32 %v1893_v7, %v1892_v13  ;;  %2134 = vst [vmem:[#allocation2 + $0x13c] sm:$0xf] %v2066_v14  ;;  %2295 = vst [vmem:[#allocation2 + $0xec] sm:$0xf] %v2066_v14  ;;  %v1897_v63 = vrot.slane %v1558_v62, 6  ;;  %v525_v38 = vadd.f32 %v16632_v18, %v16480_v32  ;;  %v16754_v0 = vpop.f32.mrf.mxu0  ;;  %v16756_v13 = vpop.f32.mrf.mxu1 }
 0x123   :  { %2456 = vst [vmem:[#allocation2 + $0x9c] sm:$0xf] %v2066_v14  ;;  %2617 = vst [vmem:[#allocation2 + $0x4c] sm:$0xf] %v2066_v14  ;;  %v1561_v44 = vor.u32 %v1560_v56, %v1557_v17  ;;  %v798_v10 = vadd.f32 %v16634_v23, %v16484_v33  ;;  %v527_v45 = vadd.f32 %v16644_v36, %v16488_v34 }
 0x124   :  { %1741 = vst [vmem:[#allocation2 + $0x130] sm:$0xf] %v1553_v41  ;;  %2205 = vst [vmem:[#allocation2 + $0xe0] sm:$0xf] %v1553_v41  ;;  %v1895_v62 = vsel %vm16544_vm12, %v1889_v26, %v1894_v16  ;;  %v1898_v11 = vor.u32 %v1897_v63, %v1896_v47  ;;  %v800_v19 = vadd.f32 %v16646_v43, %v16492_v35  ;;  %v1026_v51 = vmax.f32 %v525_v38, 0.0  ;;  %v16762_v43 = vpop.f32.mrf.mxu0  ;;  %v16764_v17 = vpop.f32.mrf.mxu1 }
 0x125   :  { %2366 = vst [vmem:[#allocation2 + $0x90] sm:$0xf] %v1553_v41  ;;  %2527 = vst [vmem:[#allocation2 + $0x40] sm:$0xf] %v1553_v41  ;;  %v1562_v18 = vrot.slane %v1561_v44, 4  ;;  %v1283_v23 = vmax.f32 %v1187_v50, %v1235_v49  ;;  %v1028_v53 = vmax.f32 %v798_v10, 0.0  ;;  %v529_v36 = vadd.f32 %v16648_v60, %v16480_v32 }
 0x126   :  { %2035 = vst [vmem:[#allocation2 + $0x138] sm:$0xf] %v1895_v62  ;;  %2269 = vst [vmem:[#allocation2 + $0xe8] sm:$0xf] %v1895_v62  ;;  %v16758_v26 = vrot.slane %v1898_v11, 4  ;;  %v1027_v7 = vmax.f32 %v527_v45, 0.0  ;;  %v802_v47 = vadd.f32 %v16650_v55, %v16484_v33  ;;  %v531_v41 = vadd.f32 %v16659_v9, %v16488_v34  ;;  %v16775_v49 = vpop.f32.mrf.mxu0  ;;  %v16777_v38 = vpop.f32.mrf.mxu1 }
 0x127   :  { %2430 = vst [vmem:[#allocation2 + $0x98] sm:$0xf] %v1895_v62  ;;  %2591 = vst [vmem:[#allocation2 + $0x48] sm:$0xf] %v1895_v62  ;;  %v1029_v14 = vmax.f32 %v800_v19, 0.0  ;;  %v1336_v56 = vsel %vm1326_vm1, %v1283_v23, 0.0  ;;  %v804_v16 = vadd.f32 %v16661_v5, %v16492_v35  ;;  %v16803_v28 = vadd.f32 %v16679_v24, %v16484_v33 }
 0x128   :  { %v1379_v63 = vpack.c.bf16 %v1336_v56, %v16709_v20  ;;  %v13801_v50 = vpack.c.bf16 %v1336_v56, %v1336_v56  ;;  %v1188_v60 = vmax.f32 %v1026_v51, %v1027_v7  ;;  %v1030_v10 = vmax.f32 %v529_v36, 0.0  ;;  %v16779_v5 = vpop.f32.mrf.mxu0  ;;  %v16781_v20 = vpop.f32.mrf.mxu1  ;;  %v14816_v56 = vld [vmem:[#allocation2 + $0xc8] ss:$100 sps:$4 sm:$0xff]  }
 0x129   :  { %v1236_v44 = vmax.f32 %v1028_v53, %v1029_v14  ;;  %v1032_v62 = vmax.f32 %v802_v47, 0.0  ;;  %v1031_v11 = vmax.f32 %v531_v41, 0.0  ;;  %v1033_v45 = vmax.f32 %v804_v16, 0.0 }
 0x12a   :  { %1403 = vst [vmem:[#allocation2 + $0x190] sm:$0xf] %v1379_v63  ;;  %v1564_v55 = vshll.u32 %v13801_v50, 16  ;;  %v1775_v19 = vrot.slane %v13801_v50, 5  ;;  %v1900_v9 = vshrl.u32 %v13801_v50, 16  ;;  %v2069_v23 = vrot.slane %v13801_v50, 6  ;;  %v16789_v2 = vpop.f32.mrf.mxu0  ;;  %v16791_v30 = vpop.f32.mrf.mxu1 }
 0x12b   :  { %2150 = vst [vmem:[#allocation2 + $0x140] sm:$0xf] %v1379_v63  ;;  %2311 = vst [vmem:[#allocation2 + $0xf0] sm:$0xf] %v1379_v63  ;;  %v1284_v51 = vmax.f32 %v1188_v60, %v1236_v44  ;;  %v1189_v53 = vmax.f32 %v1030_v10, %v1031_v11  ;;  %v1237_v7 = vmax.f32 %v1032_v62, %v1033_v45  ;;  %v14814_v36 = vld [vmem:[#allocation2 + $0xcc] ss:$100 sps:$4 sm:$0xff]  }
 0x12c   :  { %2472 = vst [vmem:[#allocation2 + $0xa0] sm:$0xf] %v1379_v63  ;;  %2633 = vst [vmem:[#allocation2 + $0x50] sm:$0xf] %v1379_v63  ;;  %v535_v14 = vadd.f32 %v16677_v39, %v16480_v32  ;;  %v1566_v47 = vrot.slane %v1564_v55, 5  ;;  %v1776_v41 = vsel %vm16524_vm10, %v12770_v48, %v1775_v19  ;;  %v1902_v16 = vrot.slane %v1900_v9, 5  ;;  %5658 = vmatprep.mubr.bf16.mxu0 %v14814_v36  ;;  %v16807_v45 = vpop.f32.mrf.mxu0 }
 0x12d   :  { %v1903_v63 = vrot.slane %v1564_v55, 6  ;;  %v14817_v50 = vld [vmem:[#allocation2 + $0xd4] ss:$100 sps:$4 sm:$0xff]   ;;  %1841 = vst [vmem:[#allocation2 + $0x198] sm:$0xf] %v1776_v41  ;;  %v2070_v39 = vsel %vm16531_vm11, %v12786_v4, %v2069_v23  ;;  %v16797_v60 = vpack.c.bf16 %v1284_v51, %v1284_v51  ;;  %v1285_v48 = vmax.f32 %v1189_v53, %v1237_v7  ;;  %5659 = vmatmul.mubr.bf16.gmra.mxu0 %v14816_v56  ;;  %v16809_v55 = vpop.f32.mrf.mxu1 }
 0x12e   :  { %2232 = vst [vmem:[#allocation2 + $0x148] sm:$0xf] %v1776_v41  ;;  %2393 = vst [vmem:[#allocation2 + $0xf8] sm:$0xf] %v1776_v41  ;;  %v1034_v44 = vmax.f32 %v535_v14, 0.0  ;;  %v1567_v62 = vsel %vm16513_vm9, %v1562_v18, %v1566_v47  ;;  %v537_v4 = vadd.f32 %v16688_v52, %v16488_v34  ;;  %5755 = vmatprep.mubr.bf16.mxu1 %v14817_v50  ;;  %v1036_v53 = vmax.f32 %v16803_v28, 0.0  ;;  %v16821_v14 = vpop.f32.mrf.mxu0 }
 0x12f   :  { %2554 = vst [vmem:[#allocation2 + $0xa8] sm:$0xf] %v1776_v41  ;;  %2715 = vst [vmem:[#allocation2 + $0x58] sm:$0xf] %v1776_v41  ;;  %v14819_v10 = vld [vmem:[#allocation2 + $0xd0] ss:$100 sps:$4 sm:$0xff]   ;;  %v1904_v11 = vor.u32 %v1903_v63, %v1902_v16  ;;  %v16823_v36 = vpop.f32.mrf.mxu1  ;;  %v16837_v28 = vadd.f32 %v16695_v1, %v16484_v33 }
 0x130   :  { %2135 = vst [vmem:[#allocation2 + $0x1a0] sm:$0xf] %v2070_v39  ;;  %2296 = vst [vmem:[#allocation2 + $0x150] sm:$0xf] %v2070_v39  ;;  %v1569_v18 = vshrl.u32 %v16797_v60, 16  ;;  %v1572_v19 = vshll.u32 %v16797_v60, 16  ;;  %5756 = vmatmul.mubr.bf16.gmra.mxu1 %v14819_v10 }
 0x131   :  { %2457 = vst [vmem:[#allocation2 + $0x100] sm:$0xf] %v2070_v39  ;;  %2618 = vst [vmem:[#allocation2 + $0xb0] sm:$0xf] %v2070_v39  ;;  %v12771_v24 = vrot.slane %v16797_v60, 9  ;;  %v12787_v9 = vrot.slane %v16797_v60, 10  ;;  %v1905_v52 = vsel %vm16544_vm12, %v16758_v26, %v1904_v11  ;;  %v16827_v60 = vpop.f32.mrf.mxu0  ;;  %v16833_v11 = vadd.f32 %v16693_v22, %v16480_v32 }
 0x132   :  { %2779 = vst [vmem:[#allocation2 + $0x60] sm:$0xf] %v2070_v39  ;;  %1742 = vst [vmem:[#allocation2 + $0x194] sm:$0xf] %v1567_v62  ;;  %v1338_v23 = vsel %vm1326_vm1, %v1285_v48, 0.0  ;;  %v1035_v7 = vmax.f32 %v537_v4, 0.0  ;;  %v810_v39 = vadd.f32 %v16690_v37, %v16492_v35  ;;  %v16829_v48 = vpop.f32.mrf.mxu1 }
 0x133   :  { %2206 = vst [vmem:[#allocation2 + $0x144] sm:$0xf] %v1567_v62  ;;  %2367 = vst [vmem:[#allocation2 + $0xf4] sm:$0xf] %v1567_v62  ;;  %v1571_v56 = vrot.slane %v1569_v18, 4  ;;  %v1574_v47 = vrot.slane %v1572_v19, 5  ;;  %v1380_v16 = vpack.c.bf16 %v1338_v23, %v1284_v51  ;;  %v13803_v63 = vpack.c.bf16 %v1338_v23, %v1338_v23  ;;  %v16839_v37 = vpop.f32.mrf.mxu0 }
 0x134   :  { %2528 = vst [vmem:[#allocation2 + $0xa4] sm:$0xf] %v1567_v62  ;;  %2689 = vst [vmem:[#allocation2 + $0x54] sm:$0xf] %v1567_v62  ;;  %v1906_v41 = vrot.slane %v1569_v18, 5  ;;  %v1907_v26 = vrot.slane %v1572_v19, 6  ;;  %v1190_v50 = vmax.f32 %v1034_v44, %v1035_v7  ;;  %v16841_v19 = vpop.f32.mrf.mxu1 }
 0x135   :  { %2036 = vst [vmem:[#allocation2 + $0x19c] sm:$0xf] %v1905_v52  ;;  %2270 = vst [vmem:[#allocation2 + $0x14c] sm:$0xf] %v1905_v52  ;;  %v1575_v10 = vor.u32 %v1574_v47, %v1571_v56  ;;  %v1578_v51 = vshll.u32 %v13803_v63, 16  ;;  %v1779_v44 = vrot.slane %v13803_v63, 5 }
 0x136   :  { %2431 = vst [vmem:[#allocation2 + $0xfc] sm:$0xf] %v1905_v52  ;;  %2592 = vst [vmem:[#allocation2 + $0xac] sm:$0xf] %v1905_v52  ;;  %v1908_v62 = vor.u32 %v1907_v26, %v1906_v41  ;;  %v1910_v4 = vshrl.u32 %v13803_v63, 16  ;;  %v2073_v18 = vrot.slane %v13803_v63, 6  ;;  %v16846_v26 = vpop.f32.mrf.mxu0  ;;  %v16848_v63 = vpop.f32.mrf.mxu1 }
 0x137   :  { %2753 = vst [vmem:[#allocation2 + $0x5c] sm:$0xf] %v1905_v52  ;;  %1404 = vst [vmem:[#allocation2 + $0x1f4] sm:$0xf] %v1380_v16  ;;  %v1576_v52 = vrot.slane %v1575_v10, 4  ;;  %v1037_v23 = vmax.f32 %v810_v39, 0.0  ;;  %v1780_v56 = vsel %vm16524_vm10, %v12771_v24, %v1779_v44  ;;  %v541_v24 = vadd.f32 %v16703_v15, %v16488_v34 }
 0x138   :  { %2151 = vst [vmem:[#allocation2 + $0x1a4] sm:$0xf] %v1380_v16  ;;  %2312 = vst [vmem:[#allocation2 + $0x154] sm:$0xf] %v1380_v16  ;;  %v1909_v22 = vrot.slane %v1908_v62, 4  ;;  %v1038_v7 = vmax.f32 %v16833_v11, 0.0 }
 0x139   :  { %2473 = vst [vmem:[#allocation2 + $0x104] sm:$0xf] %v1380_v16  ;;  %2634 = vst [vmem:[#allocation2 + $0xb4] sm:$0xf] %v1380_v16  ;;  %v1580_v1 = vrot.slane %v1578_v51, 5  ;;  %v1912_v47 = vrot.slane %v1910_v4, 5  ;;  %v2074_v16 = vsel %vm16531_vm11, %v12787_v9, %v2073_v18  ;;  %v1238_v39 = vmax.f32 %v1036_v53, %v1037_v23 }
 0x13a   :  { %v1913_v41 = vrot.slane %v1578_v51, 6  ;;  %1842 = vst [vmem:[#allocation2 + $0x1fc] sm:$0xf] %v1780_v56  ;;  %2233 = vst [vmem:[#allocation2 + $0x1ac] sm:$0xf] %v1780_v56  ;;  %v1040_v10 = vmax.f32 %v16837_v28, 0.0  ;;  %v814_v9 = vadd.f32 %v16705_v6, %v16492_v35  ;;  %v545_v53 = vadd.f32 %v16714_v57, %v16480_v32  ;;  %v16861_v51 = vpop.f32.mrf.mxu0  ;;  %v16863_v28 = vpop.f32.mrf.mxu1 }
 0x13b   :  { %2394 = vst [vmem:[#allocation2 + $0x15c] sm:$0xf] %v1780_v56  ;;  %2555 = vst [vmem:[#allocation2 + $0x10c] sm:$0xf] %v1780_v56  ;;  %v1581_v62 = vsel %vm16513_vm9, %v1576_v52, %v1580_v1  ;;  %v1286_v15 = vmax.f32 %v1190_v50, %v1238_v39  ;;  %v1039_v44 = vmax.f32 %v541_v24, 0.0  ;;  %v818_v4 = vadd.f32 %v16716_v3, %v16484_v33 }
 0x13c   :  { %2716 = vst [vmem:[#allocation2 + $0xbc] sm:$0xf] %v1780_v56  ;;  %v1914_v11 = vor.u32 %v1913_v41, %v1912_v47  ;;  %2136 = vst [vmem:[#allocation2 + $0x204] sm:$0xf] %v2074_v16  ;;  %v547_v6 = vadd.f32 %v16722_v46, %v16488_v34  ;;  %v1041_v18 = vmax.f32 %v814_v9, 0.0  ;;  %v1042_v52 = vmax.f32 %v545_v53, 0.0  ;;  %v16873_v1 = vpop.f32.mrf.mxu0  ;;  %v16875_v56 = vpop.f32.mrf.mxu1 }
 0x13d   :  { %2297 = vst [vmem:[#allocation2 + $0x1b4] sm:$0xf] %v2074_v16  ;;  %2458 = vst [vmem:[#allocation2 + $0x164] sm:$0xf] %v2074_v16  ;;  %v820_v23 = vadd.f32 %v16724_v54, %v16492_v35  ;;  %v16877_v3 = vpack.c.bf16 %v1286_v15, %v1286_v15  ;;  %v1191_v46 = vmax.f32 %v1038_v7, %v1039_v44  ;;  %v1044_v50 = vmax.f32 %v818_v4, 0.0  ;;  %v14833_v7 = vld [vmem:[%s20961_s3 + $0x138] sm:$0xff]  }
 0x13e   :  { %2619 = vst [vmem:[#allocation2 + $0x114] sm:$0xf] %v2074_v16  ;;  %2780 = vst [vmem:[#allocation2 + $0xc4] sm:$0xf] %v2074_v16  ;;  %v1915_v57 = vsel %vm16544_vm12, %v1909_v22, %v1914_v11  ;;  %v1043_v47 = vmax.f32 %v547_v6, 0.0  ;;  %v14832_v22 = vld [vmem:[%s20961_s3 + $0x178] sm:$0xff]   ;;  %v1239_v41 = vmax.f32 %v1040_v10, %v1041_v18  ;;  %v16884_v16 = vadd.f32 %v16732_v59, %v16480_v32  ;;  %v16890_v24 = vpop.f32.mrf.mxu0 }
 0x13f   :  { %1743 = vst [vmem:[#allocation2 + $0x1f8] sm:$0xf] %v1581_v62  ;;  %2207 = vst [vmem:[#allocation2 + $0x1a8] sm:$0xf] %v1581_v62  ;;  %v1045_v54 = vmax.f32 %v820_v23, 0.0  ;;  %v16888_v39 = vadd.f32 %v16734_v58, %v16484_v33  ;;  %v1583_v11 = vshrl.u32 %v16877_v3, 16  ;;  %13968 = vmatprep.subr.bf16.mxu0 %v14832_v22 }
 0x140   :  { %2368 = vst [vmem:[#allocation2 + $0x158] sm:$0xf] %v1581_v62  ;;  %2529 = vst [vmem:[#allocation2 + $0x108] sm:$0xf] %v1581_v62  ;;  %v1586_v10 = vshll.u32 %v16877_v3, 16  ;;  %v12772_v9 = vrot.slane %v16877_v3, 9  ;;  %v1287_v53 = vmax.f32 %v1191_v46, %v1239_v41  ;;  %v1192_v58 = vmax.f32 %v1042_v52, %v1043_v47  ;;  %v16902_v6 = vpop.f32.mrf.mxu0  ;;  %13969 = vmatpush3.bf16.msra.mxu0 %v14833_v7 }
 0x141   :  { %2690 = vst [vmem:[#allocation2 + $0xb8] sm:$0xf] %v1581_v62  ;;  %2037 = vst [vmem:[#allocation2 + $0x200] sm:$0xf] %v1915_v57  ;;  %v16892_v62 = vpop.f32.mrf.mxu1  ;;  %v12788_v59 = vrot.slane %v16877_v3, 10  ;;  %v1240_v44 = vmax.f32 %v1044_v50, %v1045_v54  ;;  %v1585_v18 = vrot.slane %v1583_v11, 4  ;;  %v16913_v52 = vadd.f32 %v16740_v8, %v16488_v34 }
 0x142   :  { %2271 = vst [vmem:[#allocation2 + $0x1b0] sm:$0xf] %v1915_v57  ;;  %2432 = vst [vmem:[#allocation2 + $0x160] sm:$0xf] %v1915_v57  ;;  %v1588_v23 = vrot.slane %v1586_v10, 5  ;;  %v1916_v31 = vrot.slane %v1583_v11, 5  ;;  %v16915_v50 = vpop.f32.mrf.mxu0  ;;  %v16926_v8 = vadd.f32 %v16742_v25, %v16492_v35 }
 0x143   :  { %2593 = vst [vmem:[#allocation2 + $0x110] sm:$0xf] %v1915_v57  ;;  %2754 = vst [vmem:[#allocation2 + $0xc0] sm:$0xf] %v1915_v57  ;;  %v16904_v57 = vpop.f32.mrf.mxu1  ;;  %v1917_v29 = vrot.slane %v1586_v10, 6  ;;  %v1340_v27 = vsel %vm1326_vm1, %v1287_v53, 0.0 }
 0x144   :  { %20984 = vst [vmem:[#allocation8_spill] sm:$0xff] %v16892_v62  ;;  %v16908_v62 = vmax.f32 %v1192_v58, %v1240_v44  ;;  %v1589_v22 = vor.u32 %v1588_v23, %v1585_v18  ;;  %v1381_v54 = vpack.c.bf16 %v1340_v27, %v1286_v15  ;;  %v13805_v7 = vpack.c.bf16 %v1340_v27, %v1340_v27  ;;  %v14822_v11 = vld [vmem:[#allocation2 + $0x190] ss:$100 sps:$4 sm:$0xff]  }
 0x145   :  { %v16917_v47 = vpop.f32.mrf.mxu1  ;;  %v1918_v41 = vor.u32 %v1917_v29, %v1916_v31  ;;  %v1047_v53 = vmax.f32 %v16913_v52, 0.0  ;;  %v16930_v58 = vadd.f32 %v16754_v0, %v16480_v32  ;;  %v14825_v29 = vld [vmem:[#allocation2 + $0x198] ss:$100 sps:$4 sm:$0xff]   ;;  %v16932_v31 = vpop.f32.mrf.mxu0 }
 0x146   :  { %v14820_v46 = vld [vmem:[#allocation2 + $0x194] ss:$100 sps:$4 sm:$0xff]   ;;  %20985 = vst [vmem:[#allocation9_spill] sm:$0xff] %v16917_v47  ;;  %v16921_v10 = vpack.c.bf16 %v16908_v62, %v16908_v62  ;;  %20986 = vst [vmem:[#allocation10_spill] sm:$0xff] %v16932_v31  ;;  %v1590_v15 = vrot.slane %v1589_v22, 4  ;;  %v1592_v23 = vshll.u32 %v13805_v7, 16 }
 0x147   :  { %5666 = vmatprep.mubr.bf16.mxu0 %v14820_v46  ;;  %v16934_v27 = vpop.f32.mrf.mxu1  ;;  %v1919_v18 = vrot.slane %v1918_v41, 4  ;;  %1405 = vst [vmem:[#allocation2 + $0x258] sm:$0xf] %v1381_v54  ;;  %v1783_v52 = vrot.slane %v13805_v7, 5  ;;  %2152 = vst [vmem:[#allocation2 + $0x208] sm:$0xf] %v1381_v54  ;;  %v16938_v4 = vpop.f32.mrf.mxu0 }
 0x148   :  { %v14823_v44 = vld [vmem:[#allocation2 + $0x19c] ss:$100 sps:$4 sm:$0xff]   ;;  %20987 = vst [vmem:[#allocation11_spill] sm:$0xff] %v16934_v27  ;;  %2313 = vst [vmem:[#allocation2 + $0x1b8] sm:$0xf] %v1381_v54  ;;  %5667 = vmatmul.mubr.bf16.gmra.mxu0 %v14822_v11  ;;  %v1920_v25 = vshrl.u32 %v13805_v7, 16 }
 0x149   :  { %2474 = vst [vmem:[#allocation2 + $0x168] sm:$0xf] %v1381_v54  ;;  %2635 = vst [vmem:[#allocation2 + $0x118] sm:$0xf] %v1381_v54  ;;  %v2077_v0 = vrot.slane %v13805_v7, 6  ;;  %v1597_v46 = vshrl.u32 %v16921_v10, 16  ;;  %5763 = vmatprep.mubr.bf16.mxu1 %v14823_v44  ;;  %v16940_v27 = vpop.f32.mrf.mxu1  ;;  %v1784_v41 = vsel %vm16524_vm10, %v12772_v9, %v1783_v52 }
 0x14a   :  { %v1600_v3 = vshll.u32 %v16921_v10, 16  ;;  %20988 = vst [vmem:[#allocation12_spill] sm:$0xff] %v16938_v4  ;;  %20989 = vst [vmem:[#allocation13_spill] sm:$0xff] %v16940_v27  ;;  %v1594_v22 = vrot.slane %v1592_v23, 5  ;;  %v1923_v31 = vrot.slane %v1592_v23, 6  ;;  %v12773_v47 = vrot.slane %v16921_v10, 9  ;;  %5764 = vmatmul.mubr.bf16.gmra.mxu1 %v14825_v29  ;;  %v16947_v27 = vpop.f32.mrf.mxu0 }
 0x14b   :  { %1843 = vst [vmem:[#allocation2 + $0x260] sm:$0xf] %v1784_v41  ;;  %v1922_v54 = vrot.slane %v1920_v25, 5  ;;  %v2078_v7 = vsel %vm16531_vm11, %v12788_v59, %v2077_v0  ;;  %2234 = vst [vmem:[#allocation2 + $0x210] sm:$0xf] %v1784_v41  ;;  %v1599_v11 = vrot.slane %v1597_v46, 4  ;;  %v16949_v4 = vpop.f32.mrf.mxu1 }
 0x14c   :  { %2395 = vst [vmem:[#allocation2 + $0x1c0] sm:$0xf] %v1784_v41  ;;  %2556 = vst [vmem:[#allocation2 + $0x170] sm:$0xf] %v1784_v41  ;;  %v1602_v44 = vrot.slane %v1600_v3, 5  ;;  %v1595_v9 = vsel %vm16513_vm9, %v1590_v15, %v1594_v22  ;;  %v1926_v29 = vrot.slane %v1597_v46, 5  ;;  %v16960_v46 = vpop.f32.mrf.mxu0 }
 0x14d   :  { %2717 = vst [vmem:[#allocation2 + $0x120] sm:$0xf] %v1784_v41  ;;  %2137 = vst [vmem:[#allocation2 + $0x268] sm:$0xf] %v2078_v7  ;;  %v1927_v59 = vrot.slane %v1600_v3, 6  ;;  %v14837_v52 = vld [vmem:[%s20961_s3 + $0x170] sm:$0xff]   ;;  %v1924_v25 = vor.u32 %v1923_v31, %v1922_v54  ;;  %v16962_v3 = vpop.f32.mrf.mxu1  ;;  %v828_v31 = vadd.f32 %v16756_v13, %v16484_v33  ;;  %v557_v54 = vadd.f32 %v16762_v43, %v16488_v34 }
 0x14e   :  { %2298 = vst [vmem:[#allocation2 + $0x218] sm:$0xf] %v2078_v7  ;;  %2459 = vst [vmem:[#allocation2 + $0x1c8] sm:$0xf] %v2078_v7  ;;  %v1603_v15 = vor.u32 %v1602_v44, %v1599_v11  ;;  %v20990_v0 = vmax.f32 %v16884_v16, 0.0  ;;  %v1049_v41 = vmax.f32 %v16926_v8, 0.0  ;;  %13970 = vmatprep.subr.bf16.mxu0 %v14837_v52  ;;  %v830_v44 = vadd.f32 %v16764_v17, %v16492_v35 }
 0x14f   :  { %2620 = vst [vmem:[#allocation2 + $0x178] sm:$0xf] %v2078_v7  ;;  %2781 = vst [vmem:[#allocation2 + $0x128] sm:$0xf] %v2078_v7  ;;  %v1928_v7 = vor.u32 %v1927_v59, %v1926_v29  ;;  %v1050_v23 = vmax.f32 %v16930_v58, 0.0  ;;  %v1925_v16 = vsel %vm16544_vm12, %v1919_v18, %v1924_v25  ;;  %v20991_v8 = vmax.f32 %v16888_v39, 0.0  ;;  %v16979_v58 = vpop.f32.mrf.mxu1 }
 0x150   :  { %1744 = vst [vmem:[#allocation2 + $0x25c] sm:$0xf] %v1595_v9  ;;  %2208 = vst [vmem:[#allocation2 + $0x20c] sm:$0xf] %v1595_v9  ;;  %v1193_v22 = vmax.f32 %v20990_v0, %v1047_v53  ;;  %v16971_v53 = vrot.slane %v1603_v15, 4  ;;  %v1052_v43 = vmax.f32 %v828_v31, 0.0  ;;  %v559_v39 = vadd.f32 %v16775_v49, %v16480_v32 }
 0x151   :  { %2369 = vst [vmem:[#allocation2 + $0x1bc] sm:$0xf] %v1595_v9  ;;  %2530 = vst [vmem:[#allocation2 + $0x16c] sm:$0xf] %v1595_v9  ;;  %v1241_v11 = vmax.f32 %v20991_v8, %v1049_v41  ;;  %v16981_v13 = vrot.slane %v1928_v7, 4  ;;  %v1051_v18 = vmax.f32 %v557_v54, 0.0  ;;  %v832_v52 = vadd.f32 %v16777_v38, %v16484_v33  ;;  %v16994_v0 = vpop.f32.mrf.mxu1 }
 0x152   :  { %2691 = vst [vmem:[#allocation2 + $0x11c] sm:$0xf] %v1595_v9  ;;  %v16977_v9 = vpop.f32.mrf.mxu0  ;;  %2038 = vst [vmem:[#allocation2 + $0x264] sm:$0xf] %v1925_v16  ;;  %v14838_v17 = vld [vmem:[%s20961_s3 + $0x130] sm:$0xff]   ;;  %v1053_v59 = vmax.f32 %v830_v44, 0.0  ;;  %v561_v25 = vadd.f32 %v16779_v5, %v16488_v34  ;;  %v834_v49 = vadd.f32 %v16781_v20, %v16492_v35  ;;  %v17000_v31 = vadd.f32 %v16789_v2, %v16480_v32 }
 0x153   :  { %2272 = vst [vmem:[#allocation2 + $0x214] sm:$0xf] %v1925_v16  ;;  %2433 = vst [vmem:[#allocation2 + $0x1c4] sm:$0xf] %v1925_v16  ;;  %v1289_v29 = vmax.f32 %v1193_v22, %v1241_v11  ;;  %v1194_v41 = vmax.f32 %v1050_v23, %v1051_v18  ;;  %v1054_v7 = vmax.f32 %v559_v39, 0.0  ;;  %13971 = vmatpush3.bf16.msra.mxu0 %v14838_v17  ;;  %v1056_v54 = vmax.f32 %v832_v52, 0.0  ;;  %v17006_v8 = vpop.f32.mrf.mxu1 }
 0x154   :  { %2594 = vst [vmem:[#allocation2 + $0x174] sm:$0xf] %v1925_v16  ;;  %2755 = vst [vmem:[#allocation2 + $0x124] sm:$0xf] %v1925_v16  ;;  %v16992_v15 = vpop.f32.mrf.mxu0  ;;  %v1242_v22 = vmax.f32 %v1052_v43, %v1053_v59  ;;  %v1055_v5 = vmax.f32 %v561_v25, 0.0  ;;  %v1057_v44 = vmax.f32 %v834_v49, 0.0  ;;  %v17014_v39 = vadd.f32 %v16791_v30, %v16484_v33 }
 0x155   :  { %v1342_v38 = vsel %vm1326_vm1, %v1289_v29, 0.0  ;;  %v1058_v20 = vmax.f32 %v17000_v31, 0.0  ;;  %v567_v43 = vadd.f32 %v16807_v45, %v16488_v34  ;;  %v17020_v29 = vpop.f32.mrf.mxu1  ;;  %v14842_v30 = vld [vmem:[%s20961_s3 + $0x168] sm:$0xff]  }
 0x156   :  { %v17004_v16 = vpop.f32.mrf.mxu0  ;;  %v1382_v23 = vpack.c.bf16 %v1342_v38, %v16908_v62  ;;  %v13807_v11 = vpack.c.bf16 %v1342_v38, %v1342_v38  ;;  %v17010_v18 = vmax.f32 %v1194_v41, %v1242_v22  ;;  %v1195_v2 = vmax.f32 %v1054_v7, %v1055_v5  ;;  %20992 = vst [vmem:[#allocation14_spill] sm:$0xff] %v17020_v29 }
 0x157   :  { %v1243_v41 = vmax.f32 %v1056_v54, %v1057_v44  ;;  %v1059_v49 = vmax.f32 %v567_v43, 0.0  ;;  %v17032_v38 = vpop.f32.mrf.mxu1  ;;  %13972 = vmatprep.subr.bf16.mxu0 %v14842_v30  ;;  %v20993_v29 = vrot.slane %v16921_v10, 10 }
 0x158   :  { %v17018_v17 = vpop.f32.mrf.mxu0  ;;  %1406 = vst [vmem:[#allocation2 + $0x2bc] sm:$0xf] %v1382_v23  ;;  %v1606_v62 = vshll.u32 %v13807_v11, 16  ;;  %v1787_v59 = vrot.slane %v13807_v11, 5  ;;  %v1930_v52 = vshrl.u32 %v13807_v11, 16  ;;  %v2081_v25 = vrot.slane %v13807_v11, 6 }
 0x159   :  { %2153 = vst [vmem:[#allocation2 + $0x26c] sm:$0xf] %v1382_v23  ;;  %2314 = vst [vmem:[#allocation2 + $0x21c] sm:$0xf] %v1382_v23  ;;  %v17027_v45 = vpack.c.bf16 %v17010_v18, %v17010_v18 }
 0x15a   :  { %2475 = vst [vmem:[#allocation2 + $0x1cc] sm:$0xf] %v1382_v23  ;;  %2636 = vst [vmem:[#allocation2 + $0x17c] sm:$0xf] %v1382_v23  ;;  %v17030_v31 = vpop.f32.mrf.mxu0  ;;  %v1608_v22 = vrot.slane %v1606_v62, 5  ;;  %v1788_v5 = vsel %vm16524_vm10, %v12773_v47, %v1787_v59  ;;  %v1932_v23 = vrot.slane %v1930_v52, 5  ;;  %v2082_v54 = vsel %vm16531_vm11, %v20993_v29, %v2081_v25  ;;  %v17051_v52 = vpop.f32.mrf.mxu1 }
 0x15b   :  { %v1933_v11 = vrot.slane %v1606_v62, 6  ;;  %1844 = vst [vmem:[#allocation2 + $0x2c4] sm:$0xf] %v1788_v5  ;;  %2235 = vst [vmem:[#allocation2 + $0x274] sm:$0xf] %v1788_v5  ;;  %v2174_v44 = vshrl.u32 %v17027_v45, 16  ;;  %v1291_v59 = vmax.f32 %v1195_v2, %v1243_v41  ;;  %v840_v41 = vadd.f32 %v16809_v55, %v16492_v35 }
 0x15c   :  { %2396 = vst [vmem:[#allocation2 + $0x224] sm:$0xf] %v1788_v5  ;;  %2557 = vst [vmem:[#allocation2 + $0x1d4] sm:$0xf] %v1788_v5  ;;  %v2177_v43 = vshll.u32 %v17027_v45, 16  ;;  %v12802_v7 = vrot.slane %v17027_v45, 9  ;;  %v17045_v47 = vpop.f32.mrf.mxu0  ;;  %v1609_v62 = vsel %vm16513_vm9, %v16971_v53, %v1608_v22  ;;  %v571_v55 = vadd.f32 %v16827_v60, %v16488_v34 }
 0x15d   :  { %2718 = vst [vmem:[#allocation2 + $0x184] sm:$0xf] %v1788_v5  ;;  %v1934_v10 = vor.u32 %v1933_v11, %v1932_v23  ;;  %2138 = vst [vmem:[#allocation2 + $0x2cc] sm:$0xf] %v2082_v54  ;;  %v12804_v29 = vrot.slane %v17027_v45, 10  ;;  %v2176_v25 = vrot.slane %v2174_v44, 4  ;;  %v1196_v45 = vmax.f32 %v1058_v20, %v1059_v49  ;;  %v17071_v49 = vpop.f32.mrf.mxu1 }
 0x15e   :  { %2299 = vst [vmem:[#allocation2 + $0x27c] sm:$0xf] %v2082_v54  ;;  %2460 = vst [vmem:[#allocation2 + $0x22c] sm:$0xf] %v2082_v54  ;;  %v2179_v30 = vrot.slane %v2177_v43, 5  ;;  %v2245_v5 = vrot.slane %v2174_v44, 5  ;;  %v17053_v22 = vpop.f32.mrf.mxu0  ;;  %v17067_v20 = vadd.f32 %v16823_v36, %v16484_v33 }
 0x15f   :  { %2621 = vst [vmem:[#allocation2 + $0x1dc] sm:$0xf] %v2082_v54  ;;  %2782 = vst [vmem:[#allocation2 + $0x18c] sm:$0xf] %v2082_v54  ;;  %v2246_v53 = vrot.slane %v2177_v43, 6  ;;  %v1935_v23 = vsel %vm16544_vm12, %v16981_v13, %v1934_v10  ;;  %v1344_v2 = vsel %vm1326_vm1, %v1291_v59, 0.0  ;;  %v569_v13 = vadd.f32 %v16821_v14, %v16480_v32 }
 0x160   :  { %1745 = vst [vmem:[#allocation2 + $0x2c0] sm:$0xf] %v1609_v62  ;;  %2209 = vst [vmem:[#allocation2 + $0x270] sm:$0xf] %v1609_v62  ;;  %v2180_v11 = vor.u32 %v2179_v30, %v2176_v25  ;;  %v1383_v44 = vpack.c.bf16 %v1344_v2, %v17010_v18  ;;  %v13825_v43 = vpack.c.bf16 %v1344_v2, %v1344_v2  ;;  %v14843_v10 = vld [vmem:[%s20961_s3 + $0x128] sm:$0xff]   ;;  %v17076_v14 = vpop.f32.mrf.mxu0  ;;  %v20995_v60 = vmax.f32 %v17014_v39, 0.0 }
 0x161   :  { %2370 = vst [vmem:[#allocation2 + $0x220] sm:$0xf] %v1609_v62  ;;  %2531 = vst [vmem:[#allocation2 + $0x1d0] sm:$0xf] %v1609_v62  ;;  %v2247_v54 = vor.u32 %v2246_v53, %v2245_v5  ;;  %13973 = vmatpush3.bf16.msra.mxu0 %v14843_v10  ;;  %v1063_v39 = vmax.f32 %v571_v55, 0.0 }
 0x162   :  { %2692 = vst [vmem:[#allocation2 + $0x180] sm:$0xf] %v1609_v62  ;;  %2039 = vst [vmem:[#allocation2 + $0x2c8] sm:$0xf] %v1935_v23  ;;  %v1061_v62 = vmax.f32 %v840_v41, 0.0  ;;  %v2181_v59 = vrot.slane %v2180_v11, 4  ;;  %v17097_v10 = vpop.f32.mrf.mxu0 }
 0x163   :  { %2273 = vst [vmem:[#allocation2 + $0x278] sm:$0xf] %v1935_v23  ;;  %2434 = vst [vmem:[#allocation2 + $0x228] sm:$0xf] %v1935_v23  ;;  %v2248_v18 = vrot.slane %v2247_v54, 4  ;;  %v2183_v25 = vshll.u32 %v13825_v43, 16 }
 0x164   :  { %2595 = vst [vmem:[#allocation2 + $0x1d8] sm:$0xf] %v1935_v23  ;;  %2756 = vst [vmem:[#allocation2 + $0x188] sm:$0xf] %v1935_v23  ;;  %v2221_v30 = vrot.slane %v13825_v43, 5  ;;  %v2249_v36 = vshrl.u32 %v13825_v43, 16  ;;  %v1244_v53 = vmax.f32 %v20995_v60, %v1061_v62 }
 0x165   :  { %20994 = vst [vmem:[#allocation15_spill] sm:$0xff] %v17071_v49  ;;  %2154 = vst [vmem:[#allocation2 + $0x2d0] sm:$0xf] %v1383_v44  ;;  %v2285_v5 = vrot.slane %v13825_v43, 6  ;;  %v1062_v23 = vmax.f32 %v569_v13, 0.0  ;;  %v2185_v2 = vrot.slane %v2183_v25, 5  ;;  %v17087_v13 = vpop.f32.mrf.mxu1 }
 0x166   :  { %2315 = vst [vmem:[#allocation2 + $0x280] sm:$0xf] %v1383_v44  ;;  %2476 = vst [vmem:[#allocation2 + $0x230] sm:$0xf] %v1383_v44  ;;  %v2222_v41 = vsel %vm16524_vm10, %v12802_v7, %v2221_v30  ;;  %v2252_v11 = vrot.slane %v2183_v25, 6  ;;  %v1064_v54 = vmax.f32 %v17067_v20, 0.0  ;;  %v17085_v43 = vmax.f32 %v1196_v45, %v1244_v53 }
 0x167   :  { %2637 = vst [vmem:[#allocation2 + $0x1e0] sm:$0xf] %v1383_v44  ;;  %2236 = vst [vmem:[#allocation2 + $0x2d8] sm:$0xf] %v2222_v41  ;;  %v2251_v49 = vrot.slane %v2249_v36, 5  ;;  %v2286_v44 = vsel %vm16531_vm11, %v12804_v29, %v2285_v5  ;;  %v2186_v7 = vsel %vm16513_vm9, %v2181_v59, %v2185_v2  ;;  %v844_v20 = vadd.f32 %v16829_v48, %v16492_v35  ;;  %v14854_v53 = vld [vmem:[%s20961_s3 + $0x1f8] sm:$0xff]  }
 0x168   :  { %2397 = vst [vmem:[#allocation2 + $0x288] sm:$0xf] %v2222_v41  ;;  %2558 = vst [vmem:[#allocation2 + $0x238] sm:$0xf] %v2222_v41  ;;  %v14826_v62 = vld [vmem:[#allocation2 + $0x25c] ss:$100 sps:$4 sm:$0xff]   ;;  %v575_v29 = vadd.f32 %v16839_v37, %v16480_v32  ;;  %v848_v45 = vadd.f32 %v16841_v19, %v16484_v33  ;;  %v17101_v59 = vpack.c.bf16 %v17085_v43, %v17085_v43  ;;  %14032 = vmatprep.subr.bf16.mxu1 %v14854_v53 }
 0x169   :  { %2719 = vst [vmem:[#allocation2 + $0x1e8] sm:$0xf] %v2222_v41  ;;  %2300 = vst [vmem:[#allocation2 + $0x2e0] sm:$0xf] %v2286_v44  ;;  %v14828_v55 = vld [vmem:[#allocation2 + $0x258] ss:$100 sps:$4 sm:$0xff]   ;;  %v2253_v25 = vor.u32 %v2252_v11, %v2251_v49  ;;  %v1197_v30 = vmax.f32 %v1062_v23, %v1063_v39  ;;  %v577_v48 = vadd.f32 %v16846_v26, %v16488_v34  ;;  %5674 = vmatprep.mubr.bf16.mxu0 %v14826_v62 }
 0x16a   :  { %2461 = vst [vmem:[#allocation2 + $0x290] sm:$0xf] %v2286_v44  ;;  %2622 = vst [vmem:[#allocation2 + $0x240] sm:$0xf] %v2286_v44  ;;  %v14829_v37 = vld [vmem:[#allocation2 + $0x264] ss:$100 sps:$4 sm:$0xff]   ;;  %v850_v49 = vadd.f32 %v16848_v63, %v16492_v35  ;;  %5675 = vmatmul.mubr.bf16.gmra.mxu0 %v14828_v55  ;;  %v17118_v63 = vpop.f32.mrf.mxu1 }
 0x16b   :  { %2783 = vst [vmem:[#allocation2 + $0x1f0] sm:$0xf] %v2286_v44  ;;  %20996 = vst [vmem:[#allocation16_spill] sm:$0xff] %v17097_v10  ;;  %v14831_v36 = vld [vmem:[#allocation2 + $0x260] ss:$100 sps:$4 sm:$0xff]   ;;  %v1065_v19 = vmax.f32 %v844_v20, 0.0  ;;  %v2254_v26 = vsel %vm16544_vm12, %v2248_v18, %v2253_v25  ;;  %5771 = vmatprep.mubr.bf16.mxu1 %v14829_v37 }
 0x16c   :  { %2210 = vst [vmem:[#allocation2 + $0x2d4] sm:$0xf] %v2186_v7  ;;  %2371 = vst [vmem:[#allocation2 + $0x284] sm:$0xf] %v2186_v7  ;;  %v1066_v5 = vmax.f32 %v575_v29, 0.0  ;;  %v1068_v60 = vmax.f32 %v848_v45, 0.0  ;;  %5772 = vmatmul.mubr.bf16.gmra.mxu1 %v14831_v36  ;;  %v17127_v29 = vpop.f32.mrf.mxu0 }
 0x16d   :  { %2532 = vst [vmem:[#allocation2 + $0x234] sm:$0xf] %v2186_v7  ;;  %2693 = vst [vmem:[#allocation2 + $0x1e4] sm:$0xf] %v2186_v7  ;;  %v14855_v23 = vld [vmem:[%s20961_s3 + $0x1b8] sm:$0xff]   ;;  %v2336_v2 = vshrl.u32 %v17101_v59, 16  ;;  %v1245_v62 = vmax.f32 %v1064_v54, %v1065_v19  ;;  %v17136_v19 = vadd.f32 %v16863_v28, %v16484_v33 }
 0x16e   :  { %v2339_v41 = vshll.u32 %v17101_v59, 16  ;;  %20997 = vst [vmem:[#allocation17_spill] sm:$0xff] %v17118_v63  ;;  %v14847_v44 = vld [vmem:[%s20961_s3 + $0x160] sm:$0xff]   ;;  %2274 = vst [vmem:[#allocation2 + $0x2dc] sm:$0xf] %v2254_v26  ;;  %v12812_v18 = vrot.slane %v17101_v59, 10  ;;  %14033 = vmatpush3.bf16.msra.mxu1 %v14855_v23  ;;  %v854_v23 = vadd.f32 %v16875_v56, %v16492_v35  ;;  %v17151_v28 = vpop.f32.mrf.mxu0 }
 0x16f   :  { %v14848_v39 = vld [vmem:[%s20961_s3 + $0x120] sm:$0xff]   ;;  %2435 = vst [vmem:[#allocation2 + $0x28c] sm:$0xf] %v2254_v26  ;;  %2596 = vst [vmem:[#allocation2 + $0x23c] sm:$0xf] %v2254_v26  ;;  %v1067_v7 = vmax.f32 %v577_v48, 0.0  ;;  %13974 = vmatprep.subr.bf16.mxu0 %v14847_v44  ;;  %v1293_v11 = vmax.f32 %v1197_v30, %v1245_v62  ;;  %v17140_v30 = vpop.f32.mrf.mxu1 }
 0x170   :  { %2757 = vst [vmem:[#allocation2 + $0x1ec] sm:$0xf] %v2254_v26  ;;  %v1069_v20 = vmax.f32 %v850_v49, 0.0  ;;  %v2338_v45 = vrot.slane %v2336_v2, 4  ;;  %v2341_v55 = vrot.slane %v2339_v41, 5  ;;  %v2407_v25 = vrot.slane %v2336_v2, 5  ;;  %13975 = vmatpush3.bf16.msra.mxu0 %v14848_v39 }
 0x171   :  { %v2408_v37 = vrot.slane %v2339_v41, 6  ;;  %v1198_v63 = vmax.f32 %v1066_v5, %v1067_v7  ;;  %v579_v26 = vadd.f32 %v16861_v51, %v16480_v32  ;;  %v14856_v54 = vld [vmem:[%s20961_s3 + $0x1f0] sm:$0xff]   ;;  %v581_v49 = vadd.f32 %v16873_v1, %v16488_v34  ;;  %v14866_v56 = vld [vmem:[%s20961_s3 + $0x1e8] sm:$0xff]  }
 0x172   :  { %v1246_v10 = vmax.f32 %v1068_v60, %v1069_v20  ;;  %v2342_v48 = vor.u32 %v2341_v55, %v2338_v45  ;;  %v14861_v51 = vld [vmem:[%s20961_s3 + $0x1b0] sm:$0xff]   ;;  %v1346_v5 = vsel %vm1326_vm1, %v1293_v11, 0.0  ;;  %14034 = vmatprep.subr.bf16.mxu1 %v14856_v54  ;;  %v14867_v55 = vld [vmem:[%s20961_s3 + $0x1a8] sm:$0xff]   ;;  %v14868_v54 = vld [vmem:[%s20961_s3 + $0x1e0] sm:$0xff]  }
 0x173   :  { %v2409_v36 = vor.u32 %v2408_v37, %v2407_v25  ;;  %v1070_v53 = vmax.f32 %v579_v26, 0.0  ;;  %v1384_v41 = vpack.c.bf16 %v1346_v5, %v17085_v43  ;;  %v13829_v44 = vpack.c.bf16 %v1346_v5, %v1346_v5  ;;  %14035 = vmatpush3.bf16.msra.mxu1 %v14861_v51  ;;  %v17162_v43 = vpop.f32.mrf.mxu1 }
 0x174   :  { %v17147_v60 = vmax.f32 %v1198_v63, %v1246_v10  ;;  %v2343_v2 = vrot.slane %v2342_v48, 4  ;;  %v1072_v10 = vmax.f32 %v17136_v19, 0.0  ;;  %v1071_v11 = vmax.f32 %v581_v49, 0.0  ;;  %v17171_v48 = vpop.f32.mrf.mxu0  ;;  %14036 = vmatprep.subr.bf16.mxu1 %v14866_v56 }
 0x175   :  { %v2410_v1 = vrot.slane %v2409_v36, 4  ;;  %v1073_v63 = vmax.f32 %v854_v23, 0.0  ;;  %2316 = vst [vmem:[#allocation2 + $0x2e4] sm:$0xf] %v1384_v41  ;;  %v2345_v62 = vshll.u32 %v13829_v44, 16  ;;  %v2383_v7 = vrot.slane %v13829_v44, 5 }
 0x176   :  { %v17156_v39 = vpack.c.bf16 %v17147_v60, %v17147_v60  ;;  %v2411_v20 = vshrl.u32 %v13829_v44, 16  ;;  %v2447_v45 = vrot.slane %v13829_v44, 6  ;;  %2477 = vst [vmem:[#allocation2 + $0x294] sm:$0xf] %v1384_v41  ;;  %2638 = vst [vmem:[#allocation2 + $0x244] sm:$0xf] %v1384_v41 }
 0x177   :  { %v2347_v36 = vrot.slane %v2345_v62, 5  ;;  %v20998_v19 = vrot.slane %v17101_v59, 9  ;;  %v2414_v5 = vrot.slane %v2345_v62, 6  ;;  %14037 = vmatpush3.bf16.msra.mxu1 %v14867_v55  ;;  %v17186_v55 = vpop.f32.mrf.mxu1 }
 0x178   :  { %v2498_v25 = vshrl.u32 %v17156_v39, 16  ;;  %v2501_v37 = vshll.u32 %v17156_v39, 16  ;;  %v12818_v26 = vrot.slane %v17156_v39, 9  ;;  %v2413_v51 = vrot.slane %v2411_v20, 5  ;;  %14038 = vmatprep.subr.bf16.mxu1 %v14868_v54 }
 0x179   :  { %v2384_v49 = vsel %vm16524_vm10, %v20998_v19, %v2383_v7  ;;  %v2448_v23 = vsel %vm16531_vm11, %v12812_v18, %v2447_v45  ;;  %v2348_v7 = vsel %vm16513_vm9, %v2343_v2, %v2347_v36  ;;  %v1199_v20 = vmax.f32 %v1070_v53, %v1071_v11  ;;  %v14852_v18 = vld [vmem:[%s20961_s3 + $0x158] sm:$0xff]   ;;  %v14870_v45 = vld [vmem:[%s20961_s3 + $0x1a0] sm:$0xff]  }
 0x17a   :  { %2398 = vst [vmem:[#allocation2 + $0x2ec] sm:$0xf] %v2384_v49  ;;  %2559 = vst [vmem:[#allocation2 + $0x29c] sm:$0xf] %v2384_v49  ;;  %v2500_v41 = vrot.slane %v2498_v25, 4  ;;  %v2503_v44 = vrot.slane %v2501_v37, 5  ;;  %v2415_v62 = vor.u32 %v2414_v5, %v2413_v51  ;;  %v585_v36 = vadd.f32 %v16890_v24, %v16480_v32  ;;  %13976 = vmatprep.subr.bf16.mxu0 %v14852_v18 }
 0x17b   :  { %2720 = vst [vmem:[#allocation2 + $0x24c] sm:$0xf] %v2384_v49  ;;  %v2569_v56 = vrot.slane %v2498_v25, 5  ;;  %2462 = vst [vmem:[#allocation2 + $0x2f4] sm:$0xf] %v2448_v23  ;;  %v2570_v59 = vrot.slane %v2501_v37, 6  ;;  %v1247_v25 = vmax.f32 %v1072_v10, %v1073_v63  ;;  %v17198_v37 = vpop.f32.mrf.mxu0  ;;  %v587_v10 = vadd.f32 %v16902_v6, %v16488_v34  ;;  %14039 = vmatpush3.bf16.msra.mxu1 %v14870_v45 }
 0x17c   :  { %2623 = vst [vmem:[#allocation2 + $0x2a4] sm:$0xf] %v2448_v23  ;;  %2784 = vst [vmem:[#allocation2 + $0x254] sm:$0xf] %v2448_v23  ;;  %v2504_v2 = vor.u32 %v2503_v44, %v2500_v41  ;;  %v20999_v53 = vld [vmem:[#allocation8_spill] sm:$0xff]  ;;  %v2416_v49 = vsel %vm16544_vm12, %v2410_v1, %v2415_v62  ;;  %v860_v24 = vadd.f32 %v16904_v57, %v16492_v35  ;;  %v1074_v23 = vmax.f32 %v585_v36, 0.0 }
 0x17d   :  { %2372 = vst [vmem:[#allocation2 + $0x2e8] sm:$0xf] %v2348_v7  ;;  %2533 = vst [vmem:[#allocation2 + $0x298] sm:$0xf] %v2348_v7  ;;  %v858_v11 = vadd.f32 %v20999_v53, %v16484_v33  ;;  %v14853_v19 = vld [vmem:[%s20961_s3 + $0x118] sm:$0xff]   ;;  %v2571_v51 = vor.u32 %v2570_v59, %v2569_v56  ;;  %v1295_v5 = vmax.f32 %v1199_v20, %v1247_v25  ;;  %v1075_v6 = vmax.f32 %v587_v10, 0.0  ;;  %v17218_v56 = vpop.f32.mrf.mxu1  ;;  %v17231_v36 = vpop.f32.mrf.mxu0 }
 0x17e   :  { %2694 = vst [vmem:[#allocation2 + $0x248] sm:$0xf] %v2348_v7  ;;  %2436 = vst [vmem:[#allocation2 + $0x2f0] sm:$0xf] %v2416_v49  ;;  %v17209_v63 = vrot.slane %v2504_v2, 4  ;;  %13977 = vmatpush3.bf16.msra.mxu0 %v14853_v19  ;;  %v14872_v1 = vld [vmem:[%s20961_s3 + $0x1d8] sm:$0xff]   ;;  %v589_v57 = vadd.f32 %v16915_v50, %v16480_v32 }
 0x17f   :  { %2597 = vst [vmem:[#allocation2 + $0x2a0] sm:$0xf] %v2416_v49  ;;  %2758 = vst [vmem:[#allocation2 + $0x250] sm:$0xf] %v2416_v49  ;;  %v1076_v41 = vmax.f32 %v858_v11, 0.0  ;;  %v17214_v54 = vrot.slane %v2571_v51, 4  ;;  %14040 = vmatprep.subr.bf16.mxu1 %v14872_v1  ;;  %v1200_v19 = vmax.f32 %v1074_v23, %v1075_v6 }
 0x180   :  { %v1077_v44 = vmax.f32 %v860_v24, 0.0  ;;  %v14873_v7 = vld [vmem:[%s20961_s3 + $0x198] sm:$0xff]   ;;  %v1348_v62 = vsel %vm1326_vm1, %v1295_v5, 0.0  ;;  %v21000_v59 = vld [vmem:[#allocation9_spill] sm:$0xff]  ;;  %v21001_v18 = vld [vmem:[#allocation10_spill] sm:$0xff]  ;;  %v1078_v10 = vmax.f32 %v589_v57, 0.0 }
 0x181   :  { %v862_v20 = vadd.f32 %v21000_v59, %v16484_v33  ;;  %v591_v45 = vadd.f32 %v21001_v18, %v16488_v34  ;;  %v21002_v2 = vld [vmem:[#allocation11_spill] sm:$0xff]  ;;  %v1385_v53 = vpack.c.bf16 %v1348_v62, %v17147_v60  ;;  %v13833_v11 = vpack.c.bf16 %v1348_v62, %v1348_v62  ;;  %14041 = vmatpush3.bf16.msra.mxu1 %v14873_v7 }
 0x182   :  { %v864_v25 = vadd.f32 %v21002_v2, %v16492_v35  ;;  %v14860_v50 = vld [vmem:[%s20961_s3 + $0x150] sm:$0xff]   ;;  %v1248_v49 = vmax.f32 %v1076_v41, %v1077_v44  ;;  %v17243_v41 = vpop.f32.mrf.mxu1  ;;  %v17252_v2 = vpop.f32.mrf.mxu0 }
 0x183   :  { %v14862_v51 = vld [vmem:[%s20961_s3 + $0x110] sm:$0xff]   ;;  %v1080_v24 = vmax.f32 %v862_v20, 0.0  ;;  %v1079_v5 = vmax.f32 %v591_v45, 0.0  ;;  %13978 = vmatprep.subr.bf16.mxu0 %v14860_v50  ;;  %2478 = vst [vmem:[#allocation2 + $0x2f8] sm:$0xf] %v1385_v53  ;;  %v2507_v1 = vshll.u32 %v13833_v11, 16 }
 0x184   :  { %v1081_v59 = vmax.f32 %v864_v25, 0.0  ;;  %v14874_v18 = vld [vmem:[%s20961_s3 + $0x1d0] sm:$0xff]   ;;  %v2545_v60 = vrot.slane %v13833_v11, 5  ;;  %v2573_v62 = vshrl.u32 %v13833_v11, 16  ;;  %v2609_v23 = vrot.slane %v13833_v11, 6  ;;  %13979 = vmatpush3.bf16.msra.mxu0 %v14862_v51  ;;  %v21003_v20 = vld [vmem:[#allocation12_spill] sm:$0xff] }
 0x185   :  { %2639 = vst [vmem:[#allocation2 + $0x2a8] sm:$0xf] %v1385_v53  ;;  %v14879_v6 = vld [vmem:[%s20961_s3 + $0x190] sm:$0xff]   ;;  %v17248_v44 = vmax.f32 %v1200_v19, %v1248_v49  ;;  %v1201_v57 = vmax.f32 %v1078_v10, %v1079_v5  ;;  %v595_v45 = vadd.f32 %v21003_v20, %v16480_v32  ;;  %v14869_v25 = vld [vmem:[%s20961_s3 + $0x148] sm:$0xff]   ;;  %14042 = vmatprep.subr.bf16.mxu1 %v14874_v18  ;;  %v2509_v50 = vrot.slane %v2507_v1, 5 }
 0x186   :  { %v1249_v7 = vmax.f32 %v1080_v24, %v1081_v59  ;;  %v2546_v53 = vsel %vm16524_vm10, %v12818_v26, %v2545_v60  ;;  %v2575_v11 = vrot.slane %v2573_v62, 5  ;;  %v2576_v19 = vrot.slane %v2507_v1, 6  ;;  %v14871_v49 = vld [vmem:[%s20961_s3 + $0x108] sm:$0xff]   ;;  %13980 = vmatprep.subr.bf16.mxu0 %v14869_v25  ;;  %v14878_v26 = vld [vmem:[%s20961_s3 + $0x140] sm:$0xff]   ;;  %14043 = vmatpush3.bf16.msra.mxu1 %v14879_v6  ;;  %v17297_v25 = vpop.f32.mrf.mxu0 }
 0x187   :  { %2560 = vst [vmem:[#allocation2 + $0x300] sm:$0xf] %v2546_v53  ;;  %v21004_v51 = vrot.slane %v17156_v39, 10  ;;  %2721 = vst [vmem:[#allocation2 + $0x2b0] sm:$0xf] %v2546_v53  ;;  %v17270_v24 = vpack.c.bf16 %v17248_v44, %v17248_v44  ;;  %v1082_v59 = vmax.f32 %v595_v45, 0.0  ;;  %v2510_v18 = vsel %vm16513_vm9, %v17209_v63, %v2509_v50 }
 0x188   :  { %v1297_v5 = vmax.f32 %v1201_v57, %v1249_v7  ;;  %v14887_v39 = vld [vmem:[%s20961_s3 + $0x1c8] sm:$0xff]   ;;  %v2577_v1 = vor.u32 %v2576_v19, %v2575_v11  ;;  %v17285_v57 = vpop.f32.mrf.mxu1  ;;  %13981 = vmatpush3.bf16.msra.mxu0 %v14871_v49  ;;  %v14880_v6 = vld [vmem:[%s20961_s3 + $0x100] sm:$0xff]   ;;  %2534 = vst [vmem:[#allocation2 + $0x2fc] sm:$0xf] %v2510_v18  ;;  %2695 = vst [vmem:[#allocation2 + $0x2ac] sm:$0xf] %v2510_v18 }
 0x189   :  { %v2610_v10 = vsel %vm16531_vm11, %v21004_v51, %v2609_v23  ;;  %v21005_v60 = vld [vmem:[#allocation13_spill] sm:$0xff]  ;;  %v597_v23 = vadd.f32 %v16947_v27, %v16488_v34  ;;  %v2660_v7 = vshrl.u32 %v17270_v24, 16  ;;  %v2663_v20 = vshll.u32 %v17270_v24, 16  ;;  %13982 = vmatprep.subr.bf16.mxu0 %v14878_v26  ;;  %14044 = vmatprep.subr.bf16.mxu1 %v14887_v39  ;;  %v14894_v51 = vld [vmem:[%s20961_s3 + $0x278] sm:$0xff]  }
 0x18a   :  { %2624 = vst [vmem:[#allocation2 + $0x308] sm:$0xf] %v2610_v10  ;;  %2785 = vst [vmem:[#allocation2 + $0x2b8] sm:$0xf] %v2610_v10  ;;  %v868_v62 = vadd.f32 %v21005_v60, %v16484_v33  ;;  %v14888_v63 = vld [vmem:[%s20961_s3 + $0x188] sm:$0xff]   ;;  %v12826_v45 = vrot.slane %v17270_v24, 9  ;;  %v2578_v53 = vsel %vm16544_vm12, %v17214_v54, %v2577_v1  ;;  %v870_v60 = vadd.f32 %v16949_v4, %v16492_v35 }
 0x18b   :  { %v12828_v27 = vrot.slane %v17270_v24, 10  ;;  %v14892_v50 = vld [vmem:[%s20961_s3 + $0x1c0] sm:$0xff]   ;;  %v1350_v11 = vsel %vm1326_vm1, %v1297_v5, 0.0  ;;  %v1083_v49 = vmax.f32 %v597_v23, 0.0  ;;  %2598 = vst [vmem:[#allocation2 + $0x304] sm:$0xf] %v2578_v53  ;;  %14045 = vmatpush3.bf16.msra.mxu1 %v14888_v63  ;;  %v872_v63 = vadd.f32 %v16962_v3, %v16484_v33 }
 0x18c   :  { %v1084_v19 = vmax.f32 %v868_v62, 0.0  ;;  %2759 = vst [vmem:[#allocation2 + $0x2b4] sm:$0xf] %v2578_v53  ;;  %v2662_v10 = vrot.slane %v2660_v7, 4  ;;  %v2665_v24 = vrot.slane %v2663_v20, 5  ;;  %v2731_v26 = vrot.slane %v2660_v7, 5  ;;  %v17316_v62 = vpop.f32.mrf.mxu1  ;;  %13983 = vmatpush3.bf16.msra.mxu0 %v14880_v6  ;;  %14046 = vmatprep.subr.bf16.mxu1 %v14892_v50 }
 0x18d   :  { %v2732_v39 = vrot.slane %v2663_v20, 6  ;;  %v14893_v54 = vld [vmem:[%s20961_s3 + $0x180] sm:$0xff]   ;;  %v1386_v18 = vpack.c.bf16 %v1350_v11, %v17248_v44  ;;  %v13837_v5 = vpack.c.bf16 %v1350_v11, %v1350_v11  ;;  %v1202_v1 = vmax.f32 %v1082_v59, %v1083_v49  ;;  %21006 = vst [vmem:[#allocation8_spill] sm:$0xff] %v17316_v62  ;;  %v17322_v20 = vpop.f32.mrf.mxu0  ;;  %14096 = vmatprep.subr.bf16.mxu0 %v14894_v51 }
 0x18e   :  { %v2666_v23 = vor.u32 %v2665_v24, %v2662_v10  ;;  %v599_v7 = vadd.f32 %v16960_v46, %v16480_v32  ;;  %v1085_v6 = vmax.f32 %v870_v60, 0.0  ;;  %v601_v51 = vadd.f32 %v16977_v9, %v16488_v34 }
 0x18f   :  { %v2733_v53 = vor.u32 %v2732_v39, %v2731_v26  ;;  %2640 = vst [vmem:[#allocation2 + $0x30c] sm:$0xf] %v1386_v18  ;;  %v2669_v44 = vshll.u32 %v13837_v5, 16  ;;  %v2707_v59 = vrot.slane %v13837_v5, 5  ;;  %v2735_v11 = vshrl.u32 %v13837_v5, 16  ;;  %14047 = vmatpush3.bf16.msra.mxu1 %v14893_v54  ;;  %v17326_v39 = vpop.f32.mrf.mxu1  ;;  %v17332_v60 = vpop.f32.mrf.mxu0 }
 0x190   :  { %v2771_v49 = vrot.slane %v13837_v5, 6  ;;  %v2667_v4 = vrot.slane %v2666_v23, 4  ;;  %v1086_v10 = vmax.f32 %v599_v7, 0.0  ;;  %v1250_v18 = vmax.f32 %v1084_v19, %v1085_v6 }
 0x191   :  { %v2734_v62 = vrot.slane %v2733_v53, 4  ;;  %v2671_v24 = vrot.slane %v2669_v44, 5  ;;  %v2708_v46 = vsel %vm16524_vm10, %v12826_v45, %v2707_v59  ;;  %v2737_v26 = vrot.slane %v2735_v11, 5  ;;  %v17348_v11 = vpop.f32.mrf.mxu1  ;;  %v17350_v6 = vpop.f32.mrf.mxu0 }
 0x192   :  { %v2738_v3 = vrot.slane %v2669_v44, 6  ;;  %2722 = vst [vmem:[#allocation2 + $0x314] sm:$0xf] %v2708_v46  ;;  %v2772_v50 = vsel %vm16531_vm11, %v12828_v27, %v2771_v49  ;;  %v1088_v5 = vmax.f32 %v872_v63, 0.0  ;;  %v874_v45 = vadd.f32 %v16979_v58, %v16492_v35 }
 0x193   :  { %v2672_v54 = vsel %vm16513_vm9, %v2667_v4, %v2671_v24  ;;  %2786 = vst [vmem:[#allocation2 + $0x31c] sm:$0xf] %v2772_v50  ;;  %v605_v53 = vadd.f32 %v16992_v15, %v16480_v32  ;;  %v1298_v27 = vmax.f32 %v1202_v1, %v1250_v18  ;;  %v1087_v19 = vmax.f32 %v601_v51, 0.0 }
 0x194   :  { %v2739_v23 = vor.u32 %v2738_v3, %v2737_v26  ;;  %2696 = vst [vmem:[#allocation2 + $0x310] sm:$0xf] %v2672_v54  ;;  %v878_v7 = vadd.f32 %v16994_v0, %v16484_v33  ;;  %v607_v9 = vadd.f32 %v17004_v16, %v16488_v34  ;;  %v1089_v44 = vmax.f32 %v874_v45, 0.0 }
 0x195   :  { %v1090_v59 = vmax.f32 %v605_v53, 0.0  ;;  %v880_v58 = vadd.f32 %v17006_v8, %v16492_v35  ;;  %v13808_v15 = vpack.c.bf16 %v1298_v27, %v1298_v27  ;;  %v1203_v1 = vmax.f32 %v1086_v10, %v1087_v19 }
 0x196   :  { %v2740_v63 = vsel %vm16544_vm12, %v2734_v62, %v2739_v23  ;;  %v1092_v49 = vmax.f32 %v878_v7, 0.0  ;;  %v1091_v4 = vmax.f32 %v607_v9, 0.0  ;;  %v1251_v0 = vmax.f32 %v1088_v5, %v1089_v44  ;;  %v21007_v62 = vld [vmem:[#allocation14_spill] sm:$0xff]  ;;  %v17358_v23 = vpop.f32.mrf.mxu1  ;;  %v17360_v7 = vpop.f32.mrf.mxu0 }
 0x197   :  { %2760 = vst [vmem:[#allocation2 + $0x318] sm:$0xf] %v2740_v63  ;;  %v1093_v24 = vmax.f32 %v880_v58, 0.0  ;;  %v609_v16 = vadd.f32 %v17018_v17, %v16480_v32  ;;  %v17356_v46 = vadd.f32 %v21007_v62, %v16484_v33  ;;  %v1611_v26 = vshrl.u32 %v13808_v15, 16 }
 0x198   :  { %v1614_v8 = vshll.u32 %v13808_v15, 16  ;;  %v12774_v3 = vrot.slane %v13808_v15, 9  ;;  %v12790_v50 = vrot.slane %v13808_v15, 10  ;;  %v1299_v18 = vmax.f32 %v1203_v1, %v1251_v0 }
 0x199   :  { %v1204_v51 = vmax.f32 %v1090_v59, %v1091_v4  ;;  %v1252_v10 = vmax.f32 %v1092_v49, %v1093_v24  ;;  %v1094_v54 = vmax.f32 %v609_v16, 0.0  ;;  %v1613_v45 = vrot.slane %v1611_v26, 4  ;;  %v17377_v16 = vpop.f32.mrf.mxu1 }
 0x19a   :  { %v1616_v5 = vrot.slane %v1614_v8, 5  ;;  %v1936_v53 = vrot.slane %v1611_v26, 5  ;;  %v1937_v19 = vrot.slane %v1614_v8, 6  ;;  %v1352_v17 = vsel %vm1326_vm1, %v1299_v18, 0.0 }
 0x19b   :  { %v17364_v9 = vmax.f32 %v1204_v51, %v1252_v10  ;;  %v1096_v63 = vmax.f32 %v17356_v46, 0.0  ;;  %v611_v44 = vadd.f32 %v17030_v31, %v16488_v34  ;;  %v1387_v15 = vpack.c.bf16 %v1352_v17, %v1298_v27  ;;  %v17379_v27 = vpop.f32.mrf.mxu0 }
 0x19c   :  { %v1617_v59 = vor.u32 %v1616_v5, %v1613_v45  ;;  %v1938_v58 = vor.u32 %v1937_v19, %v1936_v53  ;;  %v13809_v1 = vpack.c.bf16 %v1352_v17, %v1352_v17  ;;  %v884_v0 = vadd.f32 %v17032_v38, %v16492_v35 }
 0x19d   :  { %v17371_v49 = vpack.c.bf16 %v17364_v9, %v17364_v9  ;;  %v1095_v4 = vmax.f32 %v611_v44, 0.0  ;;  %v615_v24 = vadd.f32 %v17045_v47, %v16480_v32  ;;  %1407 = vst [vmem:[#allocation2 + $0x320] sm:$0xf] %v1387_v15 }
 0x19e   :  { %v1618_v62 = vrot.slane %v1617_v59, 4  ;;  %v1939_v46 = vrot.slane %v1938_v58, 4  ;;  %v1620_v31 = vshll.u32 %v13809_v1, 16  ;;  %v1791_v26 = vrot.slane %v13809_v1, 5  ;;  %v17388_v59 = vpop.f32.mrf.mxu1 }
 0x19f   :  { %v1940_v8 = vshrl.u32 %v13809_v1, 16  ;;  %v2085_v18 = vrot.slane %v13809_v1, 6  ;;  %v1625_v51 = vshrl.u32 %v17371_v49, 16  ;;  %v1628_v10 = vshll.u32 %v17371_v49, 16  ;;  %21008 = vst [vmem:[#allocation9_spill] sm:$0xff] %v17388_v59 }
 0x1a0   :  { %v1622_v45 = vrot.slane %v1620_v31, 5  ;;  %v1792_v38 = vsel %vm16524_vm10, %v12774_v3, %v1791_v26  ;;  %v1943_v47 = vrot.slane %v1620_v31, 6  ;;  %v12791_v3 = vrot.slane %v17371_v49, 10  ;;  %v17393_v31 = vpop.f32.mrf.mxu0 }
 0x1a1   :  { %1845 = vst [vmem:[#allocation2 + $0x328] sm:$0xf] %v1792_v38  ;;  %v1942_v53 = vrot.slane %v1940_v8, 5  ;;  %v2086_v19 = vsel %vm16531_vm11, %v12790_v50, %v2085_v18  ;;  %v1627_v17 = vrot.slane %v1625_v51, 4  ;;  %v1630_v44 = vrot.slane %v1628_v10, 5 }
 0x1a2   :  { %v1623_v58 = vsel %vm16513_vm9, %v1618_v62, %v1622_v45  ;;  %2139 = vst [vmem:[#allocation2 + $0x330] sm:$0xf] %v2086_v19  ;;  %v1946_v15 = vrot.slane %v1625_v51, 5  ;;  %v1947_v1 = vrot.slane %v1628_v10, 6  ;;  %v1205_v38 = vmax.f32 %v1094_v54, %v1095_v4  ;;  %v21009_v19 = vld [vmem:[#allocation15_spill] sm:$0xff] }
 0x1a3   :  { %1746 = vst [vmem:[#allocation2 + $0x324] sm:$0xf] %v1623_v58  ;;  %v1944_v26 = vor.u32 %v1943_v47, %v1942_v53  ;;  %v1631_v8 = vor.u32 %v1630_v44, %v1627_v17  ;;  %v1097_v5 = vmax.f32 %v884_v0, 0.0  ;;  %v1098_v18 = vmax.f32 %v615_v24, 0.0  ;;  %v17403_v47 = vpop.f32.mrf.mxu1  ;;  %v17409_v24 = vpop.f32.mrf.mxu0 }
 0x1a4   :  { %v1948_v50 = vor.u32 %v1947_v1, %v1946_v15  ;;  %v888_v59 = vadd.f32 %v17051_v52, %v16484_v33  ;;  %v617_v62 = vadd.f32 %v17053_v22, %v16488_v34  ;;  %v890_v58 = vadd.f32 %v21009_v19, %v16492_v35  ;;  %v21011_v15 = vld [vmem:[#allocation17_spill] sm:$0xff] }
 0x1a5   :  { %v1945_v51 = vsel %vm16544_vm12, %v1939_v46, %v1944_v26  ;;  %v1632_v10 = vrot.slane %v1631_v8, 4  ;;  %v1253_v45 = vmax.f32 %v1096_v63, %v1097_v5  ;;  %v619_v52 = vadd.f32 %v17076_v14, %v16480_v32  ;;  %v21010_v46 = vld [vmem:[#allocation16_spill] sm:$0xff] }
 0x1a6   :  { %2040 = vst [vmem:[#allocation2 + $0x32c] sm:$0xf] %v1945_v51  ;;  %v17405_v54 = vrot.slane %v1948_v50, 4  ;;  %v1100_v4 = vmax.f32 %v888_v59, 0.0  ;;  %v1099_v0 = vmax.f32 %v617_v62, 0.0  ;;  %v1101_v53 = vmax.f32 %v890_v58, 0.0  ;;  %v17421_v50 = vpop.f32.mrf.mxu1 }
 0x1a7   :  { %v1301_v22 = vmax.f32 %v1205_v38, %v1253_v45  ;;  %v892_v63 = vadd.f32 %v17087_v13, %v16484_v33  ;;  %v621_v5 = vadd.f32 %v21010_v46, %v16488_v34  ;;  %v1102_v44 = vmax.f32 %v619_v52, 0.0  ;;  %v17424_v45 = vpop.f32.mrf.mxu0 }
 0x1a8   :  { %v1206_v17 = vmax.f32 %v1098_v18, %v1099_v0  ;;  %v894_v1 = vadd.f32 %v21011_v15, %v16492_v35  ;;  %v625_v59 = vadd.f32 %v17127_v29, %v16480_v32  ;;  %v1254_v26 = vmax.f32 %v1100_v4, %v1101_v53 }
 0x1a9   :  { %v1354_v14 = vsel %vm1326_vm1, %v1301_v22, 0.0  ;;  %v1104_v8 = vmax.f32 %v892_v63, 0.0  ;;  %v1103_v38 = vmax.f32 %v621_v5, 0.0  ;;  %v17428_v29 = vadd.f32 %v17140_v30, %v16484_v33 }
 0x1aa   :  { %v1388_v13 = vpack.c.bf16 %v1354_v14, %v17364_v9  ;;  %v13811_v62 = vpack.c.bf16 %v1354_v14, %v1354_v14  ;;  %v1105_v51 = vmax.f32 %v894_v1, 0.0  ;;  %v1106_v18 = vmax.f32 %v625_v59, 0.0  ;;  %v17441_v59 = vpop.f32.mrf.mxu0 }
 0x1ab   :  { %v1302_v19 = vmax.f32 %v1206_v17, %v1254_v26  ;;  %v1207_v58 = vmax.f32 %v1102_v44, %v1103_v38  ;;  %v627_v4 = vadd.f32 %v17151_v28, %v16488_v34  ;;  %v1108_v46 = vmax.f32 %v17428_v29, 0.0  ;;  %v17435_v17 = vpop.f32.mrf.mxu1 }
 0x1ac   :  { %1408 = vst [vmem:[#allocation2 + $0x384] sm:$0xf] %v1388_v13  ;;  %v1634_v0 = vshll.u32 %v13811_v62, 16  ;;  %v1795_v52 = vrot.slane %v13811_v62, 5  ;;  %v1950_v22 = vshrl.u32 %v13811_v62, 16  ;;  %v2089_v53 = vrot.slane %v13811_v62, 6 }
 0x1ad   :  { %2155 = vst [vmem:[#allocation2 + $0x334] sm:$0xf] %v1388_v13  ;;  %v17432_v9 = vpack.c.bf16 %v1302_v19, %v1302_v19  ;;  %v1255_v63 = vmax.f32 %v1104_v8, %v1105_v51  ;;  %v1107_v5 = vmax.f32 %v627_v4, 0.0  ;;  %v21012_v30 = vrot.slane %v17371_v49, 9 }
 0x1ae   :  { %v1636_v44 = vrot.slane %v1634_v0, 5  ;;  %v1952_v15 = vrot.slane %v1950_v22, 5  ;;  %v1953_v1 = vrot.slane %v1634_v0, 6  ;;  %v2090_v14 = vsel %vm16531_vm11, %v12791_v3, %v2089_v53  ;;  %v14931_v3 = vld [vmem:[%s20961_s3 + $0x2f8] sm:$0xff]   ;;  %v17454_v22 = vpop.f32.mrf.mxu1 }
 0x1af   :  { %v1796_v28 = vsel %vm16524_vm10, %v21012_v30, %v1795_v52  ;;  %v1639_v26 = vshrl.u32 %v17432_v9, 16  ;;  %v1642_v8 = vshll.u32 %v17432_v9, 16  ;;  %v12776_v38 = vrot.slane %v17432_v9, 9  ;;  %2140 = vst [vmem:[#allocation2 + $0x394] sm:$0xf] %v2090_v14  ;;  %14160 = vmatprep.subr.bf16.mxu1 %v14931_v3 }
 0x1b0   :  { %1846 = vst [vmem:[#allocation2 + $0x38c] sm:$0xf] %v1796_v28  ;;  %2237 = vst [vmem:[#allocation2 + $0x33c] sm:$0xf] %v1796_v28  ;;  %v1637_v49 = vsel %vm16513_vm9, %v1632_v10, %v1636_v44  ;;  %v1954_v13 = vor.u32 %v1953_v1, %v1952_v15  ;;  %v12792_v62 = vrot.slane %v17432_v9, 10  ;;  %v1303_v51 = vmax.f32 %v1207_v58, %v1255_v63  ;;  %v17463_v63 = vpop.f32.mrf.mxu0 }
 0x1b1   :  { %2301 = vst [vmem:[#allocation2 + $0x344] sm:$0xf] %v2090_v14  ;;  %1747 = vst [vmem:[#allocation2 + $0x388] sm:$0xf] %v1637_v49  ;;  %v1641_v29 = vrot.slane %v1639_v26, 4  ;;  %v1644_v4 = vrot.slane %v1642_v8, 5  ;;  %v1208_v58 = vmax.f32 %v1106_v18, %v1107_v5  ;;  %v900_v9 = vadd.f32 %v17162_v43, %v16492_v35 }
 0x1b2   :  { %2211 = vst [vmem:[#allocation2 + $0x338] sm:$0xf] %v1637_v49  ;;  %v1956_v0 = vrot.slane %v1639_v26, 5  ;;  %v1957_v52 = vrot.slane %v1642_v8, 6  ;;  %v1955_v10 = vsel %vm16544_vm12, %v17405_v54, %v1954_v13  ;;  %v1356_v53 = vsel %vm1326_vm1, %v1303_v51, 0.0  ;;  %v17471_v49 = vpop.f32.mrf.mxu1 }
 0x1b3   :  { %2041 = vst [vmem:[#allocation2 + $0x390] sm:$0xf] %v1955_v10  ;;  %2275 = vst [vmem:[#allocation2 + $0x340] sm:$0xf] %v1955_v10  ;;  %v1645_v44 = vor.u32 %v1644_v4, %v1641_v29  ;;  %v1389_v28 = vpack.c.bf16 %v1356_v53, %v1302_v19  ;;  %v13813_v15 = vpack.c.bf16 %v1356_v53, %v1356_v53  ;;  %v1109_v1 = vmax.f32 %v900_v9, 0.0 }
 0x1b4   :  { %v1958_v30 = vor.u32 %v1957_v52, %v1956_v0  ;;  %v629_v54 = vadd.f32 %v17171_v48, %v16480_v32  ;;  %v902_v14 = vadd.f32 %v17186_v55, %v16484_v33  ;;  %v631_v18 = vadd.f32 %v17198_v37, %v16488_v34  ;;  %v17473_v48 = vpop.f32.mrf.mxu0  ;;  %v14834_v9 = vld [vmem:[#allocation2 + $0x320] ss:$100 sps:$4 sm:$0xff]  }
 0x1b5   :  { %v1646_v43 = vrot.slane %v1645_v44, 4  ;;  %1409 = vst [vmem:[#allocation2 + $0x3e8] sm:$0xf] %v1389_v28  ;;  %v1648_v26 = vshll.u32 %v13813_v15, 16  ;;  %v1799_v8 = vrot.slane %v13813_v15, 5  ;;  %v1960_v19 = vshrl.u32 %v13813_v15, 16 }
 0x1b6   :  { %v1959_v5 = vrot.slane %v1958_v30, 4  ;;  %2156 = vst [vmem:[#allocation2 + $0x398] sm:$0xf] %v1389_v28  ;;  %2317 = vst [vmem:[#allocation2 + $0x348] sm:$0xf] %v1389_v28  ;;  %v2093_v13 = vrot.slane %v13813_v15, 6  ;;  %v1256_v51 = vmax.f32 %v1108_v46, %v1109_v1  ;;  %v635_v44 = vadd.f32 %v17231_v36, %v16480_v32  ;;  %v17487_v28 = vpop.f32.mrf.mxu1 }
 0x1b7   :  { %v1110_v3 = vmax.f32 %v629_v54, 0.0  ;;  %v1650_v29 = vrot.slane %v1648_v26, 5  ;;  %v1800_v55 = vsel %vm16524_vm10, %v12776_v38, %v1799_v8  ;;  %v1963_v37 = vrot.slane %v1648_v26, 6 }
 0x1b8   :  { %v1112_v4 = vmax.f32 %v902_v14, 0.0  ;;  %1847 = vst [vmem:[#allocation2 + $0x3f0] sm:$0xf] %v1800_v55  ;;  %v1962_v0 = vrot.slane %v1960_v19, 5  ;;  %v2094_v52 = vsel %vm16531_vm11, %v12792_v62, %v2093_v13  ;;  %2238 = vst [vmem:[#allocation2 + $0x3a0] sm:$0xf] %v1800_v55  ;;  %v1304_v10 = vmax.f32 %v1208_v58, %v1256_v51 }
 0x1b9   :  { %2399 = vst [vmem:[#allocation2 + $0x350] sm:$0xf] %v1800_v55  ;;  %v1111_v53 = vmax.f32 %v631_v18, 0.0  ;;  %v1651_v46 = vsel %vm16513_vm9, %v1646_v43, %v1650_v29  ;;  %2141 = vst [vmem:[#allocation2 + $0x3f8] sm:$0xf] %v2094_v52  ;;  %v904_v38 = vadd.f32 %v17218_v56, %v16492_v35  ;;  %v908_v62 = vadd.f32 %v17243_v41, %v16484_v33  ;;  %v17493_v18 = vpop.f32.mrf.mxu0  ;;  %v17503_v55 = vpop.f32.mrf.mxu1 }
 0x1ba   :  { %2302 = vst [vmem:[#allocation2 + $0x3a8] sm:$0xf] %v2094_v52  ;;  %2463 = vst [vmem:[#allocation2 + $0x358] sm:$0xf] %v2094_v52  ;;  %v14836_v30 = vld [vmem:[#allocation2 + $0x324] ss:$100 sps:$4 sm:$0xff]   ;;  %v1964_v58 = vor.u32 %v1963_v37, %v1962_v0  ;;  %v17489_v15 = vpack.c.bf16 %v1304_v10, %v1304_v10  ;;  %v637_v54 = vadd.f32 %v17252_v2, %v16488_v34 }
 0x1bb   :  { %1748 = vst [vmem:[#allocation2 + $0x3ec] sm:$0xf] %v1651_v46  ;;  %2212 = vst [vmem:[#allocation2 + $0x39c] sm:$0xf] %v1651_v46  ;;  %v1209_v1 = vmax.f32 %v1110_v3, %v1111_v53  ;;  %v14839_v56 = vld [vmem:[#allocation2 + $0x328] ss:$100 sps:$4 sm:$0xff]   ;;  %v910_v26 = vadd.f32 %v17285_v57, %v16492_v35  ;;  %5682 = vmatprep.mubr.bf16.mxu0 %v14836_v30  ;;  %v17505_v53 = vpop.f32.mrf.mxu0 }
 0x1bc   :  { %2373 = vst [vmem:[#allocation2 + $0x34c] sm:$0xf] %v1651_v46  ;;  %v14841_v14 = vld [vmem:[#allocation2 + $0x32c] ss:$100 sps:$4 sm:$0xff]   ;;  %v1113_v36 = vmax.f32 %v904_v38, 0.0  ;;  %v1114_v43 = vmax.f32 %v635_v44, 0.0  ;;  %v1965_v8 = vsel %vm16544_vm12, %v1959_v5, %v1964_v58  ;;  %5683 = vmatmul.mubr.bf16.gmra.mxu0 %v14834_v9  ;;  %v639_v44 = vadd.f32 %v17297_v25, %v16480_v32 }
 0x1bd   :  { %v1116_v41 = vmax.f32 %v908_v62, 0.0  ;;  %v1653_v19 = vshrl.u32 %v17489_v15, 16  ;;  %v1656_v13 = vshll.u32 %v17489_v15, 16  ;;  %v12777_v2 = vrot.slane %v17489_v15, 9  ;;  %5779 = vmatprep.mubr.bf16.mxu1 %v14841_v14  ;;  %2042 = vst [vmem:[#allocation2 + $0x3f4] sm:$0xf] %v1965_v8 }
 0x1be   :  { %2276 = vst [vmem:[#allocation2 + $0x3a4] sm:$0xf] %v1965_v8  ;;  %2437 = vst [vmem:[#allocation2 + $0x354] sm:$0xf] %v1965_v8  ;;  %v12793_v51 = vrot.slane %v17489_v15, 10  ;;  %v1257_v3 = vmax.f32 %v1112_v4, %v1113_v36  ;;  %v1115_v29 = vmax.f32 %v637_v54, 0.0  ;;  %5780 = vmatmul.mubr.bf16.gmra.mxu1 %v14839_v56  ;;  %v641_v15 = vadd.f32 %v17322_v20, %v16488_v34  ;;  %v17519_v36 = vpop.f32.mrf.mxu1  ;;  %v17521_v8 = vpop.f32.mrf.mxu0 }
 0x1bf   :  { %v1117_v57 = vmax.f32 %v910_v26, 0.0  ;;  %v1655_v5 = vrot.slane %v1653_v19, 4  ;;  %v1658_v37 = vrot.slane %v1656_v13, 5  ;;  %v1966_v0 = vrot.slane %v1653_v19, 5  ;;  %v21013_v4 = vld [vmem:[#allocation8_spill] sm:$0xff] }
 0x1c0   :  { %v1967_v52 = vrot.slane %v1656_v13, 6  ;;  %v1305_v46 = vmax.f32 %v1209_v1, %v1257_v3  ;;  %v1210_v9 = vmax.f32 %v1114_v43, %v1115_v29  ;;  %v912_v58 = vadd.f32 %v21013_v4, %v16484_v33 }
 0x1c1   :  { %v1258_v38 = vmax.f32 %v1116_v41, %v1117_v57  ;;  %v1659_v62 = vor.u32 %v1658_v37, %v1655_v5  ;;  %v1118_v14 = vmax.f32 %v639_v44, 0.0  ;;  %v914_v1 = vadd.f32 %v17326_v39, %v16492_v35 }
 0x1c2   :  { %v1968_v30 = vor.u32 %v1967_v52, %v1966_v0  ;;  %v1358_v54 = vsel %vm1326_vm1, %v1305_v46, 0.0  ;;  %v1120_v19 = vmax.f32 %v912_v58, 0.0  ;;  %v1119_v13 = vmax.f32 %v641_v15, 0.0  ;;  %v17531_v46 = vpop.f32.mrf.mxu1 }
 0x1c3   :  { %v17515_v56 = vmax.f32 %v1210_v9, %v1258_v38  ;;  %v1660_v25 = vrot.slane %v1659_v62, 4  ;;  %v1390_v41 = vpack.c.bf16 %v1358_v54, %v1304_v10  ;;  %v13815_v26 = vpack.c.bf16 %v1358_v54, %v1358_v54 }
 0x1c4   :  { %v1969_v43 = vrot.slane %v1968_v30, 4  ;;  %v1121_v3 = vmax.f32 %v914_v1, 0.0  ;;  %v17535_v30 = vpop.f32.mrf.mxu0 }
 0x1c5   :  { %v17525_v20 = vpack.c.bf16 %v17515_v56, %v17515_v56  ;;  %1410 = vst [vmem:[#allocation2 + $0x44c] sm:$0xf] %v1390_v41  ;;  %v1662_v29 = vshll.u32 %v13815_v26, 16  ;;  %v1803_v57 = vrot.slane %v13815_v26, 5  ;;  %v1970_v5 = vshrl.u32 %v13815_v26, 16 }
 0x1c6   :  { %v2097_v39 = vrot.slane %v13815_v26, 6  ;;  %2157 = vst [vmem:[#allocation2 + $0x3fc] sm:$0xf] %v1390_v41  ;;  %2318 = vst [vmem:[#allocation2 + $0x3ac] sm:$0xf] %v1390_v41  ;;  %v1211_v26 = vmax.f32 %v1118_v14, %v1119_v13  ;;  %v647_v14 = vadd.f32 %v17350_v6, %v16488_v34  ;;  %v920_v13 = vadd.f32 %v17358_v23, %v16492_v35 }
 0x1c7   :  { %2479 = vst [vmem:[#allocation2 + $0x35c] sm:$0xf] %v1390_v41  ;;  %v1667_v10 = vshrl.u32 %v17525_v20, 16  ;;  %v1670_v37 = vshll.u32 %v17525_v20, 16  ;;  %v12778_v0 = vrot.slane %v17525_v20, 9  ;;  %v12794_v52 = vrot.slane %v17525_v20, 10 }
 0x1c8   :  { %v1664_v9 = vrot.slane %v1662_v29, 5  ;;  %v1804_v38 = vsel %vm16524_vm10, %v12777_v2, %v1803_v57  ;;  %v1972_v44 = vrot.slane %v1970_v5, 5  ;;  %v1973_v62 = vrot.slane %v1662_v29, 6 }
 0x1c9   :  { %1848 = vst [vmem:[#allocation2 + $0x454] sm:$0xf] %v1804_v38  ;;  %v2098_v4 = vsel %vm16531_vm11, %v12793_v51, %v2097_v39  ;;  %2239 = vst [vmem:[#allocation2 + $0x404] sm:$0xf] %v1804_v38  ;;  %v1669_v58 = vrot.slane %v1667_v10, 4  ;;  %v1672_v15 = vrot.slane %v1670_v37, 5  ;;  %v1259_v29 = vmax.f32 %v1120_v19, %v1121_v3 }
 0x1ca   :  { %2400 = vst [vmem:[#allocation2 + $0x3b4] sm:$0xf] %v1804_v38  ;;  %2561 = vst [vmem:[#allocation2 + $0x364] sm:$0xf] %v1804_v38  ;;  %v1976_v54 = vrot.slane %v1667_v10, 5  ;;  %v1665_v1 = vsel %vm16513_vm9, %v1660_v25, %v1664_v9  ;;  %v1974_v41 = vor.u32 %v1973_v62, %v1972_v44  ;;  %v1977_v2 = vrot.slane %v1670_v37, 6  ;;  %v17545_v25 = vpop.f32.mrf.mxu1  ;;  %v17553_v37 = vpop.f32.mrf.mxu0 }
 0x1cb   :  { %2142 = vst [vmem:[#allocation2 + $0x45c] sm:$0xf] %v2098_v4  ;;  %2303 = vst [vmem:[#allocation2 + $0x40c] sm:$0xf] %v2098_v4  ;;  %v1673_v51 = vor.u32 %v1672_v15, %v1669_v58  ;;  %v645_v57 = vadd.f32 %v17332_v60, %v16480_v32  ;;  %v918_v5 = vadd.f32 %v17348_v11, %v16484_v33  ;;  %v1125_v38 = vmax.f32 %v920_v13, 0.0 }
 0x1cc   :  { %2464 = vst [vmem:[#allocation2 + $0x3bc] sm:$0xf] %v2098_v4  ;;  %2625 = vst [vmem:[#allocation2 + $0x36c] sm:$0xf] %v2098_v4  ;;  %v1975_v39 = vsel %vm16544_vm12, %v1969_v43, %v1974_v41  ;;  %v1978_v10 = vor.u32 %v1977_v2, %v1976_v54  ;;  %v1307_v11 = vmax.f32 %v1211_v26, %v1259_v29  ;;  %v1123_v43 = vmax.f32 %v647_v14, 0.0  ;;  %v21014_v4 = vld [vmem:[#allocation9_spill] sm:$0xff]  ;;  %v17567_v15 = vpop.f32.mrf.mxu1 }
 0x1cd   :  { %1749 = vst [vmem:[#allocation2 + $0x450] sm:$0xf] %v1665_v1  ;;  %2213 = vst [vmem:[#allocation2 + $0x400] sm:$0xf] %v1665_v1  ;;  %v1674_v60 = vrot.slane %v1673_v51, 4  ;;  %v1122_v19 = vmax.f32 %v645_v57, 0.0  ;;  %v649_v6 = vadd.f32 %v17360_v7, %v16480_v32  ;;  %v922_v44 = vadd.f32 %v17377_v16, %v16484_v33  ;;  %v17570_v7 = vpop.f32.mrf.mxu0 }
 0x1ce   :  { %2374 = vst [vmem:[#allocation2 + $0x3b0] sm:$0xf] %v1665_v1  ;;  %2535 = vst [vmem:[#allocation2 + $0x360] sm:$0xf] %v1665_v1  ;;  %v1124_v3 = vmax.f32 %v918_v5, 0.0  ;;  %v17555_v9 = vrot.slane %v1978_v10, 4  ;;  %v651_v62 = vadd.f32 %v17379_v27, %v16488_v34  ;;  %v924_v58 = vadd.f32 %v21014_v4, %v16492_v35 }
 0x1cf   :  { %2043 = vst [vmem:[#allocation2 + $0x458] sm:$0xf] %v1975_v39  ;;  %2277 = vst [vmem:[#allocation2 + $0x408] sm:$0xf] %v1975_v39  ;;  %v1360_v23 = vsel %vm1326_vm1, %v1307_v11, 0.0  ;;  %v1212_v41 = vmax.f32 %v1122_v19, %v1123_v43  ;;  %v1126_v26 = vmax.f32 %v649_v6, 0.0  ;;  %v17572_v10 = vpop.f32.mrf.mxu0  ;;  %v655_v11 = vadd.f32 %v17393_v31, %v16480_v32  ;;  %v17576_v43 = vpop.f32.mrf.mxu1 }
 0x1d0   :  { %2438 = vst [vmem:[#allocation2 + $0x3b8] sm:$0xf] %v1975_v39  ;;  %2599 = vst [vmem:[#allocation2 + $0x368] sm:$0xf] %v1975_v39  ;;  %v1391_v54 = vpack.c.bf16 %v1360_v23, %v17515_v56  ;;  %v13817_v1 = vpack.c.bf16 %v1360_v23, %v1360_v23  ;;  %v1260_v2 = vmax.f32 %v1124_v3, %v1125_v38  ;;  %v1128_v51 = vmax.f32 %v922_v44, 0.0 }
 0x1d1   :  { %v1127_v29 = vmax.f32 %v651_v62, 0.0  ;;  %v1129_v57 = vmax.f32 %v924_v58, 0.0  ;;  %v14844_v19 = vld [vmem:[#allocation2 + $0x3e8] ss:$100 sps:$4 sm:$0xff]   ;;  %v14849_v62 = vld [vmem:[#allocation2 + $0x3f0] ss:$100 sps:$4 sm:$0xff]   ;;  %v17594_v20 = vadd.f32 %v17403_v47, %v16484_v33 }
 0x1d2   :  { %1411 = vst [vmem:[#allocation2 + $0x4b0] sm:$0xf] %v1391_v54  ;;  %v1676_v16 = vshll.u32 %v13817_v1, 16  ;;  %v1807_v5 = vrot.slane %v13817_v1, 5  ;;  %v1980_v27 = vshrl.u32 %v13817_v1, 16  ;;  %v2101_v39 = vrot.slane %v13817_v1, 6 }
 0x1d3   :  { %2158 = vst [vmem:[#allocation2 + $0x460] sm:$0xf] %v1391_v54  ;;  %2319 = vst [vmem:[#allocation2 + $0x410] sm:$0xf] %v1391_v54  ;;  %v1308_v56 = vmax.f32 %v1212_v41, %v1260_v2  ;;  %v1213_v14 = vmax.f32 %v1126_v26, %v1127_v29  ;;  %v1261_v13 = vmax.f32 %v1128_v51, %v1129_v57  ;;  %v17598_v26 = vpop.f32.mrf.mxu0 }
 0x1d4   :  { %2480 = vst [vmem:[#allocation2 + $0x3c0] sm:$0xf] %v1391_v54  ;;  %2641 = vst [vmem:[#allocation2 + $0x370] sm:$0xf] %v1391_v54  ;;  %v14846_v3 = vld [vmem:[#allocation2 + $0x3ec] ss:$100 sps:$4 sm:$0xff]   ;;  %v1808_v6 = vsel %vm16524_vm10, %v12778_v0, %v1807_v5  ;;  %v2102_v4 = vsel %vm16531_vm11, %v12794_v52, %v2101_v39  ;;  %v17588_v0 = vpop.f32.mrf.mxu1  ;;  %v657_v52 = vadd.f32 %v17409_v24, %v16488_v34 }
 0x1d5   :  { %v1678_v38 = vrot.slane %v1676_v16, 5  ;;  %v1982_v23 = vrot.slane %v1980_v27, 5  ;;  %v1983_v44 = vrot.slane %v1676_v16, 6  ;;  %1849 = vst [vmem:[#allocation2 + $0x4b8] sm:$0xf] %v1808_v6  ;;  %v17586_v31 = vpack.c.bf16 %v1308_v56, %v1308_v56  ;;  %5690 = vmatprep.mubr.bf16.mxu0 %v14846_v3 }
 0x1d6   :  { %2240 = vst [vmem:[#allocation2 + $0x468] sm:$0xf] %v1808_v6  ;;  %2401 = vst [vmem:[#allocation2 + $0x418] sm:$0xf] %v1808_v6  ;;  %v1309_v58 = vmax.f32 %v1213_v14, %v1261_v13  ;;  %v1130_v54 = vmax.f32 %v655_v11, 0.0  ;;  %5691 = vmatmul.mubr.bf16.gmra.mxu0 %v14844_v19  ;;  %v1132_v16 = vmax.f32 %v17594_v20, 0.0  ;;  %v17610_v11 = vpop.f32.mrf.mxu1 }
 0x1d7   :  { %2562 = vst [vmem:[#allocation2 + $0x3c8] sm:$0xf] %v1808_v6  ;;  %2723 = vst [vmem:[#allocation2 + $0x378] sm:$0xf] %v1808_v6  ;;  %v14851_v1 = vld [vmem:[#allocation2 + $0x3f4] ss:$100 sps:$4 sm:$0xff]   ;;  %v1679_v41 = vsel %vm16513_vm9, %v1674_v60, %v1678_v38  ;;  %v1984_v2 = vor.u32 %v1983_v44, %v1982_v23  ;;  %v930_v38 = vadd.f32 %v17421_v50, %v16492_v35  ;;  %v17614_v6 = vpop.f32.mrf.mxu0 }
 0x1d8   :  { %2143 = vst [vmem:[#allocation2 + $0x4c0] sm:$0xf] %v2102_v4  ;;  %2304 = vst [vmem:[#allocation2 + $0x470] sm:$0xf] %v2102_v4  ;;  %v1681_v60 = vshrl.u32 %v17586_v31, 16  ;;  %v1684_v51 = vshll.u32 %v17586_v31, 16  ;;  %5787 = vmatprep.mubr.bf16.mxu1 %v14851_v1  ;;  %v17622_v20 = vpop.f32.mrf.mxu1 }
 0x1d9   :  { %2465 = vst [vmem:[#allocation2 + $0x420] sm:$0xf] %v2102_v4  ;;  %2626 = vst [vmem:[#allocation2 + $0x3d0] sm:$0xf] %v2102_v4  ;;  %v12779_v29 = vrot.slane %v17586_v31, 9  ;;  %v12795_v47 = vrot.slane %v17586_v31, 10  ;;  %v1985_v24 = vsel %vm16544_vm12, %v17555_v9, %v1984_v2  ;;  %5788 = vmatmul.mubr.bf16.gmra.mxu1 %v14849_v62  ;;  %v659_v62 = vadd.f32 %v17424_v45, %v16480_v32 }
 0x1da   :  { %2787 = vst [vmem:[#allocation2 + $0x380] sm:$0xf] %v2102_v4  ;;  %1750 = vst [vmem:[#allocation2 + $0x4b4] sm:$0xf] %v1679_v41  ;;  %v1362_v57 = vsel %vm1326_vm1, %v1309_v58, 0.0  ;;  %v1131_v5 = vmax.f32 %v657_v52, 0.0  ;;  %v17620_v4 = vadd.f32 %v17435_v17, %v16484_v33 }
 0x1db   :  { %2214 = vst [vmem:[#allocation2 + $0x464] sm:$0xf] %v1679_v41  ;;  %2375 = vst [vmem:[#allocation2 + $0x414] sm:$0xf] %v1679_v41  ;;  %v1683_v27 = vrot.slane %v1681_v60, 4  ;;  %v1686_v39 = vrot.slane %v1684_v51, 5  ;;  %v1392_v19 = vpack.c.bf16 %v1362_v57, %v1308_v56  ;;  %v13819_v9 = vpack.c.bf16 %v1362_v57, %v1362_v57 }
 0x1dc   :  { %2536 = vst [vmem:[#allocation2 + $0x3c4] sm:$0xf] %v1679_v41  ;;  %2697 = vst [vmem:[#allocation2 + $0x374] sm:$0xf] %v1679_v41  ;;  %v1986_v14 = vrot.slane %v1681_v60, 5  ;;  %v1987_v13 = vrot.slane %v1684_v51, 6  ;;  %v1214_v3 = vmax.f32 %v1130_v54, %v1131_v5  ;;  %v17626_v51 = vpop.f32.mrf.mxu0 }
 0x1dd   :  { %2044 = vst [vmem:[#allocation2 + $0x4bc] sm:$0xf] %v1985_v24  ;;  %2278 = vst [vmem:[#allocation2 + $0x46c] sm:$0xf] %v1985_v24  ;;  %v1687_v23 = vor.u32 %v1686_v39, %v1683_v27  ;;  %v1690_v31 = vshll.u32 %v13819_v9, 16  ;;  %v1811_v58 = vrot.slane %v13819_v9, 5  ;;  %v661_v27 = vadd.f32 %v17441_v59, %v16488_v34 }
 0x1de   :  { %2439 = vst [vmem:[#allocation2 + $0x41c] sm:$0xf] %v1985_v24  ;;  %2600 = vst [vmem:[#allocation2 + $0x3cc] sm:$0xf] %v1985_v24  ;;  %v1988_v44 = vor.u32 %v1987_v13, %v1986_v14  ;;  %v1990_v56 = vshrl.u32 %v13819_v9, 16  ;;  %v2105_v1 = vrot.slane %v13819_v9, 6  ;;  %v938_v13 = vadd.f32 %v17471_v49, %v16484_v33  ;;  %v17643_v9 = vpop.f32.mrf.mxu1 }
 0x1df   :  { %2761 = vst [vmem:[#allocation2 + $0x37c] sm:$0xf] %v1985_v24  ;;  %1412 = vst [vmem:[#allocation2 + $0x514] sm:$0xf] %v1392_v19  ;;  %v1688_v50 = vrot.slane %v1687_v23, 4  ;;  %v1133_v41 = vmax.f32 %v930_v38, 0.0  ;;  %v1812_v17 = vsel %vm16524_vm10, %v12779_v29, %v1811_v58  ;;  %v940_v23 = vadd.f32 %v17487_v28, %v16492_v35 }
 0x1e0   :  { %2159 = vst [vmem:[#allocation2 + $0x4c4] sm:$0xf] %v1392_v19  ;;  %2320 = vst [vmem:[#allocation2 + $0x474] sm:$0xf] %v1392_v19  ;;  %v1989_v54 = vrot.slane %v1988_v44, 4  ;;  %v1134_v2 = vmax.f32 %v659_v62, 0.0  ;;  %v2106_v24 = vsel %vm16531_vm11, %v12795_v47, %v2105_v1  ;;  %v934_v47 = vadd.f32 %v17454_v22, %v16492_v35  ;;  %v17649_v44 = vpop.f32.mrf.mxu0 }
 0x1e1   :  { %2481 = vst [vmem:[#allocation2 + $0x424] sm:$0xf] %v1392_v19  ;;  %2642 = vst [vmem:[#allocation2 + $0x3d4] sm:$0xf] %v1392_v19  ;;  %v1692_v45 = vrot.slane %v1690_v31, 5  ;;  %v1992_v52 = vrot.slane %v1990_v56, 5  ;;  %v1262_v57 = vmax.f32 %v1132_v16, %v1133_v41  ;;  %v665_v16 = vadd.f32 %v17463_v63, %v16480_v32  ;;  %v17665_v41 = vpop.f32.mrf.mxu1 }
 0x1e2   :  { %v1993_v60 = vrot.slane %v1690_v31, 6  ;;  %1850 = vst [vmem:[#allocation2 + $0x51c] sm:$0xf] %v1812_v17  ;;  %2241 = vst [vmem:[#allocation2 + $0x4cc] sm:$0xf] %v1812_v17  ;;  %v1136_v5 = vmax.f32 %v17620_v4, 0.0  ;;  %v667_v19 = vadd.f32 %v17473_v48, %v16488_v34  ;;  %v17655_v58 = vadd.f32 %v17493_v18, %v16480_v32 }
 0x1e3   :  { %2402 = vst [vmem:[#allocation2 + $0x47c] sm:$0xf] %v1812_v17  ;;  %2563 = vst [vmem:[#allocation2 + $0x42c] sm:$0xf] %v1812_v17  ;;  %v1693_v29 = vsel %vm16513_vm9, %v1688_v50, %v1692_v45  ;;  %v1310_v59 = vmax.f32 %v1214_v3, %v1262_v57  ;;  %v1135_v14 = vmax.f32 %v661_v27, 0.0  ;;  %v1137_v38 = vmax.f32 %v934_v47, 0.0 }
 0x1e4   :  { %2724 = vst [vmem:[#allocation2 + $0x3dc] sm:$0xf] %v1812_v17  ;;  %v1994_v39 = vor.u32 %v1993_v60, %v1992_v52  ;;  %2144 = vst [vmem:[#allocation2 + $0x524] sm:$0xf] %v2106_v24  ;;  %v1138_v63 = vmax.f32 %v665_v16, 0.0  ;;  %v1140_v3 = vmax.f32 %v938_v13, 0.0  ;;  %v17659_v28 = vadd.f32 %v17503_v55, %v16484_v33  ;;  %v17668_v52 = vpop.f32.mrf.mxu0 }
 0x1e5   :  { %2305 = vst [vmem:[#allocation2 + $0x4d4] sm:$0xf] %v2106_v24  ;;  %2466 = vst [vmem:[#allocation2 + $0x484] sm:$0xf] %v2106_v24  ;;  %v17651_v49 = vpack.c.bf16 %v1310_v59, %v1310_v59  ;;  %v1215_v48 = vmax.f32 %v1134_v2, %v1135_v14  ;;  %v1139_v62 = vmax.f32 %v667_v19, 0.0  ;;  %v1263_v4 = vmax.f32 %v1136_v5, %v1137_v38  ;;  %v17679_v38 = vpop.f32.mrf.mxu1 }
 0x1e6   :  { %2627 = vst [vmem:[#allocation2 + $0x434] sm:$0xf] %v2106_v24  ;;  %2788 = vst [vmem:[#allocation2 + $0x3e4] sm:$0xf] %v2106_v24  ;;  %v1995_v22 = vsel %vm16544_vm12, %v1989_v54, %v1994_v39  ;;  %v1141_v31 = vmax.f32 %v940_v23, 0.0  ;;  %v1142_v18 = vmax.f32 %v17655_v58, 0.0  ;;  %v17677_v39 = vadd.f32 %v17505_v53, %v16488_v34 }
 0x1e7   :  { %1751 = vst [vmem:[#allocation2 + $0x518] sm:$0xf] %v1693_v29  ;;  %2215 = vst [vmem:[#allocation2 + $0x4c8] sm:$0xf] %v1693_v29  ;;  %v1695_v56 = vshrl.u32 %v17651_v49, 16  ;;  %v1698_v1 = vshll.u32 %v17651_v49, 16  ;;  %v1311_v2 = vmax.f32 %v1215_v48, %v1263_v4  ;;  %v1216_v45 = vmax.f32 %v1138_v63, %v1139_v62 }
 0x1e8   :  { %2376 = vst [vmem:[#allocation2 + $0x478] sm:$0xf] %v1693_v29  ;;  %2537 = vst [vmem:[#allocation2 + $0x428] sm:$0xf] %v1693_v29  ;;  %v12780_v50 = vrot.slane %v17651_v49, 9  ;;  %v12796_v54 = vrot.slane %v17651_v49, 10  ;;  %v1264_v17 = vmax.f32 %v1140_v3, %v1141_v31  ;;  %v17688_v49 = vadd.f32 %v17519_v36, %v16492_v35  ;;  %v17694_v3 = vpop.f32.mrf.mxu0 }
 0x1e9   :  { %2698 = vst [vmem:[#allocation2 + $0x3d8] sm:$0xf] %v1693_v29  ;;  %2045 = vst [vmem:[#allocation2 + $0x520] sm:$0xf] %v1995_v22  ;;  %v1697_v60 = vrot.slane %v1695_v56, 4  ;;  %v1700_v55 = vrot.slane %v1698_v1, 5  ;;  %v17692_v53 = vadd.f32 %v17521_v8, %v16480_v32 }
 0x1ea   :  { %2279 = vst [vmem:[#allocation2 + $0x4d0] sm:$0xf] %v1995_v22  ;;  %2440 = vst [vmem:[#allocation2 + $0x480] sm:$0xf] %v1995_v22  ;;  %v1996_v24 = vrot.slane %v1695_v56, 5  ;;  %v1997_v57 = vrot.slane %v1698_v1, 6  ;;  %v17672_v27 = vmax.f32 %v1216_v45, %v1264_v17 }
 0x1eb   :  { %2601 = vst [vmem:[#allocation2 + $0x430] sm:$0xf] %v1995_v22  ;;  %2762 = vst [vmem:[#allocation2 + $0x3e0] sm:$0xf] %v1995_v22  ;;  %v1364_v5 = vsel %vm1326_vm1, %v1311_v2, 0.0  ;;  %v1144_v29 = vmax.f32 %v17659_v28, 0.0  ;;  %v1701_v16 = vor.u32 %v1700_v55, %v1697_v60 }
 0x1ec   :  { %v14857_v47 = vld [vmem:[#allocation2 + $0x4b0] ss:$100 sps:$4 sm:$0xff]   ;;  %v1998_v14 = vor.u32 %v1997_v57, %v1996_v24  ;;  %v1393_v13 = vpack.c.bf16 %v1364_v5, %v1310_v59  ;;  %v13821_v19 = vpack.c.bf16 %v1364_v5, %v1364_v5  ;;  %v17683_v63 = vpack.c.bf16 %v17672_v27, %v17672_v27  ;;  %v14863_v48 = vld [vmem:[#allocation2 + $0x4b8] ss:$100 sps:$4 sm:$0xff]   ;;  %v17701_v24 = vpop.f32.mrf.mxu1 }
 0x1ed   :  { %v1143_v23 = vmax.f32 %v17677_v39, 0.0  ;;  %v1702_v62 = vrot.slane %v1701_v16, 4  ;;  %v17705_v16 = vpop.f32.mrf.mxu0 }
 0x1ee   :  { %v14859_v22 = vld [vmem:[#allocation2 + $0x4b4] ss:$100 sps:$4 sm:$0xff]   ;;  %v1999_v4 = vrot.slane %v1998_v14, 4  ;;  %1413 = vst [vmem:[#allocation2 + $0x578] sm:$0xf] %v1393_v13  ;;  %v1704_v31 = vshll.u32 %v13821_v19, 16 }
 0x1ef   :  { %v1815_v56 = vrot.slane %v13821_v19, 5  ;;  %2160 = vst [vmem:[#allocation2 + $0x528] sm:$0xf] %v1393_v13  ;;  %2321 = vst [vmem:[#allocation2 + $0x4d8] sm:$0xf] %v1393_v13  ;;  %5698 = vmatprep.mubr.bf16.mxu0 %v14859_v22  ;;  %v2000_v36 = vshrl.u32 %v13821_v19, 16 }
 0x1f0   :  { %v14865_v59 = vld [vmem:[#allocation2 + $0x4bc] ss:$100 sps:$4 sm:$0xff]   ;;  %2482 = vst [vmem:[#allocation2 + $0x488] sm:$0xf] %v1393_v13  ;;  %2643 = vst [vmem:[#allocation2 + $0x438] sm:$0xf] %v1393_v13  ;;  %5699 = vmatmul.mubr.bf16.gmra.mxu0 %v14857_v47 }
 0x1f1   :  { %v2109_v1 = vrot.slane %v13821_v19, 6  ;;  %v1709_v2 = vshrl.u32 %v17683_v63, 16  ;;  %v1712_v8 = vshll.u32 %v17683_v63, 16  ;;  %5795 = vmatprep.mubr.bf16.mxu1 %v14865_v59  ;;  %v1706_v45 = vrot.slane %v1704_v31, 5 }
 0x1f2   :  { %v1816_v17 = vsel %vm16524_vm10, %v12780_v50, %v1815_v56  ;;  %v2003_v60 = vrot.slane %v1704_v31, 6  ;;  %v12781_v55 = vrot.slane %v17683_v63, 9  ;;  %5796 = vmatmul.mubr.bf16.gmra.mxu1 %v14863_v48  ;;  %v2002_v57 = vrot.slane %v2000_v36, 5 }
 0x1f3   :  { %1851 = vst [vmem:[#allocation2 + $0x580] sm:$0xf] %v1816_v17  ;;  %v2110_v5 = vsel %vm16531_vm11, %v12796_v54, %v2109_v1  ;;  %2242 = vst [vmem:[#allocation2 + $0x530] sm:$0xf] %v1816_v17  ;;  %v1711_v39 = vrot.slane %v1709_v2, 4  ;;  %v1714_v47 = vrot.slane %v1712_v8, 5  ;;  %v1707_v50 = vsel %vm16513_vm9, %v1702_v62, %v1706_v45  ;;  %v17718_v1 = vpop.f32.mrf.mxu1 }
 0x1f4   :  { %2403 = vst [vmem:[#allocation2 + $0x4e0] sm:$0xf] %v1816_v17  ;;  %2564 = vst [vmem:[#allocation2 + $0x490] sm:$0xf] %v1816_v17  ;;  %v2006_v14 = vrot.slane %v1709_v2, 5  ;;  %v2007_v13 = vrot.slane %v1712_v8, 6  ;;  %v2004_v19 = vor.u32 %v2003_v60, %v2002_v57  ;;  %v1217_v48 = vmax.f32 %v1142_v18, %v1143_v23  ;;  %v17728_v23 = vpop.f32.mrf.mxu0 }
 0x1f5   :  { %2725 = vst [vmem:[#allocation2 + $0x440] sm:$0xf] %v1816_v17  ;;  %2145 = vst [vmem:[#allocation2 + $0x588] sm:$0xf] %v2110_v5  ;;  %v12797_v54 = vrot.slane %v17683_v63, 10  ;;  %v1715_v22 = vor.u32 %v1714_v47, %v1711_v39  ;;  %v1145_v59 = vmax.f32 %v17688_v49, 0.0  ;;  %v948_v56 = vadd.f32 %v17531_v46, %v16484_v33 }
 0x1f6   :  { %2306 = vst [vmem:[#allocation2 + $0x538] sm:$0xf] %v2110_v5  ;;  %2467 = vst [vmem:[#allocation2 + $0x4e8] sm:$0xf] %v2110_v5  ;;  %v2008_v62 = vor.u32 %v2007_v13, %v2006_v14  ;;  %v1146_v31 = vmax.f32 %v17692_v53, 0.0  ;;  %v677_v36 = vadd.f32 %v17535_v30, %v16488_v34  ;;  %v2005_v2 = vsel %vm16544_vm12, %v1999_v4, %v2004_v19  ;;  %v17734_v4 = vpop.f32.mrf.mxu1  ;;  %v17748_v14 = vpop.f32.mrf.mxu0 }
 0x1f7   :  { %2628 = vst [vmem:[#allocation2 + $0x498] sm:$0xf] %v2110_v5  ;;  %2789 = vst [vmem:[#allocation2 + $0x448] sm:$0xf] %v2110_v5  ;;  %v17722_v8 = vrot.slane %v1715_v22, 4  ;;  %v1265_v58 = vmax.f32 %v1144_v29, %v1145_v59  ;;  %v950_v18 = vadd.f32 %v17545_v25, %v16492_v35  ;;  %v1148_v30 = vmax.f32 %v948_v56, 0.0 }
 0x1f8   :  { %1752 = vst [vmem:[#allocation2 + $0x57c] sm:$0xf] %v1707_v50  ;;  %2216 = vst [vmem:[#allocation2 + $0x52c] sm:$0xf] %v1707_v50  ;;  %v17730_v46 = vrot.slane %v2008_v62, 4  ;;  %v1147_v49 = vmax.f32 %v677_v36, 0.0  ;;  %v679_v53 = vadd.f32 %v17553_v37, %v16480_v32  ;;  %v952_v25 = vadd.f32 %v17567_v15, %v16484_v33  ;;  %v17752_v22 = vpop.f32.mrf.mxu1 }
 0x1f9   :  { %2377 = vst [vmem:[#allocation2 + $0x4dc] sm:$0xf] %v1707_v50  ;;  %2538 = vst [vmem:[#allocation2 + $0x48c] sm:$0xf] %v1707_v50  ;;  %v1313_v28 = vmax.f32 %v1217_v48, %v1265_v58  ;;  %v1149_v29 = vmax.f32 %v950_v18, 0.0  ;;  %v681_v45 = vadd.f32 %v17570_v7, %v16488_v34  ;;  %v954_v57 = vadd.f32 %v17576_v43, %v16492_v35  ;;  %v17767_v18 = vpop.f32.mrf.mxu0 }
 0x1fa   :  { %2699 = vst [vmem:[#allocation2 + $0x43c] sm:$0xf] %v1707_v50  ;;  %2046 = vst [vmem:[#allocation2 + $0x584] sm:$0xf] %v2005_v2  ;;  %v1218_v17 = vmax.f32 %v1146_v31, %v1147_v49  ;;  %v1150_v60 = vmax.f32 %v679_v53, 0.0  ;;  %v17744_v5 = vadd.f32 %v17572_v10, %v16480_v32  ;;  %v1152_v47 = vmax.f32 %v952_v25, 0.0 }
 0x1fb   :  { %2280 = vst [vmem:[#allocation2 + $0x534] sm:$0xf] %v2005_v2  ;;  %2441 = vst [vmem:[#allocation2 + $0x4e4] sm:$0xf] %v2005_v2  ;;  %v1366_v37 = vsel %vm1326_vm1, %v1313_v28, 0.0  ;;  %v1266_v39 = vmax.f32 %v1148_v30, %v1149_v29  ;;  %v1151_v50 = vmax.f32 %v681_v45, 0.0  ;;  %v17758_v48 = vadd.f32 %v17588_v0, %v16484_v33  ;;  %v17773_v28 = vpop.f32.mrf.mxu1 }
 0x1fc   :  { %2602 = vst [vmem:[#allocation2 + $0x494] sm:$0xf] %v2005_v2  ;;  %2763 = vst [vmem:[#allocation2 + $0x444] sm:$0xf] %v2005_v2  ;;  %v1394_v15 = vpack.c.bf16 %v1366_v37, %v17672_v27  ;;  %v13823_v7 = vpack.c.bf16 %v1366_v37, %v1366_v37  ;;  %v1153_v13 = vmax.f32 %v954_v57, 0.0  ;;  %v1154_v19 = vmax.f32 %v17744_v5, 0.0 }
 0x1fd   :  { %v17754_v43 = vmax.f32 %v1218_v17, %v1266_v39  ;;  %v1219_v10 = vmax.f32 %v1150_v60, %v1151_v50  ;;  %v687_v59 = vadd.f32 %v17598_v26, %v16488_v34  ;;  %v1156_v0 = vmax.f32 %v17758_v48, 0.0 }
 0x1fe   :  { %1414 = vst [vmem:[#allocation2 + $0x5dc] sm:$0xf] %v1394_v15  ;;  %v1718_v62 = vshll.u32 %v13823_v7, 16  ;;  %v1819_v31 = vrot.slane %v13823_v7, 5  ;;  %v2010_v27 = vshrl.u32 %v13823_v7, 16  ;;  %v2113_v56 = vrot.slane %v13823_v7, 6 }
 0x1ff   :  { %2161 = vst [vmem:[#allocation2 + $0x58c] sm:$0xf] %v1394_v15  ;;  %2322 = vst [vmem:[#allocation2 + $0x53c] sm:$0xf] %v1394_v15  ;;  %v17764_v36 = vpack.c.bf16 %v17754_v43, %v17754_v43  ;;  %v1267_v2 = vmax.f32 %v1152_v47, %v1153_v13  ;;  %v1155_v58 = vmax.f32 %v687_v59, 0.0  ;;  %v17786_v47 = vpop.f32.mrf.mxu0  ;;  %v960_v7 = vadd.f32 %v17610_v11, %v16492_v35  ;;  %v17795_v13 = vpop.f32.mrf.mxu1 }
 0x200   :  { %2483 = vst [vmem:[#allocation2 + $0x4ec] sm:$0xf] %v1394_v15  ;;  %2644 = vst [vmem:[#allocation2 + $0x49c] sm:$0xf] %v1394_v15  ;;  %v1720_v26 = vrot.slane %v1718_v62, 5  ;;  %v1820_v30 = vsel %vm16524_vm10, %v12781_v55, %v1819_v31  ;;  %v2012_v49 = vrot.slane %v2010_v27, 5  ;;  %v2114_v29 = vsel %vm16531_vm11, %v12797_v54, %v2113_v56 }
 0x201   :  { %v2013_v53 = vrot.slane %v1718_v62, 6  ;;  %1852 = vst [vmem:[#allocation2 + $0x5e4] sm:$0xf] %v1820_v30  ;;  %2243 = vst [vmem:[#allocation2 + $0x594] sm:$0xf] %v1820_v30  ;;  %v2188_v25 = vshrl.u32 %v17764_v36, 16  ;;  %v1315_v54 = vmax.f32 %v1219_v10, %v1267_v2  ;;  %v1220_v15 = vmax.f32 %v1154_v19, %v1155_v58 }
 0x202   :  { %2404 = vst [vmem:[#allocation2 + $0x544] sm:$0xf] %v1820_v30  ;;  %2565 = vst [vmem:[#allocation2 + $0x4f4] sm:$0xf] %v1820_v30  ;;  %v2191_v45 = vshll.u32 %v17764_v36, 16  ;;  %v12803_v55 = vrot.slane %v17764_v36, 9  ;;  %v1721_v17 = vsel %vm16513_vm9, %v17722_v8, %v1720_v26  ;;  %v689_v27 = vadd.f32 %v17614_v6, %v16480_v32 }
 0x203   :  { %2726 = vst [vmem:[#allocation2 + $0x4a4] sm:$0xf] %v1820_v30  ;;  %v2014_v60 = vor.u32 %v2013_v53, %v2012_v49  ;;  %2146 = vst [vmem:[#allocation2 + $0x5ec] sm:$0xf] %v2114_v29  ;;  %v12805_v63 = vrot.slane %v17764_v36, 10  ;;  %v2190_v57 = vrot.slane %v2188_v25, 4  ;;  %v17802_v19 = vadd.f32 %v17622_v20, %v16484_v33  ;;  %v17810_v49 = vpop.f32.mrf.mxu1 }
 0x204   :  { %2307 = vst [vmem:[#allocation2 + $0x59c] sm:$0xf] %v2114_v29  ;;  %2468 = vst [vmem:[#allocation2 + $0x54c] sm:$0xf] %v2114_v29  ;;  %v2193_v5 = vrot.slane %v2191_v45, 5  ;;  %v2255_v37 = vrot.slane %v2188_v25, 5  ;;  %v691_v11 = vadd.f32 %v17626_v51, %v16488_v34 }
 0x205   :  { %2629 = vst [vmem:[#allocation2 + $0x4fc] sm:$0xf] %v2114_v29  ;;  %2790 = vst [vmem:[#allocation2 + $0x4ac] sm:$0xf] %v2114_v29  ;;  %v2256_v39 = vrot.slane %v2191_v45, 6  ;;  %v2015_v8 = vsel %vm16544_vm12, %v17730_v46, %v2014_v60  ;;  %v1368_v50 = vsel %vm1326_vm1, %v1315_v54, 0.0  ;;  %v964_v54 = vadd.f32 %v17643_v9, %v16492_v35 }
 0x206   :  { %1753 = vst [vmem:[#allocation2 + $0x5e0] sm:$0xf] %v1721_v17  ;;  %2217 = vst [vmem:[#allocation2 + $0x590] sm:$0xf] %v1721_v17  ;;  %v2194_v10 = vor.u32 %v2193_v5, %v2190_v57  ;;  %v1395_v62 = vpack.c.bf16 %v1368_v50, %v17754_v43  ;;  %v13827_v31 = vpack.c.bf16 %v1368_v50, %v1368_v50  ;;  %v1157_v46 = vmax.f32 %v960_v7, 0.0  ;;  %v17806_v43 = vpop.f32.mrf.mxu0 }
 0x207   :  { %2378 = vst [vmem:[#allocation2 + $0x540] sm:$0xf] %v1721_v17  ;;  %2539 = vst [vmem:[#allocation2 + $0x4f0] sm:$0xf] %v1721_v17  ;;  %v2257_v59 = vor.u32 %v2256_v39, %v2255_v37  ;;  %v1158_v20 = vmax.f32 %v689_v27, 0.0  ;;  %v1160_v25 = vmax.f32 %v17802_v19, 0.0  ;;  %v968_v37 = vadd.f32 %v17665_v41, %v16484_v33 }
 0x208   :  { %2700 = vst [vmem:[#allocation2 + $0x4a0] sm:$0xf] %v1721_v17  ;;  %2047 = vst [vmem:[#allocation2 + $0x5e8] sm:$0xf] %v2015_v8  ;;  %v2195_v56 = vrot.slane %v2194_v10, 4  ;;  %v2197_v2 = vshll.u32 %v13827_v31, 16  ;;  %v1268_v6 = vmax.f32 %v1156_v0, %v1157_v46  ;;  %v17827_v39 = vpop.f32.mrf.mxu0  ;;  %v17835_v10 = vpop.f32.mrf.mxu1 }
 0x209   :  { %2281 = vst [vmem:[#allocation2 + $0x598] sm:$0xf] %v2015_v8  ;;  %2442 = vst [vmem:[#allocation2 + $0x548] sm:$0xf] %v2015_v8  ;;  %v2258_v36 = vrot.slane %v2257_v59, 4  ;;  %v2225_v58 = vrot.slane %v13827_v31, 5 }
 0x20a   :  { %2603 = vst [vmem:[#allocation2 + $0x4f8] sm:$0xf] %v2015_v8  ;;  %2764 = vst [vmem:[#allocation2 + $0x4a8] sm:$0xf] %v2015_v8  ;;  %v2259_v26 = vshrl.u32 %v13827_v31, 16  ;;  %v2289_v30 = vrot.slane %v13827_v31, 6  ;;  %v17817_v60 = vmax.f32 %v1220_v15, %v1268_v6  ;;  %v970_v31 = vadd.f32 %v17679_v38, %v16492_v35 }
 0x20b   :  { %2162 = vst [vmem:[#allocation2 + $0x5f0] sm:$0xf] %v1395_v62  ;;  %2323 = vst [vmem:[#allocation2 + $0x5a0] sm:$0xf] %v1395_v62  ;;  %v2199_v53 = vrot.slane %v2197_v2, 5  ;;  %v2226_v51 = vsel %vm16524_vm10, %v12803_v55, %v2225_v58  ;;  %v2262_v29 = vrot.slane %v2197_v2, 6 }
 0x20c   :  { %2484 = vst [vmem:[#allocation2 + $0x550] sm:$0xf] %v1395_v62  ;;  %2645 = vst [vmem:[#allocation2 + $0x500] sm:$0xf] %v1395_v62  ;;  %v2261_v45 = vrot.slane %v2259_v26, 5  ;;  %v2290_v17 = vsel %vm16531_vm11, %v12805_v63, %v2289_v30  ;;  %v1159_v5 = vmax.f32 %v691_v11, 0.0  ;;  %v695_v63 = vadd.f32 %v17649_v44, %v16480_v32 }
 0x20d   :  { %2244 = vst [vmem:[#allocation2 + $0x5f8] sm:$0xf] %v2226_v51  ;;  %2405 = vst [vmem:[#allocation2 + $0x5a8] sm:$0xf] %v2226_v51  ;;  %v14875_v48 = vld [vmem:[#allocation2 + $0x578] ss:$100 sps:$4 sm:$0xff]   ;;  %v2200_v55 = vsel %vm16513_vm9, %v2195_v56, %v2199_v53  ;;  %v17831_v15 = vpack.c.bf16 %v17817_v60, %v17817_v60  ;;  %v697_v44 = vadd.f32 %v17668_v52, %v16488_v34  ;;  %v17847_v53 = vpop.f32.mrf.mxu1 }
 0x20e   :  { %2566 = vst [vmem:[#allocation2 + $0x558] sm:$0xf] %v2226_v51  ;;  %2727 = vst [vmem:[#allocation2 + $0x508] sm:$0xf] %v2226_v51  ;;  %v14877_v0 = vld [vmem:[#allocation2 + $0x57c] ss:$100 sps:$4 sm:$0xff]   ;;  %v2263_v8 = vor.u32 %v2262_v29, %v2261_v45  ;;  %v1221_v41 = vmax.f32 %v1158_v20, %v1159_v5  ;;  %v17862_v5 = vadd.f32 %v17705_v16, %v16488_v34 }
 0x20f   :  { %2308 = vst [vmem:[#allocation2 + $0x600] sm:$0xf] %v2290_v17  ;;  %2469 = vst [vmem:[#allocation2 + $0x5b0] sm:$0xf] %v2290_v17  ;;  %v14886_v57 = vld [vmem:[#allocation2 + $0x14] ss:$100 sps:$4 sm:$0xff]   ;;  %5706 = vmatprep.mubr.bf16.mxu0 %v14877_v0 }
 0x210   :  { %2630 = vst [vmem:[#allocation2 + $0x560] sm:$0xf] %v2290_v17  ;;  %2791 = vst [vmem:[#allocation2 + $0x510] sm:$0xf] %v2290_v17  ;;  %v14881_v9 = vld [vmem:[#allocation2 + $0x580] ss:$100 sps:$4 sm:$0xff]   ;;  %5707 = vmatmul.mubr.bf16.gmra.mxu0 %v14875_v48  ;;  %v2264_v46 = vsel %vm16544_vm12, %v2258_v36, %v2263_v8  ;;  %v17845_v36 = vpop.f32.mrf.mxu0  ;;  %v17851_v48 = vadd.f32 %v17694_v3, %v16480_v32 }
 0x211   :  { %2218 = vst [vmem:[#allocation2 + $0x5f4] sm:$0xf] %v2200_v55  ;;  %2379 = vst [vmem:[#allocation2 + $0x5a4] sm:$0xf] %v2200_v55  ;;  %v14883_v50 = vld [vmem:[#allocation2 + $0x584] ss:$100 sps:$4 sm:$0xff]   ;;  %5844 = vmatprep.mubr.bf16.mxu0 %v14886_v57  ;;  %v17858_v57 = vadd.f32 %v17701_v24, %v16484_v33  ;;  %v17874_v24 = vadd.f32 %v17718_v1, %v16492_v35 }
 0x212   :  { %2540 = vst [vmem:[#allocation2 + $0x554] sm:$0xf] %v2200_v55  ;;  %2701 = vst [vmem:[#allocation2 + $0x504] sm:$0xf] %v2200_v55  ;;  %v1161_v7 = vmax.f32 %v964_v54, 0.0  ;;  %v1162_v59 = vmax.f32 %v695_v63, 0.0  ;;  %5803 = vmatprep.mubr.bf16.mxu1 %v14883_v50  ;;  %v17876_v50 = vpop.f32.mrf.mxu0 }
 0x213   :  { %v1164_v62 = vmax.f32 %v968_v37, 0.0  ;;  %v14891_v27 = vld [vmem:[#allocation2 + $0x1c] ss:$100 sps:$4 sm:$0xff]   ;;  %v2350_v19 = vshrl.u32 %v17831_v15, 16  ;;  %v2353_v11 = vshll.u32 %v17831_v15, 16  ;;  %v12811_v52 = vrot.slane %v17831_v15, 9  ;;  %5804 = vmatmul.mubr.bf16.gmra.mxu1 %v14881_v9 }
 0x214   :  { %2282 = vst [vmem:[#allocation2 + $0x5fc] sm:$0xf] %v2264_v46  ;;  %2443 = vst [vmem:[#allocation2 + $0x5ac] sm:$0xf] %v2264_v46  ;;  %v12813_v56 = vrot.slane %v17831_v15, 10  ;;  %v1269_v38 = vmax.f32 %v1160_v25, %v1161_v7  ;;  %v1163_v2 = vmax.f32 %v697_v44, 0.0  ;;  %5941 = vmatprep.mubr.bf16.mxu1 %v14891_v27 }
 0x215   :  { %2604 = vst [vmem:[#allocation2 + $0x55c] sm:$0xf] %v2264_v46  ;;  %2765 = vst [vmem:[#allocation2 + $0x50c] sm:$0xf] %v2264_v46  ;;  %v1165_v58 = vmax.f32 %v970_v31, 0.0  ;;  %v2352_v26 = vrot.slane %v2350_v19, 4  ;;  %v17884_v31 = vpop.f32.mrf.mxu1 }
 0x216   :  { %v2355_v30 = vrot.slane %v2353_v11, 5  ;;  %v2417_v6 = vrot.slane %v2350_v19, 5  ;;  %v2418_v20 = vrot.slane %v2353_v11, 6  ;;  %v14884_v51 = vld [vmem:[#allocation2 + $0x10] ss:$100 sps:$4 sm:$0xff]   ;;  %v1317_v29 = vmax.f32 %v1221_v41, %v1269_v38  ;;  %v14895_v25 = vld [vmem:[%s20961_s3 + $0x238] sm:$0xff]   ;;  %v17899_v38 = vpop.f32.mrf.mxu0 }
 0x217   :  { %v1222_v45 = vmax.f32 %v1162_v59, %v1163_v2  ;;  %v1270_v17 = vmax.f32 %v1164_v62, %v1165_v58  ;;  %v14898_v0 = vld [vmem:[#allocation2 + $0xdc] ss:$100 sps:$4 sm:$0xff]   ;;  %v14902_v3 = vld [vmem:[%s20961_s3 + $0x270] sm:$0xff]   ;;  %v1166_v9 = vmax.f32 %v17851_v48, 0.0  ;;  %v14901_v16 = vld [vmem:[#allocation2 + $0xe4] ss:$100 sps:$4 sm:$0xff]  }
 0x218   :  { %v2356_v54 = vor.u32 %v2355_v30, %v2352_v26  ;;  %v2419_v55 = vor.u32 %v2418_v20, %v2417_v6  ;;  %v14889_v63 = vld [vmem:[#allocation2 + $0x18] ss:$100 sps:$4 sm:$0xff]   ;;  %v1370_v37 = vsel %vm1326_vm1, %v1317_v29, 0.0  ;;  %5845 = vmatmul.mubr.bf16.vlgmr.msra.gmra.mxu0 %v14884_v51  ;;  %v14903_v1 = vld [vmem:[%s20961_s3 + $0x230] sm:$0xff]   ;;  %v1168_v27 = vmax.f32 %v17858_v57, 0.0  ;;  %v17901_v6 = vpop.f32.mrf.mxu1  ;;  %v14910_v20 = vld [vmem:[%s20961_s3 + $0x268] sm:$0xff]  }
 0x219   :  { %v17869_v8 = vmax.f32 %v1222_v45, %v1270_v17  ;;  %v1396_v41 = vpack.c.bf16 %v1370_v37, %v17817_v60  ;;  %v13831_v59 = vpack.c.bf16 %v1370_v37, %v1370_v37  ;;  %v14935_v62 = vld [vmem:[%s20961_s3 + $0x2b8] sm:$0xff]   ;;  %v1167_v60 = vmax.f32 %v17862_v5, 0.0  ;;  %v14936_v11 = vld [vmem:[%s20961_s3 + $0x2f0] sm:$0xff]   ;;  %14097 = vmatpush3.bf16.msra.mxu0 %v14895_v25  ;;  %5852 = vmatprep.mubr.bf16.mxu0 %v14898_v0  ;;  %v14943_v57 = vld [vmem:[%s20961_s3 + $0x2e8] sm:$0xff]   ;;  %v17924_v37 = vpop.f32.mrf.mxu0 }
 0x21a   :  { %v2357_v7 = vrot.slane %v2356_v54, 4  ;;  %v17878_v44 = vrot.slane %v2419_v55, 4  ;;  %v1169_v19 = vmax.f32 %v17874_v24, 0.0  ;;  %14098 = vmatprep.subr.bf16.mxu0 %v14902_v3  ;;  %v14938_v55 = vld [vmem:[%s20961_s3 + $0x2b0] sm:$0xff]   ;;  %v14896_v24 = vld [vmem:[#allocation2 + $0xd8] ss:$100 sps:$4 sm:$0xff]  }
 0x21b   :  { %v17891_v46 = vpack.c.bf16 %v17869_v8, %v17869_v8  ;;  %2324 = vst [vmem:[#allocation2 + $0x604] sm:$0xf] %v1396_v41  ;;  %v2359_v2 = vshll.u32 %v13831_v59, 16  ;;  %v2387_v58 = vrot.slane %v13831_v59, 5  ;;  %v2421_v26 = vshrl.u32 %v13831_v59, 16  ;;  %5942 = vmatmul.mubr.bf16.vlgmr.msra.gmra.mxu1 %v14889_v63 }
 0x21c   :  { %v2451_v30 = vrot.slane %v13831_v59, 6  ;;  %2485 = vst [vmem:[#allocation2 + $0x5b4] sm:$0xf] %v1396_v41  ;;  %2646 = vst [vmem:[#allocation2 + $0x564] sm:$0xf] %v1396_v41  ;;  %5949 = vmatprep.mubr.bf16.mxu1 %v14901_v16  ;;  %14161 = vmatpush3.bf16.msra.mxu1 %v14935_v62  ;;  %v14911_v16 = vld [vmem:[%s20961_s3 + $0x228] sm:$0xff]   ;;  %v1223_v59 = vmax.f32 %v1166_v9, %v1167_v60  ;;  %v17931_v62 = vpop.f32.mrf.mxu1  ;;  %v707_v9 = vadd.f32 %v17748_v14, %v16488_v34 }
 0x21d   :  { %v2512_v51 = vshrl.u32 %v17891_v46, 16  ;;  %v2515_v29 = vshll.u32 %v17891_v46, 16  ;;  %v12819_v45 = vrot.slane %v17891_v46, 9  ;;  %v12821_v17 = vrot.slane %v17891_v46, 10  ;;  %14162 = vmatprep.subr.bf16.mxu1 %v14936_v11  ;;  %14099 = vmatpush3.bf16.msra.mxu0 %v14903_v1  ;;  %v14899_v11 = vld [vmem:[#allocation2 + $0xe0] ss:$100 sps:$4 sm:$0xff]  }
 0x21e   :  { %v2361_v48 = vrot.slane %v2359_v2, 5  ;;  %v2388_v25 = vsel %vm16524_vm10, %v12811_v52, %v2387_v58  ;;  %v2423_v0 = vrot.slane %v2421_v26, 5  ;;  %v2424_v54 = vrot.slane %v2359_v2, 6  ;;  %v14906_v2 = vld [vmem:[#allocation2 + $0x1a4] ss:$100 sps:$4 sm:$0xff]   ;;  %14100 = vmatprep.subr.bf16.mxu0 %v14910_v20  ;;  %v14939_v46 = vld [vmem:[%s20961_s3 + $0x210] sm:$0xff]  }
 0x21f   :  { %2406 = vst [vmem:[#allocation2 + $0x60c] sm:$0xf] %v2388_v25  ;;  %v2452_v5 = vsel %vm16531_vm11, %v12813_v56, %v2451_v30  ;;  %2567 = vst [vmem:[#allocation2 + $0x5bc] sm:$0xf] %v2388_v25  ;;  %v2514_v52 = vrot.slane %v2512_v51, 4  ;;  %v2517_v63 = vrot.slane %v2515_v29, 5  ;;  %v705_v26 = vadd.f32 %v17728_v23, %v16480_v32 }
 0x220   :  { %2728 = vst [vmem:[#allocation2 + $0x56c] sm:$0xf] %v2388_v25  ;;  %v2579_v3 = vrot.slane %v2512_v51, 5  ;;  %v2362_v15 = vsel %vm16513_vm9, %v2357_v7, %v2361_v48  ;;  %v2425_v41 = vor.u32 %v2424_v54, %v2423_v0  ;;  %2470 = vst [vmem:[#allocation2 + $0x614] sm:$0xf] %v2452_v5  ;;  %v2580_v56 = vrot.slane %v2515_v29, 6  ;;  %14163 = vmatpush3.bf16.msra.mxu1 %v14938_v55  ;;  %v17964_v55 = vpop.f32.mrf.mxu1 }
 0x221   :  { %2631 = vst [vmem:[#allocation2 + $0x5c4] sm:$0xf] %v2452_v5  ;;  %2792 = vst [vmem:[#allocation2 + $0x574] sm:$0xf] %v2452_v5  ;;  %v14918_v1 = vld [vmem:[%s20961_s3 + $0x260] sm:$0xff]   ;;  %v2518_v58 = vor.u32 %v2517_v63, %v2514_v52  ;;  %v1271_v7 = vmax.f32 %v1168_v27, %v1169_v19  ;;  %v978_v51 = vadd.f32 %v17734_v4, %v16484_v33  ;;  %v14947_v23 = vld [vmem:[%s20961_s3 + $0x2a8] sm:$0xff]   ;;  %5853 = vmatmul.mubr.bf16.gmra.mxu0 %v14896_v24 }
 0x222   :  { %2380 = vst [vmem:[#allocation2 + $0x608] sm:$0xf] %v2362_v15  ;;  %2541 = vst [vmem:[#allocation2 + $0x5b8] sm:$0xf] %v2362_v15  ;;  %v14909_v60 = vld [vmem:[#allocation2 + $0x1ac] ss:$100 sps:$4 sm:$0xff]   ;;  %v2426_v30 = vsel %vm16544_vm12, %v17878_v44, %v2425_v41  ;;  %v2581_v20 = vor.u32 %v2580_v56, %v2579_v3  ;;  %v709_v29 = vadd.f32 %v17767_v18, %v16480_v32  ;;  %14164 = vmatprep.subr.bf16.mxu1 %v14943_v57  ;;  %v17955_v32 = vpop.f32.mrf.mxu0 }
 0x223   :  { %2702 = vst [vmem:[#allocation2 + $0x568] sm:$0xf] %v2362_v15  ;;  %2444 = vst [vmem:[#allocation2 + $0x610] sm:$0xf] %v2426_v30  ;;  %v17950_v14 = vrot.slane %v2518_v58, 4  ;;  %v1319_v27 = vmax.f32 %v1223_v59, %v1271_v7  ;;  %v1170_v44 = vmax.f32 %v705_v26, 0.0  ;;  %5860 = vmatprep.mubr.bf16.mxu0 %v14906_v2  ;;  %14101 = vmatpush3.bf16.msra.mxu0 %v14911_v16  ;;  %v17995_v58 = vpop.f32.mrf.mxu1 }
 0x224   :  { %2605 = vst [vmem:[#allocation2 + $0x5c0] sm:$0xf] %v2426_v30  ;;  %2766 = vst [vmem:[#allocation2 + $0x570] sm:$0xf] %v2426_v30  ;;  %v1171_v19 = vmax.f32 %v707_v9, 0.0  ;;  %v14948_v4 = vld [vmem:[%s20961_s3 + $0x2e0] sm:$0xff]   ;;  %v980_v54 = vadd.f32 %v17752_v22, %v16492_v35  ;;  %5950 = vmatmul.mubr.bf16.gmra.mxu1 %v14899_v11  ;;  %14102 = vmatprep.subr.bf16.mxu0 %v14918_v1  ;;  %v711_v63 = vadd.f32 %v17786_v47, %v16488_v34 }
 0x225   :  { %v14919_v18 = vld [vmem:[%s20961_s3 + $0x220] sm:$0xff]   ;;  %v17960_v48 = vrot.slane %v2581_v20, 4  ;;  %v1172_v25 = vmax.f32 %v978_v51, 0.0  ;;  %v1174_v0 = vmax.f32 %v709_v29, 0.0  ;;  %v1372_v57 = vsel %vm1326_vm1, %v1319_v27, 0.0  ;;  %v14926_v5 = vld [vmem:[%s20961_s3 + $0x258] sm:$0xff]   ;;  %5957 = vmatprep.mubr.bf16.mxu1 %v14909_v60  ;;  %14165 = vmatpush3.bf16.msra.mxu1 %v14947_v23  ;;  %v18010_v27 = vpop.f32.mrf.mxu1 }
 0x226   :  { %v1224_v52 = vmax.f32 %v1170_v44, %v1171_v19  ;;  %v982_v3 = vadd.f32 %v17773_v28, %v16484_v33  ;;  %v17978_v22 = vld [vmem:[%s20962_s4] ss:$0 sm:$0xff]  ;;  %v1397_v24 = vpack.c.bf16 %v1372_v57, %v17869_v8  ;;  %v13835_v16 = vpack.c.bf16 %v1372_v57, %v1372_v57  ;;  %v14927_v33 = vld [vmem:[%s20961_s3 + $0x218] sm:$0xff]   ;;  %14166 = vmatprep.subr.bf16.mxu1 %v14948_v4  ;;  %v14907_v7 = vld [vmem:[#allocation2 + $0x1a8] ss:$100 sps:$4 sm:$0xff]  }
 0x227   :  { %v1173_v15 = vmax.f32 %v980_v54, 0.0  ;;  %v984_v41 = vadd.f32 %v17795_v13, %v16492_v35  ;;  %v14950_v34 = vld [vmem:[%s20961_s3 + $0x2a0] sm:$0xff]   ;;  %v1175_v28 = vmax.f32 %v711_v63, 0.0  ;;  %v13858_v8 = vadd.f32 %v17827_v39, %v17806_v43  ;;  %v17993_v35 = vpop.f32.mrf.mxu0  ;;  %14103 = vmatpush3.bf16.msra.mxu0 %v14919_v18  ;;  %v14914_v26 = vld [vmem:[#allocation2 + $0x26c] ss:$100 sps:$4 sm:$0xff]   ;;  %v14955_v23 = vld [vmem:[%s20961_s3 + $0x2d8] sm:$0xff]  }
 0x228   :  { %v14904_v47 = vld [vmem:[#allocation2 + $0x1a0] ss:$100 sps:$4 sm:$0xff]   ;;  %v1176_v56 = vmax.f32 %v982_v3, 0.0  ;;  %v13922_v59 = vadd.f32 %v17835_v10, %v17810_v49  ;;  %2486 = vst [vmem:[#allocation2 + $0x618] sm:$0xf] %v1397_v24  ;;  %v2521_v13 = vshll.u32 %v13835_v16, 16  ;;  %14104 = vmatprep.subr.bf16.mxu0 %v14926_v5 }
 0x229   :  { %v2549_v11 = vrot.slane %v13835_v16, 5  ;;  %v2583_v2 = vshrl.u32 %v13835_v16, 16  ;;  %v2613_v1 = vrot.slane %v13835_v16, 6  ;;  %2647 = vst [vmem:[#allocation2 + $0x5c8] sm:$0xf] %v1397_v24  ;;  %v1272_v9 = vmax.f32 %v1172_v25, %v1173_v15  ;;  %v14937_v49 = vld [vmem:[%s20961_s3 + $0x250] sm:$0xff]   ;;  %v18001_v60 = vpop.f32.mrf.mxu0  ;;  %14167 = vmatpush3.bf16.msra.mxu1 %v14950_v34  ;;  %5861 = vmatmul.mubr.bf16.gmra.mxu0 %v14904_v47  ;;  %v18052_v15 = vpop.f32.mrf.mxu1 }
 0x22a   :  { %v1225_v43 = vmax.f32 %v1174_v0, %v1175_v28  ;;  %v1177_v39 = vmax.f32 %v984_v41, 0.0  ;;  %v5653_v10 = vadd.f32 %v13858_v8, %v17978_v22  ;;  %v2523_v30 = vrot.slane %v2521_v13, 5  ;;  %v14917_v44 = vld [vmem:[#allocation2 + $0x274] ss:$100 sps:$4 sm:$0xff]   ;;  %5868 = vmatprep.mubr.bf16.mxu0 %v14914_v26  ;;  %v14951_v24 = vld [vmem:[%s20961_s3 + $0x208] sm:$0xff]   ;;  %14168 = vmatprep.subr.bf16.mxu1 %v14955_v23 }
 0x22b   :  { %v2550_v20 = vsel %vm16524_vm10, %v12819_v45, %v2549_v11  ;;  %v2585_v51 = vrot.slane %v2583_v2, 5  ;;  %v2586_v29 = vrot.slane %v2521_v13, 6  ;;  %v2614_v19 = vsel %vm16531_vm11, %v12821_v17, %v2613_v1  ;;  %v14959_v25 = vld [vmem:[%s20961_s3 + $0x298] sm:$0xff]   ;;  %14105 = vmatpush3.bf16.msra.mxu0 %v14927_v33  ;;  %v14960_v57 = vld [vmem:[%s20961_s3 + $0x2d0] sm:$0xff]   ;;  %v14912_v41 = vld [vmem:[#allocation2 + $0x268] ss:$100 sps:$4 sm:$0xff]  }
 0x22c   :  { %2568 = vst [vmem:[#allocation2 + $0x620] sm:$0xf] %v2550_v20  ;;  %2729 = vst [vmem:[#allocation2 + $0x5d0] sm:$0xf] %v2550_v20  ;;  %v18016_v4 = vmax.f32 %v1224_v52, %v1272_v9  ;;  %v1273_v45 = vmax.f32 %v1176_v56, %v1177_v39  ;;  %v18018_v18 = vadd.f32 %v13922_v59, %v5653_v10  ;;  %5958 = vmatmul.mubr.bf16.gmra.mxu1 %v14907_v7  ;;  %v14949_v52 = vld [vmem:[%s20961_s3 + $0x248] sm:$0xff]   ;;  %v14962_v34 = vld [vmem:[%s20961_s3 + $0x290] sm:$0xff]   ;;  %v13935_v39 = vpop.f32.mrf.mxu1 }
 0x22d   :  { %v2524_v0 = vsel %vm16513_vm9, %v17950_v14, %v2523_v30  ;;  %v2587_v54 = vor.u32 %v2586_v29, %v2585_v51  ;;  %2632 = vst [vmem:[#allocation2 + $0x628] sm:$0xf] %v2614_v19  ;;  %2793 = vst [vmem:[#allocation2 + $0x5d8] sm:$0xf] %v2614_v19  ;;  %v13861_v17 = vadd.f32 %v17876_v50, %v17845_v36  ;;  %14106 = vmatprep.subr.bf16.mxu0 %v14937_v49  ;;  %v13869_v50 = vpop.f32.mrf.mxu0  ;;  %v14922_v47 = vld [vmem:[#allocation2 + $0x334] ss:$100 sps:$4 sm:$0xff]  }
 0x22e   :  { %2542 = vst [vmem:[#allocation2 + $0x61c] sm:$0xf] %v2524_v0  ;;  %2703 = vst [vmem:[#allocation2 + $0x5cc] sm:$0xf] %v2524_v0  ;;  %v18036_v14 = vpack.c.bf16 %v18016_v4, %v18016_v4  ;;  %v1321_v5 = vmax.f32 %v1225_v43, %v1273_v45  ;;  %v13925_v36 = vadd.f32 %v17884_v31, %v17847_v53  ;;  %5965 = vmatprep.mubr.bf16.mxu1 %v14917_v44  ;;  %v14961_v33 = vld [vmem:[%s20961_s3 + $0x240] sm:$0xff]   ;;  %v14967_v56 = vld [vmem:[%s20961_s3 + $0x2c8] sm:$0xff]  }
 0x22f   :  { %v2588_v63 = vsel %vm16544_vm12, %v17960_v48, %v2587_v54  ;;  %v5656_v3 = vadd.f32 %v13861_v17, %v17978_v22  ;;  %v13864_v16 = vadd.f32 %v17924_v37, %v17899_v38  ;;  %14169 = vmatpush3.bf16.msra.mxu1 %v14959_v25  ;;  %14107 = vmatpush3.bf16.msra.mxu0 %v14939_v46  ;;  %v14915_v59 = vld [vmem:[#allocation2 + $0x270] ss:$100 sps:$4 sm:$0xff]   ;;  %v14968_v1 = vld [vmem:[%s20961_s3 + $0x288] sm:$0xff]   ;;  %v13871_v7 = vpop.f32.mrf.mxu0  ;;  %v14925_v26 = vld [vmem:[#allocation2 + $0x33c] ss:$100 sps:$4 sm:$0xff]  }
 0x230   :  { %2606 = vst [vmem:[#allocation2 + $0x624] sm:$0xf] %v2588_v63  ;;  %2767 = vst [vmem:[#allocation2 + $0x5d4] sm:$0xf] %v2588_v63  ;;  %v2674_v53 = vshrl.u32 %v18036_v14, 16  ;;  %v2677_v31 = vshll.u32 %v18036_v14, 16  ;;  %14170 = vmatprep.subr.bf16.mxu1 %v14960_v57  ;;  %v13928_v8 = vadd.f32 %v17931_v62, %v17901_v6  ;;  %14108 = vmatprep.subr.bf16.mxu0 %v14949_v52  ;;  %v13936_v57 = vpop.f32.mrf.mxu1 }
 0x231   :  { %v12827_v48 = vrot.slane %v18036_v14, 9  ;;  %v1374_v38 = vsel %vm1326_vm1, %v1321_v5, 0.0  ;;  %v18062_v37 = vadd.f32 %v13925_v36, %v5656_v3  ;;  %v5661_v28 = vadd.f32 %v13864_v16, %v17978_v22  ;;  %v14963_v49 = vld [vmem:[%s20961_s3 + $0x200] sm:$0xff]   ;;  %5869 = vmatmul.mubr.bf16.gmra.mxu0 %v14912_v41  ;;  %v14974_v25 = vld [vmem:[%s20961_s3 + $0x378] sm:$0xff]  }
 0x232   :  { %v2676_v40 = vrot.slane %v2674_v53, 4  ;;  %v2679_v13 = vrot.slane %v2677_v31, 5  ;;  %v2741_v11 = vrot.slane %v2674_v53, 5  ;;  %v2742_v2 = vrot.slane %v2677_v31, 6  ;;  %v14972_v51 = vld [vmem:[%s20961_s3 + $0x2c0] sm:$0xff]   ;;  %5876 = vmatprep.mubr.bf16.mxu0 %v14922_v47  ;;  %v13938_v47 = vpop.f32.mrf.mxu1 }
 0x233   :  { %v1398_v9 = vpack.c.bf16 %v1374_v38, %v18016_v4  ;;  %v13839_v43 = vpack.c.bf16 %v1374_v38, %v1374_v38  ;;  %v18080_v6 = vadd.f32 %v13928_v8, %v5661_v28  ;;  %v13867_v62 = vadd.f32 %v17993_v35, %v17955_v32  ;;  %14171 = vmatpush3.bf16.msra.mxu1 %v14962_v34  ;;  %v14930_v63 = vld [vmem:[#allocation2 + $0x3fc] ss:$100 sps:$4 sm:$0xff]   ;;  %v14934_v31 = vld [vmem:[#allocation2 + $0x404] ss:$100 sps:$4 sm:$0xff]  }
 0x234   :  { %v2680_v10 = vor.u32 %v2679_v13, %v2676_v40  ;;  %v2743_v30 = vor.u32 %v2742_v2, %v2741_v11  ;;  %v12829_v20 = vrot.slane %v18036_v14, 10  ;;  %v13931_v29 = vadd.f32 %v17995_v58, %v17964_v55  ;;  %14109 = vmatpush3.bf16.msra.mxu0 %v14951_v24  ;;  %5966 = vmatmul.mubr.bf16.gmra.mxu1 %v14915_v59  ;;  %v13872_v55 = vpop.f32.mrf.mxu0  ;;  %v14920_v14 = vld [vmem:[#allocation2 + $0x330] ss:$100 sps:$4 sm:$0xff]   ;;  %v14923_v16 = vld [vmem:[#allocation2 + $0x338] ss:$100 sps:$4 sm:$0xff]   ;;  %v13939_v61 = vpop.f32.mrf.mxu1 }
 0x235   :  { %2648 = vst [vmem:[#allocation2 + $0x62c] sm:$0xf] %v1398_v9  ;;  %v2683_v23 = vshll.u32 %v13839_v43, 16  ;;  %v2711_v44 = vrot.slane %v13839_v43, 5  ;;  %v2745_v19 = vshrl.u32 %v13839_v43, 16  ;;  %v2775_v32 = vrot.slane %v13839_v43, 6  ;;  %14110 = vmatprep.subr.bf16.mxu0 %v14961_v33  ;;  %5973 = vmatprep.mubr.bf16.mxu1 %v14925_v26 }
 0x236   :  { %v2681_v35 = vrot.slane %v2680_v10, 4  ;;  %v2744_v4 = vrot.slane %v2743_v30, 4  ;;  %v5664_v45 = vadd.f32 %v13867_v62, %v17978_v22  ;;  %v13870_v0 = vadd.f32 %v13869_v50, %v18001_v60  ;;  %14172 = vmatprep.subr.bf16.mxu1 %v14967_v56  ;;  %v14973_v60 = vld [vmem:[%s20961_s3 + $0x280] sm:$0xff]   ;;  %v15011_v50 = vld [vmem:[%s20961_s3 + $0x3f8] sm:$0xff]   ;;  %v14946_v13 = vld [vmem:[#allocation2 + $0x4cc] ss:$100 sps:$4 sm:$0xff]   ;;  %v13941_v2 = vpop.f32.mrf.mxu1 }
 0x237   :  { %v2685_v58 = vrot.slane %v2683_v23, 5  ;;  %v2712_v54 = vsel %vm16524_vm10, %v12827_v48, %v2711_v44  ;;  %v2747_v46 = vrot.slane %v2745_v19, 5  ;;  %v2748_v17 = vrot.slane %v2683_v23, 6  ;;  %14173 = vmatpush3.bf16.msra.mxu1 %v14968_v1  ;;  %v13874_v48 = vpop.f32.mrf.mxu0  ;;  %v14928_v38 = vld [vmem:[#allocation2 + $0x3f8] ss:$100 sps:$4 sm:$0xff]  }
 0x238   :  { %2730 = vst [vmem:[#allocation2 + $0x634] sm:$0xf] %v2712_v54  ;;  %v2776_v5 = vsel %vm16531_vm11, %v12829_v20, %v2775_v32  ;;  %v18102_v52 = vadd.f32 %v13931_v29, %v5664_v45  ;;  %v5669_v36 = vadd.f32 %v13870_v0, %v17978_v22  ;;  %v13934_v21 = vadd.f32 %v18052_v15, %v18010_v27  ;;  %v14932_v56 = vld [vmem:[#allocation2 + $0x400] ss:$100 sps:$4 sm:$0xff]   ;;  %v13942_v26 = vpop.f32.mrf.mxu1  ;;  %v14954_v62 = vld [vmem:[#allocation2 + $0x58c] ss:$100 sps:$4 sm:$0xff]  }
 0x239   :  { %v2686_v42 = vsel %vm16513_vm9, %v2681_v35, %v2685_v58  ;;  %v2749_v3 = vor.u32 %v2748_v17, %v2747_v46  ;;  %2794 = vst [vmem:[#allocation2 + $0x63c] sm:$0xf] %v2776_v5  ;;  %14111 = vmatpush3.bf16.msra.mxu0 %v14963_v49  ;;  %14174 = vmatprep.subr.bf16.mxu1 %v14972_v51  ;;  %v13875_v34 = vpop.f32.mrf.mxu0  ;;  %v14942_v8 = vld [vmem:[#allocation2 + $0x4c4] ss:$100 sps:$4 sm:$0xff]   ;;  %v14958_v30 = vld [vmem:[#allocation2 + $0x594] ss:$100 sps:$4 sm:$0xff]  }
 0x23a   :  { %v13873_v24 = vadd.f32 %v13872_v55, %v13871_v7  ;;  %2704 = vst [vmem:[#allocation2 + $0x630] sm:$0xf] %v2686_v42  ;;  %14224 = vmatprep.subr.bf16.mxu0 %v14974_v25  ;;  %v18112_v41 = vadd.f32 %v13934_v21, %v5669_v36  ;;  %v13937_v53 = vadd.f32 %v13936_v57, %v13935_v39  ;;  %v14940_v49 = vld [vmem:[#allocation2 + $0x4c0] ss:$100 sps:$4 sm:$0xff]   ;;  %v14944_v10 = vld [vmem:[#allocation2 + $0x4c8] ss:$100 sps:$4 sm:$0xff]  }
 0x23b   :  { %v2750_v27 = vsel %vm16544_vm12, %v2744_v4, %v2749_v3  ;;  %5877 = vmatmul.mubr.bf16.gmra.mxu0 %v14920_v14  ;;  %14175 = vmatpush3.bf16.msra.mxu1 %v14973_v60  ;;  %v13876_v33 = vadd.f32 %v13875_v34, %v13874_v48  ;;  %v13877_v28 = vpop.f32.mrf.mxu0  ;;  %v13940_v40 = vadd.f32 %v13939_v61, %v13938_v47  ;;  %v14952_v20 = vld [vmem:[#allocation2 + $0x588] ss:$100 sps:$4 sm:$0xff]   ;;  %v14956_v23 = vld [vmem:[#allocation2 + $0x590] ss:$100 sps:$4 sm:$0xff]   ;;  %v14964_v44 = vld [vmem:[#allocation2 + $0x20] ss:$100 sps:$4 sm:$0xff]  }
 0x23c   :  { %v5672_v15 = vadd.f32 %v13873_v24, %v17978_v22  ;;  %2768 = vst [vmem:[#allocation2 + $0x638] sm:$0xf] %v2750_v27  ;;  %5884 = vmatprep.mubr.bf16.mxu0 %v14930_v63  ;;  %14288 = vmatprep.subr.bf16.mxu1 %v15011_v50  ;;  %v13943_v43 = vadd.f32 %v13942_v26, %v13941_v2  ;;  %v14966_v51 = vld [vmem:[#allocation2 + $0x24] ss:$100 sps:$4 sm:$0xff]   ;;  %v14971_v29 = vld [vmem:[#allocation2 + $0x2c] ss:$100 sps:$4 sm:$0xff]  }
 0x23d   :  { %5974 = vmatmul.mubr.bf16.gmra.mxu1 %v14923_v16  ;;  %v5677_v59 = vadd.f32 %v13876_v33, %v17978_v22  ;;  %v13878_v11 = vpop.f32.mrf.mxu0  ;;  %v14978_v19 = vld [vmem:[#allocation2 + $0xec] ss:$100 sps:$4 sm:$0xff]   ;;  %v15015_v35 = vld [vmem:[%s20961_s3 + $0x3b8] sm:$0xff]   ;;  %v14998_v57 = vld [vmem:[%s20961_s3 + $0x360] sm:$0xff]  }
 0x23e   :  { %v18117_v12 = vadd.f32 %v13937_v53, %v5672_v15  ;;  %5981 = vmatprep.mubr.bf16.mxu1 %v14934_v31  ;;  %v13879_v7 = vadd.f32 %v13878_v11, %v13877_v28  ;;  %v14982_v32 = vld [vmem:[%s20961_s3 + $0x370] sm:$0xff]   ;;  %v14969_v4 = vld [vmem:[#allocation2 + $0x28] ss:$100 sps:$4 sm:$0xff]   ;;  %v15028_v36 = vld [vmem:[%s20961_s3 + $0x3e0] sm:$0xff]  }
 0x23f   :  { %v18120_v1 = vadd.f32 %v13940_v40, %v5677_v59  ;;  %v15016_v45 = vld [vmem:[%s20961_s3 + $0x3f0] sm:$0xff]   ;;  %v14990_v55 = vld [vmem:[%s20961_s3 + $0x368] sm:$0xff]   ;;  %v14989_v21 = vld [vmem:[#allocation2 + $0x1bc] ss:$100 sps:$4 sm:$0xff]  }
 0x240   :  { %v5680_v9 = vadd.f32 %v13879_v7, %v17978_v22  ;;  %v14975_v22 = vld [vmem:[%s20961_s3 + $0x338] sm:$0xff]   ;;  %v14983_v0 = vld [vmem:[%s20961_s3 + $0x330] sm:$0xff]   ;;  %v14991_v54 = vld [vmem:[%s20961_s3 + $0x328] sm:$0xff]  }
 0x241   :  { %v14981_v25 = vld [vmem:[#allocation2 + $0xf4] ss:$100 sps:$4 sm:$0xff]   ;;  %v15023_v46 = vld [vmem:[%s20961_s3 + $0x3e8] sm:$0xff]   ;;  %v14999_v50 = vld [vmem:[%s20961_s3 + $0x320] sm:$0xff]  }
 0x242   :  { %v18123_v39 = vadd.f32 %v13943_v43, %v5680_v9  ;;  %v15018_v58 = vld [vmem:[%s20961_s3 + $0x3b0] sm:$0xff]   ;;  %v14976_v17 = vld [vmem:[#allocation2 + $0xe8] ss:$100 sps:$4 sm:$0xff]   ;;  %v15006_v63 = vld [vmem:[%s20961_s3 + $0x358] sm:$0xff]  }
 0x243   :  { %5885 = vmatmul.mubr.bf16.gmra.mxu0 %v14928_v38  ;;  %v14986_v14 = vld [vmem:[#allocation2 + $0x1b4] ss:$100 sps:$4 sm:$0xff]   ;;  %v15027_v5 = vld [vmem:[%s20961_s3 + $0x3a8] sm:$0xff]   ;;  %v15030_v42 = vld [vmem:[%s20961_s3 + $0x3a0] sm:$0xff]  }
 0x244   :  { %5892 = vmatprep.mubr.bf16.mxu0 %v14942_v8  ;;  %v14979_v60 = vld [vmem:[#allocation2 + $0xf0] ss:$100 sps:$4 sm:$0xff]   ;;  %v15007_v3 = vld [vmem:[%s20961_s3 + $0x318] sm:$0xff]   ;;  %v14997_v34 = vld [vmem:[#allocation2 + $0x284] ss:$100 sps:$4 sm:$0xff]  }
 0x245   :  { %5982 = vmatmul.mubr.bf16.gmra.mxu1 %v14932_v56  ;;  %v15035_v24 = vld [vmem:[%s20961_s3 + $0x3d8] sm:$0xff]   ;;  %v14984_v16 = vld [vmem:[#allocation2 + $0x1b0] ss:$100 sps:$4 sm:$0xff]   ;;  %v15029_v38 = vld [vmem:[%s20961_s3 + $0x348] sm:$0xff]  }
 0x246   :  { %5989 = vmatprep.mubr.bf16.mxu1 %v14946_v13  ;;  %v15017_v53 = vld [vmem:[%s20961_s3 + $0x350] sm:$0xff]   ;;  %v14994_v27 = vld [vmem:[#allocation2 + $0x27c] ss:$100 sps:$4 sm:$0xff]   ;;  %v15031_v28 = vld [vmem:[%s20961_s3 + $0x308] sm:$0xff]  }
 0x247   :  { %v15039_v15 = vld [vmem:[%s20961_s3 + $0x398] sm:$0xff]   ;;  %v15040_v48 = vld [vmem:[%s20961_s3 + $0x3d0] sm:$0xff]   ;;  %v15047_v61 = vld [vmem:[%s20961_s3 + $0x3c8] sm:$0xff]  }
 0x248   :  { %v14987_v31 = vld [vmem:[#allocation2 + $0x1b8] ss:$100 sps:$4 sm:$0xff]   ;;  %v15019_v47 = vld [vmem:[%s20961_s3 + $0x310] sm:$0xff]   ;;  %v15041_v8 = vld [vmem:[%s20961_s3 + $0x340] sm:$0xff]  }
 0x249   :  { %v15042_v33 = vld [vmem:[%s20961_s3 + $0x390] sm:$0xff]   ;;  %v14992_v56 = vld [vmem:[#allocation2 + $0x278] ss:$100 sps:$4 sm:$0xff]   ;;  %v15002_v59 = vld [vmem:[#allocation2 + $0x344] ss:$100 sps:$4 sm:$0xff]  }
 0x24a   :  { %v15048_v40 = vld [vmem:[%s20961_s3 + $0x388] sm:$0xff]   ;;  %v14995_v13 = vld [vmem:[#allocation2 + $0x280] ss:$100 sps:$4 sm:$0xff]   ;;  %v15054_v9 = vld [vmem:[%s20961_s3 + $0x478] sm:$0xff]  }
 0x24b   :  { %5893 = vmatmul.mubr.bf16.gmra.mxu0 %v14940_v49  ;;  %v15052_v11 = vld [vmem:[%s20961_s3 + $0x3c0] sm:$0xff]   ;;  %v15005_v2 = vld [vmem:[#allocation2 + $0x34c] ss:$100 sps:$4 sm:$0xff]   ;;  %v15091_v43 = vld [vmem:[%s20961_s3 + $0x4f8] sm:$0xff]  }
 0x24c   :  { %5900 = vmatprep.mubr.bf16.mxu0 %v14954_v62  ;;  %v15043_v7 = vld [vmem:[%s20961_s3 + $0x300] sm:$0xff]   ;;  %v15010_v62 = vld [vmem:[#allocation2 + $0x40c] ss:$100 sps:$4 sm:$0xff]  }
 0x24d   :  { %5990 = vmatmul.mubr.bf16.gmra.mxu1 %v14944_v10  ;;  %v15053_v26 = vld [vmem:[%s20961_s3 + $0x380] sm:$0xff]   ;;  %v15003_v10 = vld [vmem:[#allocation2 + $0x348] ss:$100 sps:$4 sm:$0xff]  }
 0x24e   :  { %5997 = vmatprep.mubr.bf16.mxu1 %v14958_v30  ;;  %v15000_v49 = vld [vmem:[#allocation2 + $0x340] ss:$100 sps:$4 sm:$0xff]   ;;  %v15014_v30 = vld [vmem:[#allocation2 + $0x414] ss:$100 sps:$4 sm:$0xff]  }
 0x253   :  { %5901 = vmatmul.mubr.bf16.gmra.mxu0 %v14952_v20 }
 0x254   :  { %6038 = vmatprep.mubr.bf16.mxu0 %v14966_v51 }
 0x255   :  { %5998 = vmatmul.mubr.bf16.gmra.mxu1 %v14956_v23 }
 0x256   :  { %6135 = vmatprep.mubr.bf16.mxu1 %v14971_v29 }
 0x25b   :  { %6039 = vmatmul.mubr.bf16.vlgmr.msra.gmra.mxu0 %v14964_v44 }
 0x25c   :  { %14225 = vmatpush3.bf16.msra.mxu0 %v14975_v22  ;;  %6046 = vmatprep.mubr.bf16.mxu0 %v14978_v19 }
 0x25d   :  { %6136 = vmatmul.mubr.bf16.vlgmr.msra.gmra.mxu1 %v14969_v4  ;;  %14226 = vmatprep.subr.bf16.mxu0 %v14982_v32 }
 0x25e   :  { %6143 = vmatprep.mubr.bf16.mxu1 %v14981_v25  ;;  %14289 = vmatpush3.bf16.msra.mxu1 %v15015_v35 }
 0x25f   :  { %14290 = vmatprep.subr.bf16.mxu1 %v15016_v45 }
 0x260   :  { %14227 = vmatpush3.bf16.msra.mxu0 %v14983_v0 }
 0x261   :  { %14228 = vmatprep.subr.bf16.mxu0 %v14990_v55 }
 0x262   :  { %14291 = vmatpush3.bf16.msra.mxu1 %v15018_v58 }
 0x263   :  { %6047 = vmatmul.mubr.bf16.gmra.mxu0 %v14976_v17  ;;  %14292 = vmatprep.subr.bf16.mxu1 %v15023_v46 }
 0x264   :  { %6054 = vmatprep.mubr.bf16.mxu0 %v14986_v14  ;;  %14229 = vmatpush3.bf16.msra.mxu0 %v14991_v54 }
 0x265   :  { %6144 = vmatmul.mubr.bf16.gmra.mxu1 %v14979_v60  ;;  %14230 = vmatprep.subr.bf16.mxu0 %v14998_v57 }
 0x266   :  { %6151 = vmatprep.mubr.bf16.mxu1 %v14989_v21  ;;  %14293 = vmatpush3.bf16.msra.mxu1 %v15027_v5 }
 0x267   :  { %14294 = vmatprep.subr.bf16.mxu1 %v15028_v36 }
 0x268   :  { %14231 = vmatpush3.bf16.msra.mxu0 %v14999_v50 }
 0x269   :  { %14232 = vmatprep.subr.bf16.mxu0 %v15006_v63 }
 0x26a   :  { %14295 = vmatpush3.bf16.msra.mxu1 %v15030_v42 }
 0x26b   :  { %6055 = vmatmul.mubr.bf16.gmra.mxu0 %v14984_v16  ;;  %14296 = vmatprep.subr.bf16.mxu1 %v15035_v24 }
 0x26c   :  { %6062 = vmatprep.mubr.bf16.mxu0 %v14994_v27  ;;  %14233 = vmatpush3.bf16.msra.mxu0 %v15007_v3 }
 0x26d   :  { %6152 = vmatmul.mubr.bf16.gmra.mxu1 %v14987_v31  ;;  %14234 = vmatprep.subr.bf16.mxu0 %v15017_v53 }
 0x26e   :  { %6159 = vmatprep.mubr.bf16.mxu1 %v14997_v34  ;;  %14297 = vmatpush3.bf16.msra.mxu1 %v15039_v15 }
 0x26f   :  { %14298 = vmatprep.subr.bf16.mxu1 %v15040_v48 }
 0x270   :  { %14235 = vmatpush3.bf16.msra.mxu0 %v15019_v47 }
 0x271   :  { %14236 = vmatprep.subr.bf16.mxu0 %v15029_v38 }
 0x272   :  { %14299 = vmatpush3.bf16.msra.mxu1 %v15042_v33 }
 0x273   :  { %6063 = vmatmul.mubr.bf16.gmra.mxu0 %v14992_v56  ;;  %14300 = vmatprep.subr.bf16.mxu1 %v15047_v61 }
 0x274   :  { %6070 = vmatprep.mubr.bf16.mxu0 %v15002_v59  ;;  %14237 = vmatpush3.bf16.msra.mxu0 %v15031_v28 }
 0x275   :  { %6160 = vmatmul.mubr.bf16.gmra.mxu1 %v14995_v13  ;;  %14238 = vmatprep.subr.bf16.mxu0 %v15041_v8 }
 0x276   :  { %6167 = vmatprep.mubr.bf16.mxu1 %v15005_v2  ;;  %14301 = vmatpush3.bf16.msra.mxu1 %v15048_v40 }
 0x277   :  { %14302 = vmatprep.subr.bf16.mxu1 %v15052_v11 }
 0x278   :  { %14239 = vmatpush3.bf16.msra.mxu0 %v15043_v7 }
 0x279   :  { %14352 = vmatprep.subr.bf16.mxu0 %v15054_v9 }
 0x27a   :  { %14303 = vmatpush3.bf16.msra.mxu1 %v15053_v26 }
 0x27b   :  { %6071 = vmatmul.mubr.bf16.gmra.mxu0 %v15000_v49  ;;  %14416 = vmatprep.subr.bf16.mxu1 %v15091_v43 }
 0x27c   :  { %6078 = vmatprep.mubr.bf16.mxu0 %v15010_v62 }
 0x27d   :  { %6168 = vmatmul.mubr.bf16.gmra.mxu1 %v15003_v10 }
 0x27e   :  { %14 = vsyncpa [#allocation5], 0  ;;  %6175 = vmatprep.mubr.bf16.mxu1 %v15014_v30  ;;  %v15008_v20 = vld [vmem:[#allocation2 + $0x408] ss:$100 sps:$4 sm:$0xff]   ;;  %v15022_v51 = vld [vmem:[#allocation2 + $0x4d4] ss:$100 sps:$4 sm:$0xff]   ;;  %v13880_v44 = vpop.f32.mrf.mxu0  ;;  %v13944_v32 = vpop.f32.mrf.mxu1 }
 0x27f   :  { %v15012_v29 = vld [vmem:[#allocation2 + $0x410] ss:$100 sps:$4 sm:$0xff]   ;;  %v15026_v23 = vld [vmem:[#allocation2 + $0x4dc] ss:$100 sps:$4 sm:$0xff]   ;;  %v15038_v45 = vld [vmem:[#allocation2 + $0x5a4] ss:$100 sps:$4 sm:$0xff]  }
 0x280   :  { %v15020_v22 = vld [vmem:[#allocation2 + $0x4d0] ss:$100 sps:$4 sm:$0xff]   ;;  %v15034_v19 = vld [vmem:[#allocation2 + $0x59c] ss:$100 sps:$4 sm:$0xff]   ;;  %v13881_v4 = vpop.f32.mrf.mxu0  ;;  %v13945_v0 = vpop.f32.mrf.mxu1  ;;  %v15061_v47 = vld [vmem:[#allocation2 + $0x104] ss:$100 sps:$4 sm:$0xff]  }
 0x281   :  { %v15024_v35 = vld [vmem:[#allocation2 + $0x4d8] ss:$100 sps:$4 sm:$0xff]   ;;  %v13882_v25 = vadd.f32 %v13881_v4, %v13880_v44  ;;  %v13946_v58 = vadd.f32 %v13945_v0, %v13944_v32  ;;  %v18224_v54 = vld [vmem:[%s20962_s4] ss:$0 sm:$0xff]  ;;  %v15044_v53 = vld [vmem:[#allocation2 + $0x30] ss:$100 sps:$4 sm:$0xff]  }
 0x282   :  { %v13883_v55 = vpop.f32.mrf.mxu0  ;;  %v13947_v17 = vpop.f32.mrf.mxu1  ;;  %v15032_v36 = vld [vmem:[#allocation2 + $0x598] ss:$100 sps:$4 sm:$0xff]   ;;  %v15036_v42 = vld [vmem:[#allocation2 + $0x5a0] ss:$100 sps:$4 sm:$0xff]   ;;  %v15062_v27 = vld [vmem:[%s20961_s3 + $0x470] sm:$0xff]   ;;  %vm7000_vm13 = vcmask 1043458  }
 0x283   :  { %6079 = vmatmul.mubr.bf16.gmra.mxu0 %v15008_v20  ;;  %v5685_v46 = vadd.f32 %v18224_v54, %v13882_v25  ;;  %v15046_v50 = vld [vmem:[#allocation2 + $0x34] ss:$100 sps:$4 sm:$0xff]   ;;  %v15051_v3 = vld [vmem:[#allocation2 + $0x3c] ss:$100 sps:$4 sm:$0xff]   ;;  %v15070_v33 = vld [vmem:[%s20961_s3 + $0x468] sm:$0xff]   ;;  %vm7192_vm14 = vcmask 1047558  }
 0x284   :  { %6086 = vmatprep.mubr.bf16.mxu0 %v15022_v51  ;;  %v13884_v57 = vpop.f32.mrf.mxu0  ;;  %v13948_v60 = vpop.f32.mrf.mxu1  ;;  %v15055_v16 = vld [vmem:[%s20961_s3 + $0x438] sm:$0xff]   ;;  %v15096_v34 = vld [vmem:[%s20961_s3 + $0x4f0] sm:$0xff]   ;;  %v15103_v61 = vld [vmem:[%s20961_s3 + $0x4e8] sm:$0xff]   ;;  %vm6981_vm15 = vcmask 1041409  }
 0x285   :  { %6176 = vmatmul.mubr.bf16.gmra.mxu1 %v15012_v29  ;;  %v18227_v14 = vadd.f32 %v13946_v58, %v5685_v46  ;;  %v13885_v5 = vadd.f32 %v13884_v57, %v13883_v55  ;;  %v13949_v21 = vadd.f32 %v13948_v60, %v13947_v17  ;;  %v15058_v15 = vld [vmem:[#allocation2 + $0xfc] ss:$100 sps:$4 sm:$0xff]   ;;  %v15063_v38 = vld [vmem:[%s20961_s3 + $0x430] sm:$0xff]   ;;  %v15071_v56 = vld [vmem:[%s20961_s3 + $0x428] sm:$0xff]  }
 0x286   :  { %6183 = vmatprep.mubr.bf16.mxu1 %v15026_v23  ;;  %v15095_v31 = vld [vmem:[%s20961_s3 + $0x4b8] sm:$0xff]   ;;  %v15098_v28 = vld [vmem:[%s20961_s3 + $0x4b0] sm:$0xff]   ;;  %v15078_v59 = vld [vmem:[%s20961_s3 + $0x460] sm:$0xff]  }
 0x287   :  { %v5688_v63 = vadd.f32 %v18224_v54, %v13885_v5  ;;  %v15049_v48 = vld [vmem:[#allocation2 + $0x38] ss:$100 sps:$4 sm:$0xff]   ;;  %v15066_v13 = vld [vmem:[#allocation2 + $0x1c4] ss:$100 sps:$4 sm:$0xff]   ;;  %v15069_v43 = vld [vmem:[#allocation2 + $0x1cc] ss:$100 sps:$4 sm:$0xff]  }
 0x288   :  { %v15056_v8 = vld [vmem:[#allocation2 + $0xf8] ss:$100 sps:$4 sm:$0xff]   ;;  %v15107_v11 = vld [vmem:[%s20961_s3 + $0x4a8] sm:$0xff]   ;;  %v15059_v2 = vld [vmem:[#allocation2 + $0x100] ss:$100 sps:$4 sm:$0xff]  }
 0x289   :  { %v18230_v24 = vadd.f32 %v13949_v21, %v5688_v63  ;;  %v15108_v9 = vld [vmem:[%s20961_s3 + $0x4e0] sm:$0xff]   ;;  %v15086_v20 = vld [vmem:[%s20961_s3 + $0x458] sm:$0xff]   ;;  %v15097_v0 = vld [vmem:[%s20961_s3 + $0x450] sm:$0xff]  }
 0x28a   :  { %v15079_v49 = vld [vmem:[%s20961_s3 + $0x420] sm:$0xff]   ;;  %v15087_v4 = vld [vmem:[%s20961_s3 + $0x418] sm:$0xff]   ;;  %v15074_v55 = vld [vmem:[#allocation2 + $0x28c] ss:$100 sps:$4 sm:$0xff]  }
 0x28b   :  { %6087 = vmatmul.mubr.bf16.gmra.mxu0 %v15020_v22  ;;  %v15110_v23 = vld [vmem:[%s20961_s3 + $0x4a0] sm:$0xff]   ;;  %v15119_v17 = vld [vmem:[%s20961_s3 + $0x498] sm:$0xff]   ;;  %v15067_v57 = vld [vmem:[#allocation2 + $0x1c8] ss:$100 sps:$4 sm:$0xff]  }
 0x28c   :  { %6094 = vmatprep.mubr.bf16.mxu0 %v15034_v19  ;;  %v15115_v19 = vld [vmem:[%s20961_s3 + $0x4d8] sm:$0xff]   ;;  %v15120_v5 = vld [vmem:[%s20961_s3 + $0x4d0] sm:$0xff]  }
 0x28d   :  { %6184 = vmatmul.mubr.bf16.gmra.mxu1 %v15024_v35  ;;  %v15077_v60 = vld [vmem:[#allocation2 + $0x294] ss:$100 sps:$4 sm:$0xff]  }
 0x28e   :  { %6191 = vmatprep.mubr.bf16.mxu1 %v15038_v45  ;;  %v15064_v45 = vld [vmem:[#allocation2 + $0x1c0] ss:$100 sps:$4 sm:$0xff]   ;;  %v15099_v21 = vld [vmem:[%s20961_s3 + $0x410] sm:$0xff]  }
 0x28f   :  { %v15122_v63 = vld [vmem:[%s20961_s3 + $0x490] sm:$0xff]  }
 0x293   :  { %6095 = vmatmul.mubr.bf16.gmra.mxu0 %v15032_v36 }
 0x294   :  { %6232 = vmatprep.mubr.bf16.mxu0 %v15046_v50  ;;  %v15109_v50 = vld [vmem:[%s20961_s3 + $0x448] sm:$0xff]  }
 0x295   :  { %6192 = vmatmul.mubr.bf16.gmra.mxu1 %v15036_v42  ;;  %v15127_v42 = vld [vmem:[%s20961_s3 + $0x4c8] sm:$0xff]  }
 0x296   :  { %6329 = vmatprep.mubr.bf16.mxu1 %v15051_v3  ;;  %v13886_v40 = vpop.f32.mrf.mxu0  ;;  %v15111_v3 = vld [vmem:[%s20961_s3 + $0x408] sm:$0xff]  }
 0x298   :  { %v13887_v7 = vpop.f32.mrf.mxu0 }
 0x299   :  { %v13950_v26 = vpop.f32.mrf.mxu1  ;;  %v13888_v62 = vadd.f32 %v13887_v7, %v13886_v40  ;;  %v15090_v40 = vld [vmem:[#allocation2 + $0x41c] ss:$100 sps:$4 sm:$0xff]  }
 0x29a   :  { %v13889_v10 = vpop.f32.mrf.mxu0 }
 0x29b   :  { %6233 = vmatmul.mubr.bf16.vlgmr.msra.gmra.mxu0 %v15044_v53  ;;  %v13951_v30 = vpop.f32.mrf.mxu1  ;;  %v5693_v51 = vadd.f32 %v18224_v54, %v13888_v62  ;;  %v15121_v53 = vld [vmem:[%s20961_s3 + $0x440] sm:$0xff]  }
 0x29c   :  { %14353 = vmatpush3.bf16.msra.mxu0 %v15055_v16  ;;  %6240 = vmatprep.mubr.bf16.mxu0 %v15058_v15  ;;  %v13952_v29 = vadd.f32 %v13951_v30, %v13950_v26  ;;  %v13890_v22 = vpop.f32.mrf.mxu0  ;;  %v15072_v16 = vld [vmem:[#allocation2 + $0x288] ss:$100 sps:$4 sm:$0xff]  }
 0x29d   :  { %6330 = vmatmul.mubr.bf16.vlgmr.msra.gmra.mxu1 %v15049_v48  ;;  %14354 = vmatprep.subr.bf16.mxu0 %v15062_v27  ;;  %v13953_v44 = vpop.f32.mrf.mxu1  ;;  %v13891_v35 = vadd.f32 %v13890_v22, %v13889_v10  ;;  %v15082_v27 = vld [vmem:[#allocation2 + $0x354] ss:$100 sps:$4 sm:$0xff]   ;;  %v15128_v15 = vld [vmem:[%s20961_s3 + $0x488] sm:$0xff]   ;;  %v15132_v48 = vld [vmem:[%s20961_s3 + $0x4c0] sm:$0xff]  }
 0x29e   :  { %6337 = vmatprep.mubr.bf16.mxu1 %v15061_v47  ;;  %14417 = vmatpush3.bf16.msra.mxu1 %v15095_v31  ;;  %v18281_v32 = vadd.f32 %v13952_v29, %v5693_v51  ;;  %v15075_v31 = vld [vmem:[#allocation2 + $0x290] ss:$100 sps:$4 sm:$0xff]   ;;  %v15123_v47 = vld [vmem:[%s20961_s3 + $0x400] sm:$0xff]  }
 0x29f   :  { %14418 = vmatprep.subr.bf16.mxu1 %v15096_v34  ;;  %v13954_v25 = vpop.f32.mrf.mxu1  ;;  %v5696_v58 = vadd.f32 %v18224_v54, %v13891_v35  ;;  %v15085_v34 = vld [vmem:[#allocation2 + $0x35c] ss:$100 sps:$4 sm:$0xff]   ;;  %v15102_v22 = vld [vmem:[#allocation2 + $0x4e4] ss:$100 sps:$4 sm:$0xff]   ;;  %v15106_v35 = vld [vmem:[#allocation2 + $0x4ec] ss:$100 sps:$4 sm:$0xff]  }
 0x2a0   :  { %14355 = vmatpush3.bf16.msra.mxu0 %v15063_v38  ;;  %v13955_v46 = vadd.f32 %v13954_v25, %v13953_v44  ;;  %v15134_v38 = vld [vmem:[%s20961_s3 + $0x578] sm:$0xff]   ;;  %v15104_v25 = vld [vmem:[#allocation2 + $0x4e8] ss:$100 sps:$4 sm:$0xff]  }
 0x2a1   :  { %14356 = vmatprep.subr.bf16.mxu0 %v15070_v33  ;;  %v15133_v33 = vld [vmem:[%s20961_s3 + $0x480] sm:$0xff]  }
 0x2a2   :  { %14419 = vmatpush3.bf16.msra.mxu1 %v15098_v28  ;;  %v18296_v36 = vadd.f32 %v13955_v46, %v5696_v58  ;;  %v15126_v58 = vld [vmem:[#allocation2 + $0x44] ss:$100 sps:$4 sm:$0xff]   ;;  %v15116_v46 = vld [vmem:[#allocation2 + $0x5b0] ss:$100 sps:$4 sm:$0xff]  }
 0x2a3   :  { %6241 = vmatmul.mubr.bf16.gmra.mxu0 %v15056_v8  ;;  %14420 = vmatprep.subr.bf16.mxu1 %v15103_v61  ;;  %v15171_v61 = vld [vmem:[%s20961_s3 + $0x5f8] sm:$0xff]   ;;  %v15080_v8 = vld [vmem:[#allocation2 + $0x350] ss:$100 sps:$4 sm:$0xff]  }
 0x2a4   :  { %6248 = vmatprep.mubr.bf16.mxu0 %v15066_v13  ;;  %14357 = vmatpush3.bf16.msra.mxu0 %v15071_v56 }
 0x2a5   :  { %6338 = vmatmul.mubr.bf16.gmra.mxu1 %v15059_v2  ;;  %14358 = vmatprep.subr.bf16.mxu0 %v15078_v59  ;;  %v15083_v2 = vld [vmem:[#allocation2 + $0x358] ss:$100 sps:$4 sm:$0xff]  }
 0x2a6   :  { %6345 = vmatprep.mubr.bf16.mxu1 %v15069_v43  ;;  %14421 = vmatpush3.bf16.msra.mxu1 %v15107_v11 }
 0x2a7   :  { %14422 = vmatprep.subr.bf16.mxu1 %v15108_v9  ;;  %v15094_v9 = vld [vmem:[#allocation2 + $0x424] ss:$100 sps:$4 sm:$0xff]  }
 0x2a8   :  { %14359 = vmatpush3.bf16.msra.mxu0 %v15079_v49 }
 0x2a9   :  { %14360 = vmatprep.subr.bf16.mxu0 %v15086_v20 }
 0x2aa   :  { %14423 = vmatpush3.bf16.msra.mxu1 %v15110_v23  ;;  %v15088_v23 = vld [vmem:[#allocation2 + $0x418] ss:$100 sps:$4 sm:$0xff]  }
 0x2ab   :  { %6249 = vmatmul.mubr.bf16.gmra.mxu0 %v15064_v45  ;;  %14424 = vmatprep.subr.bf16.mxu1 %v15115_v19  ;;  %v15092_v19 = vld [vmem:[#allocation2 + $0x420] ss:$100 sps:$4 sm:$0xff]   ;;  %v15114_v45 = vld [vmem:[#allocation2 + $0x5ac] ss:$100 sps:$4 sm:$0xff]  }
 0x2ac   :  { %6256 = vmatprep.mubr.bf16.mxu0 %v15074_v55  ;;  %14361 = vmatpush3.bf16.msra.mxu0 %v15087_v4  ;;  %v15100_v4 = vld [vmem:[#allocation2 + $0x4e0] ss:$100 sps:$4 sm:$0xff]   ;;  %v15112_v55 = vld [vmem:[#allocation2 + $0x5a8] ss:$100 sps:$4 sm:$0xff]  }
 0x2ad   :  { %6346 = vmatmul.mubr.bf16.gmra.mxu1 %v15067_v57  ;;  %14362 = vmatprep.subr.bf16.mxu0 %v15097_v0  ;;  %v15118_v0 = vld [vmem:[#allocation2 + $0x5b4] ss:$100 sps:$4 sm:$0xff]   ;;  %v15131_v57 = vld [vmem:[#allocation2 + $0x4c] ss:$100 sps:$4 sm:$0xff]  }
 0x2ae   :  { %6353 = vmatprep.mubr.bf16.mxu1 %v15077_v60  ;;  %14425 = vmatpush3.bf16.msra.mxu1 %v15119_v17 }
 0x2af   :  { %14426 = vmatprep.subr.bf16.mxu1 %v15120_v5 }
 0x2b0   :  { %14363 = vmatpush3.bf16.msra.mxu0 %v15099_v21  ;;  %v13892_v28 = vpop.f32.mrf.mxu0 }
 0x2b1   :  { %14364 = vmatprep.subr.bf16.mxu0 %v15109_v50 }
 0x2b2   :  { %14427 = vmatpush3.bf16.msra.mxu1 %v15122_v63  ;;  %v13956_v56 = vpop.f32.mrf.mxu1  ;;  %v13893_v59 = vpop.f32.mrf.mxu0 }
 0x2b3   :  { %6257 = vmatmul.mubr.bf16.gmra.mxu0 %v15072_v16  ;;  %14428 = vmatprep.subr.bf16.mxu1 %v15127_v42  ;;  %v13894_v13 = vadd.f32 %v13893_v59, %v13892_v28  ;;  %v15135_v16 = vld [vmem:[%s20961_s3 + $0x538] sm:$0xff]  }
 0x2b4   :  { %6264 = vmatprep.mubr.bf16.mxu0 %v15082_v27  ;;  %14365 = vmatpush3.bf16.msra.mxu0 %v15111_v3  ;;  %v13957_v11 = vpop.f32.mrf.mxu1  ;;  %v13895_v7 = vpop.f32.mrf.mxu0 }
 0x2b5   :  { %6354 = vmatmul.mubr.bf16.gmra.mxu1 %v15075_v31  ;;  %14366 = vmatprep.subr.bf16.mxu0 %v15121_v53  ;;  %v13958_v26 = vadd.f32 %v13957_v11, %v13956_v56  ;;  %v5701_v43 = vadd.f32 %v18224_v54, %v13894_v13  ;;  %v15124_v53 = vld [vmem:[#allocation2 + $0x40] ss:$100 sps:$4 sm:$0xff]   ;;  %v15142_v31 = vld [vmem:[%s20961_s3 + $0x570] sm:$0xff]  }
 0x2b6   :  { %6361 = vmatprep.mubr.bf16.mxu1 %v15085_v34  ;;  %14429 = vmatpush3.bf16.msra.mxu1 %v15128_v15  ;;  %v13959_v49 = vpop.f32.mrf.mxu1  ;;  %v13896_v62 = vpop.f32.mrf.mxu0  ;;  %v15176_v56 = vld [vmem:[%s20961_s3 + $0x5f0] sm:$0xff]  }
 0x2b7   :  { %14430 = vmatprep.subr.bf16.mxu1 %v15132_v48  ;;  %v18335_v10 = vadd.f32 %v13958_v26, %v5701_v43  ;;  %v13897_v30 = vadd.f32 %v13896_v62, %v13895_v7  ;;  %v15143_v13 = vld [vmem:[%s20961_s3 + $0x530] sm:$0xff]   ;;  %v15150_v7 = vld [vmem:[%s20961_s3 + $0x568] sm:$0xff]  }
 0x2b8   :  { %14367 = vmatpush3.bf16.msra.mxu0 %v15123_v47  ;;  %v13960_v20 = vpop.f32.mrf.mxu1  ;;  %v15138_v47 = vld [vmem:[#allocation2 + $0x10c] ss:$100 sps:$4 sm:$0xff]  }
 0x2b9   :  { %14480 = vmatprep.subr.bf16.mxu0 %v15134_v38  ;;  %v13961_v51 = vadd.f32 %v13960_v20, %v13959_v49  ;;  %v5704_v29 = vadd.f32 %v18224_v54, %v13897_v30  ;;  %v15175_v38 = vld [vmem:[%s20961_s3 + $0x5b8] sm:$0xff]   ;;  %v15183_v62 = vld [vmem:[%s20961_s3 + $0x5e8] sm:$0xff]  }
 0x2ba   :  { %14431 = vmatpush3.bf16.msra.mxu1 %v15133_v33  ;;  %v15129_v33 = vld [vmem:[#allocation2 + $0x48] ss:$100 sps:$4 sm:$0xff]  }
 0x2bb   :  { %6265 = vmatmul.mubr.bf16.gmra.mxu0 %v15080_v8  ;;  %14544 = vmatprep.subr.bf16.mxu1 %v15171_v61  ;;  %v18338_v44 = vadd.f32 %v13961_v51, %v5704_v29  ;;  %v15151_v51 = vld [vmem:[%s20961_s3 + $0x528] sm:$0xff]  }
 0x2bc   :  { %6272 = vmatprep.mubr.bf16.mxu0 %v15090_v40  ;;  %v15141_v40 = vld [vmem:[#allocation2 + $0x114] ss:$100 sps:$4 sm:$0xff]   ;;  %v15136_v29 = vld [vmem:[#allocation2 + $0x108] ss:$100 sps:$4 sm:$0xff]  }
 0x2bd   :  { %6362 = vmatmul.mubr.bf16.gmra.mxu1 %v15083_v2 }
 0x2be   :  { %6369 = vmatprep.mubr.bf16.mxu1 %v15094_v9 }
 0x2c3   :  { %6273 = vmatmul.mubr.bf16.gmra.mxu0 %v15088_v23 }
 0x2c4   :  { %6280 = vmatprep.mubr.bf16.mxu0 %v15102_v22 }
 0x2c5   :  { %6370 = vmatmul.mubr.bf16.gmra.mxu1 %v15092_v19  ;;  %v15158_v19 = vld [vmem:[%s20961_s3 + $0x560] sm:$0xff]  }
 0x2c6   :  { %6377 = vmatprep.mubr.bf16.mxu1 %v15106_v35 }
 0x2cb   :  { %6281 = vmatmul.mubr.bf16.gmra.mxu0 %v15100_v4 }
 0x2cc   :  { %6288 = vmatprep.mubr.bf16.mxu0 %v15114_v45  ;;  %v15146_v45 = vld [vmem:[#allocation2 + $0x1d4] ss:$100 sps:$4 sm:$0xff]  }
 0x2cd   :  { %6378 = vmatmul.mubr.bf16.gmra.mxu1 %v15104_v25  ;;  %v15139_v25 = vld [vmem:[#allocation2 + $0x110] ss:$100 sps:$4 sm:$0xff]  }
 0x2ce   :  { %6385 = vmatprep.mubr.bf16.mxu1 %v15118_v0 }
 0x2d0   :  { %v13898_v17 = vpop.f32.mrf.mxu0 }
 0x2d2   :  { %v13899_v5 = vpop.f32.mrf.mxu0 }
 0x2d3   :  { %6289 = vmatmul.mubr.bf16.gmra.mxu0 %v15112_v55  ;;  %v13962_v60 = vpop.f32.mrf.mxu1  ;;  %v13900_v21 = vadd.f32 %v13899_v5, %v13898_v17  ;;  %v15159_v5 = vld [vmem:[%s20961_s3 + $0x520] sm:$0xff]  }
 0x2d4   :  { %6426 = vmatprep.mubr.bf16.mxu0 %v15126_v58  ;;  %v13901_v50 = vpop.f32.mrf.mxu0  ;;  %v15188_v58 = vld [vmem:[%s20961_s3 + $0x5e0] sm:$0xff]  }
 0x2d5   :  { %6386 = vmatmul.mubr.bf16.gmra.mxu1 %v15116_v46  ;;  %v13963_v63 = vpop.f32.mrf.mxu1  ;;  %v5709_v42 = vadd.f32 %v18224_v54, %v13900_v21 }
 0x2d6   :  { %6523 = vmatprep.mubr.bf16.mxu1 %v15131_v57  ;;  %v13964_v3 = vadd.f32 %v13963_v63, %v13962_v60  ;;  %v13902_v27 = vpop.f32.mrf.mxu0  ;;  %v15149_v57 = vld [vmem:[#allocation2 + $0x1dc] ss:$100 sps:$4 sm:$0xff]  }
 0x2d7   :  { %v13965_v15 = vpop.f32.mrf.mxu1  ;;  %v13903_v34 = vadd.f32 %v13902_v27, %v13901_v50  ;;  %v15166_v50 = vld [vmem:[%s20961_s3 + $0x558] sm:$0xff]  }
 0x2d8   :  { %v18347_v48 = vadd.f32 %v13964_v3, %v5709_v42  ;;  %v13984_v61 = vpop.f32.mrf.mxu0 }
 0x2d9   :  { %v13966_v28 = vpop.f32.mrf.mxu1  ;;  %v5712_v8 = vadd.f32 %v18224_v54, %v13903_v34  ;;  %v15178_v54 = vld [vmem:[%s20961_s3 + $0x5b0] sm:$0xff]  }
 0x2da   :  { %v13967_v59 = vadd.f32 %v13966_v28, %v13965_v15  ;;  %v13985_v11 = vpop.f32.mrf.mxu0  ;;  %v15144_v34 = vld [vmem:[#allocation2 + $0x1d0] ss:$100 sps:$4 sm:$0xff]  }
 0x2db   :  { %6427 = vmatmul.mubr.bf16.vlgmr.msra.gmra.mxu0 %v15124_v53  ;;  %v14048_v2 = vpop.f32.mrf.mxu1  ;;  %v13986_v9 = vadd.f32 %v13985_v11, %v13984_v61  ;;  %v15195_v53 = vld [vmem:[%s20961_s3 + $0x5d8] sm:$0xff]  }
 0x2dc   :  { %14481 = vmatpush3.bf16.msra.mxu0 %v15135_v16  ;;  %6434 = vmatprep.mubr.bf16.mxu0 %v15138_v47  ;;  %v18362_v26 = vadd.f32 %v13967_v59, %v5712_v8  ;;  %v13987_v43 = vpop.f32.mrf.mxu0  ;;  %v15147_v8 = vld [vmem:[#allocation2 + $0x1d8] ss:$100 sps:$4 sm:$0xff]  }
 0x2dd   :  { %6524 = vmatmul.mubr.bf16.vlgmr.msra.gmra.mxu1 %v15129_v33  ;;  %14482 = vmatprep.subr.bf16.mxu0 %v15142_v31  ;;  %v14049_v49 = vpop.f32.mrf.mxu1  ;;  %v5847_v30 = vadd.f32 %v13986_v9, %v18018_v18  ;;  %v15187_v18 = vld [vmem:[%s20961_s3 + $0x5a8] sm:$0xff]   ;;  %v15167_v31 = vld [vmem:[%s20961_s3 + $0x518] sm:$0xff]   ;;  %v15177_v33 = vld [vmem:[%s20961_s3 + $0x550] sm:$0xff]  }
 0x2de   :  { %6531 = vmatprep.mubr.bf16.mxu1 %v15141_v40  ;;  %14545 = vmatpush3.bf16.msra.mxu1 %v15175_v38  ;;  %v14050_v20 = vadd.f32 %v14049_v49, %v14048_v2  ;;  %v13988_v23 = vpop.f32.mrf.mxu0  ;;  %v15179_v9 = vld [vmem:[%s20961_s3 + $0x510] sm:$0xff]   ;;  %v15189_v49 = vld [vmem:[%s20961_s3 + $0x548] sm:$0xff]  }
 0x2df   :  { %14546 = vmatprep.subr.bf16.mxu1 %v15176_v56  ;;  %v14051_v22 = vpop.f32.mrf.mxu1  ;;  %v13989_v4 = vadd.f32 %v13988_v23, %v13987_v43  ;;  %v15154_v56 = vld [vmem:[#allocation2 + $0x29c] ss:$100 sps:$4 sm:$0xff]  }
 0x2e0   :  { %14483 = vmatpush3.bf16.msra.mxu0 %v15143_v13  ;;  %v18377_v35 = vadd.f32 %v14050_v20, %v5847_v30  ;;  %v15200_v13 = vld [vmem:[%s20961_s3 + $0x5d0] sm:$0xff]  }
 0x2e1   :  { %14484 = vmatprep.subr.bf16.mxu0 %v15150_v7  ;;  %v13990_v0 = vpop.f32.mrf.mxu0  ;;  %v14052_v55 = vpop.f32.mrf.mxu1  ;;  %v5850_v46 = vadd.f32 %v13989_v4, %v18062_v37  ;;  %v15190_v37 = vld [vmem:[%s20961_s3 + $0x5a0] sm:$0xff]   ;;  %v15152_v4 = vld [vmem:[#allocation2 + $0x298] ss:$100 sps:$4 sm:$0xff]  }
 0x2e2   :  { %14547 = vmatpush3.bf16.msra.mxu1 %v15178_v54  ;;  %v14053_v17 = vadd.f32 %v14052_v55, %v14051_v22  ;;  %v15157_v7 = vld [vmem:[#allocation2 + $0x2a4] ss:$100 sps:$4 sm:$0xff]  }
 0x2e3   :  { %6435 = vmatmul.mubr.bf16.gmra.mxu0 %v15136_v29  ;;  %14548 = vmatprep.subr.bf16.mxu1 %v15183_v62  ;;  %v13991_v60 = vpop.f32.mrf.mxu0  ;;  %v15207_v29 = vld [vmem:[%s20961_s3 + $0x5c8] sm:$0xff]  }
 0x2e4   :  { %6442 = vmatprep.mubr.bf16.mxu0 %v15146_v45  ;;  %14485 = vmatpush3.bf16.msra.mxu0 %v15151_v51  ;;  %v14054_v21 = vpop.f32.mrf.mxu1  ;;  %v18392_v63 = vadd.f32 %v14053_v17, %v5850_v46  ;;  %v13992_v42 = vadd.f32 %v13991_v60, %v13990_v0  ;;  %v15155_v46 = vld [vmem:[#allocation2 + $0x2a0] ss:$100 sps:$4 sm:$0xff]  }
 0x2e5   :  { %6532 = vmatmul.mubr.bf16.gmra.mxu1 %v15139_v25  ;;  %14486 = vmatprep.subr.bf16.mxu0 %v15158_v19  ;;  %v13993_v3 = vpop.f32.mrf.mxu0  ;;  %v15191_v19 = vld [vmem:[%s20961_s3 + $0x508] sm:$0xff]   ;;  %v15201_v25 = vld [vmem:[%s20961_s3 + $0x540] sm:$0xff]  }
 0x2e6   :  { %6539 = vmatprep.mubr.bf16.mxu1 %v15149_v57  ;;  %14549 = vmatpush3.bf16.msra.mxu1 %v15187_v18  ;;  %v14055_v16 = vpop.f32.mrf.mxu1  ;;  %v5855_v27 = vadd.f32 %v13992_v42, %v18080_v6  ;;  %v15199_v6 = vld [vmem:[%s20961_s3 + $0x598] sm:$0xff]   ;;  %v15203_v42 = vld [vmem:[%s20961_s3 + $0x500] sm:$0xff]  }
 0x2e7   :  { %14550 = vmatprep.subr.bf16.mxu1 %v15188_v58  ;;  %v14056_v15 = vadd.f32 %v14055_v16, %v14054_v21  ;;  %v13994_v47 = vpop.f32.mrf.mxu0  ;;  %v15162_v58 = vld [vmem:[#allocation2 + $0x364] ss:$100 sps:$4 sm:$0xff]   ;;  %v18452_v16 = vld [vmem:[%s20961_s3 + $0x638] sm:$0xff]  }
 0x2e8   :  { %14487 = vmatpush3.bf16.msra.mxu0 %v15159_v5  ;;  %v14057_v38 = vpop.f32.mrf.mxu1  ;;  %v13995_v61 = vadd.f32 %v13994_v47, %v13993_v3  ;;  %v15212_v5 = vld [vmem:[%s20961_s3 + $0x5c0] sm:$0xff]  }
 0x2e9   :  { %14488 = vmatprep.subr.bf16.mxu0 %v15166_v50  ;;  %v18407_v28 = vadd.f32 %v14056_v15, %v5855_v27  ;;  %v13996_v59 = vpop.f32.mrf.mxu0  ;;  %v15165_v50 = vld [vmem:[#allocation2 + $0x36c] ss:$100 sps:$4 sm:$0xff]   ;;  %v15213_v27 = vld [vmem:[%s20961_s3 + $0x580] sm:$0xff]  }
 0x2ea   :  { %14551 = vmatpush3.bf16.msra.mxu1 %v15190_v37  ;;  %v14058_v40 = vpop.f32.mrf.mxu1  ;;  %v5858_v11 = vadd.f32 %v13995_v61, %v18102_v52  ;;  %v15202_v52 = vld [vmem:[%s20961_s3 + $0x590] sm:$0xff]  }
 0x2eb   :  { %6443 = vmatmul.mubr.bf16.gmra.mxu0 %v15144_v34  ;;  %14552 = vmatprep.subr.bf16.mxu1 %v15195_v53  ;;  %v14059_v2 = vadd.f32 %v14058_v40, %v14057_v38  ;;  %v13997_v54 = vpop.f32.mrf.mxu0  ;;  %v15160_v38 = vld [vmem:[#allocation2 + $0x360] ss:$100 sps:$4 sm:$0xff]  }
 0x2ec   :  { %6450 = vmatprep.mubr.bf16.mxu0 %v15154_v56  ;;  %14489 = vmatpush3.bf16.msra.mxu0 %v15167_v31  ;;  %v14060_v43 = vpop.f32.mrf.mxu1  ;;  %v13998_v30 = vadd.f32 %v13997_v54, %v13996_v59  ;;  %v15163_v59 = vld [vmem:[#allocation2 + $0x368] ss:$100 sps:$4 sm:$0xff]  }
 0x2ed   :  { %6540 = vmatmul.mubr.bf16.gmra.mxu1 %v15147_v8  ;;  %14490 = vmatprep.subr.bf16.mxu0 %v15177_v33  ;;  %v18422_v62 = vadd.f32 %v14059_v2, %v5858_v11  ;;  %v13999_v20 = vpop.f32.mrf.mxu0  ;;  %v15170_v8 = vld [vmem:[#allocation2 + $0x42c] ss:$100 sps:$4 sm:$0xff]  }
 0x2ee   :  { %6547 = vmatprep.mubr.bf16.mxu1 %v15157_v7  ;;  %14553 = vmatpush3.bf16.msra.mxu1 %v15199_v6  ;;  %v14061_v51 = vpop.f32.mrf.mxu1  ;;  %v5863_v23 = vadd.f32 %v13998_v30, %v18112_v41  ;;  %v15208_v41 = vld [vmem:[%s20961_s3 + $0x588] sm:$0xff]  }
 0x2ef   :  { %14554 = vmatprep.subr.bf16.mxu1 %v15200_v13  ;;  %v14062_v22 = vadd.f32 %v14061_v51, %v14060_v43  ;;  %v14000_v45 = vpop.f32.mrf.mxu0  ;;  %v15168_v51 = vld [vmem:[#allocation2 + $0x428] ss:$100 sps:$4 sm:$0xff]  }
 0x2f0   :  { %14491 = vmatpush3.bf16.msra.mxu0 %v15179_v9  ;;  %v14063_v18 = vpop.f32.mrf.mxu1  ;;  %v14001_v55 = vadd.f32 %v14000_v45, %v13999_v20 }
 0x2f1   :  { %14492 = vmatprep.subr.bf16.mxu0 %v15189_v49  ;;  %v18437_v0 = vadd.f32 %v14062_v22, %v5863_v23  ;;  %v14002_v17 = vpop.f32.mrf.mxu0 }
 0x2f2   :  { %14555 = vmatpush3.bf16.msra.mxu1 %v15202_v52  ;;  %v14064_v57 = vpop.f32.mrf.mxu1  ;;  %v5866_v60 = vadd.f32 %v14001_v55, %v18117_v12 }
 0x2f3   :  { %6451 = vmatmul.mubr.bf16.gmra.mxu0 %v15152_v4  ;;  %14556 = vmatprep.subr.bf16.mxu1 %v15207_v29  ;;  %v14065_v21 = vadd.f32 %v14064_v57, %v14063_v18  ;;  %v14003_v37 = vpop.f32.mrf.mxu0  ;;  %v15172_v4 = vld [vmem:[#allocation2 + $0x430] ss:$100 sps:$4 sm:$0xff]  }
 0x2f4   :  { %6458 = vmatprep.mubr.bf16.mxu0 %v15162_v58  ;;  %14493 = vmatpush3.bf16.msra.mxu0 %v15191_v19  ;;  %v14066_v3 = vpop.f32.mrf.mxu1  ;;  %v14004_v12 = vadd.f32 %v14003_v37, %v14002_v17  ;;  %v15182_v19 = vld [vmem:[#allocation2 + $0x4f4] ss:$100 sps:$4 sm:$0xff]   ;;  %v15186_v58 = vld [vmem:[#allocation2 + $0x4fc] ss:$100 sps:$4 sm:$0xff]  }
 0x2f5   :  { %6548 = vmatmul.mubr.bf16.gmra.mxu1 %v15155_v46  ;;  %14494 = vmatprep.subr.bf16.mxu0 %v15201_v25  ;;  %v18454_v53 = vadd.f32 %v14065_v21, %v5866_v60  ;;  %v14005_v15 = vpop.f32.mrf.mxu0 }
 0x2f6   :  { %6555 = vmatprep.mubr.bf16.mxu1 %v15165_v50  ;;  %14557 = vmatpush3.bf16.msra.mxu1 %v15208_v41  ;;  %v14067_v31 = vpop.f32.mrf.mxu1  ;;  %v5871_v34 = vadd.f32 %v14004_v12, %v18120_v1  ;;  %v15174_v1 = vld [vmem:[#allocation2 + $0x434] ss:$100 sps:$4 sm:$0xff]   ;;  %v15194_v12 = vld [vmem:[#allocation2 + $0x5bc] ss:$100 sps:$4 sm:$0xff]  }
 0x2f7   :  { %14558 = vmatprep.subr.bf16.mxu1 %v15212_v5  ;;  %v14068_v47 = vadd.f32 %v14067_v31, %v14066_v3  ;;  %v14006_v33 = vpop.f32.mrf.mxu0  ;;  %v15180_v50 = vld [vmem:[#allocation2 + $0x4f0] ss:$100 sps:$4 sm:$0xff]  }
 0x2f8   :  { %14495 = vmatpush3.bf16.msra.mxu0 %v15203_v42  ;;  %v14069_v61 = vpop.f32.mrf.mxu1  ;;  %v14007_v6 = vadd.f32 %v14006_v33, %v14005_v15 }
 0x2f9   :  { %14668 = vmatprep.subr.bf16.mxu0 %v18452_v16  ;;  %v18461_v56 = vadd.f32 %v14068_v47, %v5871_v34 }
 0x2fa   :  { %14559 = vmatpush3.bf16.msra.mxu1 %v15213_v27  ;;  %v14070_v13 = vpop.f32.mrf.mxu1  ;;  %v5874_v11 = vadd.f32 %v14007_v6, %v18123_v39  ;;  %v15184_v27 = vld [vmem:[#allocation2 + $0x4f8] ss:$100 sps:$4 sm:$0xff]  }
 0x2fb   :  { %v14008_v40 = vpop.f32.mrf.mxu0  ;;  %6459 = vmatmul.mubr.bf16.gmra.mxu0 %v15160_v38  ;;  %v14071_v2 = vadd.f32 %v14070_v13, %v14069_v61  ;;  %v15198_v38 = vld [vmem:[#allocation2 + $0x5c4] ss:$100 sps:$4 sm:$0xff]  }
 0x2fc   :  { %6466 = vmatprep.mubr.bf16.mxu0 %v15170_v8 }
 0x2fd   :  { %v14009_v7 = vpop.f32.mrf.mxu0  ;;  %v14072_v9 = vpop.f32.mrf.mxu1  ;;  %6556 = vmatmul.mubr.bf16.gmra.mxu1 %v15163_v59  ;;  %v18464_v54 = vadd.f32 %v14071_v2, %v5874_v11  ;;  %v15192_v11 = vld [vmem:[#allocation2 + $0x5b8] ss:$100 sps:$4 sm:$0xff]  }
 0x2fe   :  { %v14010_v43 = vadd.f32 %v14009_v7, %v14008_v40  ;;  %6563 = vmatprep.mubr.bf16.mxu1 %v15174_v1 }
 0x2ff   :  { %v14011_v49 = vpop.f32.mrf.mxu0  ;;  %v14073_v30 = vpop.f32.mrf.mxu1 }
 0x300   :  { %v5879_v52 = vadd.f32 %v14010_v43, %v18227_v14  ;;  %v14074_v20 = vadd.f32 %v14073_v30, %v14072_v9  ;;  %v15206_v9 = vld [vmem:[#allocation2 + $0x54] ss:$100 sps:$4 sm:$0xff]   ;;  %v15196_v43 = vld [vmem:[#allocation2 + $0x5c0] ss:$100 sps:$4 sm:$0xff]  }
 0x301   :  { %v14012_v29 = vpop.f32.mrf.mxu0  ;;  %v14075_v23 = vpop.f32.mrf.mxu1 }
 0x302   :  { %v18467_v22 = vadd.f32 %v14074_v20, %v5879_v52  ;;  %v14013_v39 = vadd.f32 %v14012_v29, %v14011_v49 }
 0x303   :  { %v14014_v45 = vpop.f32.mrf.mxu0  ;;  %v14076_v18 = vpop.f32.mrf.mxu1  ;;  %6467 = vmatmul.mubr.bf16.gmra.mxu0 %v15168_v51  ;;  %v15211_v51 = vld [vmem:[#allocation2 + $0x5c] ss:$100 sps:$4 sm:$0xff]  }
 0x304   :  { %v5882_v25 = vadd.f32 %v14013_v39, %v18230_v24  ;;  %v14077_v55 = vadd.f32 %v14076_v18, %v14075_v23  ;;  %6474 = vmatprep.mubr.bf16.mxu0 %v15182_v19 }
 0x305   :  { %v14015_v41 = vpop.f32.mrf.mxu0  ;;  %v14078_v46 = vpop.f32.mrf.mxu1  ;;  %6564 = vmatmul.mubr.bf16.gmra.mxu1 %v15172_v4 }
 0x306   :  { %v18470_v14 = vadd.f32 %v14077_v55, %v5882_v25  ;;  %v14016_v17 = vadd.f32 %v14015_v41, %v14014_v45  ;;  %6571 = vmatprep.mubr.bf16.mxu1 %v15186_v58  ;;  %v15204_v25 = vld [vmem:[#allocation2 + $0x50] ss:$100 sps:$4 sm:$0xff]  }
 0x307   :  { %v14017_v57 = vpop.f32.mrf.mxu0  ;;  %v14079_v5 = vpop.f32.mrf.mxu1 }
 0x308   :  { %v5887_v60 = vadd.f32 %v14016_v17, %v18281_v32  ;;  %v14080_v21 = vadd.f32 %v14079_v5, %v14078_v46  ;;  %v15217_v17 = vld [vmem:[#allocation2 + $0x11c] ss:$100 sps:$4 sm:$0xff]  }
 0x309   :  { %v14018_v42 = vpop.f32.mrf.mxu0  ;;  %v14081_v37 = vpop.f32.mrf.mxu1 }
 0x30a   :  { %v18473_v3 = vadd.f32 %v14080_v21, %v5887_v60  ;;  %v14019_v24 = vadd.f32 %v14018_v42, %v14017_v57  ;;  %v15209_v57 = vld [vmem:[#allocation2 + $0x58] ss:$100 sps:$4 sm:$0xff]  }
 0x30b   :  { %v14020_v15 = vpop.f32.mrf.mxu0  ;;  %v14082_v31 = vpop.f32.mrf.mxu1  ;;  %6475 = vmatmul.mubr.bf16.gmra.mxu0 %v15180_v50 }
 0x30c   :  { %v5890_v34 = vadd.f32 %v14019_v24, %v18296_v36  ;;  %v14083_v47 = vadd.f32 %v14082_v31, %v14081_v37  ;;  %6482 = vmatprep.mubr.bf16.mxu0 %v15194_v12  ;;  %v15228_v24 = vld [vmem:[%s20961_s3 + $0x628] sm:$0xff]  }
 0x30d   :  { %v14021_v33 = vpop.f32.mrf.mxu0  ;;  %v14084_v61 = vpop.f32.mrf.mxu1  ;;  %6572 = vmatmul.mubr.bf16.gmra.mxu1 %v15184_v27 }
 0x30e   :  { %v18476_v32 = vadd.f32 %v14083_v47, %v5890_v34  ;;  %v14022_v6 = vadd.f32 %v14021_v33, %v14020_v15  ;;  %6579 = vmatprep.mubr.bf16.mxu1 %v15198_v38  ;;  %v15235_v33 = vld [vmem:[%s20961_s3 + $0x620] sm:$0xff]  }
 0x30f   :  { %v14023_v8 = vpop.f32.mrf.mxu0  ;;  %v14085_v59 = vpop.f32.mrf.mxu1 }
 0x310   :  { %v5895_v40 = vadd.f32 %v14022_v6, %v18335_v10  ;;  %v14086_v13 = vadd.f32 %v14085_v59, %v14084_v61  ;;  %v15218_v59 = vld [vmem:[#allocation2 + $0x120] ss:$100 sps:$4 sm:$0xff]  }
 0x311   :  { %v14024_v2 = vpop.f32.mrf.mxu0  ;;  %v14087_v1 = vpop.f32.mrf.mxu1 }
 0x312   :  { %v18479_v7 = vadd.f32 %v14086_v13, %v5895_v40  ;;  %v14025_v36 = vadd.f32 %v14024_v2, %v14023_v8  ;;  %v15224_v8 = vld [vmem:[#allocation2 + $0x1e4] ss:$100 sps:$4 sm:$0xff]   ;;  %v15227_v2 = vld [vmem:[#allocation2 + $0x1ec] ss:$100 sps:$4 sm:$0xff]  }
 0x313   :  { %v14026_v49 = vpop.f32.mrf.mxu0  ;;  %v14088_v30 = vpop.f32.mrf.mxu1  ;;  %6483 = vmatmul.mubr.bf16.gmra.mxu0 %v15192_v11 }
 0x314   :  { %v5898_v52 = vadd.f32 %v14025_v36, %v18338_v44  ;;  %v14089_v20 = vadd.f32 %v14088_v30, %v14087_v1  ;;  %6620 = vmatprep.mubr.bf16.mxu0 %v15206_v9  ;;  %v15221_v44 = vld [vmem:[%s20961_s3 + $0x630] sm:$0xff]   ;;  %v15242_v9 = vld [vmem:[%s20961_s3 + $0x618] sm:$0xff]  }
 0x315   :  { %v14027_v29 = vpop.f32.mrf.mxu0  ;;  %v14090_v23 = vpop.f32.mrf.mxu1  ;;  %6580 = vmatmul.mubr.bf16.gmra.mxu1 %v15196_v43 }
 0x316   :  { %v18482_v10 = vadd.f32 %v14089_v20, %v5898_v52  ;;  %v14028_v39 = vadd.f32 %v14027_v29, %v14026_v49  ;;  %6717 = vmatprep.mubr.bf16.mxu1 %v15211_v51  ;;  %v15222_v51 = vld [vmem:[#allocation2 + $0x1e0] ss:$100 sps:$4 sm:$0xff]  }
 0x317   :  { %v14029_v19 = vpop.f32.mrf.mxu0  ;;  %v14091_v4 = vpop.f32.mrf.mxu1 }
 0x318   :  { %v5903_v45 = vadd.f32 %v14028_v39, %v18347_v48  ;;  %v14092_v18 = vadd.f32 %v14091_v4, %v14090_v23  ;;  %v15220_v48 = vld [vmem:[#allocation2 + $0x124] ss:$100 sps:$4 sm:$0xff]   ;;  %v15249_v39 = vld [vmem:[%s20961_s3 + $0x610] sm:$0xff]  }
 0x319   :  { %v14030_v55 = vpop.f32.mrf.mxu0  ;;  %v14093_v58 = vpop.f32.mrf.mxu1 }
 0x31a   :  { %v18488_v41 = vadd.f32 %v14092_v18, %v5903_v45  ;;  %v14031_v46 = vadd.f32 %v14030_v55, %v14029_v19  ;;  %v15231_v45 = vld [vmem:[#allocation2 + $0x2ac] ss:$100 sps:$4 sm:$0xff]  }
 0x31b   :  { %v14094_v5 = vpop.f32.mrf.mxu1  ;;  %v14112_v60 = vpop.f32.mrf.mxu0  ;;  %6621 = vmatmul.mubr.bf16.vlgmr.msra.gmra.mxu0 %v15204_v25  ;;  %v15225_v18 = vld [vmem:[#allocation2 + $0x1e8] ss:$100 sps:$4 sm:$0xff]  }
 0x31c   :  { %v5906_v21 = vadd.f32 %v14031_v46, %v18362_v26  ;;  %v14095_v50 = vadd.f32 %v14094_v5, %v14093_v58  ;;  %14669 = vmatpush3.bf16.msra.mxu0 %v18452_v16  ;;  %6628 = vmatprep.mubr.bf16.mxu0 %v15217_v17  ;;  %v15215_v16 = vld [vmem:[#allocation2 + $0x118] ss:$100 sps:$4 sm:$0xff]  }
 0x31d   :  { %v14113_v42 = vpop.f32.mrf.mxu0  ;;  %v14176_v37 = vpop.f32.mrf.mxu1  ;;  %6718 = vmatmul.mubr.bf16.vlgmr.msra.gmra.mxu1 %v15209_v57  ;;  %14670 = vmatprep.subr.bf16.mxu0 %v15221_v44  ;;  %v15256_v57 = vld [vmem:[%s20961_s3 + $0x608] sm:$0xff]  }
 0x31e   :  { %v18495_v12 = vadd.f32 %v14095_v50, %v5906_v21  ;;  %v14114_v27 = vadd.f32 %v14113_v42, %v14112_v60  ;;  %6725 = vmatprep.mubr.bf16.mxu1 %v15220_v48  ;;  %v15229_v42 = vld [vmem:[#allocation2 + $0x2a8] ss:$100 sps:$4 sm:$0xff]  }
 0x31f   :  { %v14115_v15 = vpop.f32.mrf.mxu0  ;;  %v14177_v31 = vpop.f32.mrf.mxu1 }
 0x320   :  { %v6041_v26 = vadd.f32 %v14114_v27, %v18377_v35  ;;  %v14178_v34 = vadd.f32 %v14177_v31, %v14176_v37  ;;  %14671 = vmatpush3.bf16.msra.mxu0 %v15221_v44  ;;  %v15234_v44 = vld [vmem:[#allocation2 + $0x2b4] ss:$100 sps:$4 sm:$0xff]   ;;  %v15263_v27 = vld [vmem:[%s20961_s3 + $0x600] sm:$0xff]  }
 0x321   :  { %v14116_v47 = vpop.f32.mrf.mxu0  ;;  %v14179_v38 = vpop.f32.mrf.mxu1  ;;  %14672 = vmatprep.subr.bf16.mxu0 %v15228_v24 }
 0x322   :  { %v18501_v61 = vadd.f32 %v14178_v34, %v6041_v26  ;;  %v14117_v6 = vadd.f32 %v14116_v47, %v14115_v15  ;;  %v15238_v26 = vld [vmem:[#allocation2 + $0x374] ss:$100 sps:$4 sm:$0xff]  }
 0x323   :  { %v14118_v40 = vpop.f32.mrf.mxu0  ;;  %v14180_v13 = vpop.f32.mrf.mxu1  ;;  %6629 = vmatmul.mubr.bf16.gmra.mxu0 %v15215_v16  ;;  %v15232_v34 = vld [vmem:[#allocation2 + $0x2b0] ss:$100 sps:$4 sm:$0xff]  }
 0x324   :  { %v6044_v35 = vadd.f32 %v14117_v6, %v18392_v63  ;;  %v14181_v11 = vadd.f32 %v14180_v13, %v14179_v38  ;;  %6636 = vmatprep.mubr.bf16.mxu0 %v15224_v8  ;;  %14673 = vmatpush3.bf16.msra.mxu0 %v15228_v24 }
 0x325   :  { %v14119_v1 = vpop.f32.mrf.mxu0  ;;  %v14182_v36 = vpop.f32.mrf.mxu1  ;;  %6726 = vmatmul.mubr.bf16.gmra.mxu1 %v15218_v59  ;;  %14674 = vmatprep.subr.bf16.mxu0 %v15235_v33 }
 0x326   :  { %v18507_v43 = vadd.f32 %v14181_v11, %v6044_v35  ;;  %v14120_v49 = vadd.f32 %v14119_v1, %v14118_v40  ;;  %6733 = vmatprep.mubr.bf16.mxu1 %v15227_v2  ;;  %v15236_v1 = vld [vmem:[#allocation2 + $0x370] ss:$100 sps:$4 sm:$0xff]  }
 0x327   :  { %v14121_v30 = vpop.f32.mrf.mxu0  ;;  %v14183_v52 = vpop.f32.mrf.mxu1 }
 0x328   :  { %v6049_v63 = vadd.f32 %v14120_v49, %v18407_v28  ;;  %v14184_v20 = vadd.f32 %v14183_v52, %v14182_v36  ;;  %14675 = vmatpush3.bf16.msra.mxu0 %v15235_v33  ;;  %v15241_v33 = vld [vmem:[#allocation2 + $0x37c] ss:$100 sps:$4 sm:$0xff]  }
 0x329   :  { %v14122_v29 = vpop.f32.mrf.mxu0  ;;  %v14185_v23 = vpop.f32.mrf.mxu1  ;;  %14676 = vmatprep.subr.bf16.mxu0 %v15242_v9  ;;  %v15239_v52 = vld [vmem:[#allocation2 + $0x378] ss:$100 sps:$4 sm:$0xff]  }
 0x32a   :  { %v18513_v19 = vadd.f32 %v14184_v20, %v6049_v63  ;;  %v14123_v4 = vadd.f32 %v14122_v29, %v14121_v30  ;;  %v15245_v30 = vld [vmem:[#allocation2 + $0x43c] ss:$100 sps:$4 sm:$0xff]  }
 0x32b   :  { %v14124_v25 = vpop.f32.mrf.mxu0  ;;  %v14186_v55 = vpop.f32.mrf.mxu1  ;;  %6637 = vmatmul.mubr.bf16.gmra.mxu0 %v15222_v51 }
 0x32c   :  { %v6052_v28 = vadd.f32 %v14123_v4, %v18422_v62  ;;  %v14187_v58 = vadd.f32 %v14186_v55, %v14185_v23  ;;  %6644 = vmatprep.mubr.bf16.mxu0 %v15231_v45  ;;  %14677 = vmatpush3.bf16.msra.mxu0 %v15242_v9  ;;  %v15248_v23 = vld [vmem:[#allocation2 + $0x444] ss:$100 sps:$4 sm:$0xff]  }
 0x32d   :  { %v14125_v46 = vpop.f32.mrf.mxu0  ;;  %v14188_v17 = vpop.f32.mrf.mxu1  ;;  %6734 = vmatmul.mubr.bf16.gmra.mxu1 %v15225_v18  ;;  %14678 = vmatprep.subr.bf16.mxu0 %v15249_v39 }
 0x32e   :  { %v18519_v5 = vadd.f32 %v14187_v58, %v6052_v28  ;;  %v14126_v60 = vadd.f32 %v14125_v46, %v14124_v25  ;;  %6741 = vmatprep.mubr.bf16.mxu1 %v15234_v44  ;;  %v15243_v58 = vld [vmem:[#allocation2 + $0x438] ss:$100 sps:$4 sm:$0xff]  }
 0x32f   :  { %v14127_v21 = vpop.f32.mrf.mxu0  ;;  %v14189_v50 = vpop.f32.mrf.mxu1 }
 0x330   :  { %v6057_v62 = vadd.f32 %v14126_v60, %v18437_v0  ;;  %v14190_v48 = vadd.f32 %v14189_v50, %v14188_v17  ;;  %14679 = vmatpush3.bf16.msra.mxu0 %v15249_v39  ;;  %v15246_v60 = vld [vmem:[#allocation2 + $0x440] ss:$100 sps:$4 sm:$0xff]  }
 0x331   :  { %v14128_v37 = vpop.f32.mrf.mxu0  ;;  %v14191_v24 = vpop.f32.mrf.mxu1  ;;  %14680 = vmatprep.subr.bf16.mxu0 %v15256_v57 }
 0x332   :  { %v18525_v15 = vadd.f32 %v14190_v48, %v6057_v62  ;;  %v14129_v31 = vadd.f32 %v14128_v37, %v14127_v21 }
 0x333   :  { %v14130_v16 = vpop.f32.mrf.mxu0  ;;  %v14192_v47 = vpop.f32.mrf.mxu1  ;;  %6645 = vmatmul.mubr.bf16.gmra.mxu0 %v15229_v42  ;;  %v15255_v42 = vld [vmem:[#allocation2 + $0x50c] ss:$100 sps:$4 sm:$0xff]  }
 0x334   :  { %v6060_v0 = vadd.f32 %v14129_v31, %v18454_v53  ;;  %v14193_v38 = vadd.f32 %v14192_v47, %v14191_v24  ;;  %6652 = vmatprep.mubr.bf16.mxu0 %v15238_v26  ;;  %14681 = vmatpush3.bf16.msra.mxu0 %v15256_v57  ;;  %v15252_v57 = vld [vmem:[#allocation2 + $0x504] ss:$100 sps:$4 sm:$0xff]  }
 0x335   :  { %v14131_v6 = vpop.f32.mrf.mxu0  ;;  %v14194_v8 = vpop.f32.mrf.mxu1  ;;  %6742 = vmatmul.mubr.bf16.gmra.mxu1 %v15232_v34  ;;  %14682 = vmatprep.subr.bf16.mxu0 %v15263_v27  ;;  %v15250_v47 = vld [vmem:[#allocation2 + $0x500] ss:$100 sps:$4 sm:$0xff]  }
 0x336   :  { %v18528_v59 = vadd.f32 %v14193_v38, %v6060_v0  ;;  %v14132_v40 = vadd.f32 %v14131_v6, %v14130_v16  ;;  %6749 = vmatprep.mubr.bf16.mxu1 %v15241_v33  ;;  %v15259_v6 = vld [vmem:[#allocation2 + $0x5cc] ss:$100 sps:$4 sm:$0xff]  }
 0x337   :  { %v14133_v13 = vpop.f32.mrf.mxu0  ;;  %v14195_v35 = vpop.f32.mrf.mxu1 }
 0x338   :  { %v6065_v11 = vadd.f32 %v14132_v40, %v18461_v56  ;;  %v14196_v2 = vadd.f32 %v14195_v35, %v14194_v8  ;;  %14683 = vmatpush3.bf16.msra.mxu0 %v15263_v27  ;;  %v15253_v8 = vld [vmem:[#allocation2 + $0x508] ss:$100 sps:$4 sm:$0xff]  }
 0x339   :  { %v14134_v53 = vpop.f32.mrf.mxu0  ;;  %v14197_v36 = vpop.f32.mrf.mxu1 }
 0x33a   :  { %v18531_v9 = vadd.f32 %v14196_v2, %v6065_v11  ;;  %v14135_v49 = vadd.f32 %v14134_v53, %v14133_v13  ;;  %v15262_v2 = vld [vmem:[#allocation2 + $0x5d4] ss:$100 sps:$4 sm:$0xff]  }
 0x33b   :  { %v14136_v63 = vpop.f32.mrf.mxu0  ;;  %v14198_v20 = vpop.f32.mrf.mxu1  ;;  %6653 = vmatmul.mubr.bf16.gmra.mxu0 %v15236_v1 }
 0x33c   :  { %v6068_v51 = vadd.f32 %v14135_v49, %v18464_v54  ;;  %v14199_v29 = vadd.f32 %v14198_v20, %v14197_v36  ;;  %6660 = vmatprep.mubr.bf16.mxu0 %v15245_v30  ;;  %v15257_v20 = vld [vmem:[#allocation2 + $0x5c8] ss:$100 sps:$4 sm:$0xff]  }
 0x33d   :  { %v14137_v39 = vpop.f32.mrf.mxu0  ;;  %v14200_v56 = vpop.f32.mrf.mxu1  ;;  %6750 = vmatmul.mubr.bf16.gmra.mxu1 %v15239_v52 }
 0x33e   :  { %v18534_v4 = vadd.f32 %v14199_v29, %v6068_v51  ;;  %v14138_v45 = vadd.f32 %v14137_v39, %v14136_v63  ;;  %6757 = vmatprep.mubr.bf16.mxu1 %v15248_v23  ;;  %v15264_v39 = vld [vmem:[#allocation2 + $0x60] ss:$100 sps:$4 sm:$0xff]  }
 0x33f   :  { %v14139_v18 = vpop.f32.mrf.mxu0  ;;  %v14201_v25 = vpop.f32.mrf.mxu1 }
 0x340   :  { %v6073_v55 = vadd.f32 %v14138_v45, %v18467_v22  ;;  %v14202_v28 = vadd.f32 %v14201_v25, %v14200_v56  ;;  %v15260_v56 = vld [vmem:[#allocation2 + $0x5d0] ss:$100 sps:$4 sm:$0xff]  }
 0x341   :  { %v14140_v44 = vpop.f32.mrf.mxu0  ;;  %v14203_v46 = vpop.f32.mrf.mxu1 }
 0x342   :  { %v18537_v17 = vadd.f32 %v14202_v28, %v6073_v55  ;;  %v14141_v54 = vadd.f32 %v14140_v44, %v14139_v18 }
 0x343   :  { %v14142_v21 = vpop.f32.mrf.mxu0  ;;  %v14204_v50 = vpop.f32.mrf.mxu1  ;;  %6661 = vmatmul.mubr.bf16.gmra.mxu0 %v15243_v58 }
 0x344   :  { %v6076_v62 = vadd.f32 %v14141_v54, %v18470_v14  ;;  %v14205_v48 = vadd.f32 %v14204_v50, %v14203_v46  ;;  %6668 = vmatprep.mubr.bf16.mxu0 %v15252_v57 }
 0x345   :  { %v14143_v37 = vpop.f32.mrf.mxu0  ;;  %v14206_v24 = vpop.f32.mrf.mxu1  ;;  %6758 = vmatmul.mubr.bf16.gmra.mxu1 %v15246_v60 }
 0x346   :  { %v18540_v22 = vadd.f32 %v14205_v48, %v6076_v62  ;;  %v14144_v27 = vadd.f32 %v14143_v37, %v14142_v21  ;;  %6765 = vmatprep.mubr.bf16.mxu1 %v15255_v42  ;;  %v15265_v62 = vld [vmem:[#allocation2 + $0x128] ss:$100 sps:$4 sm:$0xff]  }
 0x347   :  { %v14145_v31 = vpop.f32.mrf.mxu0  ;;  %v14207_v26 = vpop.f32.mrf.mxu1 }
 0x348   :  { %v6081_v34 = vadd.f32 %v14144_v27, %v18473_v3  ;;  %v14208_v16 = vadd.f32 %v14207_v26, %v14206_v24 }
 0x349   :  { %v14146_v0 = vpop.f32.mrf.mxu0  ;;  %v14209_v38 = vpop.f32.mrf.mxu1 }
 0x34a   :  { %v18543_v33 = vadd.f32 %v14208_v16, %v6081_v34  ;;  %v14147_v14 = vadd.f32 %v14146_v0, %v14145_v31 }
 0x34b   :  { %v14148_v40 = vpop.f32.mrf.mxu0  ;;  %v14210_v13 = vpop.f32.mrf.mxu1  ;;  %6669 = vmatmul.mubr.bf16.gmra.mxu0 %v15250_v47 }
 0x34c   :  { %v6084_v35 = vadd.f32 %v14147_v14, %v18476_v32  ;;  %v14211_v11 = vadd.f32 %v14210_v13, %v14209_v38  ;;  %6676 = vmatprep.mubr.bf16.mxu0 %v15259_v6 }
 0x34d   :  { %v14149_v1 = vpop.f32.mrf.mxu0  ;;  %v14212_v53 = vpop.f32.mrf.mxu1  ;;  %6766 = vmatmul.mubr.bf16.gmra.mxu1 %v15253_v8 }
 0x34e   :  { %v18546_v3 = vadd.f32 %v14211_v11, %v6084_v35  ;;  %v14150_v36 = vadd.f32 %v14149_v1, %v14148_v40  ;;  %6773 = vmatprep.mubr.bf16.mxu1 %v15262_v2  ;;  %v15267_v40 = vld [vmem:[#allocation2 + $0x2b8] ss:$100 sps:$4 sm:$0xff]   ;;  %v15268_v11 = vld [vmem:[#allocation2 + $0x380] ss:$100 sps:$4 sm:$0xff]  }
 0x34f   :  { %v14151_v49 = vpop.f32.mrf.mxu0  ;;  %v14213_v30 = vpop.f32.mrf.mxu1 }
 0x350   :  { %v6089_v52 = vadd.f32 %v14150_v36, %v18479_v7  ;;  %v14214_v63 = vadd.f32 %v14213_v30, %v14212_v53 }
 0x351   :  { %v14152_v51 = vpop.f32.mrf.mxu0  ;;  %v14215_v29 = vpop.f32.mrf.mxu1 }
 0x352   :  { %v18549_v23 = vadd.f32 %v14214_v63, %v6089_v52  ;;  %v14153_v32 = vadd.f32 %v14152_v51, %v14151_v49 }
 0x353   :  { %v14154_v45 = vpop.f32.mrf.mxu0  ;;  %v14216_v18 = vpop.f32.mrf.mxu1  ;;  %6677 = vmatmul.mubr.bf16.gmra.mxu0 %v15257_v20 }
 0x354   :  { %v6092_v25 = vadd.f32 %v14153_v32, %v18482_v10  ;;  %v14217_v55 = vadd.f32 %v14216_v18, %v14215_v29  ;;  %14684 = vmatprep.mubr.bf16.mxu0 %v15264_v39  ;;  %v15266_v10 = vld [vmem:[#allocation2 + $0x1f0] ss:$100 sps:$4 sm:$0xff]   ;;  %v15269_v39 = vld [vmem:[#allocation2 + $0x448] ss:$100 sps:$4 sm:$0xff]  }
 0x355   :  { %v14155_v28 = vpop.f32.mrf.mxu0  ;;  %v14218_v58 = vpop.f32.mrf.mxu1  ;;  %6774 = vmatmul.mubr.bf16.gmra.mxu1 %v15260_v56  ;;  %v15270_v18 = vld [vmem:[#allocation2 + $0x510] ss:$100 sps:$4 sm:$0xff]  }
 0x356   :  { %v18552_v7 = vadd.f32 %v14217_v55, %v6092_v25  ;;  %v14156_v44 = vadd.f32 %v14155_v28, %v14154_v45 }
 0x357   :  { %v14157_v46 = vpop.f32.mrf.mxu0  ;;  %v14219_v54 = vpop.f32.mrf.mxu1 }
 0x358   :  { %v6097_v57 = vadd.f32 %v14156_v44, %v18488_v41  ;;  %v14220_v60 = vadd.f32 %v14219_v54, %v14218_v58 }
 0x359   :  { %v14158_v21 = vpop.f32.mrf.mxu0  ;;  %v14221_v50 = vpop.f32.mrf.mxu1 }
 0x35a   :  { %v18555_v48 = vadd.f32 %v14220_v60, %v6097_v57  ;;  %v14159_v42 = vadd.f32 %v14158_v21, %v14157_v46 }
 0x35b   :  { %v14222_v37 = vpop.f32.mrf.mxu1  ;;  %v14240_v24 = vpop.f32.mrf.mxu0  ;;  %14685 = vmatmul.mubr.bf16.vlgmr.msra.gmra.mxu0 %v15265_v62 }
 0x35c   :  { %v6100_v27 = vadd.f32 %v14159_v42, %v18495_v12  ;;  %v14223_v31 = vadd.f32 %v14222_v37, %v14221_v50  ;;  %14688 = vmatprep.mubr.bf16.mxu0 %v15266_v10  ;;  %v15271_v42 = vld [vmem:[#allocation2 + $0x5d8] ss:$100 sps:$4 sm:$0xff]  }
 0x35d   :  { %v14241_v26 = vpop.f32.mrf.mxu0  ;;  %v14304_v34 = vpop.f32.mrf.mxu1 }
 0x35e   :  { %v18558_v16 = vadd.f32 %v14223_v31, %v6100_v27  ;;  %v14242_v41 = vadd.f32 %v14241_v26, %v14240_v24 }
 0x35f   :  { %v14243_v47 = vpop.f32.mrf.mxu0  ;;  %v14305_v0 = vpop.f32.mrf.mxu1 }
 0x360   :  { %v6235_v38 = vadd.f32 %v14242_v41, %v18501_v61  ;;  %v14306_v14 = vadd.f32 %v14305_v0, %v14304_v34 }
 0x361   :  { %v14244_v6 = vpop.f32.mrf.mxu0  ;;  %v14307_v8 = vpop.f32.mrf.mxu1 }
 0x362   :  { %v18561_v13 = vadd.f32 %v14306_v14, %v6235_v38  ;;  %v14245_v35 = vadd.f32 %v14244_v6, %v14243_v47 }
 0x363   :  { %v14246_v12 = vpop.f32.mrf.mxu0  ;;  %v14308_v2 = vpop.f32.mrf.mxu1  ;;  %14689 = vmatmul.mubr.bf16.gmra.mxu0 %v15267_v40 }
 0x364   :  { %v6238_v1 = vadd.f32 %v14245_v35, %v18507_v43  ;;  %v14309_v53 = vadd.f32 %v14308_v2, %v14307_v8  ;;  %14692 = vmatprep.mubr.bf16.mxu0 %v15268_v11 }
 0x365   :  { %v14247_v36 = vpop.f32.mrf.mxu0  ;;  %v14310_v49 = vpop.f32.mrf.mxu1 }
 0x366   :  { %v18564_v30 = vadd.f32 %v14309_v53, %v6238_v1  ;;  %v14248_v61 = vadd.f32 %v14247_v36, %v14246_v12 }
 0x367   :  { %v14249_v52 = vpop.f32.mrf.mxu0  ;;  %v14311_v63 = vpop.f32.mrf.mxu1 }
 0x368   :  { %v6243_v20 = vadd.f32 %v14248_v61, %v18513_v19  ;;  %v14312_v51 = vadd.f32 %v14311_v63, %v14310_v49 }
 0x369   :  { %v14250_v29 = vpop.f32.mrf.mxu0  ;;  %v14313_v32 = vpop.f32.mrf.mxu1 }
 0x36a   :  { %v18567_v56 = vadd.f32 %v14312_v51, %v6243_v20  ;;  %v14251_v45 = vadd.f32 %v14250_v29, %v14249_v52 }
 0x36b   :  { %v14252_v43 = vpop.f32.mrf.mxu0  ;;  %v14314_v25 = vpop.f32.mrf.mxu1  ;;  %14693 = vmatmul.mubr.bf16.gmra.mxu0 %v15269_v39 }
 0x36c   :  { %v6246_v55 = vadd.f32 %v14251_v45, %v18519_v5  ;;  %v14315_v28 = vadd.f32 %v14314_v25, %v14313_v32  ;;  %14696 = vmatprep.mubr.bf16.mxu0 %v15270_v18 }
 0x36d   :  { %v14253_v58 = vpop.f32.mrf.mxu0  ;;  %v14316_v44 = vpop.f32.mrf.mxu1 }
 0x36e   :  { %v18570_v46 = vadd.f32 %v14315_v28, %v6246_v55  ;;  %v14254_v19 = vadd.f32 %v14253_v58, %v14252_v43 }
 0x36f   :  { %v14255_v54 = vpop.f32.mrf.mxu0  ;;  %v14317_v57 = vpop.f32.mrf.mxu1 }
 0x370   :  { %v6251_v60 = vadd.f32 %v14254_v19, %v18525_v15  ;;  %v14318_v21 = vadd.f32 %v14317_v57, %v14316_v44 }
 0x371   :  { %v14256_v50 = vpop.f32.mrf.mxu0  ;;  %v14319_v62 = vpop.f32.mrf.mxu1 }
 0x372   :  { %v18573_v10 = vadd.f32 %v14318_v21, %v6251_v60  ;;  %v14257_v37 = vadd.f32 %v14256_v50, %v14255_v54 }
 0x373   :  { %v14258_v24 = vpop.f32.mrf.mxu0  ;;  %v14320_v5 = vpop.f32.mrf.mxu1  ;;  %14697 = vmatmul.mubr.bf16.gmra.mxu0 %v15271_v42 }
 0x374   :  { %v6254_v27 = vadd.f32 %v14257_v37, %v18528_v59  ;;  %v14321_v31 = vadd.f32 %v14320_v5, %v14319_v62 }
 0x375   :  { %v14259_v26 = vpop.f32.mrf.mxu0  ;;  %v14322_v34 = vpop.f32.mrf.mxu1 }
 0x376   :  { %v18576_v41 = vadd.f32 %v14321_v31, %v6254_v27  ;;  %v14260_v47 = vadd.f32 %v14259_v26, %v14258_v24 }
 0x377   :  { %v14261_v0 = vpop.f32.mrf.mxu0  ;;  %v14323_v15 = vpop.f32.mrf.mxu1 }
 0x378   :  { %v6259_v38 = vadd.f32 %v14260_v47, %v18531_v9  ;;  %v14324_v14 = vadd.f32 %v14323_v15, %v14322_v34 }
 0x379   :  { %v14262_v6 = vpop.f32.mrf.mxu0  ;;  %v14325_v8 = vpop.f32.mrf.mxu1 }
 0x37a   :  { %v18579_v40 = vadd.f32 %v14324_v14, %v6259_v38  ;;  %v14263_v35 = vadd.f32 %v14262_v6, %v14261_v0 }
 0x37b   :  { %v14264_v11 = vpop.f32.mrf.mxu0  ;;  %v14326_v12 = vpop.f32.mrf.mxu1 }
 0x37c   :  { %v6262_v59 = vadd.f32 %v14263_v35, %v18534_v4  ;;  %v14327_v2 = vadd.f32 %v14326_v12, %v14325_v8 }
 0x37d   :  { %v14265_v1 = vpop.f32.mrf.mxu0  ;;  %v14328_v53 = vpop.f32.mrf.mxu1 }
 0x37e   :  { %v18582_v36 = vadd.f32 %v14327_v2, %v6262_v59  ;;  %v14266_v49 = vadd.f32 %v14265_v1, %v14264_v11 }
 0x37f   :  { %v14267_v61 = vpop.f32.mrf.mxu0  ;;  %v14329_v52 = vpop.f32.mrf.mxu1 }
 0x380   :  { %v6267_v9 = vadd.f32 %v14266_v49, %v18537_v17  ;;  %v14330_v63 = vadd.f32 %v14329_v52, %v14328_v53 }
 0x381   :  { %v14268_v20 = vpop.f32.mrf.mxu0  ;;  %v14331_v51 = vpop.f32.mrf.mxu1 }
 0x382   :  { %v18585_v29 = vadd.f32 %v14330_v63, %v6267_v9  ;;  %v14269_v32 = vadd.f32 %v14268_v20, %v14267_v61 }
 0x383   :  { %v14270_v39 = vpop.f32.mrf.mxu0  ;;  %v14332_v45 = vpop.f32.mrf.mxu1 }
 0x384   :  { %v6270_v4 = vadd.f32 %v14269_v32, %v18540_v22  ;;  %v14333_v18 = vadd.f32 %v14332_v45, %v14331_v51 }
 0x385   :  { %v14271_v43 = vpop.f32.mrf.mxu0  ;;  %v14334_v25 = vpop.f32.mrf.mxu1 }
 0x386   :  { %v18588_v55 = vadd.f32 %v14333_v18, %v6270_v4  ;;  %v14272_v28 = vadd.f32 %v14271_v43, %v14270_v39 }
 0x387   :  { %v14273_v58 = vpop.f32.mrf.mxu0  ;;  %v14335_v44 = vpop.f32.mrf.mxu1 }
 0x388   :  { %v6275_v17 = vadd.f32 %v14272_v28, %v18543_v33  ;;  %v14336_v19 = vadd.f32 %v14335_v44, %v14334_v25 }
 0x389   :  { %v14274_v54 = vpop.f32.mrf.mxu0  ;;  %v14337_v57 = vpop.f32.mrf.mxu1 }
 0x38a   :  { %v18591_v60 = vadd.f32 %v14336_v19, %v6275_v17  ;;  %v14275_v21 = vadd.f32 %v14274_v54, %v14273_v58 }
 0x38b   :  { %v14276_v50 = vpop.f32.mrf.mxu0  ;;  %v14338_v62 = vpop.f32.mrf.mxu1 }
 0x38c   :  { %v6278_v22 = vadd.f32 %v14275_v21, %v18546_v3  ;;  %v14339_v42 = vadd.f32 %v14338_v62, %v14337_v57 }
 0x38d   :  { %v14277_v37 = vpop.f32.mrf.mxu0  ;;  %v14340_v24 = vpop.f32.mrf.mxu1 }
 0x38e   :  { %v18594_v5 = vadd.f32 %v14339_v42, %v6278_v22  ;;  %v14278_v27 = vadd.f32 %v14277_v37, %v14276_v50 }
 0x38f   :  { %v14279_v31 = vpop.f32.mrf.mxu0  ;;  %v14341_v26 = vpop.f32.mrf.mxu1 }
 0x390   :  { %v6283_v33 = vadd.f32 %v14278_v27, %v18549_v23  ;;  %v14342_v34 = vadd.f32 %v14341_v26, %v14340_v24 }
 0x391   :  { %v14280_v47 = vpop.f32.mrf.mxu0  ;;  %v14343_v0 = vpop.f32.mrf.mxu1 }
 0x392   :  { %v18597_v15 = vadd.f32 %v14342_v34, %v6283_v33  ;;  %v14281_v38 = vadd.f32 %v14280_v47, %v14279_v31 }
 0x393   :  { %v14282_v14 = vpop.f32.mrf.mxu0  ;;  %v14344_v6 = vpop.f32.mrf.mxu1 }
 0x394   :  { %v6286_v3 = vadd.f32 %v14281_v38, %v18552_v7  ;;  %v14345_v8 = vadd.f32 %v14344_v6, %v14343_v0 }
 0x395   :  { %v14283_v35 = vpop.f32.mrf.mxu0  ;;  %v14346_v11 = vpop.f32.mrf.mxu1 }
 0x396   :  { %v18600_v12 = vadd.f32 %v14345_v8, %v6286_v3  ;;  %v14284_v59 = vadd.f32 %v14283_v35, %v14282_v14 }
 0x397   :  { %v14285_v2 = vpop.f32.mrf.mxu0  ;;  %v14347_v1 = vpop.f32.mrf.mxu1 }
 0x398   :  { %v6291_v23 = vadd.f32 %v14284_v59, %v18555_v48  ;;  %v14348_v53 = vadd.f32 %v14347_v1, %v14346_v11 }
 0x399   :  { %v14286_v49 = vpop.f32.mrf.mxu0  ;;  %v14349_v61 = vpop.f32.mrf.mxu1 }
 0x39a   :  { %v18603_v52 = vadd.f32 %v14348_v53, %v6291_v23  ;;  %v14287_v9 = vadd.f32 %v14286_v49, %v14285_v2 }
 0x39b   :  { %v14350_v63 = vpop.f32.mrf.mxu1  ;;  %v14368_v20 = vpop.f32.mrf.mxu0 }
 0x39c   :  { %v6294_v7 = vadd.f32 %v14287_v9, %v18558_v16  ;;  %v14351_v51 = vadd.f32 %v14350_v63, %v14349_v61 }
 0x39d   :  { %v14369_v32 = vpop.f32.mrf.mxu0  ;;  %v14432_v39 = vpop.f32.mrf.mxu1 }
 0x39e   :  { %v18606_v45 = vadd.f32 %v14351_v51, %v6294_v7  ;;  %v14370_v4 = vadd.f32 %v14369_v32, %v14368_v20 }
 0x39f   :  { %v14371_v18 = vpop.f32.mrf.mxu0  ;;  %v14433_v43 = vpop.f32.mrf.mxu1 }
 0x3a0   :  { %v6429_v48 = vadd.f32 %v14370_v4, %v18561_v13  ;;  %v14434_v25 = vadd.f32 %v14433_v43, %v14432_v39 }
 0x3a1   :  { %v14372_v28 = vpop.f32.mrf.mxu0  ;;  %v14435_v58 = vpop.f32.mrf.mxu1 }
 0x3a2   :  { %v18609_v44 = vadd.f32 %v14434_v25, %v6429_v48  ;;  %v14373_v17 = vadd.f32 %v14372_v28, %v14371_v18 }
 0x3a3   :  { %v14374_v19 = vpop.f32.mrf.mxu0  ;;  %v14436_v54 = vpop.f32.mrf.mxu1 }
 0x3a4   :  { %v6432_v16 = vadd.f32 %v14373_v17, %v18564_v30  ;;  %v14437_v57 = vadd.f32 %v14436_v54, %v14435_v58 }
 0x3a5   :  { %v14375_v21 = vpop.f32.mrf.mxu0  ;;  %v14438_v50 = vpop.f32.mrf.mxu1 }
 0x3a6   :  { %v18612_v62 = vadd.f32 %v14437_v57, %v6432_v16  ;;  %v14376_v22 = vadd.f32 %v14375_v21, %v14374_v19  ;;  %v15272_v19 = vld [vmem:[%s20963_s5 + $0xe0] ss:$16 sps:$4 sm:$0xff]   ;;  %v15277_v16 = vld [vmem:[%s20963_s5 + $0x2e4] ss:$16 sps:$4 sm:$0xff]  }
 0x3a7   :  { %v14377_v42 = vpop.f32.mrf.mxu0  ;;  %v14439_v37 = vpop.f32.mrf.mxu1  ;;  %11681 = vmatprep.subr.bf16.mxu0 %v15277_v16 }
 0x3a8   :  { %v6437_v13 = vadd.f32 %v14376_v22, %v18567_v56  ;;  %v14440_v24 = vadd.f32 %v14439_v37, %v14438_v50 }
 0x3a9   :  { %v14378_v27 = vpop.f32.mrf.mxu0  ;;  %v14441_v31 = vpop.f32.mrf.mxu1 }
 0x3aa   :  { %v18615_v26 = vadd.f32 %v14440_v24, %v6437_v13  ;;  %v14379_v33 = vadd.f32 %v14378_v27, %v14377_v42  ;;  %v15280_v13 = vld [vmem:[%s20963_s5 + $0xc4] ss:$16 sps:$4 sm:$0xff]  }
 0x3ab   :  { %v14380_v34 = vpop.f32.mrf.mxu0  ;;  %v14442_v47 = vpop.f32.mrf.mxu1 }
 0x3ac   :  { %v6440_v30 = vadd.f32 %v14379_v33, %v18570_v46  ;;  %v14443_v0 = vadd.f32 %v14442_v47, %v14441_v31  ;;  %v15278_v31 = vld [vmem:[%s20963_s5 + $0xc0] ss:$16 sps:$4 sm:$0xff]  }
 0x3ad   :  { %v14381_v38 = vpop.f32.mrf.mxu0  ;;  %v14444_v14 = vpop.f32.mrf.mxu1 }
 0x3ae   :  { %v18618_v6 = vadd.f32 %v14443_v0, %v6440_v30  ;;  %v14382_v3 = vadd.f32 %v14381_v38, %v14380_v34  ;;  %v15281_v0 = vld [vmem:[%s20963_s5 + $0x2c0] ss:$16 sps:$4 sm:$0xff]  }
 0x3af   :  { %v14383_v8 = vpop.f32.mrf.mxu0  ;;  %v14445_v35 = vpop.f32.mrf.mxu1 }
 0x3b0   :  { %v6445_v56 = vadd.f32 %v14382_v3, %v18573_v10  ;;  %v14446_v11 = vadd.f32 %v14445_v35, %v14444_v14  ;;  %v15286_v3 = vld [vmem:[%s20963_s5 + $0xa4] ss:$16 sps:$4 sm:$0xff]  }
 0x3b1   :  { %v14384_v59 = vpop.f32.mrf.mxu0  ;;  %v14447_v2 = vpop.f32.mrf.mxu1 }
 0x3b2   :  { %v18621_v1 = vadd.f32 %v14446_v11, %v6445_v56  ;;  %v14385_v23 = vadd.f32 %v14384_v59, %v14383_v8  ;;  %v15284_v56 = vld [vmem:[%s20963_s5 + $0xa0] ss:$16 sps:$4 sm:$0xff]  }
 0x3b3   :  { %v14386_v53 = vpop.f32.mrf.mxu0  ;;  %v14448_v49 = vpop.f32.mrf.mxu1 }
 0x3b4   :  { %v6448_v46 = vadd.f32 %v14385_v23, %v18576_v41  ;;  %v14449_v61 = vadd.f32 %v14448_v49, %v14447_v2  ;;  %v15274_v41 = vld [vmem:[%s20963_s5 + $0xe4] ss:$16 sps:$4 sm:$0xff]  }
 0x3b5   :  { %v14387_v9 = vpop.f32.mrf.mxu0  ;;  %v14450_v63 = vpop.f32.mrf.mxu1  ;;  %11640 = vmatprep.subr.bf16.mxu1 %v15274_v41 }
 0x3b6   :  { %v18624_v20 = vadd.f32 %v14449_v61, %v6448_v46  ;;  %v14388_v7 = vadd.f32 %v14387_v9, %v14386_v53  ;;  %11641 = vmatpush1.bf16.msra.mxu1 %v15272_v19 }
 0x3b7   :  { %v14389_v51 = vpop.f32.mrf.mxu0  ;;  %v14451_v32 = vpop.f32.mrf.mxu1  ;;  %11642 = vmatprep.subr.bf16.mxu1 %v15280_v13 }
 0x3b8   :  { %v6453_v10 = vadd.f32 %v14388_v7, %v18579_v40  ;;  %v14452_v39 = vadd.f32 %v14451_v32, %v14450_v63 }
 0x3b9   :  { %v14390_v4 = vpop.f32.mrf.mxu0  ;;  %v14453_v18 = vpop.f32.mrf.mxu1 }
 0x3ba   :  { %v18627_v43 = vadd.f32 %v14452_v39, %v6453_v10  ;;  %v14391_v48 = vadd.f32 %v14390_v4, %v14389_v51  ;;  %11643 = vmatpush1.bf16.msra.mxu1 %v15278_v31 }
 0x3bb   :  { %v14392_v25 = vpop.f32.mrf.mxu0  ;;  %v14454_v28 = vpop.f32.mrf.mxu1  ;;  %11644 = vmatprep.subr.bf16.mxu1 %v15286_v3 }
 0x3bc   :  { %v6456_v58 = vadd.f32 %v14391_v48, %v18582_v36  ;;  %v14455_v17 = vadd.f32 %v14454_v28, %v14453_v18  ;;  %v15275_v36 = vld [vmem:[%s20963_s5 + $0x2e0] ss:$16 sps:$4 sm:$0xff]  }
 0x3bd   :  { %v14393_v40 = vpop.f32.mrf.mxu0  ;;  %v14456_v54 = vpop.f32.mrf.mxu1  ;;  %11682 = vmatpush1.bf16.msra.mxu0 %v15275_v36 }
 0x3be   :  { %v18639_v57 = vadd.f32 %v14455_v17, %v6456_v58  ;;  %v14394_v21 = vadd.f32 %v14393_v40, %v14392_v25  ;;  %11645 = vmatpush1.bf16.msra.mxu1 %v15284_v56 }
 0x3bf   :  { %v14395_v50 = vpop.f32.mrf.mxu0  ;;  %v14457_v22 = vpop.f32.mrf.mxu1 }
 0x3c0   :  { %v6461_v42 = vadd.f32 %v14394_v21, %v18585_v29  ;;  %v14458_v37 = vadd.f32 %v14457_v22, %v14456_v54  ;;  %v15283_v29 = vld [vmem:[%s20963_s5 + $0x2c4] ss:$16 sps:$4 sm:$0xff]  }
 0x3c1   :  { %v14396_v24 = vpop.f32.mrf.mxu0  ;;  %v14459_v27 = vpop.f32.mrf.mxu1  ;;  %11683 = vmatprep.subr.bf16.mxu0 %v15283_v29 }
 0x3c2   :  { %v18651_v33 = vadd.f32 %v14458_v37, %v6461_v42  ;;  %v14397_v34 = vadd.f32 %v14396_v24, %v14395_v50  ;;  %11684 = vmatpush1.bf16.msra.mxu0 %v15281_v0  ;;  %v15289_v37 = vld [vmem:[%s20963_s5 + $0x2a4] ss:$16 sps:$4 sm:$0xff]  }
 0x3c3   :  { %v14398_v47 = vpop.f32.mrf.mxu0  ;;  %v14460_v30 = vpop.f32.mrf.mxu1  ;;  %11685 = vmatprep.subr.bf16.mxu0 %v15289_v37 }
 0x3c4   :  { %v6464_v38 = vadd.f32 %v14397_v34, %v18588_v55  ;;  %v14461_v14 = vadd.f32 %v14460_v30, %v14459_v27  ;;  %v15292_v30 = vld [vmem:[%s20963_s5 + $0x84] ss:$16 sps:$4 sm:$0xff]  }
 0x3c5   :  { %v14399_v8 = vpop.f32.mrf.mxu0  ;;  %v14462_v35 = vpop.f32.mrf.mxu1  ;;  %11646 = vmatprep.subr.bf16.mxu1 %v15292_v30 }
 0x3c6   :  { %v18666_v11 = vadd.f32 %v14461_v14, %v6464_v38  ;;  %v14400_v59 = vadd.f32 %v14399_v8, %v14398_v47  ;;  %v15290_v14 = vld [vmem:[%s20963_s5 + $0x80] ss:$16 sps:$4 sm:$0xff]  }
 0x3c7   :  { %v14401_v2 = vpop.f32.mrf.mxu0  ;;  %v14463_v23 = vpop.f32.mrf.mxu1  ;;  %11647 = vmatpush1.bf16.msra.mxu1 %v15290_v14 }
 0x3c8   :  { %v6469_v55 = vadd.f32 %v14400_v59, %v18591_v60  ;;  %v14464_v53 = vadd.f32 %v14463_v23, %v14462_v35  ;;  %v15293_v59 = vld [vmem:[%s20963_s5 + $0x280] ss:$16 sps:$4 sm:$0xff]   ;;  %v15298_v23 = vld [vmem:[%s20963_s5 + $0x64] ss:$16 sps:$4 sm:$0xff]  }
 0x3c9   :  { %v14402_v49 = vpop.f32.mrf.mxu0  ;;  %v18669_v46 = vpop.f32.mrf.mxu1  ;;  %11648 = vmatprep.subr.bf16.mxu1 %v15298_v23 }
 0x3ca   :  { %v18671_v61 = vadd.f32 %v14464_v53, %v6469_v55  ;;  %v14403_v9 = vadd.f32 %v14402_v49, %v14401_v2  ;;  %v15296_v49 = vld [vmem:[%s20963_s5 + $0x60] ss:$16 sps:$4 sm:$0xff]  }
 0x3cb   :  { %v14404_v63 = vpop.f32.mrf.mxu0  ;;  %v18673_v7 = vpop.f32.mrf.mxu1  ;;  %11649 = vmatpush1.bf16.msra.mxu1 %v15296_v49 }
 0x3cc   :  { %v18676_v51 = vadd.f32 %v14403_v9, %v18594_v5 }
 0x3cd   :  { %v14405_v32 = vpop.f32.mrf.mxu0  ;;  %v14468_v10 = vpop.f32.mrf.mxu1 }
 0x3ce   :  { %v14406_v39 = vadd.f32 %v14405_v32, %v14404_v63 }
 0x3cf   :  { %v14407_v4 = vpop.f32.mrf.mxu0  ;;  %v14469_v18 = vpop.f32.mrf.mxu1 }
 0x3d0   :  { %v6477_v60 = vadd.f32 %v14406_v39, %v18597_v15  ;;  %v14470_v48 = vadd.f32 %v14469_v18, %v14468_v10 }
 0x3d1   :  { %v14408_v25 = vpop.f32.mrf.mxu0  ;;  %v14471_v28 = vpop.f32.mrf.mxu1 }
 0x3d2   :  { %v18679_v41 = vadd.f32 %v14470_v48, %v6477_v60  ;;  %v14409_v58 = vadd.f32 %v14408_v25, %v14407_v4 }
 0x3d3   :  { %v14410_v17 = vpop.f32.mrf.mxu0  ;;  %v14472_v19 = vpop.f32.mrf.mxu1 }
 0x3d4   :  { %v6480_v40 = vadd.f32 %v14409_v58, %v18600_v12  ;;  %v14473_v54 = vadd.f32 %v14472_v19, %v14471_v28  ;;  %v15287_v12 = vld [vmem:[%s20963_s5 + $0x2a0] ss:$16 sps:$4 sm:$0xff]  }
 0x3d5   :  { %v14411_v5 = vpop.f32.mrf.mxu0  ;;  %v14474_v16 = vpop.f32.mrf.mxu1  ;;  %11686 = vmatpush1.bf16.msra.mxu0 %v15287_v12 }
 0x3d6   :  { %v18682_v21 = vadd.f32 %v14473_v54, %v6480_v40  ;;  %v14412_v36 = vadd.f32 %v14411_v5, %v14410_v17 }
 0x3d7   :  { %v14413_v50 = vpop.f32.mrf.mxu0  ;;  %v14475_v22 = vpop.f32.mrf.mxu1 }
 0x3d8   :  { %v6485_v15 = vadd.f32 %v14412_v36, %v18603_v52  ;;  %v14476_v42 = vadd.f32 %v14475_v22, %v14474_v16 }
 0x3d9   :  { %v14414_v13 = vpop.f32.mrf.mxu0  ;;  %v14477_v24 = vpop.f32.mrf.mxu1 }
 0x3da   :  { %v18691_v27 = vadd.f32 %v14476_v42, %v6485_v15  ;;  %v14415_v31 = vadd.f32 %v14414_v13, %v14413_v50 }
 0x3db   :  { %v14478_v34 = vpop.f32.mrf.mxu1  ;;  %v14496_v29 = vpop.f32.mrf.mxu0 }
 0x3dc   :  { %v6488_v52 = vadd.f32 %v14415_v31, %v18606_v45  ;;  %v14479_v47 = vadd.f32 %v14478_v34, %v14477_v24  ;;  %v15295_v45 = vld [vmem:[%s20963_s5 + $0x284] ss:$16 sps:$4 sm:$0xff]  }
 0x3dd   :  { %v14497_v0 = vpop.f32.mrf.mxu0  ;;  %v18697_v38 = vpop.f32.mrf.mxu1  ;;  %11687 = vmatprep.subr.bf16.mxu0 %v15295_v45 }
 0x3de   :  { %v18702_v3 = vadd.f32 %v14479_v47, %v6488_v52  ;;  %v14498_v8 = vadd.f32 %v14497_v0, %v14496_v29  ;;  %11688 = vmatpush1.bf16.msra.mxu0 %v15293_v59 }
 0x3df   :  { %v14499_v35 = vpop.f32.mrf.mxu0  ;;  %v18707_v56 = vpop.f32.mrf.mxu1 }
 0x3e0   :  { %v18713_v2 = vadd.f32 %v14498_v8, %v18609_v44 }
 0x3e1   :  { %v14500_v55 = vpop.f32.mrf.mxu0  ;;  %v18718_v53 = vpop.f32.mrf.mxu1 }
 0x3e2   :  { %v14501_v9 = vadd.f32 %v14500_v55, %v14499_v35 }
 0x3e3   :  { %v14502_v63 = vpop.f32.mrf.mxu0  ;;  %v18723_v32 = vpop.f32.mrf.mxu1 }
 0x3e4   :  { %v18726_v44 = vadd.f32 %v14501_v9, %v18612_v62  ;;  %v15299_v9 = vld [vmem:[%s20963_s5 + $0x260] ss:$16 sps:$4 sm:$0xff]  }
 0x3e5   :  { %v14503_v10 = vpop.f32.mrf.mxu0  ;;  %v18728_v39 = vpop.f32.mrf.mxu1 }
 0x3e6   :  { %v14504_v4 = vadd.f32 %v14503_v10, %v14502_v63 }
 0x3e7   :  { %v14505_v18 = vpop.f32.mrf.mxu0  ;;  %v18730_v60 = vpop.f32.mrf.mxu1 }
 0x3e8   :  { %v18733_v48 = vadd.f32 %v14504_v4, %v18615_v26  ;;  %v15304_v4 = vld [vmem:[%s20963_s5 + $0x44] ss:$16 sps:$4 sm:$0xff]  }
 0x3e9   :  { %v14506_v25 = vpop.f32.mrf.mxu0  ;;  %v18735_v28 = vpop.f32.mrf.mxu1  ;;  %11650 = vmatprep.subr.bf16.mxu1 %v15304_v4 }
 0x3ea   :  { %v14507_v58 = vadd.f32 %v14506_v25, %v14505_v18  ;;  %v15302_v18 = vld [vmem:[%s20963_s5 + $0x40] ss:$16 sps:$4 sm:$0xff]  }
 0x3eb   :  { %v14508_v17 = vpop.f32.mrf.mxu0  ;;  %v18737_v19 = vpop.f32.mrf.mxu1  ;;  %11651 = vmatpush1.bf16.msra.mxu1 %v15302_v18  ;;  %v15325_v18 = vld [vmem:[%s20963_s5 + $0x3e4] ss:$16 sps:$4 sm:$0xff]  }
 0x3ec   :  { %v18740_v62 = vadd.f32 %v14507_v58, %v18618_v6 }
 0x3ed   :  { %v14509_v40 = vpop.f32.mrf.mxu0  ;;  %v14572_v54 = vpop.f32.mrf.mxu1 }
 0x3ee   :  { %v14510_v5 = vadd.f32 %v14509_v40, %v14508_v17  ;;  %v15307_v17 = vld [vmem:[%s20963_s5 + $0x244] ss:$16 sps:$4 sm:$0xff]   ;;  %v15305_v40 = vld [vmem:[%s20963_s5 + $0x240] ss:$16 sps:$4 sm:$0xff]  }
 0x3ef   :  { %v14511_v16 = vpop.f32.mrf.mxu0  ;;  %v14573_v36 = vpop.f32.mrf.mxu1 }
 0x3f0   :  { %v6639_v50 = vadd.f32 %v14510_v5, %v18621_v1  ;;  %v14574_v22 = vadd.f32 %v14573_v36, %v14572_v54  ;;  %v15310_v5 = vld [vmem:[%s20963_s5 + $0x24] ss:$16 sps:$4 sm:$0xff]  }
 0x3f1   :  { %v14512_v26 = vpop.f32.mrf.mxu0  ;;  %v14575_v15 = vpop.f32.mrf.mxu1  ;;  %11652 = vmatprep.subr.bf16.mxu1 %v15310_v5  ;;  %v15328_v5 = vld [vmem:[%s20963_s5 + $0x1c4] ss:$16 sps:$4 sm:$0xff]  }
 0x3f2   :  { %v14513_v42 = vadd.f32 %v14512_v26, %v14511_v16  ;;  %v18743_v37 = vadd.f32 %v14574_v22, %v6639_v50  ;;  %v15308_v16 = vld [vmem:[%s20963_s5 + $0x20] ss:$16 sps:$4 sm:$0xff]   ;;  %v15313_v22 = vld [vmem:[%s20963_s5 + $0x224] ss:$16 sps:$4 sm:$0xff]  }
 0x3f3   :  { %v14514_v13 = vpop.f32.mrf.mxu0  ;;  %v14576_v24 = vpop.f32.mrf.mxu1  ;;  %11653 = vmatpush1.bf16.msra.mxu1 %v15308_v16  ;;  %v15311_v26 = vld [vmem:[%s20963_s5 + $0x220] ss:$16 sps:$4 sm:$0xff]  }
 0x3f4   :  { %v6642_v12 = vadd.f32 %v14513_v42, %v18624_v20  ;;  %v14577_v31 = vadd.f32 %v14576_v24, %v14575_v15  ;;  %v15316_v42 = vld [vmem:[%s20963_s5 + $0x4] ss:$16 sps:$4 sm:$0xff]  }
 0x3f5   :  { %v14515_v6 = vpop.f32.mrf.mxu0  ;;  %v18746_v34 = vpop.f32.mrf.mxu1  ;;  %11654 = vmatprep.subr.bf16.mxu1 %v15316_v42 }
 0x3f6   :  { %v14516_v29 = vadd.f32 %v14515_v6, %v14514_v13  ;;  %v18748_v52 = vadd.f32 %v14577_v31, %v6642_v12  ;;  %v15314_v13 = vld [vmem:[%s20963_s5] ss:$16 sps:$4 sm:$0xff]   ;;  %v15319_v31 = vld [vmem:[%s20963_s5 + $0x204] ss:$16 sps:$4 sm:$0xff]  }
 0x3f7   :  { %v14517_v47 = vpop.f32.mrf.mxu0  ;;  %v18750_v30 = vpop.f32.mrf.mxu1  ;;  %11655 = vmatpush1.bf16.msra.mxu1 %v15314_v13 }
 0x3f8   :  { %v18753_v1 = vadd.f32 %v14516_v29, %v18627_v43  ;;  %v15301_v43 = vld [vmem:[%s20963_s5 + $0x264] ss:$16 sps:$4 sm:$0xff]   ;;  %v15317_v29 = vld [vmem:[%s20963_s5 + $0x200] ss:$16 sps:$4 sm:$0xff]  }
 0x3f9   :  { %v14518_v0 = vpop.f32.mrf.mxu0  ;;  %v18755_v14 = vpop.f32.mrf.mxu1  ;;  %11689 = vmatprep.subr.bf16.mxu0 %v15301_v43  ;;  %v15320_v43 = vld [vmem:[%s20963_s5 + $0x1e0] ss:$16 sps:$4 sm:$0xff]  }
 0x3fa   :  { %v14519_v8 = vadd.f32 %v14518_v0, %v14517_v47  ;;  %11690 = vmatpush1.bf16.msra.mxu0 %v15299_v9  ;;  %v15322_v0 = vld [vmem:[%s20963_s5 + $0x1e4] ss:$16 sps:$4 sm:$0xff]  }
 0x3fb   :  { %v18757_v45 = vpop.f32.mrf.mxu0  ;;  %v18759_v20 = vpop.f32.mrf.mxu1  ;;  %11691 = vmatprep.subr.bf16.mxu0 %v15307_v17  ;;  %11656 = vmatprep.subr.bf16.mxu1 %v15322_v0 }
 0x3fc   :  { %v18762_v35 = vadd.f32 %v14519_v8, %v18639_v57  ;;  %11657 = vmatpush2.bf16.msra.mxu1 %v15320_v43  ;;  %v16104_v43 = vmov 1935823168  }
 0x3fd   :  { %v18764_v59 = vpop.f32.mrf.mxu0  ;;  %v18766_v23 = vpop.f32.mrf.mxu1  ;;  %11658 = vmatprep.subr.bf16.mxu1 %v15328_v5  ;;  %v14565_v5 = vadd.f32 %v18723_v32, %v18718_v53 }
 0x3fe   :  { %11692 = vmatpush1.bf16.msra.mxu0 %v15305_v40 }
 0x3ff   :  { %v18768_v55 = vpop.f32.mrf.mxu0  ;;  %v18770_v49 = vpop.f32.mrf.mxu1  ;;  %11693 = vmatprep.subr.bf16.mxu0 %v15313_v22  ;;  %v15326_v22 = vld [vmem:[%s20963_s5 + $0x1c0] ss:$16 sps:$4 sm:$0xff]  }
 0x400   :  { %11659 = vmatpush2.bf16.msra.mxu1 %v15326_v22  ;;  %v14571_v22 = vadd.f32 %v18737_v19, %v18735_v28  ;;  %v15338_v28 = vld [vmem:[%s20963_s5 + $0x180] ss:$16 sps:$4 sm:$0xff]  }
 0x401   :  { %v18778_v63 = vpop.f32.mrf.mxu0  ;;  %v18780_v57 = vpop.f32.mrf.mxu1  ;;  %v21015_v19 = vld [vmem:[#allocation7_spill] sm:$0xff] }
 0x402   :  { %11694 = vmatpush1.bf16.msra.mxu0 %v15311_v26  ;;  %v16103_v26 = vmov 1966171168  }
 0x403   :  { %v18782_v10 = vpop.f32.mrf.mxu0  ;;  %v18790_v25 = vpop.f32.mrf.mxu1  ;;  %11695 = vmatprep.subr.bf16.mxu0 %v15319_v31 }
 0x405   :  { %v18792_v58 = vpop.f32.mrf.mxu0  ;;  %v18808_v36 = vpop.f32.mrf.mxu1 }
 0x406   :  { %11696 = vmatpush1.bf16.msra.mxu0 %v15317_v29  ;;  %v14568_v29 = vadd.f32 %v18730_v60, %v18728_v39  ;;  %v15337_v39 = vld [vmem:[%s20963_s5 + $0x3a4] ss:$16 sps:$4 sm:$0xff]   ;;  %v14562_v60 = vadd.f32 %v18707_v56, %v18697_v38  ;;  %v14525_v56 = vadd.f32 %v18778_v63, %v18768_v55  ;;  %v14528_v53 = vadd.f32 %v18792_v58, %v18782_v10 }
 0x407   :  { %v18800_v54 = vpop.f32.mrf.mxu0  ;;  %v18824_v24 = vpop.f32.mrf.mxu1  ;;  %11697 = vmatprep.subr.bf16.mxu0 %v15325_v18  ;;  %v14467_v18 = vadd.f32 %v18673_v7, %v18669_v46  ;;  %v15335_v46 = vld [vmem:[%s20963_s5 + $0x3a0] ss:$16 sps:$4 sm:$0xff]   ;;  %v14522_v7 = vadd.f32 %v18764_v59, %v18757_v45  ;;  %v15340_v38 = vld [vmem:[%s20963_s5 + $0x184] ss:$16 sps:$4 sm:$0xff]  }
 0x408   :  { %v6728_v32 = vadd.f32 %v14568_v29, %v18733_v48  ;;  %v15343_v48 = vld [vmem:[%s20963_s5 + $0x384] ss:$16 sps:$4 sm:$0xff]   ;;  %v6720_v58 = vadd.f32 %v14562_v60, %v18713_v2  ;;  %v14586_v2 = vadd.f32 %v18770_v49, %v18766_v23 }
 0x409   :  { %v18810_v50 = vpop.f32.mrf.mxu0  ;;  %v18841_v9 = vpop.f32.mrf.mxu1  ;;  %v6655_v29 = vadd.f32 %v14522_v7, %v18651_v33  ;;  %v15344_v33 = vld [vmem:[%s20963_s5 + $0x160] ss:$16 sps:$4 sm:$0xff]  }
 0x40b   :  { %v14532_v15 = vpop.f32.mrf.mxu0  ;;  %v18860_v42 = vpop.f32.mrf.mxu1 }
 0x40c   :  { %v14595_v23 = vadd.f32 %v18860_v42, %v18841_v9  ;;  %v15352_v42 = vld [vmem:[%s20963_s5 + $0x144] ss:$16 sps:$4 sm:$0xff]  }
 0x40d   :  { %v14533_v12 = vpop.f32.mrf.mxu0 }
 0x40e   :  { %v14534_v6 = vadd.f32 %v14533_v12, %v14532_v15  ;;  %v6923_v15 = vunpack.c.l.s4 %v16103_v26  ;;  %v15331_v12 = vld [vmem:[%s20963_s5 + $0x3c4] ss:$16 sps:$4 sm:$0xff]  }
 0x40f   :  { %v14535_v47 = vpop.f32.mrf.mxu0 }
 0x410   :  { %v18836_v8 = vadd.f32 %v14534_v6, %v18679_v41  ;;  %v15323_v41 = vld [vmem:[%s20963_s5 + $0x3e0] ss:$16 sps:$4 sm:$0xff]   ;;  %v15334_v6 = vld [vmem:[%s20963_s5 + $0x1a4] ss:$16 sps:$4 sm:$0xff]   ;;  %v6924_v0 = vunpack.c.0.s8 %v6923_v15  ;;  %v6569_v15 = vadd.f32 %v14467_v18, %v18676_v51 }
 0x411   :  { %v14536_v4 = vpop.f32.mrf.mxu0  ;;  %11698 = vmatpush2.bf16.msra.mxu0 %v15323_v41  ;;  %11660 = vmatprep.subr.bf16.mxu1 %v15334_v6  ;;  %v6723_v6 = vadd.f32 %v14565_v5, %v18726_v44  ;;  %v15341_v51 = vld [vmem:[%s20963_s5 + $0x380] ss:$16 sps:$4 sm:$0xff]   ;;  %v15346_v44 = vld [vmem:[%s20963_s5 + $0x164] ss:$16 sps:$4 sm:$0xff]   ;;  %v18965_v5 = vadd.f32 %v14586_v2, %v6655_v29 }
 0x412   :  { %v14537_v17 = vadd.f32 %v14536_v4, %v14535_v47  ;;  %11699 = vmatprep.subr.bf16.mxu0 %v15331_v12  ;;  %v15332_v47 = vld [vmem:[%s20963_s5 + $0x1a0] ss:$16 sps:$4 sm:$0xff]   ;;  %v6951_v4 = vunpack.c.l.s4 %v16104_v43  ;;  %v18912_v45 = vsub.s32 %v6924_v0, %v21015_v19  ;;  %v14531_v12 = vadd.f32 %v18810_v50, %v18800_v54 }
 0x413   :  { %v18849_v40 = vpop.f32.mrf.mxu0  ;;  %11661 = vmatpush2.bf16.msra.mxu1 %v15332_v47  ;;  %v14580_v54 = vadd.f32 %v18750_v30, %v18746_v34  ;;  %v14583_v50 = vadd.f32 %v18759_v20, %v18755_v14  ;;  %v14589_v0 = vadd.f32 %v18790_v25, %v18780_v57  ;;  %v6663_v34 = vadd.f32 %v14528_v53, %v18671_v61  ;;  %v15349_v61 = vld [vmem:[%s20963_s5 + $0x364] ss:$16 sps:$4 sm:$0xff]  }
 0x414   :  { %v18855_v16 = vadd.f32 %v14537_v17, %v18682_v21  ;;  %v15329_v21 = vld [vmem:[%s20963_s5 + $0x3c0] ss:$16 sps:$4 sm:$0xff]   ;;  %v18882_v17 = vpop.f32.mrf.mxu1  ;;  %v6952_v59 = vunpack.c.0.s8 %v6951_v4  ;;  %11662 = vmatprep.subr.bf16.mxu1 %v15340_v38  ;;  %v14592_v14 = vadd.f32 %v18824_v24, %v18808_v36  ;;  %v6666_v20 = vadd.f32 %v14531_v12, %v6569_v15 }
 0x415   :  { %v18862_v13 = vpop.f32.mrf.mxu0  ;;  %11700 = vmatpush2.bf16.msra.mxu0 %v15329_v21  ;;  %v6731_v21 = vadd.f32 %v14571_v22, %v18740_v62  ;;  %v6658_v62 = vadd.f32 %v14525_v56, %v18666_v11  ;;  %v15347_v36 = vld [vmem:[%s20963_s5 + $0x360] ss:$16 sps:$4 sm:$0xff]   ;;  %v18957_v24 = vadd.f32 %v14580_v54, %v18753_v1  ;;  %v18960_v9 = vadd.f32 %v14583_v50, %v18762_v35  ;;  %v15355_v56 = vld [vmem:[%s20963_s5 + $0x344] ss:$16 sps:$4 sm:$0xff]  }
 0x416   :  { %11701 = vmatprep.subr.bf16.mxu0 %v15337_v39  ;;  %v14597_v55 = vpop.f32.mrf.mxu1  ;;  %v18951_v57 = vsub.s32 %v6952_v59, %v21015_v19  ;;  %v15350_v1 = vld [vmem:[%s20963_s5 + $0x140] ss:$16 sps:$4 sm:$0xff]   ;;  %v18977_v38 = vadd.f32 %v14595_v23, %v6666_v20 }
 0x417   :  { %v18870_v31 = vpop.f32.mrf.mxu0  ;;  %11663 = vmatpush2.bf16.msra.mxu1 %v15338_v28  ;;  %v18967_v22 = vadd.f32 %v14589_v0, %v6658_v62  ;;  %v15353_v59 = vld [vmem:[%s20963_s5 + $0x340] ss:$16 sps:$4 sm:$0xff]  }
 0x418   :  { %v14599_v49 = vpop.f32.mrf.mxu1  ;;  %11664 = vmatprep.subr.bf16.mxu1 %v15346_v44  ;;  %v15359_v44 = vld [vmem:[%s20963_s5 + $0x320] ss:$16 sps:$4 sm:$0xff]  }
 0x419   :  { %v18884_v41 = vpop.f32.mrf.mxu0  ;;  %11702 = vmatpush2.bf16.msra.mxu0 %v15335_v46  ;;  %v18973_v46 = vadd.f32 %v14597_v55, %v18882_v17 }
 0x41a   :  { %11703 = vmatprep.subr.bf16.mxu0 %v15343_v48  ;;  %v14600_v35 = vpop.f32.mrf.mxu1  ;;  %v15358_v48 = vld [vmem:[%s20963_s5 + $0x124] ss:$16 sps:$4 sm:$0xff]  }
 0x41b   :  { %v14686_v26 = vpop.f32.mrf.mxu0  ;;  %11665 = vmatpush2.bf16.msra.mxu1 %v15344_v33  ;;  %v15362_v33 = vld [vmem:[%s20963_s5 + $0x100] ss:$16 sps:$4 sm:$0xff]  }
 0x41c   :  { %v6825_v10 = vadd.f32 %v14686_v26, %v6728_v32  ;;  %v18975_v26 = vadd.f32 %v14592_v14, %v6663_v34  ;;  %11666 = vmatprep.subr.bf16.mxu1 %v15352_v42  ;;  %v15367_v42 = vld [vmem:[%s20963_s5 + $0x304] ss:$16 sps:$4 sm:$0xff]  }
 0x41d   :  { %v6816_v63 = vpop.f32.mrf.mxu0  ;;  %11704 = vmatpush2.bf16.msra.mxu0 %v15341_v51  ;;  %v15356_v51 = vld [vmem:[%s20963_s5 + $0x120] ss:$16 sps:$4 sm:$0xff]  }
 0x41e   :  { %v6817_v11 = vadd.f32 %v6816_v63, %v6720_v58  ;;  %v6881_v25 = vmax.f32 %v6825_v10, 0.0  ;;  %11705 = vmatprep.subr.bf16.mxu0 %v15349_v61  ;;  %v18992_v10 = vadd.f32 %v14600_v35, %v14599_v49  ;;  %v18996_v58 = vadd.f32 %v18862_v13, %v18849_v40  ;;  %v15361_v40 = vld [vmem:[%s20963_s5 + $0x324] ss:$16 sps:$4 sm:$0xff]  }
 0x41f   :  { %v14687_v47 = vpop.f32.mrf.mxu0  ;;  %11667 = vmatpush2.bf16.msra.mxu1 %v15350_v1 }
 0x420   :  { %v6828_v30 = vadd.f32 %v14687_v47, %v6731_v21  ;;  %v6879_v7 = vmax.f32 %v6817_v11, 0.0  ;;  %v19000_v21 = vadd.f32 %v18884_v41, %v18870_v31  ;;  %11668 = vmatprep.subr.bf16.mxu1 %v15358_v48  ;;  %v15364_v11 = vld [vmem:[%s20963_s5 + $0x104] ss:$16 sps:$4 sm:$0xff]  }
 0x421   :  { %v6819_v43 = vpop.f32.mrf.mxu0  ;;  %11706 = vmatpush2.bf16.msra.mxu0 %v15347_v36  ;;  %v15365_v36 = vld [vmem:[%s20963_s5 + $0x300] ss:$16 sps:$4 sm:$0xff]  }
 0x422   :  { %v6882_v4 = vmax.f32 %v6828_v30, 0.0  ;;  %v6820_v18 = vadd.f32 %v6819_v43, %v6723_v6  ;;  %11707 = vmatprep.subr.bf16.mxu0 %v15355_v56  ;;  %v19021_v43 = vpop.f32.mrf.mxu1 }
 0x423   :  { %11669 = vmatpush2.bf16.msra.mxu1 %v15356_v51 }
 0x424   :  { %v6896_v39 = vmax.f32 %v6881_v25, %v6882_v4  ;;  %v6880_v60 = vmax.f32 %v6820_v18, 0.0  ;;  %11670 = vmatprep.subr.bf16.mxu1 %v15364_v11 }
 0x425   :  { %11708 = vmatpush2.bf16.msra.mxu0 %v15353_v59 }
 0x426   :  { %v7288_v53 = vsel %vm2048_vm5, %v6896_v39, -inf  ;;  %v7383_v32 = vsel %vm7000_vm13, %v6896_v39, -inf  ;;  %v7478_v28 = vsel %vm2049_vm7, %v6896_v39, -inf  ;;  %v7573_v17 = vsel %vm7192_vm14, %v6896_v39, -inf  ;;  %11709 = vmatprep.subr.bf16.mxu0 %v15361_v40 }
 0x427   :  { %v7289_v15 = vrot.slane %v7288_v53, 4  ;;  %v7384_v12 = vrot.slane %v7383_v32, 4  ;;  %v7479_v55 = vrot.slane %v7478_v28, 4  ;;  %v7574_v63 = vrot.slane %v7573_v17, 4  ;;  %11671 = vmatpush2.bf16.msra.mxu1 %v15362_v33 }
 0x428   :  { %v6895_v6 = vmax.f32 %v6879_v7, %v6880_v60  ;;  %v15370_v7 = vld [vmem:[%s20963_s5 + $0x4e4] ss:$16 sps:$4 sm:$0xff]  }
 0x429   :  { %v7290_v54 = vmax.f32 %v7288_v53, %v7289_v15  ;;  %v7385_v50 = vmax.f32 %v7383_v32, %v7384_v12  ;;  %v7480_v29 = vmax.f32 %v7478_v28, %v7479_v55  ;;  %v7575_v2 = vmax.f32 %v7573_v17, %v7574_v63  ;;  %11710 = vmatpush2.bf16.msra.mxu0 %v15359_v44  ;;  %v14690_v55 = vpop.f32.mrf.mxu0  ;;  %v14603_v63 = vpop.f32.mrf.mxu1 }
 0x42a   :  { %v6904_v13 = vsel %vm2048_vm5, %v6895_v6, -inf  ;;  %v7001_v31 = vsel %vm7000_vm13, %v6895_v6, -inf  ;;  %v7097_v41 = vsel %vm2049_vm7, %v6895_v6, -inf  ;;  %v7193_v47 = vsel %vm7192_vm14, %v6895_v6, -inf  ;;  %11711 = vmatprep.subr.bf16.mxu0 %v15367_v42  ;;  %11722 = vmatprep.subr.bf16.mxu1 %v15370_v7 }
 0x42b   :  { %v7291_v62 = vrot.slane %v7290_v54, 2  ;;  %v7386_v0 = vrot.slane %v7385_v50, 2  ;;  %v7481_v34 = vrot.slane %v7480_v29, 2  ;;  %v7576_v30 = vrot.slane %v7575_v2, 2  ;;  %v6832_v33 = vpop.f32.mrf.mxu0 }
 0x42c   :  { %v6905_v14 = vrot.slane %v6904_v13, 4  ;;  %v7002_v20 = vrot.slane %v7001_v31, 4  ;;  %v7098_v23 = vrot.slane %v7097_v41, 4  ;;  %v7194_v49 = vrot.slane %v7193_v47, 4 }
 0x42d   :  { %v7292_v61 = vmax.f32 %v7290_v54, %v7291_v62  ;;  %v7387_v25 = vmax.f32 %v7385_v50, %v7386_v0  ;;  %v7482_v4 = vmax.f32 %v7480_v29, %v7481_v34  ;;  %v7577_v18 = vmax.f32 %v7575_v2, %v7576_v30  ;;  %11712 = vmatpush2.bf16.msra.mxu0 %v15365_v36  ;;  %v15374_v50 = vld [vmem:[%s20963_s5 + $0x6e4] ss:$16 sps:$4 sm:$0xff]  }
 0x42e   :  { %v6906_v39 = vmax.f32 %v6904_v13, %v6905_v14  ;;  %v7003_v60 = vmax.f32 %v7001_v31, %v7002_v20  ;;  %v7099_v1 = vmax.f32 %v7097_v41, %v7098_v23  ;;  %v7195_v35 = vmax.f32 %v7193_v47, %v7194_v49  ;;  %11763 = vmatprep.subr.bf16.mxu0 %v15374_v50  ;;  %v14605_v14 = vpop.f32.mrf.mxu1 }
 0x42f   :  { %v7293_v56 = vrot.slane %v7292_v61, 1  ;;  %v7388_v53 = vrot.slane %v7387_v25, 1  ;;  %v7483_v32 = vrot.slane %v7482_v4, 1  ;;  %v7578_v28 = vrot.slane %v7577_v18, 1 }
 0x430   :  { %v6907_v17 = vrot.slane %v6906_v39, 2  ;;  %v7004_v59 = vrot.slane %v7003_v60, 2  ;;  %v7100_v15 = vrot.slane %v7099_v1, 2  ;;  %v7196_v12 = vrot.slane %v7195_v35, 2 }
 0x431   :  { %v7294_v48 = vmax.f32 %v7292_v61, %v7293_v56  ;;  %v7389_v6 = vmax.f32 %v7387_v25, %v7388_v53  ;;  %v7484_v51 = vmax.f32 %v7482_v4, %v7483_v32  ;;  %v7579_v54 = vmax.f32 %v7577_v18, %v7578_v28  ;;  %v14691_v53 = vpop.f32.mrf.mxu0  ;;  %v14606_v28 = vpop.f32.mrf.mxu1 }
 0x432   :  { %v6908_v29 = vmax.f32 %v6906_v39, %v6907_v17  ;;  %v7005_v2 = vmax.f32 %v7003_v60, %v7004_v59  ;;  %v7101_v40 = vmax.f32 %v7099_v1, %v7100_v15  ;;  %v7197_v13 = vmax.f32 %v7195_v35, %v7196_v12 }
 0x433   :  { %v7302_v31 = vpack.c.bf16 %v7294_v48, %v7294_v48  ;;  %v7397_v41 = vpack.c.bf16 %v7389_v6, %v7389_v6  ;;  %v7492_v47 = vpack.c.bf16 %v7484_v51, %v7484_v51  ;;  %v7587_v44 = vpack.c.bf16 %v7579_v54, %v7579_v54 }
 0x434   :  { %v6909_v62 = vrot.slane %v6908_v29, 1  ;;  %v7006_v0 = vrot.slane %v7005_v2, 1  ;;  %v7102_v34 = vrot.slane %v7101_v40, 1  ;;  %v7198_v30 = vrot.slane %v7197_v13, 1 }
 0x435   :  { %v7312_v20 = vrot.slane %v7302_v31, %v18912_v45  ;;  %v7407_v23 = vrot.slane %v7397_v41, %v18912_v45  ;;  %v7502_v49 = vrot.slane %v7492_v47, %v18912_v45  ;;  %v7597_v11 = vrot.slane %v7587_v44, %v18912_v45  ;;  %v6835_v31 = vpop.f32.mrf.mxu0 }
 0x436   :  { %v6910_v61 = vmax.f32 %v6908_v29, %v6909_v62  ;;  %v7007_v25 = vmax.f32 %v7005_v2, %v7006_v0  ;;  %v7103_v4 = vmax.f32 %v7101_v40, %v7102_v34  ;;  %v7199_v18 = vmax.f32 %v7197_v13, %v7198_v30 }
 0x437   :  { %v7319_v36 = vrot.slane %v7312_v20, %v18912_v45  ;;  %v7414_v42 = vrot.slane %v7407_v23, %v18912_v45  ;;  %v7509_v39 = vrot.slane %v7502_v49, %v18912_v45  ;;  %v7604_v60 = vrot.slane %v7597_v11, %v18912_v45  ;;  %v14694_v49 = vpop.f32.mrf.mxu0 }
 0x438   :  { %v6918_v1 = vpack.c.bf16 %v6910_v61, %v6910_v61  ;;  %v7015_v35 = vpack.c.bf16 %v7007_v25, %v7007_v25  ;;  %v7111_v7 = vpack.c.bf16 %v7103_v4, %v7103_v4  ;;  %v7207_v56 = vpack.c.bf16 %v7199_v18, %v7199_v18 }
 0x439   :  { %v6679_v32 = vadd.f32 %v18996_v58, %v18691_v27  ;;  %v7340_v17 = vrot.slane %v7319_v36, %v18951_v57  ;;  %v7435_v59 = vrot.slane %v7414_v42, %v18951_v57  ;;  %v7530_v15 = vrot.slane %v7509_v39, %v18951_v57 }
 0x43a   :  { %v7625_v12 = vrot.slane %v7604_v60, %v18951_v57  ;;  %v6928_v48 = vrot.slane %v6918_v1, %v18912_v45  ;;  %v7025_v6 = vrot.slane %v7015_v35, %v18912_v45  ;;  %v7121_v51 = vrot.slane %v7111_v7, %v18912_v45 }
 0x43b   :  { %v14604_v54 = vadd.f32 %v14603_v63, %v19021_v43  ;;  %v6682_v27 = vadd.f32 %v19000_v21, %v18702_v3  ;;  %v6841_v58 = vadd.f32 %v14690_v55, %v18957_v24  ;;  %v6844_v50 = vadd.f32 %v14691_v53, %v18960_v9 }
 0x43c   :  { %v14607_v29 = vadd.f32 %v14606_v28, %v14605_v14  ;;  %v7347_v2 = vrot.slane %v7340_v17, %v18951_v57  ;;  %v7442_v40 = vrot.slane %v7435_v59, %v18951_v57  ;;  %v7217_v13 = vrot.slane %v7207_v56, %v18912_v45 }
 0x43d   :  { %v7537_v41 = vrot.slane %v7530_v15, %v18951_v57  ;;  %v6935_v47 = vrot.slane %v6928_v48, %v18912_v45  ;;  %v19064_v43 = vadd.f32 %v18973_v46, %v18836_v8  ;;  %v19068_v3 = vadd.f32 %v18992_v10, %v18855_v16 }
 0x43e   :  { %v7632_v24 = vrot.slane %v7625_v12, %v18951_v57  ;;  %v7032_v9 = vrot.slane %v7025_v6, %v18912_v45  ;;  %v7128_v21 = vrot.slane %v7121_v51, %v18912_v45  ;;  %v6833_v55 = vadd.f32 %v6832_v33, %v18743_v37 }
 0x43f   :  { %v6885_v63 = vmax.f32 %v6841_v58, 0.0  ;;  %v6886_v44 = vmax.f32 %v6844_v50, 0.0  ;;  %v6836_v62 = vadd.f32 %v6835_v31, %v18748_v52  ;;  %v19075_v0 = vadd.f32 %v14604_v54, %v6679_v32 }
 0x440   :  { %v19077_v8 = vunpack.c.l.b16 %v7347_v2  ;;  %v19079_v46 = vunpack.c.l.b16 %v7442_v40  ;;  %v7224_v16 = vrot.slane %v7217_v13, %v18912_v45  ;;  %v19082_v10 = vadd.f32 %v14607_v29, %v6682_v27 }
 0x441   :  { %v19084_v34 = vunpack.c.l.b16 %v7537_v41  ;;  %v19087_v30 = vrot.slane %v6935_v47, %v18951_v57  ;;  %v6898_v37 = vmax.f32 %v6885_v63, %v6886_v44  ;;  %v6884_v33 = vmax.f32 %v6836_v62, 0.0  ;;  %v6848_v44 = vpop.f32.mrf.mxu0 }
 0x442   :  { %v19089_v14 = vunpack.c.l.b16 %v7632_v24  ;;  %v19092_v52 = vrot.slane %v7032_v9, %v18951_v57  ;;  %v19095_v20 = vrot.slane %v7128_v21, %v18951_v57  ;;  %v6883_v23 = vmax.f32 %v6833_v55, 0.0 }
 0x443   :  { %v8048_v11 = vsel %vm2048_vm5, %v6898_v37, -inf  ;;  %v8143_v61 = vsel %vm7000_vm13, %v6898_v37, -inf  ;;  %v8238_v25 = vsel %vm2049_vm7, %v6898_v37, -inf  ;;  %v8333_v4 = vsel %vm7192_vm14, %v6898_v37, -inf }
 0x444   :  { %v8049_v18 = vrot.slane %v8048_v11, 4  ;;  %v8144_v36 = vrot.slane %v8143_v61, 4  ;;  %v8239_v42 = vrot.slane %v8238_v25, 4  ;;  %v8334_v39 = vrot.slane %v8333_v4, 4 }
 0x445   :  { %v6963_v60 = vrot.slane %v19087_v30, %v18951_v57  ;;  %v19104_v1 = vrot.slane %v7224_v16, %v18951_v57  ;;  %v6897_v35 = vmax.f32 %v6883_v23, %v6884_v33  ;;  %v19107_v7 = vadd.f32 %v14694_v49, %v18975_v26 }
 0x446   :  { %v8050_v56 = vmax.f32 %v8048_v11, %v8049_v18  ;;  %v8145_v53 = vmax.f32 %v8143_v61, %v8144_v36  ;;  %v8240_v32 = vmax.f32 %v8238_v25, %v8239_v42  ;;  %v8335_v28 = vmax.f32 %v8333_v4, %v8334_v39 }
 0x447   :  { %v7668_v17 = vsel %vm2048_vm5, %v6897_v35, -inf  ;;  %v7763_v59 = vsel %vm7000_vm13, %v6897_v35, -inf  ;;  %v7858_v15 = vsel %vm2049_vm7, %v6897_v35, -inf  ;;  %v7953_v12 = vsel %vm7192_vm14, %v6897_v35, -inf }
 0x448   :  { %v8051_v48 = vrot.slane %v8050_v56, 2  ;;  %v8146_v6 = vrot.slane %v8145_v53, 2  ;;  %v8241_v51 = vrot.slane %v8240_v32, 2  ;;  %v8336_v54 = vrot.slane %v8335_v28, 2 }
 0x449   :  { %v7669_v27 = vrot.slane %v7668_v17, 4  ;;  %v7764_v58 = vrot.slane %v7763_v59, 4  ;;  %v7859_v26 = vrot.slane %v7858_v15, 4  ;;  %v7954_v50 = vrot.slane %v7953_v12, 4 }
 0x44a   :  { %v8052_v29 = vmax.f32 %v8050_v56, %v8051_v48  ;;  %v8147_v2 = vmax.f32 %v8145_v53, %v8146_v6  ;;  %v8242_v40 = vmax.f32 %v8240_v32, %v8241_v51  ;;  %v8337_v13 = vmax.f32 %v8335_v28, %v8336_v54  ;;  %v14695_v53 = vpop.f32.mrf.mxu0 }
 0x44b   :  { %v7670_v31 = vmax.f32 %v7668_v17, %v7669_v27  ;;  %v7765_v41 = vmax.f32 %v7763_v59, %v7764_v58  ;;  %v7860_v47 = vmax.f32 %v7858_v15, %v7859_v26  ;;  %v7955_v24 = vmax.f32 %v7953_v12, %v7954_v50 }
 0x44c   :  { %v8053_v9 = vrot.slane %v8052_v29, 1  ;;  %v8148_v21 = vrot.slane %v8147_v2, 1  ;;  %v8243_v55 = vrot.slane %v8242_v40, 1  ;;  %v8338_v63 = vrot.slane %v8337_v13, 1 }
 0x44d   :  { %v7671_v62 = vrot.slane %v7670_v31, 2  ;;  %v7766_v16 = vrot.slane %v7765_v41, 2  ;;  %v7861_v37 = vrot.slane %v7860_v47, 2  ;;  %v7956_v33 = vrot.slane %v7955_v24, 2 }
 0x44e   :  { %v8054_v23 = vmax.f32 %v8052_v29, %v8053_v9  ;;  %v8149_v49 = vmax.f32 %v8147_v2, %v8148_v21  ;;  %v8244_v11 = vmax.f32 %v8242_v40, %v8243_v55  ;;  %v8339_v61 = vmax.f32 %v8337_v13, %v8338_v63  ;;  %v6851_v40 = vpop.f32.mrf.mxu0 }
 0x44f   :  { %v7672_v25 = vmax.f32 %v7670_v31, %v7671_v62  ;;  %v7767_v4 = vmax.f32 %v7765_v41, %v7766_v16  ;;  %v7862_v18 = vmax.f32 %v7860_v47, %v7861_v37  ;;  %v7957_v36 = vmax.f32 %v7955_v24, %v7956_v33 }
 0x450   :  { %v8062_v42 = vpack.c.bf16 %v8054_v23, %v8054_v23  ;;  %v8157_v39 = vpack.c.bf16 %v8149_v49, %v8149_v49  ;;  %v8252_v35 = vpack.c.bf16 %v8244_v11, %v8244_v11  ;;  %v8347_v56 = vpack.c.bf16 %v8339_v61, %v8339_v61  ;;  %v14698_v23 = vpop.f32.mrf.mxu0 }
 0x451   :  { %v7673_v32 = vrot.slane %v7672_v25, 1  ;;  %v7768_v28 = vrot.slane %v7767_v4, 1  ;;  %v7863_v17 = vrot.slane %v7862_v18, 1  ;;  %v7958_v59 = vrot.slane %v7957_v36, 1 }
 0x452   :  { %v8072_v15 = vrot.slane %v8062_v42, %v18912_v45  ;;  %v8167_v12 = vrot.slane %v8157_v39, %v18912_v45  ;;  %v8262_v48 = vrot.slane %v8252_v35, %v18912_v45  ;;  %v8357_v6 = vrot.slane %v8347_v56, %v18912_v45  ;;  %v6864_v56 = vpop.f32.mrf.mxu0 }
 0x453   :  { %v7674_v51 = vmax.f32 %v7672_v25, %v7673_v32  ;;  %v7769_v54 = vmax.f32 %v7767_v4, %v7768_v28  ;;  %v7864_v27 = vmax.f32 %v7862_v18, %v7863_v17  ;;  %v7959_v58 = vmax.f32 %v7957_v36, %v7958_v59 }
 0x454   :  { %v8079_v26 = vrot.slane %v8072_v15, %v18912_v45  ;;  %v8174_v50 = vrot.slane %v8167_v12, %v18912_v45  ;;  %v8269_v29 = vrot.slane %v8262_v48, %v18912_v45  ;;  %v8364_v2 = vrot.slane %v8357_v6, %v18912_v45 }
 0x455   :  { %v7682_v13 = vpack.c.bf16 %v7674_v51, %v7674_v51  ;;  %v7777_v31 = vpack.c.bf16 %v7769_v54, %v7769_v54  ;;  %v7872_v41 = vpack.c.bf16 %v7864_v27, %v7864_v27  ;;  %v7967_v47 = vpack.c.bf16 %v7959_v58, %v7959_v58 }
 0x456   :  { %v7060_v24 = vrot.slane %v19092_v52, %v18951_v57  ;;  %v7156_v9 = vrot.slane %v19095_v20, %v18951_v57  ;;  %v7252_v21 = vrot.slane %v19104_v1, %v18951_v57  ;;  %v6849_v55 = vadd.f32 %v6848_v44, %v18965_v5 }
 0x457   :  { %v7692_v63 = vrot.slane %v7682_v13, %v18912_v45  ;;  %v7787_v62 = vrot.slane %v7777_v31, %v18912_v45  ;;  %v7882_v16 = vrot.slane %v7872_v41, %v18912_v45  ;;  %v7977_v37 = vrot.slane %v7967_v47, %v18912_v45 }
 0x458   :  { %v19133_v33 = vrot.slane %v8079_v26, %v18951_v57  ;;  %v19136_v52 = vrot.slane %v8174_v50, %v18951_v57  ;;  %v6860_v20 = vadd.f32 %v14695_v53, %v18977_v38  ;;  %v6852_v1 = vadd.f32 %v6851_v40, %v18967_v22 }
 0x459   :  { %v19141_v5 = vrot.slane %v8269_v29, %v18951_v57  ;;  %v19144_v44 = vrot.slane %v8364_v2, %v18951_v57  ;;  %v7699_v49 = vrot.slane %v7692_v63, %v18912_v45  ;;  %v7794_v11 = vrot.slane %v7787_v62, %v18912_v45 }
 0x45a   :  { %v19151_v61 = vunpack.c.l.b16 %v6963_v60  ;;  %v7889_v38 = vrot.slane %v7882_v16, %v18912_v45  ;;  %v7984_v22 = vrot.slane %v7977_v37, %v18912_v45  ;;  %v6889_v25 = vmax.f32 %v19107_v7, 0.0 }
 0x45b   :  { %v19156_v4 = vunpack.c.l.b16 %v7060_v24  ;;  %v19158_v18 = vunpack.c.l.b16 %v7156_v9  ;;  %v19161_v36 = vrot.slane %v7699_v49, %v18951_v57  ;;  %v19164_v42 = vrot.slane %v7794_v11, %v18951_v57 }
 0x45c   :  { %v19166_v39 = vunpack.c.l.b16 %v7252_v21  ;;  %v6887_v30 = vmax.f32 %v6849_v55, 0.0  ;;  %v6890_v60 = vmax.f32 %v6860_v20, 0.0  ;;  %v6888_v35 = vmax.f32 %v6852_v1, 0.0 }
 0x45d   :  { %v8107_v53 = vrot.slane %v19133_v33, %v18951_v57  ;;  %v8202_v7 = vrot.slane %v19136_v52, %v18951_v57  ;;  %v8297_v32 = vrot.slane %v19141_v5, %v18951_v57  ;;  %v8392_v28 = vrot.slane %v19144_v44, %v18951_v57 }
 0x45e   :  { %v19177_v17 = vrot.slane %v7889_v38, %v18951_v57  ;;  %v19180_v59 = vrot.slane %v7984_v22, %v18951_v57  ;;  %v6900_v15 = vmax.f32 %v6889_v25, %v6890_v60  ;;  %v6899_v12 = vmax.f32 %v6887_v30, %v6888_v35 }
 0x45f   :  { %v7727_v48 = vrot.slane %v19161_v36, %v18951_v57  ;;  %v19187_v51 = vadd.f32 %v14698_v23, %v19075_v0  ;;  %v19190_v54 = vadd.f32 %v6864_v56, %v19064_v43  ;;  %v19282_v33 = vunpack.c.l.b16 %v8392_v28 }
 0x460   :  { %v7295_v27 = vsel %vm2048_vm5, %v6900_v15, -inf  ;;  %v7390_v58 = vsel %vm7000_vm13, %v6900_v15, -inf  ;;  %v7485_v26 = vsel %vm2049_vm7, %v6900_v15, -inf  ;;  %v7580_v50 = vsel %vm7192_vm14, %v6900_v15, -inf }
 0x461   :  { %v7296_v29 = vrot.slane %v7295_v27, 4  ;;  %v7391_v2 = vrot.slane %v7390_v58, 4  ;;  %v7486_v40 = vrot.slane %v7485_v26, 4  ;;  %v7581_v13 = vrot.slane %v7580_v50, 4 }
 0x462   :  { %v6911_v31 = vsel %vm2048_vm5, %v6899_v12, -inf  ;;  %v7008_v0 = vsel %vm7000_vm13, %v6899_v12, -inf  ;;  %v7104_v41 = vsel %vm2049_vm7, %v6899_v12, -inf  ;;  %v7200_v43 = vsel %vm7192_vm14, %v6899_v12, -inf }
 0x463   :  { %v7297_v47 = vmax.f32 %v7295_v27, %v7296_v29  ;;  %v7392_v24 = vmax.f32 %v7390_v58, %v7391_v2  ;;  %v7487_v9 = vmax.f32 %v7485_v26, %v7486_v40  ;;  %v7582_v21 = vmax.f32 %v7580_v50, %v7581_v13 }
 0x464   :  { %v6912_v55 = vrot.slane %v6911_v31, 4  ;;  %v7009_v63 = vrot.slane %v7008_v0, 4  ;;  %v7105_v62 = vrot.slane %v7104_v41, 4  ;;  %v7201_v16 = vrot.slane %v7200_v43, 4 }
 0x465   :  { %v7298_v37 = vrot.slane %v7297_v47, 2  ;;  %v7393_v20 = vrot.slane %v7392_v24, 2  ;;  %v7488_v1 = vrot.slane %v7487_v9, 2  ;;  %v7583_v23 = vrot.slane %v7582_v21, 2 }
 0x466   :  { %v6913_v49 = vmax.f32 %v6911_v31, %v6912_v55  ;;  %v7010_v11 = vmax.f32 %v7008_v0, %v7009_v63  ;;  %v7106_v38 = vmax.f32 %v7104_v41, %v7105_v62  ;;  %v7202_v22 = vmax.f32 %v7200_v43, %v7201_v16 }
 0x467   :  { %v7299_v25 = vmax.f32 %v7297_v47, %v7298_v37  ;;  %v7394_v30 = vmax.f32 %v7392_v24, %v7393_v20  ;;  %v7489_v60 = vmax.f32 %v7487_v9, %v7488_v1  ;;  %v7584_v35 = vmax.f32 %v7582_v21, %v7583_v23 }
 0x468   :  { %v6914_v56 = vrot.slane %v6913_v49, 2  ;;  %v7011_v15 = vrot.slane %v7010_v11, 2  ;;  %v7107_v12 = vrot.slane %v7106_v38, 2  ;;  %v7203_v27 = vrot.slane %v7202_v22, 2 }
 0x469   :  { %v7300_v58 = vrot.slane %v7299_v25, 1  ;;  %v7395_v26 = vrot.slane %v7394_v30, 1  ;;  %v7490_v50 = vrot.slane %v7489_v60, 1  ;;  %v7585_v29 = vrot.slane %v7584_v35, 1 }
 0x46a   :  { %v6915_v2 = vmax.f32 %v6913_v49, %v6914_v56  ;;  %v7012_v40 = vmax.f32 %v7010_v11, %v7011_v15  ;;  %v7108_v13 = vmax.f32 %v7106_v38, %v7107_v12  ;;  %v7204_v6 = vmax.f32 %v7202_v22, %v7203_v27 }
 0x46b   :  { %v7301_v31 = vmax.f32 %v7299_v25, %v7300_v58  ;;  %v7396_v0 = vmax.f32 %v7394_v30, %v7395_v26  ;;  %v7491_v41 = vmax.f32 %v7489_v60, %v7490_v50  ;;  %v7586_v43 = vmax.f32 %v7584_v35, %v7585_v29 }
 0x46c   :  { %v6916_v47 = vrot.slane %v6915_v2, 1  ;;  %v7013_v24 = vrot.slane %v7012_v40, 1  ;;  %v7109_v9 = vrot.slane %v7108_v13, 1  ;;  %v7205_v21 = vrot.slane %v7204_v6, 1 }
 0x46d   :  { %v7303_v55 = vpack.c.bf16 %v7301_v31, %v7301_v31  ;;  %v7398_v63 = vpack.c.bf16 %v7396_v0, %v7396_v0  ;;  %v7493_v62 = vpack.c.bf16 %v7491_v41, %v7491_v41  ;;  %v7588_v16 = vpack.c.bf16 %v7586_v43, %v7586_v43 }
 0x46e   :  { %v6917_v37 = vmax.f32 %v6915_v2, %v6916_v47  ;;  %v7014_v20 = vmax.f32 %v7012_v40, %v7013_v24  ;;  %v7110_v1 = vmax.f32 %v7108_v13, %v7109_v9  ;;  %v7206_v23 = vmax.f32 %v7204_v6, %v7205_v21 }
 0x46f   :  { %v7326_v49 = vrot.slane %v7303_v55, %v18912_v45  ;;  %v7421_v11 = vrot.slane %v7398_v63, %v18912_v45  ;;  %v7516_v38 = vrot.slane %v7493_v62, %v18912_v45  ;;  %v7611_v22 = vrot.slane %v7588_v16, %v18912_v45 }
 0x470   :  { %v6919_v25 = vpack.c.bf16 %v6917_v37, %v6917_v37  ;;  %v7016_v30 = vpack.c.bf16 %v7014_v20, %v7014_v20  ;;  %v7112_v60 = vpack.c.bf16 %v7110_v1, %v7110_v1  ;;  %v7208_v35 = vpack.c.bf16 %v7206_v23, %v7206_v23 }
 0x471   :  { %v7333_v56 = vrot.slane %v7326_v49, %v18912_v45  ;;  %v7428_v15 = vrot.slane %v7421_v11, %v18912_v45  ;;  %v7523_v12 = vrot.slane %v7516_v38, %v18912_v45  ;;  %v7618_v6 = vrot.slane %v7611_v22, %v18912_v45 }
 0x472   :  { %v6942_v27 = vrot.slane %v6919_v25, %v18912_v45  ;;  %v7039_v58 = vrot.slane %v7016_v30, %v18912_v45  ;;  %v7135_v26 = vrot.slane %v7112_v60, %v18912_v45  ;;  %v7231_v50 = vrot.slane %v7208_v35, %v18912_v45 }
 0x473   :  { %v7354_v29 = vrot.slane %v7333_v56, %v18951_v57  ;;  %v7449_v2 = vrot.slane %v7428_v15, %v18951_v57  ;;  %v7544_v40 = vrot.slane %v7523_v12, %v18951_v57  ;;  %v7639_v13 = vrot.slane %v7618_v6, %v18951_v57 }
 0x474   :  { %v6949_v31 = vrot.slane %v6942_v27, %v18912_v45  ;;  %v7046_v0 = vrot.slane %v7039_v58, %v18912_v45  ;;  %v7142_v41 = vrot.slane %v7135_v26, %v18912_v45  ;;  %v7238_v43 = vrot.slane %v7231_v50, %v18912_v45  ;;  %v14699_v27 = vpop.f32.mrf.mxu0 }
 0x475   :  { %v7361_v47 = vrot.slane %v7354_v29, %v18951_v57  ;;  %v7456_v24 = vrot.slane %v7449_v2, %v18951_v57  ;;  %v7551_v9 = vrot.slane %v7544_v40, %v18951_v57  ;;  %v7646_v21 = vrot.slane %v7639_v13, %v18951_v57 }
 0x476   :  { %v6970_v55 = vrot.slane %v6949_v31, %v18951_v57  ;;  %v7067_v63 = vrot.slane %v7046_v0, %v18951_v57  ;;  %v7163_v62 = vrot.slane %v7142_v41, %v18951_v57  ;;  %v7259_v16 = vrot.slane %v7238_v43, %v18951_v57 }
 0x477   :  { %v7363_v37 = vunpack.c.l.b16 %v7361_v47  ;;  %v7458_v20 = vunpack.c.l.b16 %v7456_v24  ;;  %v7553_v1 = vunpack.c.l.b16 %v7551_v9  ;;  %v7648_v23 = vunpack.c.l.b16 %v7646_v21 }
 0x478   :  { %v6977_v49 = vrot.slane %v6970_v55, %v18951_v57  ;;  %v7074_v11 = vrot.slane %v7067_v63, %v18951_v57  ;;  %v7170_v38 = vrot.slane %v7163_v62, %v18951_v57  ;;  %v7266_v22 = vrot.slane %v7259_v16, %v18951_v57 }
 0x479   :  { %v7364_v25 = vrot.slane %v7363_v37, 7  ;;  %v7459_v30 = vrot.slane %v7458_v20, 7  ;;  %v7554_v60 = vrot.slane %v7553_v1, 7  ;;  %v7649_v35 = vrot.slane %v7648_v23, 7 }
 0x47a   :  { %v6979_v56 = vunpack.c.l.b16 %v6977_v49  ;;  %v7076_v15 = vunpack.c.l.b16 %v7074_v11  ;;  %v7172_v12 = vunpack.c.l.b16 %v7170_v38  ;;  %v7268_v6 = vunpack.c.l.b16 %v7266_v22 }
 0x47b   :  { %v7365_v58 = vsel %vm6981_vm15, %v7364_v25, %v19077_v8  ;;  %v7460_v26 = vsel %vm6981_vm15, %v7459_v30, %v19079_v46  ;;  %v7555_v50 = vsel %vm6981_vm15, %v7554_v60, %v19084_v34  ;;  %v7650_v29 = vsel %vm6981_vm15, %v7649_v35, %v19089_v14  ;;  %v6867_v34 = vpop.f32.mrf.mxu0 }
 0x47c   :  { %v7366_v2 = vpack.c.b16 %v7365_v58, %v7365_v58  ;;  %v7461_v40 = vpack.c.b16 %v7460_v26, %v7460_v26  ;;  %v7556_v13 = vpack.c.b16 %v7555_v50, %v7555_v50  ;;  %v7651_v31 = vpack.c.b16 %v7650_v29, %v7650_v29 }
 0x47d   :  { %v6980_v0 = vrot.slane %v6979_v56, 7  ;;  %v7077_v41 = vrot.slane %v7076_v15, 7  ;;  %v7173_v43 = vrot.slane %v7172_v12, 7  ;;  %v7269_v47 = vrot.slane %v7268_v6, 7 }
 0x47e   :  { %v7373_v24 = vrot.slane %v7366_v2, %v18912_v45  ;;  %v7468_v8 = vrot.slane %v7461_v40, %v18912_v45  ;;  %v7563_v46 = vrot.slane %v7556_v13, %v18912_v45  ;;  %v7658_v9 = vrot.slane %v7651_v31, %v18912_v45 }
 0x47f   :  { %v6982_v14 = vsel %vm6981_vm15, %v6980_v0, %v19151_v61  ;;  %v7078_v21 = vsel %vm6981_vm15, %v7077_v41, %v19156_v4  ;;  %v7174_v55 = vsel %vm6981_vm15, %v7173_v43, %v19158_v18  ;;  %v7270_v63 = vsel %vm6981_vm15, %v7269_v47, %v19166_v39 }
 0x480   :  { %13235 = vst.sshfl [vmem:[#allocation3 + $0x4] sm:$0x1 pattern:$0x73625140] %v7373_v24  ;;  %v6983_v62 = vpack.c.b16 %v6982_v14, %v6982_v14  ;;  %v7079_v16 = vpack.c.b16 %v7078_v21, %v7078_v21  ;;  %v7175_v37 = vpack.c.b16 %v7174_v55, %v7174_v55  ;;  %v7271_v20 = vpack.c.b16 %v7270_v63, %v7270_v63 }
 0x481   :  { %13236 = vst.sshfl [vmem:[#allocation3 + $0x5] sm:$0x1 pattern:$0x73625140] %v7468_v8  ;;  %v7917_v61 = vrot.slane %v19177_v17, %v18951_v57  ;;  %v8012_v4 = vrot.slane %v19180_v59, %v18951_v57  ;;  %v6876_v1 = vadd.f32 %v14699_v27, %v19082_v10  ;;  %v6868_v18 = vadd.f32 %v6867_v34, %v19068_v3 }
 0x482   :  { %13237 = vst.sshfl [vmem:[#allocation3 + $0x6] sm:$0x1 pattern:$0x73625140] %v7563_v46  ;;  %v6990_v39 = vrot.slane %v6983_v62, %v18912_v45  ;;  %v7086_v23 = vrot.slane %v7079_v16, %v18912_v45  ;;  %v7182_v49 = vrot.slane %v7175_v37, %v18912_v45  ;;  %v7278_v11 = vrot.slane %v7271_v20, %v18912_v45 }
 0x483   :  { %13238 = vst.sshfl [vmem:[#allocation3 + $0x7] sm:$0x1 pattern:$0x73625140] %v7658_v9  ;;  %v6893_v38 = vmax.f32 %v19187_v51, 0.0  ;;  %v6891_v22 = vmax.f32 %v19190_v54, 0.0  ;;  %v19267_v10 = vunpack.c.l.b16 %v8107_v53  ;;  %v19272_v3 = vunpack.c.l.b16 %v8202_v7 }
 0x484   :  { %v6894_v17 = vmax.f32 %v6876_v1, 0.0  ;;  %v6892_v25 = vmax.f32 %v6868_v18, 0.0  ;;  %13231 = vst.sshfl [vmem:[#allocation3] sm:$0x1 pattern:$0x73625140] %v6990_v39  ;;  %v19277_v59 = vunpack.c.l.b16 %v8297_v32  ;;  %v19287_v52 = vunpack.c.l.b16 %v7727_v48 }
 0x485   :  { %13232 = vst.sshfl [vmem:[#allocation3 + $0x1] sm:$0x1 pattern:$0x73625140] %v7086_v23  ;;  %v21016_v7 = vrot.slane %v19164_v42, %v18951_v57  ;;  %v19294_v5 = vunpack.c.l.b16 %v7917_v61  ;;  %v19296_v32 = vunpack.c.l.b16 %v8012_v4 }
 0x486   :  { %13233 = vst.sshfl [vmem:[#allocation3 + $0x2] sm:$0x1 pattern:$0x73625140] %v7182_v49  ;;  %v6902_v53 = vmax.f32 %v6893_v38, %v6894_v17  ;;  %v6901_v51 = vmax.f32 %v6891_v22, %v6892_v25 }
 0x487   :  { %13234 = vst.sshfl [vmem:[#allocation3 + $0x3] sm:$0x1 pattern:$0x73625140] %v7278_v11  ;;  %v19292_v54 = vunpack.c.l.b16 %v21016_v7 }
 0x488   :  { %v8055_v44 = vsel %vm2048_vm5, %v6902_v53, -inf  ;;  %v8150_v28 = vsel %vm7000_vm13, %v6902_v53, -inf  ;;  %v8245_v30 = vsel %vm2049_vm7, %v6902_v53, -inf  ;;  %v8340_v60 = vsel %vm7192_vm14, %v6902_v53, -inf }
 0x489   :  { %v8056_v36 = vrot.slane %v8055_v44, 4  ;;  %v8151_v48 = vrot.slane %v8150_v28, 4  ;;  %v8246_v35 = vrot.slane %v8245_v30, 4  ;;  %v8341_v56 = vrot.slane %v8340_v60, 4 }
 0x48a   :  { %v7675_v42 = vsel %vm2048_vm5, %v6901_v51, -inf  ;;  %v7770_v15 = vsel %vm7000_vm13, %v6901_v51, -inf  ;;  %v7865_v12 = vsel %vm2049_vm7, %v6901_v51, -inf  ;;  %v7960_v6 = vsel %vm7192_vm14, %v6901_v51, -inf }
 0x48b   :  { %v8057_v27 = vmax.f32 %v8055_v44, %v8056_v36  ;;  %v8152_v58 = vmax.f32 %v8150_v28, %v8151_v48  ;;  %v8247_v26 = vmax.f32 %v8245_v30, %v8246_v35  ;;  %v8342_v50 = vmax.f32 %v8340_v60, %v8341_v56 }
 0x48c   :  { %v7676_v29 = vrot.slane %v7675_v42, 4  ;;  %v7771_v2 = vrot.slane %v7770_v15, 4  ;;  %v7866_v40 = vrot.slane %v7865_v12, 4  ;;  %v7961_v13 = vrot.slane %v7960_v6, 4 }
 0x48d   :  { %v8058_v31 = vrot.slane %v8057_v27, 2  ;;  %v8153_v0 = vrot.slane %v8152_v58, 2  ;;  %v8248_v41 = vrot.slane %v8247_v26, 2  ;;  %v8343_v43 = vrot.slane %v8342_v50, 2 }
 0x48e   :  { %v7677_v47 = vmax.f32 %v7675_v42, %v7676_v29  ;;  %v7772_v24 = vmax.f32 %v7770_v15, %v7771_v2  ;;  %v7867_v8 = vmax.f32 %v7865_v12, %v7866_v40  ;;  %v7962_v46 = vmax.f32 %v7960_v6, %v7961_v13 }
 0x48f   :  { %v8059_v9 = vmax.f32 %v8057_v27, %v8058_v31  ;;  %v8154_v34 = vmax.f32 %v8152_v58, %v8153_v0  ;;  %v8249_v14 = vmax.f32 %v8247_v26, %v8248_v41  ;;  %v8344_v21 = vmax.f32 %v8342_v50, %v8343_v43 }
 0x490   :  { %v7678_v55 = vrot.slane %v7677_v47, 2  ;;  %v7773_v63 = vrot.slane %v7772_v24, 2  ;;  %v7868_v62 = vrot.slane %v7867_v8, 2  ;;  %v7963_v16 = vrot.slane %v7962_v46, 2 }
 0x491   :  { %v8060_v37 = vrot.slane %v8059_v9, 1  ;;  %v8155_v20 = vrot.slane %v8154_v34, 1  ;;  %v8250_v61 = vrot.slane %v8249_v14, 1  ;;  %v8345_v4 = vrot.slane %v8344_v21, 1 }
 0x492   :  { %v7679_v1 = vmax.f32 %v7677_v47, %v7678_v55  ;;  %v7774_v18 = vmax.f32 %v7772_v24, %v7773_v63  ;;  %v7869_v39 = vmax.f32 %v7867_v8, %v7868_v62  ;;  %v7964_v23 = vmax.f32 %v7962_v46, %v7963_v16 }
 0x493   :  { %v8061_v49 = vmax.f32 %v8059_v9, %v8060_v37  ;;  %v8156_v11 = vmax.f32 %v8154_v34, %v8155_v20  ;;  %v8251_v38 = vmax.f32 %v8249_v14, %v8250_v61  ;;  %v8346_v22 = vmax.f32 %v8344_v21, %v8345_v4 }
 0x494   :  { %v7680_v17 = vrot.slane %v7679_v1, 1  ;;  %v7775_v25 = vrot.slane %v7774_v18, 1  ;;  %v7870_v53 = vrot.slane %v7869_v39, 1  ;;  %v7965_v51 = vrot.slane %v7964_v23, 1 }
 0x495   :  { %v8063_v7 = vpack.c.bf16 %v8061_v49, %v8061_v49  ;;  %v8158_v44 = vpack.c.bf16 %v8156_v11, %v8156_v11  ;;  %v8253_v28 = vpack.c.bf16 %v8251_v38, %v8251_v38  ;;  %v8348_v30 = vpack.c.bf16 %v8346_v22, %v8346_v22 }
 0x496   :  { %v7681_v60 = vmax.f32 %v7679_v1, %v7680_v17  ;;  %v7776_v36 = vmax.f32 %v7774_v18, %v7775_v25  ;;  %v7871_v48 = vmax.f32 %v7869_v39, %v7870_v53  ;;  %v7966_v35 = vmax.f32 %v7964_v23, %v7965_v51 }
 0x497   :  { %v8086_v56 = vrot.slane %v8063_v7, %v18912_v45  ;;  %v8181_v42 = vrot.slane %v8158_v44, %v18912_v45  ;;  %v8276_v15 = vrot.slane %v8253_v28, %v18912_v45  ;;  %v8371_v12 = vrot.slane %v8348_v30, %v18912_v45 }
 0x498   :  { %v7683_v6 = vpack.c.bf16 %v7681_v60, %v7681_v60  ;;  %v7778_v27 = vpack.c.bf16 %v7776_v36, %v7776_v36  ;;  %v7873_v58 = vpack.c.bf16 %v7871_v48, %v7871_v48  ;;  %v7968_v26 = vpack.c.bf16 %v7966_v35, %v7966_v35 }
 0x499   :  { %v8093_v50 = vrot.slane %v8086_v56, %v18912_v45  ;;  %v8188_v29 = vrot.slane %v8181_v42, %v18912_v45  ;;  %v8283_v2 = vrot.slane %v8276_v15, %v18912_v45  ;;  %v8378_v40 = vrot.slane %v8371_v12, %v18912_v45 }
 0x49a   :  { %v7706_v13 = vrot.slane %v7683_v6, %v18912_v45  ;;  %v7801_v31 = vrot.slane %v7778_v27, %v18912_v45  ;;  %v7896_v0 = vrot.slane %v7873_v58, %v18912_v45  ;;  %v7991_v41 = vrot.slane %v7968_v26, %v18912_v45 }
 0x49b   :  { %v8114_v43 = vrot.slane %v8093_v50, %v18951_v57  ;;  %v8209_v47 = vrot.slane %v8188_v29, %v18951_v57  ;;  %v8304_v24 = vrot.slane %v8283_v2, %v18951_v57  ;;  %v8399_v8 = vrot.slane %v8378_v40, %v18951_v57 }
 0x49c   :  { %v7713_v46 = vrot.slane %v7706_v13, %v18912_v45  ;;  %v7808_v9 = vrot.slane %v7801_v31, %v18912_v45  ;;  %v7903_v34 = vrot.slane %v7896_v0, %v18912_v45  ;;  %v7998_v14 = vrot.slane %v7991_v41, %v18912_v45 }
 0x49d   :  { %v8121_v21 = vrot.slane %v8114_v43, %v18951_v57  ;;  %v8216_v55 = vrot.slane %v8209_v47, %v18951_v57  ;;  %v8311_v63 = vrot.slane %v8304_v24, %v18951_v57  ;;  %v8406_v62 = vrot.slane %v8399_v8, %v18951_v57 }
 0x49e   :  { %v7734_v16 = vrot.slane %v7713_v46, %v18951_v57  ;;  %v7829_v37 = vrot.slane %v7808_v9, %v18951_v57  ;;  %v7924_v20 = vrot.slane %v7903_v34, %v18951_v57  ;;  %v8019_v61 = vrot.slane %v7998_v14, %v18951_v57  ;;  %v15368_v9 = vld [vmem:[%s20963_s5 + $0x4e0] ss:$16 sps:$4 sm:$0xff]  }
 0x49f   :  { %v8123_v4 = vunpack.c.l.b16 %v8121_v21  ;;  %v8218_v1 = vunpack.c.l.b16 %v8216_v55  ;;  %v8313_v18 = vunpack.c.l.b16 %v8311_v63  ;;  %v8408_v39 = vunpack.c.l.b16 %v8406_v62  ;;  %v15372_v55 = vld [vmem:[%s20963_s5 + $0x6e0] ss:$16 sps:$4 sm:$0xff]   ;;  %v15377_v63 = vld [vmem:[%s20963_s5 + $0x4c4] ss:$16 sps:$4 sm:$0xff]  }
 0x4a0   :  { %v7741_v23 = vrot.slane %v7734_v16, %v18951_v57  ;;  %v7836_v49 = vrot.slane %v7829_v37, %v18951_v57  ;;  %v7931_v11 = vrot.slane %v7924_v20, %v18951_v57  ;;  %v8026_v38 = vrot.slane %v8019_v61, %v18951_v57  ;;  %v15380_v16 = vld [vmem:[%s20963_s5 + $0x6c4] ss:$16 sps:$4 sm:$0xff]   ;;  %v15375_v37 = vld [vmem:[%s20963_s5 + $0x4c0] ss:$16 sps:$4 sm:$0xff]  }
 0x4a1   :  { %v8124_v22 = vrot.slane %v8123_v4, 7  ;;  %v8219_v17 = vrot.slane %v8218_v1, 7  ;;  %v8314_v25 = vrot.slane %v8313_v18, 7  ;;  %v8409_v53 = vrot.slane %v8408_v39, 7  ;;  %v15383_v61 = vld [vmem:[%s20963_s5 + $0x4a4] ss:$16 sps:$4 sm:$0xff]  }
 0x4a2   :  { %v7743_v51 = vunpack.c.l.b16 %v7741_v23  ;;  %v7838_v7 = vunpack.c.l.b16 %v7836_v49  ;;  %v7933_v44 = vunpack.c.l.b16 %v7931_v11  ;;  %v8028_v28 = vunpack.c.l.b16 %v8026_v38  ;;  %v15378_v4 = vld [vmem:[%s20963_s5 + $0x6c0] ss:$16 sps:$4 sm:$0xff]   ;;  %v15386_v1 = vld [vmem:[%s20963_s5 + $0x6a4] ss:$16 sps:$4 sm:$0xff]  }
 0x4a3   :  { %v8125_v30 = vsel %vm6981_vm15, %v8124_v22, %v19267_v10  ;;  %v8220_v60 = vsel %vm6981_vm15, %v8219_v17, %v19272_v3  ;;  %v8315_v36 = vsel %vm6981_vm15, %v8314_v25, %v19277_v59  ;;  %v8410_v57 = vsel %vm6981_vm15, %v8409_v53, %v19282_v33  ;;  %v8428_v59 = vld [vmem:[#allocation3] sm:$0xff] }
 0x4a4   :  { %v8126_v48 = vpack.c.b16 %v8125_v30, %v8125_v30  ;;  %v8221_v35 = vpack.c.b16 %v8220_v60, %v8220_v60  ;;  %v8316_v56 = vpack.c.b16 %v8315_v36, %v8315_v36  ;;  %v8411_v42 = vpack.c.b16 %v8410_v57, %v8410_v57  ;;  %v15381_v18 = vld [vmem:[%s20963_s5 + $0x4a0] ss:$16 sps:$4 sm:$0xff]   ;;  %v15389_v39 = vld [vmem:[%s20963_s5 + $0x484] ss:$16 sps:$4 sm:$0xff]  }
 0x4a5   :  { %v7744_v15 = vrot.slane %v7743_v51, 7  ;;  %v7839_v12 = vrot.slane %v7838_v7, 7  ;;  %v7934_v6 = vrot.slane %v7933_v44, 7  ;;  %v8029_v27 = vrot.slane %v8028_v28, 7  ;;  %v15384_v23 = vld [vmem:[%s20963_s5 + $0x6a0] ss:$16 sps:$4 sm:$0xff]  }
 0x4a6   :  { %v8133_v58 = vrot.slane %v8126_v48, %v18912_v45  ;;  %v8228_v10 = vrot.slane %v8221_v35, %v18912_v45  ;;  %v8323_v3 = vrot.slane %v8316_v56, %v18912_v45  ;;  %v8418_v26 = vrot.slane %v8411_v42, %v18912_v45  ;;  %v15392_v49 = vld [vmem:[%s20963_s5 + $0x684] ss:$16 sps:$4 sm:$0xff]   ;;  %v15387_v11 = vld [vmem:[%s20963_s5 + $0x480] ss:$16 sps:$4 sm:$0xff]  }
 0x4a7   :  { %v7745_v33 = vsel %vm6981_vm15, %v7744_v15, %v19287_v52  ;;  %v7840_v50 = vsel %vm6981_vm15, %v7839_v12, %v19292_v54  ;;  %v7935_v29 = vsel %vm6981_vm15, %v7934_v6, %v19294_v5  ;;  %v8030_v2 = vsel %vm6981_vm15, %v8029_v27, %v19296_v32  ;;  %v15395_v38 = vld [vmem:[%s20963_s5 + $0x464] ss:$16 sps:$4 sm:$0xff]   ;;  %v15390_v22 = vld [vmem:[%s20963_s5 + $0x680] ss:$16 sps:$4 sm:$0xff]  }
 0x4a8   :  { %13243 = vst.sshfl [vmem:[#allocation3 + $0xc] sm:$0x1 pattern:$0x73625140] %v8133_v58  ;;  %v7746_v40 = vpack.c.b16 %v7745_v33, %v7745_v33  ;;  %v7841_v13 = vpack.c.b16 %v7840_v50, %v7840_v50  ;;  %v7936_v31 = vpack.c.b16 %v7935_v29, %v7935_v29  ;;  %v8031_v0 = vpack.c.b16 %v8030_v2, %v8030_v2  ;;  %v15398_v17 = vld [vmem:[%s20963_s5 + $0x664] ss:$16 sps:$4 sm:$0xff]  }
 0x4a9   :  { %13244 = vst.sshfl [vmem:[#allocation3 + $0xd] sm:$0x1 pattern:$0x73625140] %v8228_v10  ;;  %v8973_v41 = vrot.slane %v8428_v59, %v18912_v45  ;;  %v8966_v52 = vcombine.high %v8428_v59, %v8428_v59  ;;  %v15393_v25 = vld [vmem:[%s20963_s5 + $0x460] ss:$16 sps:$4 sm:$0xff]  }
 0x4aa   :  { %13245 = vst.sshfl [vmem:[#allocation3 + $0xe] sm:$0x1 pattern:$0x73625140] %v8323_v3  ;;  %v7753_v43 = vrot.slane %v7746_v40, %v18912_v45  ;;  %v7848_v54 = vrot.slane %v7841_v13, %v18912_v45  ;;  %v7943_v5 = vrot.slane %v7936_v31, %v18912_v45  ;;  %v8038_v47 = vrot.slane %v8031_v0, %v18912_v45  ;;  %v15401_v53 = vld [vmem:[%s20963_s5 + $0x444] ss:$16 sps:$4 sm:$0xff]  }
 0x4ab   :  { %13246 = vst.sshfl [vmem:[#allocation3 + $0xf] sm:$0x1 pattern:$0x73625140] %v8418_v26  ;;  %v8981_v32 = vcombine.high %v8973_v41, %v8973_v41  ;;  %v19364_v24 = vrot.slane %v8966_v52, %v18912_v45  ;;  %v19367_v8 = vrot.slane %v8973_v41, %v18912_v45  ;;  %v15396_v51 = vld [vmem:[%s20963_s5 + $0x660] ss:$16 sps:$4 sm:$0xff]  }
 0x4ac   :  { %13239 = vst.sshfl [vmem:[#allocation3 + $0x8] sm:$0x1 pattern:$0x73625140] %v7753_v43  ;;  %v15404_v7 = vld [vmem:[%s20963_s5 + $0x644] ss:$16 sps:$4 sm:$0xff]  }
 0x4ad   :  { %13240 = vst.sshfl [vmem:[#allocation3 + $0x9] sm:$0x1 pattern:$0x73625140] %v7848_v54  ;;  %v19370_v46 = vrot.slane %v8981_v32, %v18912_v45  ;;  %v8982_v34 = vcombine.high %v19364_v24, %v19364_v24  ;;  %v19393_v62 = vcombine.high %v19367_v8, %v19367_v8  ;;  %v15399_v44 = vld [vmem:[%s20963_s5 + $0x440] ss:$16 sps:$4 sm:$0xff]  }
 0x4ae   :  { %13241 = vst.sshfl [vmem:[#allocation3 + $0xa] sm:$0x1 pattern:$0x73625140] %v7943_v5  ;;  %v15407_v28 = vld [vmem:[%s20963_s5 + $0x424] ss:$16 sps:$4 sm:$0xff]  }
 0x4af   :  { %13242 = vst.sshfl [vmem:[#allocation3 + $0xb] sm:$0x1 pattern:$0x73625140] %v8038_v47  ;;  %11672 = vmatprep.mubr.bf16.mxu1 %v19370_v46  ;;  %v19380_v14 = vcombine.high %v19370_v46, %v19370_v46  ;;  %v19383_v21 = vrot.slane %v8982_v34, %v18912_v45  ;;  %v15402_v30 = vld [vmem:[%s20963_s5 + $0x640] ss:$16 sps:$4 sm:$0xff]  }
 0x4b0   :  { %11673 = vmatmul.mubr.bf16.vlgmr.msra.gmra.mxu1 %v19367_v8  ;;  %v15410_v60 = vld [vmem:[%s20963_s5 + $0x624] ss:$16 sps:$4 sm:$0xff]   ;;  %v15405_v36 = vld [vmem:[%s20963_s5 + $0x420] ss:$16 sps:$4 sm:$0xff]  }
 0x4b1   :  { %11723 = vmatpush1.bf16.msra.mxu1 %v15368_v9  ;;  %11713 = vmatprep.mubr.bf16.mxu0 %v19380_v14  ;;  %v19405_v20 = vcombine.high %v19383_v21, %v19383_v21  ;;  %v15413_v57 = vld [vmem:[%s20963_s5 + $0x404] ss:$16 sps:$4 sm:$0xff]   ;;  %v15408_v48 = vld [vmem:[%s20963_s5 + $0x620] ss:$16 sps:$4 sm:$0xff]  }
 0x4b2   :  { %11754 = vmatprep.mubr.bf16.mxu1 %v19383_v21  ;;  %11714 = vmatmul.mubr.bf16.vlgmr.msra.gmra.mxu0 %v19393_v62  ;;  %v15416_v35 = vld [vmem:[%s20963_s5 + $0x604] ss:$16 sps:$4 sm:$0xff]   ;;  %v15411_v56 = vld [vmem:[%s20963_s5 + $0x400] ss:$16 sps:$4 sm:$0xff]  }
 0x4b3   :  { %11764 = vmatpush1.bf16.msra.mxu0 %v15372_v55  ;;  %11724 = vmatprep.subr.bf16.mxu1 %v15377_v63  ;;  %v15419_v42 = vld [vmem:[%s20963_s5 + $0x5e4] ss:$16 sps:$4 sm:$0xff]   ;;  %v15414_v15 = vld [vmem:[%s20963_s5 + $0x600] ss:$16 sps:$4 sm:$0xff]  }
 0x4b4   :  { %11795 = vmatprep.mubr.bf16.mxu0 %v19405_v20  ;;  %11765 = vmatprep.subr.bf16.mxu0 %v15380_v16  ;;  %v15422_v12 = vld [vmem:[%s20963_s5 + $0x7e4] ss:$16 sps:$4 sm:$0xff]   ;;  %v15417_v6 = vld [vmem:[%s20963_s5 + $0x5e0] ss:$16 sps:$4 sm:$0xff]  }
 0x4b5   :  { %11725 = vmatpush1.bf16.msra.mxu1 %v15375_v37  ;;  %v15425_v27 = vld [vmem:[%s20963_s5 + $0x5c4] ss:$16 sps:$4 sm:$0xff]   ;;  %v15420_v58 = vld [vmem:[%s20963_s5 + $0x7e0] ss:$16 sps:$4 sm:$0xff]  }
 0x4b6   :  { %11726 = vmatprep.subr.bf16.mxu1 %v15383_v61  ;;  %v15428_v10 = vld [vmem:[%s20963_s5 + $0x7c4] ss:$16 sps:$4 sm:$0xff]   ;;  %v15423_v3 = vld [vmem:[%s20963_s5 + $0x5c0] ss:$16 sps:$4 sm:$0xff]   ;;  %v19557_v9 = vld [vmem:[#allocation3 + $0x8] sm:$0xff] }
 0x4b7   :  { %11766 = vmatpush1.bf16.msra.mxu0 %v15378_v4  ;;  %v15431_v26 = vld [vmem:[%s20963_s5 + $0x5a4] ss:$16 sps:$4 sm:$0xff]   ;;  %v15426_v59 = vld [vmem:[%s20963_s5 + $0x7c0] ss:$16 sps:$4 sm:$0xff]   ;;  %v19570_v16 = vrot.slane %v19557_v9, %v18912_v45 }
 0x4b8   :  { %11767 = vmatprep.subr.bf16.mxu0 %v15386_v1  ;;  %v15434_v33 = vld [vmem:[%s20963_s5 + $0x7a4] ss:$16 sps:$4 sm:$0xff]   ;;  %v15429_v50 = vld [vmem:[%s20963_s5 + $0x5a0] ss:$16 sps:$4 sm:$0xff]  }
 0x4b9   :  { %11727 = vmatpush1.bf16.msra.mxu1 %v15381_v18  ;;  %v15437_v29 = vld [vmem:[%s20963_s5 + $0x584] ss:$16 sps:$4 sm:$0xff]   ;;  %v15432_v2 = vld [vmem:[%s20963_s5 + $0x7a0] ss:$16 sps:$4 sm:$0xff]   ;;  %v9030_v18 = vcombine.high %v19570_v16, %v19570_v16 }
 0x4ba   :  { %11728 = vmatprep.subr.bf16.mxu1 %v15389_v39  ;;  %v15440_v40 = vld [vmem:[%s20963_s5 + $0x784] ss:$16 sps:$4 sm:$0xff]   ;;  %v15435_v13 = vld [vmem:[%s20963_s5 + $0x580] ss:$16 sps:$4 sm:$0xff]  }
 0x4bb   :  { %11768 = vmatpush1.bf16.msra.mxu0 %v15384_v23  ;;  %v15443_v31 = vld [vmem:[%s20963_s5 + $0x564] ss:$16 sps:$4 sm:$0xff]   ;;  %v15438_v0 = vld [vmem:[%s20963_s5 + $0x780] ss:$16 sps:$4 sm:$0xff]  }
 0x4bc   :  { %11769 = vmatprep.subr.bf16.mxu0 %v15392_v49  ;;  %v15446_v41 = vld [vmem:[%s20963_s5 + $0x764] ss:$16 sps:$4 sm:$0xff]   ;;  %v15441_v52 = vld [vmem:[%s20963_s5 + $0x560] ss:$16 sps:$4 sm:$0xff]   ;;  %v19594_v49 = vrot.slane %v19364_v24, %v18912_v45 }
 0x4bd   :  { %11729 = vmatpush1.bf16.msra.mxu1 %v15387_v11  ;;  %v15449_v43 = vld [vmem:[%s20963_s5 + $0x544] ss:$16 sps:$4 sm:$0xff]   ;;  %v15444_v54 = vld [vmem:[%s20963_s5 + $0x760] ss:$16 sps:$4 sm:$0xff]  }
 0x4be   :  { %11730 = vmatprep.subr.bf16.mxu1 %v15395_v38  ;;  %v15452_v5 = vld [vmem:[%s20963_s5 + $0x744] ss:$16 sps:$4 sm:$0xff]   ;;  %v15447_v47 = vld [vmem:[%s20963_s5 + $0x540] ss:$16 sps:$4 sm:$0xff]  }
 0x4bf   :  { %11770 = vmatpush1.bf16.msra.mxu0 %v15390_v22  ;;  %v15455_v32 = vld [vmem:[%s20963_s5 + $0x524] ss:$16 sps:$4 sm:$0xff]   ;;  %v15450_v34 = vld [vmem:[%s20963_s5 + $0x740] ss:$16 sps:$4 sm:$0xff]   ;;  %v19603_v22 = vrot.slane %v9030_v18, %v18912_v45 }
 0x4c0   :  { %11771 = vmatprep.subr.bf16.mxu0 %v15398_v17  ;;  %v15458_v55 = vld [vmem:[%s20963_s5 + $0x724] ss:$16 sps:$4 sm:$0xff]   ;;  %v15453_v63 = vld [vmem:[%s20963_s5 + $0x520] ss:$16 sps:$4 sm:$0xff]  }
 0x4c1   :  { %11731 = vmatpush1.bf16.msra.mxu1 %v15393_v25  ;;  %v15461_v37 = vld [vmem:[%s20963_s5 + $0x504] ss:$16 sps:$4 sm:$0xff]   ;;  %v15456_v61 = vld [vmem:[%s20963_s5 + $0x720] ss:$16 sps:$4 sm:$0xff]   ;;  %v19614_v25 = vcombine.high %v19594_v49, %v19594_v49 }
 0x4c2   :  { %11732 = vmatprep.subr.bf16.mxu1 %v15401_v53  ;;  %v15464_v4 = vld [vmem:[%s20963_s5 + $0x704] ss:$16 sps:$4 sm:$0xff]   ;;  %v15459_v1 = vld [vmem:[%s20963_s5 + $0x500] ss:$16 sps:$4 sm:$0xff]  }
 0x4c3   :  { %11772 = vmatpush1.bf16.msra.mxu0 %v15396_v51  ;;  %v15467_v39 = vld [vmem:[%s20963_s5 + $0x8e4] ss:$16 sps:$4 sm:$0xff]   ;;  %v15462_v23 = vld [vmem:[%s20963_s5 + $0x700] ss:$16 sps:$4 sm:$0xff]   ;;  %v19622_v51 = vcombine.high %v19603_v22, %v19603_v22 }
 0x4c4   :  { %11773 = vmatprep.subr.bf16.mxu0 %v15404_v7  ;;  %v15470_v11 = vld [vmem:[%s20963_s5 + $0xae4] ss:$16 sps:$4 sm:$0xff]   ;;  %v15465_v38 = vld [vmem:[%s20963_s5 + $0x8e0] ss:$16 sps:$4 sm:$0xff]  }
 0x4c5   :  { %11733 = vmatpush1.bf16.msra.mxu1 %v15399_v44  ;;  %v15473_v17 = vld [vmem:[%s20963_s5 + $0x8c4] ss:$16 sps:$4 sm:$0xff]   ;;  %v15468_v24 = vld [vmem:[%s20963_s5 + $0xae0] ss:$16 sps:$4 sm:$0xff]  }
 0x4c6   :  { %11734 = vmatprep.subr.bf16.mxu1 %v15407_v28  ;;  %v15476_v53 = vld [vmem:[%s20963_s5 + $0xac4] ss:$16 sps:$4 sm:$0xff]   ;;  %v15471_v7 = vld [vmem:[%s20963_s5 + $0x8c0] ss:$16 sps:$4 sm:$0xff]  }
 0x4c7   :  { %11774 = vmatpush1.bf16.msra.mxu0 %v15402_v30  ;;  %v15479_v44 = vld [vmem:[%s20963_s5 + $0x8a4] ss:$16 sps:$4 sm:$0xff]   ;;  %v15474_v28 = vld [vmem:[%s20963_s5 + $0xac0] ss:$16 sps:$4 sm:$0xff]  }
 0x4c8   :  { %11775 = vmatprep.subr.bf16.mxu0 %v15410_v60  ;;  %v15482_v30 = vld [vmem:[%s20963_s5 + $0xaa4] ss:$16 sps:$4 sm:$0xff]   ;;  %v15477_v60 = vld [vmem:[%s20963_s5 + $0x8a0] ss:$16 sps:$4 sm:$0xff]  }
 0x4c9   :  { %11735 = vmatpush1.bf16.msra.mxu1 %v15405_v36  ;;  %v15485_v36 = vld [vmem:[%s20963_s5 + $0x884] ss:$16 sps:$4 sm:$0xff]   ;;  %v15534_v18 = vld [vmem:[%s20963_s5 + $0xb80] ss:$16 sps:$4 sm:$0xff]  }
 0x4ca   :  { %11736 = vmatprep.subr.bf16.mxu1 %v15413_v57  ;;  %v15480_v57 = vld [vmem:[%s20963_s5 + $0xaa0] ss:$16 sps:$4 sm:$0xff]  }
 0x4cb   :  { %11776 = vmatpush1.bf16.msra.mxu0 %v15408_v48  ;;  %v15488_v48 = vld [vmem:[%s20963_s5 + $0xa84] ss:$16 sps:$4 sm:$0xff]  }
 0x4cc   :  { %11777 = vmatprep.subr.bf16.mxu0 %v15416_v35  ;;  %v15483_v35 = vld [vmem:[%s20963_s5 + $0x880] ss:$16 sps:$4 sm:$0xff]  }
 0x4cd   :  { %11737 = vmatpush1.bf16.msra.mxu1 %v15411_v56  ;;  %v15491_v56 = vld [vmem:[%s20963_s5 + $0x864] ss:$16 sps:$4 sm:$0xff]  }
 0x4ce   :  { %11738 = vmatprep.subr.bf16.mxu1 %v15419_v42  ;;  %v15486_v42 = vld [vmem:[%s20963_s5 + $0xa80] ss:$16 sps:$4 sm:$0xff]  }
 0x4cf   :  { %11778 = vmatpush1.bf16.msra.mxu0 %v15414_v15  ;;  %v15494_v15 = vld [vmem:[%s20963_s5 + $0xa64] ss:$16 sps:$4 sm:$0xff]  }
 0x4d0   :  { %11779 = vmatprep.subr.bf16.mxu0 %v15422_v12  ;;  %v15489_v12 = vld [vmem:[%s20963_s5 + $0x860] ss:$16 sps:$4 sm:$0xff]  }
 0x4d1   :  { %11739 = vmatpush2.bf16.msra.mxu1 %v15417_v6  ;;  %v15497_v6 = vld [vmem:[%s20963_s5 + $0x844] ss:$16 sps:$4 sm:$0xff]  }
 0x4d2   :  { %11740 = vmatprep.subr.bf16.mxu1 %v15425_v27  ;;  %v15492_v27 = vld [vmem:[%s20963_s5 + $0xa60] ss:$16 sps:$4 sm:$0xff]  }
 0x4d3   :  { %11780 = vmatpush2.bf16.msra.mxu0 %v15420_v58  ;;  %v15500_v58 = vld [vmem:[%s20963_s5 + $0xa44] ss:$16 sps:$4 sm:$0xff]  }
 0x4d4   :  { %11781 = vmatprep.subr.bf16.mxu0 %v15428_v10  ;;  %v15495_v10 = vld [vmem:[%s20963_s5 + $0x840] ss:$16 sps:$4 sm:$0xff]  }
 0x4d5   :  { %11741 = vmatpush2.bf16.msra.mxu1 %v15423_v3  ;;  %v15503_v3 = vld [vmem:[%s20963_s5 + $0x824] ss:$16 sps:$4 sm:$0xff]  }
 0x4d6   :  { %11742 = vmatprep.subr.bf16.mxu1 %v15431_v26  ;;  %v15498_v26 = vld [vmem:[%s20963_s5 + $0xa40] ss:$16 sps:$4 sm:$0xff]  }
 0x4d7   :  { %11782 = vmatpush2.bf16.msra.mxu0 %v15426_v59  ;;  %v15506_v59 = vld [vmem:[%s20963_s5 + $0xa24] ss:$16 sps:$4 sm:$0xff]  }
 0x4d8   :  { %11783 = vmatprep.subr.bf16.mxu0 %v15434_v33  ;;  %v15501_v33 = vld [vmem:[%s20963_s5 + $0x820] ss:$16 sps:$4 sm:$0xff]  }
 0x4d9   :  { %11743 = vmatpush2.bf16.msra.mxu1 %v15429_v50  ;;  %v15509_v50 = vld [vmem:[%s20963_s5 + $0x804] ss:$16 sps:$4 sm:$0xff]  }
 0x4da   :  { %11744 = vmatprep.subr.bf16.mxu1 %v15437_v29  ;;  %v15504_v29 = vld [vmem:[%s20963_s5 + $0xa20] ss:$16 sps:$4 sm:$0xff]  }
 0x4db   :  { %11784 = vmatpush2.bf16.msra.mxu0 %v15432_v2  ;;  %v15512_v2 = vld [vmem:[%s20963_s5 + $0xa04] ss:$16 sps:$4 sm:$0xff]  }
 0x4dc   :  { %11785 = vmatprep.subr.bf16.mxu0 %v15440_v40  ;;  %v15507_v40 = vld [vmem:[%s20963_s5 + $0x800] ss:$16 sps:$4 sm:$0xff]  }
 0x4dd   :  { %11745 = vmatpush2.bf16.msra.mxu1 %v15435_v13  ;;  %v15515_v13 = vld [vmem:[%s20963_s5 + $0x9e4] ss:$16 sps:$4 sm:$0xff]  }
 0x4de   :  { %11746 = vmatprep.subr.bf16.mxu1 %v15443_v31  ;;  %v15510_v31 = vld [vmem:[%s20963_s5 + $0xa00] ss:$16 sps:$4 sm:$0xff]  }
 0x4df   :  { %11786 = vmatpush2.bf16.msra.mxu0 %v15438_v0  ;;  %v15518_v0 = vld [vmem:[%s20963_s5 + $0xbe4] ss:$16 sps:$4 sm:$0xff]  }
 0x4e0   :  { %11787 = vmatprep.subr.bf16.mxu0 %v15446_v41  ;;  %v15513_v41 = vld [vmem:[%s20963_s5 + $0x9e0] ss:$16 sps:$4 sm:$0xff]  }
 0x4e1   :  { %11747 = vmatpush2.bf16.msra.mxu1 %v15441_v52  ;;  %v15521_v52 = vld [vmem:[%s20963_s5 + $0x9c4] ss:$16 sps:$4 sm:$0xff]  }
 0x4e2   :  { %11748 = vmatprep.subr.bf16.mxu1 %v15449_v43  ;;  %v15516_v43 = vld [vmem:[%s20963_s5 + $0xbe0] ss:$16 sps:$4 sm:$0xff]  }
 0x4e3   :  { %11788 = vmatpush2.bf16.msra.mxu0 %v15444_v54  ;;  %v15524_v54 = vld [vmem:[%s20963_s5 + $0xbc4] ss:$16 sps:$4 sm:$0xff]  }
 0x4e4   :  { %11789 = vmatprep.subr.bf16.mxu0 %v15452_v5  ;;  %v15519_v5 = vld [vmem:[%s20963_s5 + $0x9c0] ss:$16 sps:$4 sm:$0xff]  }
 0x4e5   :  { %11749 = vmatpush2.bf16.msra.mxu1 %v15447_v47  ;;  %v15527_v47 = vld [vmem:[%s20963_s5 + $0x9a4] ss:$16 sps:$4 sm:$0xff]  }
 0x4e6   :  { %11750 = vmatprep.subr.bf16.mxu1 %v15455_v32  ;;  %v15522_v32 = vld [vmem:[%s20963_s5 + $0xbc0] ss:$16 sps:$4 sm:$0xff]  }
 0x4e7   :  { %11790 = vmatpush2.bf16.msra.mxu0 %v15450_v34  ;;  %v15530_v34 = vld [vmem:[%s20963_s5 + $0xba4] ss:$16 sps:$4 sm:$0xff]  }
 0x4e8   :  { %11791 = vmatprep.subr.bf16.mxu0 %v15458_v55  ;;  %v15525_v55 = vld [vmem:[%s20963_s5 + $0x9a0] ss:$16 sps:$4 sm:$0xff]  }
 0x4e9   :  { %11751 = vmatpush2.bf16.msra.mxu1 %v15453_v63  ;;  %v15533_v63 = vld [vmem:[%s20963_s5 + $0x984] ss:$16 sps:$4 sm:$0xff]  }
 0x4ea   :  { %11752 = vmatprep.subr.bf16.mxu1 %v15461_v37  ;;  %v15528_v37 = vld [vmem:[%s20963_s5 + $0xba0] ss:$16 sps:$4 sm:$0xff]  }
 0x4eb   :  { %11792 = vmatpush2.bf16.msra.mxu0 %v15456_v61  ;;  %v15536_v61 = vld [vmem:[%s20963_s5 + $0xb84] ss:$16 sps:$4 sm:$0xff]  }
 0x4ec   :  { %11793 = vmatprep.subr.bf16.mxu0 %v15464_v4  ;;  %v15531_v4 = vld [vmem:[%s20963_s5 + $0x980] ss:$16 sps:$4 sm:$0xff]  }
 0x4ed   :  { %11753 = vmatpush2.bf16.msra.mxu1 %v15459_v1  ;;  %v15539_v1 = vld [vmem:[%s20963_s5 + $0x964] ss:$16 sps:$4 sm:$0xff]  }
 0x4ee   :  { %11804 = vmatprep.subr.bf16.mxu1 %v15467_v39  ;;  %v15542_v39 = vld [vmem:[%s20963_s5 + $0xb64] ss:$16 sps:$4 sm:$0xff]  }
 0x4ef   :  { %11794 = vmatpush2.bf16.msra.mxu0 %v15462_v23  ;;  %v15537_v23 = vld [vmem:[%s20963_s5 + $0x960] ss:$16 sps:$4 sm:$0xff]  }
 0x4f0   :  { %11755 = vmatmul.mubr.bf16.vlgmr.msra.gmra.mxu1 %v19594_v49  ;;  %11845 = vmatprep.subr.bf16.mxu0 %v15470_v11  ;;  %v15545_v11 = vld [vmem:[%s20963_s5 + $0x944] ss:$16 sps:$4 sm:$0xff]  }
 0x4f1   :  { %11805 = vmatpush1.bf16.msra.mxu1 %v15465_v38  ;;  %11836 = vmatprep.mubr.bf16.mxu1 %v19603_v22  ;;  %v15540_v38 = vld [vmem:[%s20963_s5 + $0xb60] ss:$16 sps:$4 sm:$0xff]  }
 0x4f2   :  { %11796 = vmatmul.mubr.bf16.vlgmr.msra.gmra.mxu0 %v19614_v25  ;;  %11806 = vmatprep.subr.bf16.mxu1 %v15473_v17  ;;  %v15548_v17 = vld [vmem:[%s20963_s5 + $0xb44] ss:$16 sps:$4 sm:$0xff]  }
 0x4f3   :  { %11846 = vmatpush1.bf16.msra.mxu0 %v15468_v24  ;;  %11877 = vmatprep.mubr.bf16.mxu0 %v19622_v51  ;;  %v15543_v24 = vld [vmem:[%s20963_s5 + $0x940] ss:$16 sps:$4 sm:$0xff]  }
 0x4f4   :  { %11847 = vmatprep.subr.bf16.mxu0 %v15476_v53  ;;  %v9015_v53 = vcombine.high %v19557_v9, %v19557_v9  ;;  %v15549_v9 = vld [vmem:[%s20963_s5 + $0x920] ss:$16 sps:$4 sm:$0xff]  }
 0x4f5   :  { %11807 = vmatpush1.bf16.msra.mxu1 %v15471_v7  ;;  %v15551_v7 = vld [vmem:[%s20963_s5 + $0x924] ss:$16 sps:$4 sm:$0xff]  }
 0x4f6   :  { %11808 = vmatprep.subr.bf16.mxu1 %v15479_v44  ;;  %v15546_v44 = vld [vmem:[%s20963_s5 + $0xb40] ss:$16 sps:$4 sm:$0xff]  }
 0x4f7   :  { %11848 = vmatpush1.bf16.msra.mxu0 %v15474_v28  ;;  %v15554_v28 = vld [vmem:[%s20963_s5 + $0xb24] ss:$16 sps:$4 sm:$0xff]  }
 0x4f8   :  { %11849 = vmatprep.subr.bf16.mxu0 %v15482_v30  ;;  %v19788_v30 = vrot.slane %v9015_v53, %v18912_v45  ;;  %v15613_v53 = vld [vmem:[%s20963_s5 + $0xfe0] ss:$16 sps:$4 sm:$0xff]  }
 0x4f9   :  { %11809 = vmatpush1.bf16.msra.mxu1 %v15477_v60  ;;  %v15557_v60 = vld [vmem:[%s20963_s5 + $0x904] ss:$16 sps:$4 sm:$0xff]  }
 0x4fa   :  { %11810 = vmatprep.subr.bf16.mxu1 %v15485_v36  ;;  %v15552_v36 = vld [vmem:[%s20963_s5 + $0xb20] ss:$16 sps:$4 sm:$0xff]  }
 0x4fb   :  { %11850 = vmatpush1.bf16.msra.mxu0 %v15480_v57  ;;  %v15560_v57 = vld [vmem:[%s20963_s5 + $0xb04] ss:$16 sps:$4 sm:$0xff]  }
 0x4fc   :  { %11851 = vmatprep.subr.bf16.mxu0 %v15488_v48  ;;  %v15555_v48 = vld [vmem:[%s20963_s5 + $0x900] ss:$16 sps:$4 sm:$0xff]  }
 0x4fd   :  { %11811 = vmatpush1.bf16.msra.mxu1 %v15483_v35  ;;  %v9031_v35 = vcombine.high %v19788_v30, %v19788_v30 }
 0x4fe   :  { %11812 = vmatprep.subr.bf16.mxu1 %v15491_v56  ;;  %v15563_v56 = vld [vmem:[%s20963_s5 + $0xce4] ss:$16 sps:$4 sm:$0xff]  }
 0x4ff   :  { %11852 = vmatpush1.bf16.msra.mxu0 %v15486_v42  ;;  %v15558_v42 = vld [vmem:[%s20963_s5 + $0xb00] ss:$16 sps:$4 sm:$0xff]  }
 0x500   :  { %11853 = vmatprep.subr.bf16.mxu0 %v15494_v15  ;;  %v19812_v15 = vrot.slane %v19570_v16, %v18912_v45  ;;  %v15565_v16 = vld [vmem:[%s20963_s5 + $0xee0] ss:$16 sps:$4 sm:$0xff]  }
 0x501   :  { %11813 = vmatpush1.bf16.msra.mxu1 %v15489_v12  ;;  %v15567_v12 = vld [vmem:[%s20963_s5 + $0xee4] ss:$16 sps:$4 sm:$0xff]  }
 0x502   :  { %11814 = vmatprep.subr.bf16.mxu1 %v15497_v6  ;;  %v15561_v6 = vld [vmem:[%s20963_s5 + $0xce0] ss:$16 sps:$4 sm:$0xff]  }
 0x503   :  { %11854 = vmatpush1.bf16.msra.mxu0 %v15492_v27  ;;  %v19821_v27 = vrot.slane %v9031_v35, %v18912_v45  ;;  %v15633_v35 = vld [vmem:[%s20963_s5 + $0xf84] ss:$16 sps:$4 sm:$0xff]  }
 0x504   :  { %11855 = vmatprep.subr.bf16.mxu0 %v15500_v58  ;;  %v15570_v58 = vld [vmem:[%s20963_s5 + $0xcc4] ss:$16 sps:$4 sm:$0xff]  }
 0x505   :  { %11815 = vmatpush1.bf16.msra.mxu1 %v15495_v10  ;;  %v19832_v10 = vcombine.high %v19812_v15, %v19812_v15 }
 0x506   :  { %11816 = vmatprep.subr.bf16.mxu1 %v15503_v3  ;;  %v15573_v3 = vld [vmem:[%s20963_s5 + $0xec4] ss:$16 sps:$4 sm:$0xff]  }
 0x507   :  { %11856 = vmatpush1.bf16.msra.mxu0 %v15498_v26  ;;  %v19840_v26 = vcombine.high %v19821_v27, %v19821_v27 }
 0x508   :  { %11857 = vmatprep.subr.bf16.mxu0 %v15506_v59  ;;  %v15568_v59 = vld [vmem:[%s20963_s5 + $0xcc0] ss:$16 sps:$4 sm:$0xff]  }
 0x509   :  { %11817 = vmatpush1.bf16.msra.mxu1 %v15501_v33  ;;  %v15576_v33 = vld [vmem:[%s20963_s5 + $0xca4] ss:$16 sps:$4 sm:$0xff]  }
 0x50a   :  { %11818 = vmatprep.subr.bf16.mxu1 %v15509_v50  ;;  %v15571_v50 = vld [vmem:[%s20963_s5 + $0xec0] ss:$16 sps:$4 sm:$0xff]  }
 0x50b   :  { %11858 = vmatpush1.bf16.msra.mxu0 %v15504_v29  ;;  %v15579_v29 = vld [vmem:[%s20963_s5 + $0xea4] ss:$16 sps:$4 sm:$0xff]  }
 0x50c   :  { %11859 = vmatprep.subr.bf16.mxu0 %v15512_v2  ;;  %v15574_v2 = vld [vmem:[%s20963_s5 + $0xca0] ss:$16 sps:$4 sm:$0xff]  }
 0x50d   :  { %11819 = vmatpush1.bf16.msra.mxu1 %v15507_v40  ;;  %v15582_v40 = vld [vmem:[%s20963_s5 + $0xc84] ss:$16 sps:$4 sm:$0xff]  }
 0x50e   :  { %11820 = vmatprep.subr.bf16.mxu1 %v15515_v13  ;;  %v15577_v13 = vld [vmem:[%s20963_s5 + $0xea0] ss:$16 sps:$4 sm:$0xff]  }
 0x50f   :  { %11860 = vmatpush1.bf16.msra.mxu0 %v15510_v31  ;;  %v15585_v31 = vld [vmem:[%s20963_s5 + $0xe84] ss:$16 sps:$4 sm:$0xff]  }
 0x510   :  { %11861 = vmatprep.subr.bf16.mxu0 %v15518_v0  ;;  %v15580_v0 = vld [vmem:[%s20963_s5 + $0xc80] ss:$16 sps:$4 sm:$0xff]  }
 0x511   :  { %11821 = vmatpush2.bf16.msra.mxu1 %v15513_v41  ;;  %v15588_v41 = vld [vmem:[%s20963_s5 + $0xc64] ss:$16 sps:$4 sm:$0xff]  }
 0x512   :  { %11822 = vmatprep.subr.bf16.mxu1 %v15521_v52  ;;  %v15583_v52 = vld [vmem:[%s20963_s5 + $0xe80] ss:$16 sps:$4 sm:$0xff]  }
 0x513   :  { %11862 = vmatpush2.bf16.msra.mxu0 %v15516_v43  ;;  %v15591_v43 = vld [vmem:[%s20963_s5 + $0xe64] ss:$16 sps:$4 sm:$0xff]  }
 0x514   :  { %11863 = vmatprep.subr.bf16.mxu0 %v15524_v54  ;;  %v15586_v54 = vld [vmem:[%s20963_s5 + $0xc60] ss:$16 sps:$4 sm:$0xff]  }
 0x515   :  { %11823 = vmatpush2.bf16.msra.mxu1 %v15519_v5  ;;  %v15594_v5 = vld [vmem:[%s20963_s5 + $0xc44] ss:$16 sps:$4 sm:$0xff]  }
 0x516   :  { %11824 = vmatprep.subr.bf16.mxu1 %v15527_v47  ;;  %v15589_v47 = vld [vmem:[%s20963_s5 + $0xe60] ss:$16 sps:$4 sm:$0xff]  }
 0x517   :  { %11864 = vmatpush2.bf16.msra.mxu0 %v15522_v32  ;;  %v15597_v32 = vld [vmem:[%s20963_s5 + $0xe44] ss:$16 sps:$4 sm:$0xff]  }
 0x518   :  { %11865 = vmatprep.subr.bf16.mxu0 %v15530_v34  ;;  %v15592_v34 = vld [vmem:[%s20963_s5 + $0xc40] ss:$16 sps:$4 sm:$0xff]  }
 0x519   :  { %11825 = vmatpush2.bf16.msra.mxu1 %v15525_v55  ;;  %v15600_v55 = vld [vmem:[%s20963_s5 + $0xc24] ss:$16 sps:$4 sm:$0xff]  }
 0x51a   :  { %11826 = vmatprep.subr.bf16.mxu1 %v15533_v63  ;;  %v15595_v63 = vld [vmem:[%s20963_s5 + $0xe40] ss:$16 sps:$4 sm:$0xff]  }
 0x51b   :  { %11866 = vmatpush2.bf16.msra.mxu0 %v15528_v37  ;;  %v15603_v37 = vld [vmem:[%s20963_s5 + $0xe24] ss:$16 sps:$4 sm:$0xff]  }
 0x51c   :  { %11867 = vmatprep.subr.bf16.mxu0 %v15536_v61  ;;  %v15598_v61 = vld [vmem:[%s20963_s5 + $0xc20] ss:$16 sps:$4 sm:$0xff]  }
 0x51d   :  { %11827 = vmatpush2.bf16.msra.mxu1 %v15531_v4  ;;  %v15606_v4 = vld [vmem:[%s20963_s5 + $0xc04] ss:$16 sps:$4 sm:$0xff]  }
 0x51e   :  { %11828 = vmatprep.subr.bf16.mxu1 %v15539_v1  ;;  %v15601_v1 = vld [vmem:[%s20963_s5 + $0xe20] ss:$16 sps:$4 sm:$0xff]  }
 0x51f   :  { %11868 = vmatpush2.bf16.msra.mxu0 %v15534_v18  ;;  %v15609_v18 = vld [vmem:[%s20963_s5 + $0xe04] ss:$16 sps:$4 sm:$0xff]  }
 0x520   :  { %11869 = vmatprep.subr.bf16.mxu0 %v15542_v39  ;;  %v15604_v39 = vld [vmem:[%s20963_s5 + $0xc00] ss:$16 sps:$4 sm:$0xff]  }
 0x521   :  { %11829 = vmatpush2.bf16.msra.mxu1 %v15537_v23  ;;  %v15612_v23 = vld [vmem:[%s20963_s5 + $0xde4] ss:$16 sps:$4 sm:$0xff]  }
 0x522   :  { %11830 = vmatprep.subr.bf16.mxu1 %v15545_v11  ;;  %v15607_v11 = vld [vmem:[%s20963_s5 + $0xe00] ss:$16 sps:$4 sm:$0xff]  }
 0x523   :  { %11870 = vmatpush2.bf16.msra.mxu0 %v15540_v38  ;;  %v15615_v38 = vld [vmem:[%s20963_s5 + $0xfe4] ss:$16 sps:$4 sm:$0xff]  }
 0x524   :  { %11871 = vmatprep.subr.bf16.mxu0 %v15548_v17  ;;  %v15610_v17 = vld [vmem:[%s20963_s5 + $0xde0] ss:$16 sps:$4 sm:$0xff]  }
 0x525   :  { %11831 = vmatpush2.bf16.msra.mxu1 %v15543_v24  ;;  %v15618_v24 = vld [vmem:[%s20963_s5 + $0xdc4] ss:$16 sps:$4 sm:$0xff]  }
 0x526   :  { %11832 = vmatprep.subr.bf16.mxu1 %v15551_v7  ;;  %v15621_v7 = vld [vmem:[%s20963_s5 + $0xfc4] ss:$16 sps:$4 sm:$0xff]  }
 0x527   :  { %11872 = vmatpush2.bf16.msra.mxu0 %v15546_v44  ;;  %v15616_v44 = vld [vmem:[%s20963_s5 + $0xdc0] ss:$16 sps:$4 sm:$0xff]  }
 0x528   :  { %11873 = vmatprep.subr.bf16.mxu0 %v15554_v28  ;;  %v15624_v28 = vld [vmem:[%s20963_s5 + $0xda4] ss:$16 sps:$4 sm:$0xff]  }
 0x529   :  { %11833 = vmatpush2.bf16.msra.mxu1 %v15549_v9  ;;  %v15619_v9 = vld [vmem:[%s20963_s5 + $0xfc0] ss:$16 sps:$4 sm:$0xff]  }
 0x52a   :  { %11834 = vmatprep.subr.bf16.mxu1 %v15557_v60  ;;  %v15627_v60 = vld [vmem:[%s20963_s5 + $0xfa4] ss:$16 sps:$4 sm:$0xff]  }
 0x52b   :  { %11874 = vmatpush2.bf16.msra.mxu0 %v15552_v36  ;;  %v15622_v36 = vld [vmem:[%s20963_s5 + $0xda0] ss:$16 sps:$4 sm:$0xff]  }
 0x52c   :  { %11875 = vmatprep.subr.bf16.mxu0 %v15560_v57  ;;  %v15630_v57 = vld [vmem:[%s20963_s5 + $0xd84] ss:$16 sps:$4 sm:$0xff]  }
 0x52d   :  { %11835 = vmatpush2.bf16.msra.mxu1 %v15555_v48  ;;  %v15625_v48 = vld [vmem:[%s20963_s5 + $0xfa0] ss:$16 sps:$4 sm:$0xff]  }
 0x52e   :  { %11886 = vmatprep.subr.bf16.mxu1 %v15563_v56  ;;  %v15628_v56 = vld [vmem:[%s20963_s5 + $0xd80] ss:$16 sps:$4 sm:$0xff]  }
 0x52f   :  { %11876 = vmatpush2.bf16.msra.mxu0 %v15558_v42  ;;  %v15636_v42 = vld [vmem:[%s20963_s5 + $0xd64] ss:$16 sps:$4 sm:$0xff]  }
 0x530   :  { %11837 = vmatmul.mubr.bf16.vlgmr.msra.gmra.mxu1 %v19812_v15  ;;  %11927 = vmatprep.subr.bf16.mxu0 %v15567_v12  ;;  %v15631_v12 = vld [vmem:[%s20963_s5 + $0xf80] ss:$16 sps:$4 sm:$0xff]  }
 0x531   :  { %11887 = vmatpush1.bf16.msra.mxu1 %v15561_v6  ;;  %11918 = vmatprep.mubr.bf16.mxu1 %v19821_v27  ;;  %v15639_v6 = vld [vmem:[%s20963_s5 + $0xf64] ss:$16 sps:$4 sm:$0xff]  }
 0x532   :  { %11878 = vmatmul.mubr.bf16.vlgmr.msra.gmra.mxu0 %v19832_v10  ;;  %11888 = vmatprep.subr.bf16.mxu1 %v15570_v58  ;;  %v15634_v58 = vld [vmem:[%s20963_s5 + $0xd60] ss:$16 sps:$4 sm:$0xff]  }
 0x533   :  { %11928 = vmatpush1.bf16.msra.mxu0 %v15565_v16  ;;  %11959 = vmatprep.mubr.bf16.mxu0 %v19840_v26  ;;  %v15642_v16 = vld [vmem:[%s20963_s5 + $0xd44] ss:$16 sps:$4 sm:$0xff]  }
 0x534   :  { %11929 = vmatprep.subr.bf16.mxu0 %v15573_v3  ;;  %v15637_v3 = vld [vmem:[%s20963_s5 + $0xf60] ss:$16 sps:$4 sm:$0xff]  }
 0x535   :  { %11889 = vmatpush1.bf16.msra.mxu1 %v15568_v59  ;;  %v15645_v59 = vld [vmem:[%s20963_s5 + $0xf44] ss:$16 sps:$4 sm:$0xff]  }
 0x536   :  { %11890 = vmatprep.subr.bf16.mxu1 %v15576_v33  ;;  %v15640_v33 = vld [vmem:[%s20963_s5 + $0xd40] ss:$16 sps:$4 sm:$0xff]  }
 0x537   :  { %11930 = vmatpush1.bf16.msra.mxu0 %v15571_v50  ;;  %v15648_v50 = vld [vmem:[%s20963_s5 + $0xd24] ss:$16 sps:$4 sm:$0xff]  }
 0x538   :  { %11931 = vmatprep.subr.bf16.mxu0 %v15579_v29  ;;  %v15643_v29 = vld [vmem:[%s20963_s5 + $0xf40] ss:$16 sps:$4 sm:$0xff]  }
 0x539   :  { %11891 = vmatpush1.bf16.msra.mxu1 %v15574_v2  ;;  %v15651_v2 = vld [vmem:[%s20963_s5 + $0xf24] ss:$16 sps:$4 sm:$0xff]  }
 0x53a   :  { %11892 = vmatprep.subr.bf16.mxu1 %v15582_v40  ;;  %v15646_v40 = vld [vmem:[%s20963_s5 + $0xd20] ss:$16 sps:$4 sm:$0xff]  }
 0x53b   :  { %11932 = vmatpush1.bf16.msra.mxu0 %v15577_v13  ;;  %v15654_v13 = vld [vmem:[%s20963_s5 + $0xd04] ss:$16 sps:$4 sm:$0xff]  }
 0x53c   :  { %11933 = vmatprep.subr.bf16.mxu0 %v15585_v31  ;;  %v15649_v31 = vld [vmem:[%s20963_s5 + $0xf20] ss:$16 sps:$4 sm:$0xff]  }
 0x53d   :  { %11893 = vmatpush1.bf16.msra.mxu1 %v15580_v0  ;;  %v15657_v0 = vld [vmem:[%s20963_s5 + $0xf04] ss:$16 sps:$4 sm:$0xff]  }
 0x53e   :  { %11894 = vmatprep.subr.bf16.mxu1 %v15588_v41  ;;  %v15652_v41 = vld [vmem:[%s20963_s5 + $0xd00] ss:$16 sps:$4 sm:$0xff]  }
 0x53f   :  { %11934 = vmatpush1.bf16.msra.mxu0 %v15583_v52  ;;  %v15660_v52 = vld [vmem:[%s20963_s5 + $0xec] ss:$16 sps:$4 sm:$0xff]  }
 0x540   :  { %11935 = vmatprep.subr.bf16.mxu0 %v15591_v43  ;;  %v8942_v43 = vld [vmem:[%s20964_s6] sm:$0xf] }
 0x541   :  { %11895 = vmatpush1.bf16.msra.mxu1 %v15586_v54  ;;  %v15655_v54 = vld [vmem:[%s20963_s5 + $0xf00] ss:$16 sps:$4 sm:$0xff]  }
 0x542   :  { %11896 = vmatprep.subr.bf16.mxu1 %v15594_v5  ;;  %v20026_v5 = vrot.slane %v19788_v30, %v18912_v45  ;;  %v15661_v45 = vld [vmem:[%s20963_s5 + $0x2e8] ss:$16 sps:$4 sm:$0xff]   ;;  %v21018_v30 = vsub.s32 1, %v21015_v19 }
 0x543   :  { %11936 = vmatpush1.bf16.msra.mxu0 %v15589_v47  ;;  %v15663_v47 = vld [vmem:[%s20963_s5 + $0x2ec] ss:$16 sps:$4 sm:$0xff]  }
 0x544   :  { %11937 = vmatprep.subr.bf16.mxu0 %v15597_v32  ;;  %v15658_v32 = vld [vmem:[%s20963_s5 + $0xe8] ss:$16 sps:$4 sm:$0xff]  }
 0x545   :  { %11897 = vmatpush1.bf16.msra.mxu1 %v15592_v34  ;;  %v21017_v34 = vsub.s32 0, %v21015_v19 }
 0x546   :  { %11898 = vmatprep.subr.bf16.mxu1 %v15600_v55 }
 0x547   :  { %11938 = vmatpush1.bf16.msra.mxu0 %v15595_v63  ;;  %v8947_v55 = vrot.slane %v8942_v43, %v21017_v34  ;;  %v15666_v63 = vld [vmem:[%s20963_s5 + $0xcc] ss:$16 sps:$4 sm:$0xff]   ;;  %v15709_v34 = vld [vmem:[%s20963_s5 + $0x3e8] ss:$16 sps:$4 sm:$0xff]  }
 0x548   :  { %11939 = vmatprep.subr.bf16.mxu0 %v15603_v37  ;;  %v8951_v37 = vrot.slane %v8942_v43, %v21018_v30  ;;  %v15703_v43 = vld [vmem:[%s20963_s5 + $0x208] ss:$16 sps:$4 sm:$0xff]  }
 0x549   :  { %11899 = vmatpush1.bf16.msra.mxu1 %v15598_v61  ;;  %v15715_v30 = vld [vmem:[%s20963_s5 + $0x3c8] ss:$16 sps:$4 sm:$0xff]  }
 0x54a   :  { %11900 = vmatprep.subr.bf16.mxu1 %v15606_v4  ;;  %v20047_v4 = vcombine.high %v20026_v5, %v20026_v5 }
 0x54b   :  { %11940 = vmatpush1.bf16.msra.mxu0 %v15601_v1  ;;  %v15669_v1 = vld [vmem:[%s20963_s5 + $0x2cc] ss:$16 sps:$4 sm:$0xff]  }
 0x54c   :  { %11941 = vmatprep.subr.bf16.mxu0 %v15609_v18 }
 0x54d   :  { %11901 = vmatpush1.bf16.msra.mxu1 %v15604_v39  ;;  %v15664_v39 = vld [vmem:[%s20963_s5 + $0xc8] ss:$16 sps:$4 sm:$0xff]  }
 0x54e   :  { %11902 = vmatprep.subr.bf16.mxu1 %v15612_v23 }
 0x54f   :  { %11942 = vmatpush1.bf16.msra.mxu0 %v15607_v11 }
 0x550   :  { %11943 = vmatprep.subr.bf16.mxu0 %v15615_v38  ;;  %v15672_v38 = vld [vmem:[%s20963_s5 + $0xac] ss:$16 sps:$4 sm:$0xff]  }
 0x551   :  { %11903 = vmatpush2.bf16.msra.mxu1 %v15610_v17 }
 0x552   :  { %11904 = vmatprep.subr.bf16.mxu1 %v15618_v24 }
 0x553   :  { %11944 = vmatpush2.bf16.msra.mxu0 %v15613_v53 }
 0x554   :  { %11945 = vmatprep.subr.bf16.mxu0 %v15621_v7 }
 0x555   :  { %11905 = vmatpush2.bf16.msra.mxu1 %v15616_v44  ;;  %v15675_v44 = vld [vmem:[%s20963_s5 + $0x2ac] ss:$16 sps:$4 sm:$0xff]  }
 0x556   :  { %11906 = vmatprep.subr.bf16.mxu1 %v15624_v28 }
 0x557   :  { %11946 = vmatpush2.bf16.msra.mxu0 %v15619_v9  ;;  %v15670_v9 = vld [vmem:[%s20963_s5 + $0xa8] ss:$16 sps:$4 sm:$0xff]  }
 0x558   :  { %11947 = vmatprep.subr.bf16.mxu0 %v15627_v60 }
 0x559   :  { %11907 = vmatpush2.bf16.msra.mxu1 %v15622_v36  ;;  %v15678_v36 = vld [vmem:[%s20963_s5 + $0x8c] ss:$16 sps:$4 sm:$0xff]  }
 0x55a   :  { %11908 = vmatprep.subr.bf16.mxu1 %v15630_v57  ;;  %v15673_v57 = vld [vmem:[%s20963_s5 + $0x2a8] ss:$16 sps:$4 sm:$0xff]  }
 0x55b   :  { %11948 = vmatpush2.bf16.msra.mxu0 %v15625_v48 }
 0x55c   :  { %11949 = vmatprep.subr.bf16.mxu0 %v15633_v35  ;;  %v15681_v35 = vld [vmem:[%s20963_s5 + $0x28c] ss:$16 sps:$4 sm:$0xff]  }
 0x55d   :  { %11909 = vmatpush2.bf16.msra.mxu1 %v15628_v56  ;;  %v15676_v56 = vld [vmem:[%s20963_s5 + $0x88] ss:$16 sps:$4 sm:$0xff]  }
 0x55e   :  { %11910 = vmatprep.subr.bf16.mxu1 %v15636_v42  ;;  %v15684_v42 = vld [vmem:[%s20963_s5 + $0x6c] ss:$16 sps:$4 sm:$0xff]  }
 0x55f   :  { %11950 = vmatpush2.bf16.msra.mxu0 %v15631_v12  ;;  %v15679_v12 = vld [vmem:[%s20963_s5 + $0x288] ss:$16 sps:$4 sm:$0xff]  }
 0x560   :  { %11951 = vmatprep.subr.bf16.mxu0 %v15639_v6  ;;  %v15687_v6 = vld [vmem:[%s20963_s5 + $0x26c] ss:$16 sps:$4 sm:$0xff]  }
 0x561   :  { %11911 = vmatpush2.bf16.msra.mxu1 %v15634_v58  ;;  %v15682_v58 = vld [vmem:[%s20963_s5 + $0x68] ss:$16 sps:$4 sm:$0xff]  }
 0x562   :  { %11912 = vmatprep.subr.bf16.mxu1 %v15642_v16  ;;  %v15690_v16 = vld [vmem:[%s20963_s5 + $0x4c] ss:$16 sps:$4 sm:$0xff]  }
 0x563   :  { %11952 = vmatpush2.bf16.msra.mxu0 %v15637_v3  ;;  %v15685_v3 = vld [vmem:[%s20963_s5 + $0x268] ss:$16 sps:$4 sm:$0xff]  }
 0x564   :  { %11953 = vmatprep.subr.bf16.mxu0 %v15645_v59  ;;  %v15693_v59 = vld [vmem:[%s20963_s5 + $0x24c] ss:$16 sps:$4 sm:$0xff]  }
 0x565   :  { %11913 = vmatpush2.bf16.msra.mxu1 %v15640_v33  ;;  %v15688_v33 = vld [vmem:[%s20963_s5 + $0x48] ss:$16 sps:$4 sm:$0xff]  }
 0x566   :  { %11914 = vmatprep.subr.bf16.mxu1 %v15648_v50  ;;  %v15696_v50 = vld [vmem:[%s20963_s5 + $0x2c] ss:$16 sps:$4 sm:$0xff]  }
 0x567   :  { %11954 = vmatpush2.bf16.msra.mxu0 %v15643_v29  ;;  %v15691_v29 = vld [vmem:[%s20963_s5 + $0x248] ss:$16 sps:$4 sm:$0xff]  }
 0x568   :  { %11955 = vmatprep.subr.bf16.mxu0 %v15651_v2  ;;  %v15699_v2 = vld [vmem:[%s20963_s5 + $0x22c] ss:$16 sps:$4 sm:$0xff]  }
 0x569   :  { %11915 = vmatpush2.bf16.msra.mxu1 %v15646_v40  ;;  %v15694_v40 = vld [vmem:[%s20963_s5 + $0x28] ss:$16 sps:$4 sm:$0xff]  }
 0x56a   :  { %11916 = vmatprep.subr.bf16.mxu1 %v15654_v13  ;;  %v15702_v13 = vld [vmem:[%s20963_s5 + $0xc] ss:$16 sps:$4 sm:$0xff]  }
 0x56b   :  { %11956 = vmatpush2.bf16.msra.mxu0 %v15649_v31  ;;  %v15697_v31 = vld [vmem:[%s20963_s5 + $0x228] ss:$16 sps:$4 sm:$0xff]  }
 0x56c   :  { %11957 = vmatprep.subr.bf16.mxu0 %v15657_v0  ;;  %v15705_v0 = vld [vmem:[%s20963_s5 + $0x20c] ss:$16 sps:$4 sm:$0xff]  }
 0x56d   :  { %11917 = vmatpush2.bf16.msra.mxu1 %v15652_v41  ;;  %v15700_v41 = vld [vmem:[%s20963_s5 + $0x8] ss:$16 sps:$4 sm:$0xff]  }
 0x56e   :  { %11968 = vmatprep.subr.bf16.mxu1 %v15660_v52  ;;  %v15708_v52 = vld [vmem:[%s20963_s5 + $0x1ec] ss:$16 sps:$4 sm:$0xff]  }
 0x56f   :  { %11958 = vmatpush2.bf16.msra.mxu0 %v15655_v54  ;;  %v15711_v54 = vld [vmem:[%s20963_s5 + $0x3ec] ss:$16 sps:$4 sm:$0xff]  }
 0x570   :  { %11919 = vmatmul.mubr.bf16.vlgmr.msra.gmra.mxu1 %v20026_v5  ;;  %v11674_v61 = vpop.f32.mrf.mxu1  ;;  %12009 = vmatprep.subr.bf16.mxu0 %v15663_v47  ;;  %v15706_v47 = vld [vmem:[%s20963_s5 + $0x1e8] ss:$16 sps:$4 sm:$0xff]  }
 0x571   :  { %v11675_v18 = vadd.f32 %v11674_v61, %v8947_v55  ;;  %11969 = vmatpush1.bf16.msra.mxu1 %v15658_v32  ;;  %12000 = vmatprep.mubr.bf16.mxu1 %v19370_v46  ;;  %v15667_v46 = vld [vmem:[%s20963_s5 + $0x2c8] ss:$16 sps:$4 sm:$0xff]   ;;  %v15714_v32 = vld [vmem:[%s20963_s5 + $0x1cc] ss:$16 sps:$4 sm:$0xff]  }
 0x572   :  { %11960 = vmatmul.mubr.bf16.vlgmr.msra.gmra.mxu0 %v20047_v4  ;;  %v11676_v23 = vpop.f32.mrf.mxu1  ;;  %v11715_v11 = vpop.f32.mrf.mxu0  ;;  %11970 = vmatprep.subr.bf16.mxu1 %v15666_v63  ;;  %v15717_v55 = vld [vmem:[%s20963_s5 + $0x3cc] ss:$16 sps:$4 sm:$0xff]   ;;  %v15712_v63 = vld [vmem:[%s20963_s5 + $0x1c8] ss:$16 sps:$4 sm:$0xff]  }
 0x573   :  { %v11677_v17 = vadd.f32 %v11676_v23, %v8951_v37  ;;  %v20060_v24 = vadd.f32 %v11715_v11, %v11675_v18  ;;  %12010 = vmatpush1.bf16.msra.mxu0 %v15661_v45  ;;  %12041 = vmatprep.mubr.bf16.mxu0 %v19380_v14  ;;  %v15720_v45 = vld [vmem:[%s20963_s5 + $0x1ac] ss:$16 sps:$4 sm:$0xff]   ;;  %v15718_v61 = vld [vmem:[%s20963_s5 + $0x1a8] ss:$16 sps:$4 sm:$0xff]  }
 0x574   :  { %v11678_v53 = vpop.f32.mrf.mxu1  ;;  %v11717_v7 = vpop.f32.mrf.mxu0  ;;  %12011 = vmatprep.subr.bf16.mxu0 %v15669_v1  ;;  %v15723_v37 = vld [vmem:[%s20963_s5 + $0x3ac] ss:$16 sps:$4 sm:$0xff]   ;;  %v15721_v18 = vld [vmem:[%s20963_s5 + $0x3a8] ss:$16 sps:$4 sm:$0xff]  }
 0x575   :  { %v20069_v28 = vadd.f32 %v11717_v7, %v11677_v17  ;;  %11971 = vmatpush1.bf16.msra.mxu1 %v15664_v39  ;;  %v15726_v1 = vld [vmem:[%s20963_s5 + $0x18c] ss:$16 sps:$4 sm:$0xff]   ;;  %v15724_v23 = vld [vmem:[%s20963_s5 + $0x188] ss:$16 sps:$4 sm:$0xff]  }
 0x576   :  { %v11679_v60 = vpop.f32.mrf.mxu1  ;;  %v11719_v14 = vpop.f32.mrf.mxu0  ;;  %11972 = vmatprep.subr.bf16.mxu1 %v15672_v38  ;;  %v15729_v39 = vld [vmem:[%s20963_s5 + $0x38c] ss:$16 sps:$4 sm:$0xff]   ;;  %v15727_v38 = vld [vmem:[%s20963_s5 + $0x388] ss:$16 sps:$4 sm:$0xff]  }
 0x577   :  { %12012 = vmatpush1.bf16.msra.mxu0 %v15667_v46  ;;  %v15732_v11 = vld [vmem:[%s20963_s5 + $0x16c] ss:$16 sps:$4 sm:$0xff]   ;;  %v15730_v46 = vld [vmem:[%s20963_s5 + $0x168] ss:$16 sps:$4 sm:$0xff]  }
 0x578   :  { %v11720_v48 = vpop.f32.mrf.mxu0  ;;  %12013 = vmatprep.subr.bf16.mxu0 %v15675_v44  ;;  %v15735_v17 = vld [vmem:[%s20963_s5 + $0x36c] ss:$16 sps:$4 sm:$0xff]   ;;  %v15733_v7 = vld [vmem:[%s20963_s5 + $0x368] ss:$16 sps:$4 sm:$0xff]  }
 0x579   :  { %11973 = vmatpush1.bf16.msra.mxu1 %v15670_v9  ;;  %v15738_v53 = vld [vmem:[%s20963_s5 + $0x14c] ss:$16 sps:$4 sm:$0xff]   ;;  %v15736_v9 = vld [vmem:[%s20963_s5 + $0x148] ss:$16 sps:$4 sm:$0xff]  }
 0x57a   :  { %11974 = vmatprep.subr.bf16.mxu1 %v15678_v36  ;;  %v15741_v44 = vld [vmem:[%s20963_s5 + $0x34c] ss:$16 sps:$4 sm:$0xff]   ;;  %v15739_v14 = vld [vmem:[%s20963_s5 + $0x348] ss:$16 sps:$4 sm:$0xff]  }
 0x57b   :  { %12014 = vmatpush1.bf16.msra.mxu0 %v15673_v57  ;;  %v15744_v60 = vld [vmem:[%s20963_s5 + $0x12c] ss:$16 sps:$4 sm:$0xff]   ;;  %v15742_v57 = vld [vmem:[%s20963_s5 + $0x128] ss:$16 sps:$4 sm:$0xff]  }
 0x57c   :  { %12015 = vmatprep.subr.bf16.mxu0 %v15681_v35  ;;  %v15747_v36 = vld [vmem:[%s20963_s5 + $0x32c] ss:$16 sps:$4 sm:$0xff]   ;;  %v15745_v35 = vld [vmem:[%s20963_s5 + $0x328] ss:$16 sps:$4 sm:$0xff]  }
 0x57d   :  { %11975 = vmatpush1.bf16.msra.mxu1 %v15676_v56  ;;  %v15750_v48 = vld [vmem:[%s20963_s5 + $0x10c] ss:$16 sps:$4 sm:$0xff]  }
 0x57e   :  { %11976 = vmatprep.subr.bf16.mxu1 %v15684_v42  ;;  %v15753_v56 = vld [vmem:[%s20963_s5 + $0x30c] ss:$16 sps:$4 sm:$0xff]   ;;  %v15748_v42 = vld [vmem:[%s20963_s5 + $0x108] ss:$16 sps:$4 sm:$0xff]  }
 0x57f   :  { %12016 = vmatpush1.bf16.msra.mxu0 %v15679_v12  ;;  %v15756_v12 = vld [vmem:[%s20963_s5 + $0x4ec] ss:$16 sps:$4 sm:$0xff]  }
 0x580   :  { %12017 = vmatprep.subr.bf16.mxu0 %v15687_v6  ;;  %v15751_v6 = vld [vmem:[%s20963_s5 + $0x308] ss:$16 sps:$4 sm:$0xff]  }
 0x581   :  { %11977 = vmatpush1.bf16.msra.mxu1 %v15682_v58  ;;  %v15759_v58 = vld [vmem:[%s20963_s5 + $0x6ec] ss:$16 sps:$4 sm:$0xff]  }
 0x582   :  { %11978 = vmatprep.subr.bf16.mxu1 %v15690_v16  ;;  %v15754_v16 = vld [vmem:[%s20963_s5 + $0x4e8] ss:$16 sps:$4 sm:$0xff]  }
 0x583   :  { %12018 = vmatpush1.bf16.msra.mxu0 %v15685_v3  ;;  %v15762_v3 = vld [vmem:[%s20963_s5 + $0x4cc] ss:$16 sps:$4 sm:$0xff]  }
 0x584   :  { %12019 = vmatprep.subr.bf16.mxu0 %v15693_v59  ;;  %v15757_v59 = vld [vmem:[%s20963_s5 + $0x6e8] ss:$16 sps:$4 sm:$0xff]  }
 0x585   :  { %11979 = vmatpush1.bf16.msra.mxu1 %v15688_v33 }
 0x586   :  { %11980 = vmatprep.subr.bf16.mxu1 %v15696_v50  ;;  %v15765_v50 = vld [vmem:[%s20963_s5 + $0x6cc] ss:$16 sps:$4 sm:$0xff]  }
 0x587   :  { %12020 = vmatpush1.bf16.msra.mxu0 %v15691_v29 }
 0x588   :  { %12021 = vmatprep.subr.bf16.mxu0 %v15699_v2  ;;  %v15760_v2 = vld [vmem:[%s20963_s5 + $0x4c8] ss:$16 sps:$4 sm:$0xff]  }
 0x589   :  { %11981 = vmatpush1.bf16.msra.mxu1 %v15694_v40 }
 0x58a   :  { %11982 = vmatprep.subr.bf16.mxu1 %v15702_v13 }
 0x58b   :  { %12022 = vmatpush1.bf16.msra.mxu0 %v15697_v31 }
 0x58c   :  { %12023 = vmatprep.subr.bf16.mxu0 %v15705_v0 }
 0x58d   :  { %11983 = vmatpush1.bf16.msra.mxu1 %v15700_v41 }
 0x58e   :  { %11984 = vmatprep.subr.bf16.mxu1 %v15708_v52 }
 0x58f   :  { %12024 = vmatpush1.bf16.msra.mxu0 %v15703_v43 }
 0x590   :  { %12025 = vmatprep.subr.bf16.mxu0 %v15711_v54  ;;  %v15774_v54 = vld [vmem:[%s20963_s5 + $0x48c] ss:$16 sps:$4 sm:$0xff]  }
 0x591   :  { %11985 = vmatpush2.bf16.msra.mxu1 %v15706_v47  ;;  %v15769_v47 = vld [vmem:[%s20963_s5 + $0x6a8] ss:$16 sps:$4 sm:$0xff]  }
 0x592   :  { %11986 = vmatprep.subr.bf16.mxu1 %v15714_v32 }
 0x593   :  { %12026 = vmatpush2.bf16.msra.mxu0 %v15709_v34  ;;  %v15777_v34 = vld [vmem:[%s20963_s5 + $0x68c] ss:$16 sps:$4 sm:$0xff]  }
 0x594   :  { %12027 = vmatprep.subr.bf16.mxu0 %v15717_v55  ;;  %v15772_v55 = vld [vmem:[%s20963_s5 + $0x488] ss:$16 sps:$4 sm:$0xff]  }
 0x595   :  { %11987 = vmatpush2.bf16.msra.mxu1 %v15712_v63  ;;  %v15780_v63 = vld [vmem:[%s20963_s5 + $0x46c] ss:$16 sps:$4 sm:$0xff]  }
 0x596   :  { %11988 = vmatprep.subr.bf16.mxu1 %v15720_v45  ;;  %v15775_v45 = vld [vmem:[%s20963_s5 + $0x688] ss:$16 sps:$4 sm:$0xff]  }
 0x597   :  { %12028 = vmatpush2.bf16.msra.mxu0 %v15715_v30  ;;  %v15783_v30 = vld [vmem:[%s20963_s5 + $0x66c] ss:$16 sps:$4 sm:$0xff]  }
 0x598   :  { %12029 = vmatprep.subr.bf16.mxu0 %v15723_v37  ;;  %v15778_v37 = vld [vmem:[%s20963_s5 + $0x468] ss:$16 sps:$4 sm:$0xff]  }
 0x599   :  { %11989 = vmatpush2.bf16.msra.mxu1 %v15718_v61  ;;  %v15786_v61 = vld [vmem:[%s20963_s5 + $0x44c] ss:$16 sps:$4 sm:$0xff]  }
 0x59a   :  { %11990 = vmatprep.subr.bf16.mxu1 %v15726_v1  ;;  %v15781_v1 = vld [vmem:[%s20963_s5 + $0x668] ss:$16 sps:$4 sm:$0xff]  }
 0x59b   :  { %12030 = vmatpush2.bf16.msra.mxu0 %v15721_v18  ;;  %v15789_v18 = vld [vmem:[%s20963_s5 + $0x64c] ss:$16 sps:$4 sm:$0xff]  }
 0x59c   :  { %12031 = vmatprep.subr.bf16.mxu0 %v15729_v39  ;;  %v15784_v39 = vld [vmem:[%s20963_s5 + $0x448] ss:$16 sps:$4 sm:$0xff]  }
 0x59d   :  { %11991 = vmatpush2.bf16.msra.mxu1 %v15724_v23  ;;  %v15792_v23 = vld [vmem:[%s20963_s5 + $0x42c] ss:$16 sps:$4 sm:$0xff]  }
 0x59e   :  { %11992 = vmatprep.subr.bf16.mxu1 %v15732_v11  ;;  %v15787_v11 = vld [vmem:[%s20963_s5 + $0x648] ss:$16 sps:$4 sm:$0xff]  }
 0x59f   :  { %12032 = vmatpush2.bf16.msra.mxu0 %v15727_v38  ;;  %v15795_v38 = vld [vmem:[%s20963_s5 + $0x62c] ss:$16 sps:$4 sm:$0xff]  }
 0x5a0   :  { %12033 = vmatprep.subr.bf16.mxu0 %v15735_v17  ;;  %v15790_v17 = vld [vmem:[%s20963_s5 + $0x428] ss:$16 sps:$4 sm:$0xff]  }
 0x5a1   :  { %11993 = vmatpush2.bf16.msra.mxu1 %v15730_v46  ;;  %v15798_v46 = vld [vmem:[%s20963_s5 + $0x40c] ss:$16 sps:$4 sm:$0xff]  }
 0x5a2   :  { %11994 = vmatprep.subr.bf16.mxu1 %v15738_v53  ;;  %v15793_v53 = vld [vmem:[%s20963_s5 + $0x628] ss:$16 sps:$4 sm:$0xff]  }
 0x5a3   :  { %12034 = vmatpush2.bf16.msra.mxu0 %v15733_v7  ;;  %v15801_v7 = vld [vmem:[%s20963_s5 + $0x60c] ss:$16 sps:$4 sm:$0xff]  }
 0x5a4   :  { %12035 = vmatprep.subr.bf16.mxu0 %v15741_v44  ;;  %v15796_v44 = vld [vmem:[%s20963_s5 + $0x408] ss:$16 sps:$4 sm:$0xff]  }
 0x5a5   :  { %11995 = vmatpush2.bf16.msra.mxu1 %v15736_v9  ;;  %v15804_v9 = vld [vmem:[%s20963_s5 + $0x5ec] ss:$16 sps:$4 sm:$0xff]  }
 0x5a6   :  { %11996 = vmatprep.subr.bf16.mxu1 %v15744_v60  ;;  %v15799_v60 = vld [vmem:[%s20963_s5 + $0x608] ss:$16 sps:$4 sm:$0xff]  }
 0x5a7   :  { %12036 = vmatpush2.bf16.msra.mxu0 %v15739_v14  ;;  %v15807_v14 = vld [vmem:[%s20963_s5 + $0x7ec] ss:$16 sps:$4 sm:$0xff]  }
 0x5a8   :  { %12037 = vmatprep.subr.bf16.mxu0 %v15747_v36  ;;  %v15802_v36 = vld [vmem:[%s20963_s5 + $0x5e8] ss:$16 sps:$4 sm:$0xff]  }
 0x5a9   :  { %11997 = vmatpush2.bf16.msra.mxu1 %v15742_v57  ;;  %v15810_v57 = vld [vmem:[%s20963_s5 + $0x5cc] ss:$16 sps:$4 sm:$0xff]  }
 0x5aa   :  { %11998 = vmatprep.subr.bf16.mxu1 %v15750_v48  ;;  %v15805_v48 = vld [vmem:[%s20963_s5 + $0x7e8] ss:$16 sps:$4 sm:$0xff]  }
 0x5ab   :  { %12038 = vmatpush2.bf16.msra.mxu0 %v15745_v35  ;;  %v15813_v35 = vld [vmem:[%s20963_s5 + $0x7cc] ss:$16 sps:$4 sm:$0xff]  }
 0x5ac   :  { %12039 = vmatprep.subr.bf16.mxu0 %v15753_v56  ;;  %v15808_v56 = vld [vmem:[%s20963_s5 + $0x5c8] ss:$16 sps:$4 sm:$0xff]  }
 0x5ad   :  { %11999 = vmatpush2.bf16.msra.mxu1 %v15748_v42  ;;  %v15816_v42 = vld [vmem:[%s20963_s5 + $0x5ac] ss:$16 sps:$4 sm:$0xff]  }
 0x5ae   :  { %12050 = vmatprep.subr.bf16.mxu1 %v15756_v12  ;;  %v15811_v12 = vld [vmem:[%s20963_s5 + $0x7c8] ss:$16 sps:$4 sm:$0xff]  }
 0x5af   :  { %12040 = vmatpush2.bf16.msra.mxu0 %v15751_v6  ;;  %v15819_v6 = vld [vmem:[%s20963_s5 + $0x7ac] ss:$16 sps:$4 sm:$0xff]  }
 0x5b0   :  { %v11756_v33 = vpop.f32.mrf.mxu1  ;;  %12001 = vmatmul.mubr.bf16.vlgmr.msra.gmra.mxu1 %v19367_v8  ;;  %12091 = vmatprep.subr.bf16.mxu0 %v15759_v58  ;;  %v15768_v8 = vld [vmem:[%s20963_s5 + $0x4ac] ss:$16 sps:$4 sm:$0xff]   ;;  %v15814_v58 = vld [vmem:[%s20963_s5 + $0x5a8] ss:$16 sps:$4 sm:$0xff]  }
 0x5b1   :  { %v11757_v29 = vadd.f32 %v11756_v33, %v20060_v24  ;;  %12051 = vmatpush1.bf16.msra.mxu1 %v15754_v16  ;;  %12082 = vmatprep.mubr.bf16.mxu1 %v19383_v21  ;;  %v15763_v21 = vld [vmem:[%s20963_s5 + $0x6c8] ss:$16 sps:$4 sm:$0xff]   ;;  %v15822_v16 = vld [vmem:[%s20963_s5 + $0x58c] ss:$16 sps:$4 sm:$0xff]  }
 0x5b2   :  { %v11758_v40 = vpop.f32.mrf.mxu1  ;;  %v11797_v13 = vpop.f32.mrf.mxu0  ;;  %12042 = vmatmul.mubr.bf16.vlgmr.msra.gmra.mxu0 %v19393_v62  ;;  %12052 = vmatprep.subr.bf16.mxu1 %v15762_v3  ;;  %v15771_v62 = vld [vmem:[%s20963_s5 + $0x6ac] ss:$16 sps:$4 sm:$0xff]   ;;  %v15817_v3 = vld [vmem:[%s20963_s5 + $0x7a8] ss:$16 sps:$4 sm:$0xff]  }
 0x5b3   :  { %v11759_v31 = vadd.f32 %v11758_v40, %v20069_v28  ;;  %v20262_v0 = vadd.f32 %v11797_v13, %v11757_v29  ;;  %12092 = vmatpush1.bf16.msra.mxu0 %v15757_v59  ;;  %12123 = vmatprep.mubr.bf16.mxu0 %v19405_v20  ;;  %v15766_v28 = vld [vmem:[%s20963_s5 + $0x4a8] ss:$16 sps:$4 sm:$0xff]   ;;  %v15825_v59 = vld [vmem:[%s20963_s5 + $0x78c] ss:$16 sps:$4 sm:$0xff]  }
 0x5b4   :  { %v11760_v24 = vpop.f32.mrf.mxu1  ;;  %v11799_v41 = vpop.f32.mrf.mxu0  ;;  %12093 = vmatprep.subr.bf16.mxu0 %v15765_v50  ;;  %v15820_v33 = vld [vmem:[%s20963_s5 + $0x588] ss:$16 sps:$4 sm:$0xff]   ;;  %v15828_v50 = vld [vmem:[%s20963_s5 + $0x56c] ss:$16 sps:$4 sm:$0xff]  }
 0x5b5   :  { %v20271_v52 = vadd.f32 %v11799_v41, %v11759_v31  ;;  %12053 = vmatpush1.bf16.msra.mxu1 %v15760_v2  ;;  %v15823_v29 = vld [vmem:[%s20963_s5 + $0x788] ss:$16 sps:$4 sm:$0xff]   ;;  %v15831_v2 = vld [vmem:[%s20963_s5 + $0x76c] ss:$16 sps:$4 sm:$0xff]  }
 0x5b6   :  { %v11761_v43 = vpop.f32.mrf.mxu1  ;;  %v11801_v20 = vpop.f32.mrf.mxu0  ;;  %12054 = vmatprep.subr.bf16.mxu1 %v15768_v8  ;;  %v15826_v40 = vld [vmem:[%s20963_s5 + $0x568] ss:$16 sps:$4 sm:$0xff]   ;;  %v15834_v13 = vld [vmem:[%s20963_s5 + $0x54c] ss:$16 sps:$4 sm:$0xff]  }
 0x5b7   :  { %12094 = vmatpush1.bf16.msra.mxu0 %v15763_v21  ;;  %v15829_v8 = vld [vmem:[%s20963_s5 + $0x768] ss:$16 sps:$4 sm:$0xff]   ;;  %v15837_v31 = vld [vmem:[%s20963_s5 + $0x74c] ss:$16 sps:$4 sm:$0xff]  }
 0x5b8   :  { %v11802_v32 = vpop.f32.mrf.mxu0  ;;  %12095 = vmatprep.subr.bf16.mxu0 %v15771_v62  ;;  %v15832_v21 = vld [vmem:[%s20963_s5 + $0x548] ss:$16 sps:$4 sm:$0xff]   ;;  %v15840_v24 = vld [vmem:[%s20963_s5 + $0x52c] ss:$16 sps:$4 sm:$0xff]  }
 0x5b9   :  { %12055 = vmatpush1.bf16.msra.mxu1 %v15766_v28  ;;  %v15835_v41 = vld [vmem:[%s20963_s5 + $0x748] ss:$16 sps:$4 sm:$0xff]   ;;  %v15843_v62 = vld [vmem:[%s20963_s5 + $0x72c] ss:$16 sps:$4 sm:$0xff]  }
 0x5ba   :  { %12056 = vmatprep.subr.bf16.mxu1 %v15774_v54  ;;  %v15838_v28 = vld [vmem:[%s20963_s5 + $0x528] ss:$16 sps:$4 sm:$0xff]   ;;  %v15846_v43 = vld [vmem:[%s20963_s5 + $0x50c] ss:$16 sps:$4 sm:$0xff]  }
 0x5bb   :  { %12096 = vmatpush1.bf16.msra.mxu0 %v15769_v47  ;;  %v15841_v20 = vld [vmem:[%s20963_s5 + $0x728] ss:$16 sps:$4 sm:$0xff]   ;;  %v15849_v54 = vld [vmem:[%s20963_s5 + $0x70c] ss:$16 sps:$4 sm:$0xff]  }
 0x5bc   :  { %12097 = vmatprep.subr.bf16.mxu0 %v15777_v34  ;;  %v15844_v47 = vld [vmem:[%s20963_s5 + $0x508] ss:$16 sps:$4 sm:$0xff]   ;;  %v15852_v32 = vld [vmem:[%s20963_s5 + $0x8ec] ss:$16 sps:$4 sm:$0xff]  }
 0x5bd   :  { %12057 = vmatpush1.bf16.msra.mxu1 %v15772_v55  ;;  %v15847_v34 = vld [vmem:[%s20963_s5 + $0x708] ss:$16 sps:$4 sm:$0xff]   ;;  %v15855_v55 = vld [vmem:[%s20963_s5 + $0xaec] ss:$16 sps:$4 sm:$0xff]  }
 0x5be   :  { %12058 = vmatprep.subr.bf16.mxu1 %v15780_v63  ;;  %v15850_v63 = vld [vmem:[%s20963_s5 + $0x8e8] ss:$16 sps:$4 sm:$0xff]  }
 0x5bf   :  { %12098 = vmatpush1.bf16.msra.mxu0 %v15775_v45  ;;  %v15858_v45 = vld [vmem:[%s20963_s5 + $0x8cc] ss:$16 sps:$4 sm:$0xff]  }
 0x5c0   :  { %12099 = vmatprep.subr.bf16.mxu0 %v15783_v30  ;;  %v15853_v30 = vld [vmem:[%s20963_s5 + $0xae8] ss:$16 sps:$4 sm:$0xff]  }
 0x5c1   :  { %12059 = vmatpush1.bf16.msra.mxu1 %v15778_v37 }
 0x5c2   :  { %12060 = vmatprep.subr.bf16.mxu1 %v15786_v61  ;;  %v15861_v61 = vld [vmem:[%s20963_s5 + $0xacc] ss:$16 sps:$4 sm:$0xff]  }
 0x5c3   :  { %12100 = vmatpush1.bf16.msra.mxu0 %v15781_v1 }
 0x5c4   :  { %12101 = vmatprep.subr.bf16.mxu0 %v15789_v18  ;;  %v15856_v18 = vld [vmem:[%s20963_s5 + $0x8c8] ss:$16 sps:$4 sm:$0xff]  }
 0x5c5   :  { %12061 = vmatpush1.bf16.msra.mxu1 %v15784_v39 }
 0x5c6   :  { %12062 = vmatprep.subr.bf16.mxu1 %v15792_v23 }
 0x5c7   :  { %12102 = vmatpush1.bf16.msra.mxu0 %v15787_v11 }
 0x5c8   :  { %12103 = vmatprep.subr.bf16.mxu0 %v15795_v38 }
 0x5c9   :  { %12063 = vmatpush1.bf16.msra.mxu1 %v15790_v17 }
 0x5ca   :  { %12064 = vmatprep.subr.bf16.mxu1 %v15798_v46 }
 0x5cb   :  { %12104 = vmatpush1.bf16.msra.mxu0 %v15793_v53 }
 0x5cc   :  { %12105 = vmatprep.subr.bf16.mxu0 %v15801_v7  ;;  %v15870_v7 = vld [vmem:[%s20963_s5 + $0x88c] ss:$16 sps:$4 sm:$0xff]  }
 0x5cd   :  { %12065 = vmatpush1.bf16.msra.mxu1 %v15796_v44  ;;  %v15865_v44 = vld [vmem:[%s20963_s5 + $0xaa8] ss:$16 sps:$4 sm:$0xff]  }
 0x5ce   :  { %12066 = vmatprep.subr.bf16.mxu1 %v15804_v9 }
 0x5cf   :  { %12106 = vmatpush1.bf16.msra.mxu0 %v15799_v60  ;;  %v15873_v60 = vld [vmem:[%s20963_s5 + $0xa8c] ss:$16 sps:$4 sm:$0xff]  }
 0x5d0   :  { %12107 = vmatprep.subr.bf16.mxu0 %v15807_v14  ;;  %v15868_v14 = vld [vmem:[%s20963_s5 + $0x888] ss:$16 sps:$4 sm:$0xff]  }
 0x5d1   :  { %12067 = vmatpush2.bf16.msra.mxu1 %v15802_v36  ;;  %v15876_v36 = vld [vmem:[%s20963_s5 + $0x86c] ss:$16 sps:$4 sm:$0xff]  }
 0x5d2   :  { %12068 = vmatprep.subr.bf16.mxu1 %v15810_v57  ;;  %v15871_v57 = vld [vmem:[%s20963_s5 + $0xa88] ss:$16 sps:$4 sm:$0xff]  }
 0x5d3   :  { %12108 = vmatpush2.bf16.msra.mxu0 %v15805_v48  ;;  %v15879_v48 = vld [vmem:[%s20963_s5 + $0xa6c] ss:$16 sps:$4 sm:$0xff]  }
 0x5d4   :  { %12109 = vmatprep.subr.bf16.mxu0 %v15813_v35  ;;  %v15874_v35 = vld [vmem:[%s20963_s5 + $0x868] ss:$16 sps:$4 sm:$0xff]  }
 0x5d5   :  { %12069 = vmatpush2.bf16.msra.mxu1 %v15808_v56  ;;  %v15882_v56 = vld [vmem:[%s20963_s5 + $0x84c] ss:$16 sps:$4 sm:$0xff]  }
 0x5d6   :  { %12070 = vmatprep.subr.bf16.mxu1 %v15816_v42  ;;  %v15877_v42 = vld [vmem:[%s20963_s5 + $0xa68] ss:$16 sps:$4 sm:$0xff]  }
 0x5d7   :  { %12110 = vmatpush2.bf16.msra.mxu0 %v15811_v12  ;;  %v15885_v12 = vld [vmem:[%s20963_s5 + $0xa4c] ss:$16 sps:$4 sm:$0xff]  }
 0x5d8   :  { %12111 = vmatprep.subr.bf16.mxu0 %v15819_v6  ;;  %v15880_v6 = vld [vmem:[%s20963_s5 + $0x848] ss:$16 sps:$4 sm:$0xff]  }
 0x5d9   :  { %12071 = vmatpush2.bf16.msra.mxu1 %v15814_v58  ;;  %v15888_v58 = vld [vmem:[%s20963_s5 + $0x82c] ss:$16 sps:$4 sm:$0xff]  }
 0x5da   :  { %12072 = vmatprep.subr.bf16.mxu1 %v15822_v16  ;;  %v15883_v16 = vld [vmem:[%s20963_s5 + $0xa48] ss:$16 sps:$4 sm:$0xff]  }
 0x5db   :  { %12112 = vmatpush2.bf16.msra.mxu0 %v15817_v3  ;;  %v15891_v3 = vld [vmem:[%s20963_s5 + $0xa2c] ss:$16 sps:$4 sm:$0xff]  }
 0x5dc   :  { %12113 = vmatprep.subr.bf16.mxu0 %v15825_v59  ;;  %v15886_v59 = vld [vmem:[%s20963_s5 + $0x828] ss:$16 sps:$4 sm:$0xff]  }
 0x5dd   :  { %12073 = vmatpush2.bf16.msra.mxu1 %v15820_v33  ;;  %v15894_v33 = vld [vmem:[%s20963_s5 + $0x80c] ss:$16 sps:$4 sm:$0xff]  }
 0x5de   :  { %12074 = vmatprep.subr.bf16.mxu1 %v15828_v50  ;;  %v15889_v50 = vld [vmem:[%s20963_s5 + $0xa28] ss:$16 sps:$4 sm:$0xff]  }
 0x5df   :  { %12114 = vmatpush2.bf16.msra.mxu0 %v15823_v29  ;;  %v15897_v29 = vld [vmem:[%s20963_s5 + $0xa0c] ss:$16 sps:$4 sm:$0xff]  }
 0x5e0   :  { %12115 = vmatprep.subr.bf16.mxu0 %v15831_v2  ;;  %v15892_v2 = vld [vmem:[%s20963_s5 + $0x808] ss:$16 sps:$4 sm:$0xff]  }
 0x5e1   :  { %12075 = vmatpush2.bf16.msra.mxu1 %v15826_v40  ;;  %v15900_v40 = vld [vmem:[%s20963_s5 + $0x9ec] ss:$16 sps:$4 sm:$0xff]  }
 0x5e2   :  { %12076 = vmatprep.subr.bf16.mxu1 %v15834_v13  ;;  %v15895_v13 = vld [vmem:[%s20963_s5 + $0xa08] ss:$16 sps:$4 sm:$0xff]  }
 0x5e3   :  { %12116 = vmatpush2.bf16.msra.mxu0 %v15829_v8  ;;  %v15903_v8 = vld [vmem:[%s20963_s5 + $0xbec] ss:$16 sps:$4 sm:$0xff]  }
 0x5e4   :  { %12117 = vmatprep.subr.bf16.mxu0 %v15837_v31  ;;  %v15898_v31 = vld [vmem:[%s20963_s5 + $0x9e8] ss:$16 sps:$4 sm:$0xff]  }
 0x5e5   :  { %12077 = vmatpush2.bf16.msra.mxu1 %v15832_v21  ;;  %v15906_v21 = vld [vmem:[%s20963_s5 + $0x9cc] ss:$16 sps:$4 sm:$0xff]  }
 0x5e6   :  { %12078 = vmatprep.subr.bf16.mxu1 %v15840_v24  ;;  %v15901_v24 = vld [vmem:[%s20963_s5 + $0xbe8] ss:$16 sps:$4 sm:$0xff]  }
 0x5e7   :  { %12118 = vmatpush2.bf16.msra.mxu0 %v15835_v41  ;;  %v15909_v41 = vld [vmem:[%s20963_s5 + $0xbcc] ss:$16 sps:$4 sm:$0xff]  }
 0x5e8   :  { %12119 = vmatprep.subr.bf16.mxu0 %v15843_v62  ;;  %v15904_v62 = vld [vmem:[%s20963_s5 + $0x9c8] ss:$16 sps:$4 sm:$0xff]  }
 0x5e9   :  { %12079 = vmatpush2.bf16.msra.mxu1 %v15838_v28  ;;  %v15912_v28 = vld [vmem:[%s20963_s5 + $0x9ac] ss:$16 sps:$4 sm:$0xff]  }
 0x5ea   :  { %12080 = vmatprep.subr.bf16.mxu1 %v15846_v43  ;;  %v15907_v43 = vld [vmem:[%s20963_s5 + $0xbc8] ss:$16 sps:$4 sm:$0xff]  }
 0x5eb   :  { %12120 = vmatpush2.bf16.msra.mxu0 %v15841_v20  ;;  %v15915_v20 = vld [vmem:[%s20963_s5 + $0xbac] ss:$16 sps:$4 sm:$0xff]  }
 0x5ec   :  { %12121 = vmatprep.subr.bf16.mxu0 %v15849_v54  ;;  %v15910_v54 = vld [vmem:[%s20963_s5 + $0x9a8] ss:$16 sps:$4 sm:$0xff]  }
 0x5ed   :  { %12081 = vmatpush2.bf16.msra.mxu1 %v15844_v47  ;;  %v15918_v47 = vld [vmem:[%s20963_s5 + $0x98c] ss:$16 sps:$4 sm:$0xff]  }
 0x5ee   :  { %12132 = vmatprep.subr.bf16.mxu1 %v15852_v32  ;;  %v15913_v32 = vld [vmem:[%s20963_s5 + $0xba8] ss:$16 sps:$4 sm:$0xff]  }
 0x5ef   :  { %12122 = vmatpush2.bf16.msra.mxu0 %v15847_v34  ;;  %v15921_v34 = vld [vmem:[%s20963_s5 + $0xb8c] ss:$16 sps:$4 sm:$0xff]  }
 0x5f0   :  { %v11838_v37 = vpop.f32.mrf.mxu1  ;;  %12083 = vmatmul.mubr.bf16.vlgmr.msra.gmra.mxu1 %v19594_v49  ;;  %12173 = vmatprep.subr.bf16.mxu0 %v15855_v55  ;;  %v15864_v49 = vld [vmem:[%s20963_s5 + $0x8ac] ss:$16 sps:$4 sm:$0xff]   ;;  %v15916_v55 = vld [vmem:[%s20963_s5 + $0x988] ss:$16 sps:$4 sm:$0xff]  }
 0x5f1   :  { %v11839_v1 = vadd.f32 %v11838_v37, %v20262_v0  ;;  %12133 = vmatpush1.bf16.msra.mxu1 %v15850_v63  ;;  %12164 = vmatprep.mubr.bf16.mxu1 %v19603_v22  ;;  %v15859_v22 = vld [vmem:[%s20963_s5 + $0xac8] ss:$16 sps:$4 sm:$0xff]   ;;  %v15924_v63 = vld [vmem:[%s20963_s5 + $0x96c] ss:$16 sps:$4 sm:$0xff]  }
 0x5f2   :  { %v11840_v39 = vpop.f32.mrf.mxu1  ;;  %v11879_v23 = vpop.f32.mrf.mxu0  ;;  %12124 = vmatmul.mubr.bf16.vlgmr.msra.gmra.mxu0 %v19614_v25  ;;  %12134 = vmatprep.subr.bf16.mxu1 %v15858_v45  ;;  %v15867_v25 = vld [vmem:[%s20963_s5 + $0xaac] ss:$16 sps:$4 sm:$0xff]   ;;  %v15919_v45 = vld [vmem:[%s20963_s5 + $0xb88] ss:$16 sps:$4 sm:$0xff]  }
 0x5f3   :  { %v11841_v11 = vadd.f32 %v11840_v39, %v20271_v52  ;;  %v20464_v38 = vadd.f32 %v11879_v23, %v11839_v1  ;;  %12174 = vmatpush1.bf16.msra.mxu0 %v15853_v30  ;;  %12205 = vmatprep.mubr.bf16.mxu0 %v19622_v51  ;;  %v15862_v52 = vld [vmem:[%s20963_s5 + $0x8a8] ss:$16 sps:$4 sm:$0xff]   ;;  %v15927_v30 = vld [vmem:[%s20963_s5 + $0xb6c] ss:$16 sps:$4 sm:$0xff]  }
 0x5f4   :  { %v11842_v0 = vpop.f32.mrf.mxu1  ;;  %v11881_v17 = vpop.f32.mrf.mxu0  ;;  %12175 = vmatprep.subr.bf16.mxu0 %v15861_v61  ;;  %v15922_v37 = vld [vmem:[%s20963_s5 + $0x968] ss:$16 sps:$4 sm:$0xff]   ;;  %v15930_v61 = vld [vmem:[%s20963_s5 + $0x94c] ss:$16 sps:$4 sm:$0xff]  }
 0x5f5   :  { %v20473_v46 = vadd.f32 %v11881_v17, %v11841_v11  ;;  %12135 = vmatpush1.bf16.msra.mxu1 %v15856_v18  ;;  %v15925_v1 = vld [vmem:[%s20963_s5 + $0xb68] ss:$16 sps:$4 sm:$0xff]   ;;  %v15933_v18 = vld [vmem:[%s20963_s5 + $0xb4c] ss:$16 sps:$4 sm:$0xff]  }
 0x5f6   :  { %v11843_v53 = vpop.f32.mrf.mxu1  ;;  %v11883_v51 = vpop.f32.mrf.mxu0  ;;  %12136 = vmatprep.subr.bf16.mxu1 %v15864_v49  ;;  %v15928_v39 = vld [vmem:[%s20963_s5 + $0x948] ss:$16 sps:$4 sm:$0xff]   ;;  %v15936_v23 = vld [vmem:[%s20963_s5 + $0x92c] ss:$16 sps:$4 sm:$0xff]  }
 0x5f7   :  { %12176 = vmatpush1.bf16.msra.mxu0 %v15859_v22  ;;  %v15931_v49 = vld [vmem:[%s20963_s5 + $0xb48] ss:$16 sps:$4 sm:$0xff]   ;;  %v15939_v11 = vld [vmem:[%s20963_s5 + $0xb2c] ss:$16 sps:$4 sm:$0xff]  }
 0x5f8   :  { %v11884_v9 = vpop.f32.mrf.mxu0  ;;  %12177 = vmatprep.subr.bf16.mxu0 %v15867_v25  ;;  %v15934_v22 = vld [vmem:[%s20963_s5 + $0x928] ss:$16 sps:$4 sm:$0xff]   ;;  %v15942_v0 = vld [vmem:[%s20963_s5 + $0x90c] ss:$16 sps:$4 sm:$0xff]  }
 0x5f9   :  { %12137 = vmatpush1.bf16.msra.mxu1 %v15862_v52  ;;  %v15937_v17 = vld [vmem:[%s20963_s5 + $0xb28] ss:$16 sps:$4 sm:$0xff]   ;;  %v15945_v25 = vld [vmem:[%s20963_s5 + $0xb0c] ss:$16 sps:$4 sm:$0xff]  }
 0x5fa   :  { %12138 = vmatprep.subr.bf16.mxu1 %v15870_v7  ;;  %v15940_v52 = vld [vmem:[%s20963_s5 + $0x908] ss:$16 sps:$4 sm:$0xff]   ;;  %v15948_v53 = vld [vmem:[%s20963_s5 + $0xcec] ss:$16 sps:$4 sm:$0xff]  }
 0x5fb   :  { %12178 = vmatpush1.bf16.msra.mxu0 %v15865_v44  ;;  %v15943_v51 = vld [vmem:[%s20963_s5 + $0xb08] ss:$16 sps:$4 sm:$0xff]   ;;  %v15951_v7 = vld [vmem:[%s20963_s5 + $0xeec] ss:$16 sps:$4 sm:$0xff]  }
 0x5fc   :  { %12179 = vmatprep.subr.bf16.mxu0 %v15873_v60  ;;  %v15946_v44 = vld [vmem:[%s20963_s5 + $0xce8] ss:$16 sps:$4 sm:$0xff]   ;;  %v15954_v9 = vld [vmem:[%s20963_s5 + $0xccc] ss:$16 sps:$4 sm:$0xff]  }
 0x5fd   :  { %12139 = vmatpush1.bf16.msra.mxu1 %v15868_v14  ;;  %v15949_v60 = vld [vmem:[%s20963_s5 + $0xee8] ss:$16 sps:$4 sm:$0xff]  }
 0x5fe   :  { %12140 = vmatprep.subr.bf16.mxu1 %v15876_v36  ;;  %v15957_v36 = vld [vmem:[%s20963_s5 + $0xecc] ss:$16 sps:$4 sm:$0xff]  }
 0x5ff   :  { %12180 = vmatpush1.bf16.msra.mxu0 %v15871_v57 }
 0x600   :  { %12181 = vmatprep.subr.bf16.mxu0 %v15879_v48  ;;  %v15952_v48 = vld [vmem:[%s20963_s5 + $0xcc8] ss:$16 sps:$4 sm:$0xff]  }
 0x601   :  { %12141 = vmatpush1.bf16.msra.mxu1 %v15874_v35 }
 0x602   :  { %12142 = vmatprep.subr.bf16.mxu1 %v15882_v56 }
 0x603   :  { %12182 = vmatpush1.bf16.msra.mxu0 %v15877_v42 }
 0x604   :  { %12183 = vmatprep.subr.bf16.mxu0 %v15885_v12 }
 0x605   :  { %12143 = vmatpush1.bf16.msra.mxu1 %v15880_v6  ;;  %v15958_v6 = vld [vmem:[%s20963_s5 + $0xca8] ss:$16 sps:$4 sm:$0xff]  }
 0x606   :  { %12144 = vmatprep.subr.bf16.mxu1 %v15888_v58 }
 0x607   :  { %12184 = vmatpush1.bf16.msra.mxu0 %v15883_v16 }
 0x608   :  { %12185 = vmatprep.subr.bf16.mxu0 %v15891_v3  ;;  %v15961_v3 = vld [vmem:[%s20963_s5 + $0xea8] ss:$16 sps:$4 sm:$0xff]  }
 0x609   :  { %12145 = vmatpush1.bf16.msra.mxu1 %v15886_v59 }
 0x60a   :  { %12146 = vmatprep.subr.bf16.mxu1 %v15894_v33  ;;  %v15969_v33 = vld [vmem:[%s20963_s5 + $0xe8c] ss:$16 sps:$4 sm:$0xff]  }
 0x60b   :  { %12186 = vmatpush1.bf16.msra.mxu0 %v15889_v50  ;;  %v15964_v50 = vld [vmem:[%s20963_s5 + $0xc88] ss:$16 sps:$4 sm:$0xff]  }
 0x60c   :  { %12187 = vmatprep.subr.bf16.mxu0 %v15897_v29  ;;  %v15972_v29 = vld [vmem:[%s20963_s5 + $0xc6c] ss:$16 sps:$4 sm:$0xff]  }
 0x60d   :  { %12147 = vmatpush1.bf16.msra.mxu1 %v15892_v2  ;;  %v15967_v2 = vld [vmem:[%s20963_s5 + $0xe88] ss:$16 sps:$4 sm:$0xff]  }
 0x60e   :  { %12148 = vmatprep.subr.bf16.mxu1 %v15900_v40  ;;  %v15975_v40 = vld [vmem:[%s20963_s5 + $0xe6c] ss:$16 sps:$4 sm:$0xff]  }
 0x60f   :  { %12188 = vmatpush1.bf16.msra.mxu0 %v15895_v13  ;;  %v15970_v13 = vld [vmem:[%s20963_s5 + $0xc68] ss:$16 sps:$4 sm:$0xff]  }
 0x610   :  { %12189 = vmatprep.subr.bf16.mxu0 %v15903_v8  ;;  %v15978_v8 = vld [vmem:[%s20963_s5 + $0xc4c] ss:$16 sps:$4 sm:$0xff]  }
 0x611   :  { %12149 = vmatpush2.bf16.msra.mxu1 %v15898_v31  ;;  %v15973_v31 = vld [vmem:[%s20963_s5 + $0xe68] ss:$16 sps:$4 sm:$0xff]  }
 0x612   :  { %12150 = vmatprep.subr.bf16.mxu1 %v15906_v21  ;;  %v15981_v21 = vld [vmem:[%s20963_s5 + $0xe4c] ss:$16 sps:$4 sm:$0xff]  }
 0x613   :  { %12190 = vmatpush2.bf16.msra.mxu0 %v15901_v24  ;;  %v15976_v24 = vld [vmem:[%s20963_s5 + $0xc48] ss:$16 sps:$4 sm:$0xff]  }
 0x614   :  { %12191 = vmatprep.subr.bf16.mxu0 %v15909_v41  ;;  %v15984_v41 = vld [vmem:[%s20963_s5 + $0xc2c] ss:$16 sps:$4 sm:$0xff]  }
 0x615   :  { %12151 = vmatpush2.bf16.msra.mxu1 %v15904_v62  ;;  %v15979_v62 = vld [vmem:[%s20963_s5 + $0xe48] ss:$16 sps:$4 sm:$0xff]  }
 0x616   :  { %12152 = vmatprep.subr.bf16.mxu1 %v15912_v28  ;;  %v15987_v28 = vld [vmem:[%s20963_s5 + $0xe2c] ss:$16 sps:$4 sm:$0xff]  }
 0x617   :  { %12192 = vmatpush2.bf16.msra.mxu0 %v15907_v43  ;;  %v15982_v43 = vld [vmem:[%s20963_s5 + $0xc28] ss:$16 sps:$4 sm:$0xff]  }
 0x618   :  { %12193 = vmatprep.subr.bf16.mxu0 %v15915_v20  ;;  %v15990_v20 = vld [vmem:[%s20963_s5 + $0xc0c] ss:$16 sps:$4 sm:$0xff]  }
 0x619   :  { %12153 = vmatpush2.bf16.msra.mxu1 %v15910_v54  ;;  %v15985_v54 = vld [vmem:[%s20963_s5 + $0xe28] ss:$16 sps:$4 sm:$0xff]  }
 0x61a   :  { %12154 = vmatprep.subr.bf16.mxu1 %v15918_v47  ;;  %v15993_v47 = vld [vmem:[%s20963_s5 + $0xe0c] ss:$16 sps:$4 sm:$0xff]  }
 0x61b   :  { %12194 = vmatpush2.bf16.msra.mxu0 %v15913_v32  ;;  %v15988_v32 = vld [vmem:[%s20963_s5 + $0xc08] ss:$16 sps:$4 sm:$0xff]  }
 0x61c   :  { %12195 = vmatprep.subr.bf16.mxu0 %v15921_v34  ;;  %v15996_v34 = vld [vmem:[%s20963_s5 + $0xdec] ss:$16 sps:$4 sm:$0xff]  }
 0x61d   :  { %12155 = vmatpush2.bf16.msra.mxu1 %v15916_v55  ;;  %v15991_v55 = vld [vmem:[%s20963_s5 + $0xe08] ss:$16 sps:$4 sm:$0xff]  }
 0x61e   :  { %12156 = vmatprep.subr.bf16.mxu1 %v15924_v63  ;;  %v15999_v63 = vld [vmem:[%s20963_s5 + $0xfec] ss:$16 sps:$4 sm:$0xff]  }
 0x61f   :  { %12196 = vmatpush2.bf16.msra.mxu0 %v15919_v45  ;;  %v15994_v45 = vld [vmem:[%s20963_s5 + $0xde8] ss:$16 sps:$4 sm:$0xff]  }
 0x620   :  { %12197 = vmatprep.subr.bf16.mxu0 %v15927_v30  ;;  %v16002_v30 = vld [vmem:[%s20963_s5 + $0xdcc] ss:$16 sps:$4 sm:$0xff]  }
 0x621   :  { %12157 = vmatpush2.bf16.msra.mxu1 %v15922_v37  ;;  %v15997_v37 = vld [vmem:[%s20963_s5 + $0xfe8] ss:$16 sps:$4 sm:$0xff]  }
 0x622   :  { %12158 = vmatprep.subr.bf16.mxu1 %v15930_v61  ;;  %v16005_v61 = vld [vmem:[%s20963_s5 + $0xfcc] ss:$16 sps:$4 sm:$0xff]  }
 0x623   :  { %12198 = vmatpush2.bf16.msra.mxu0 %v15925_v1  ;;  %v16000_v1 = vld [vmem:[%s20963_s5 + $0xdc8] ss:$16 sps:$4 sm:$0xff]  }
 0x624   :  { %12199 = vmatprep.subr.bf16.mxu0 %v15933_v18  ;;  %v16008_v18 = vld [vmem:[%s20963_s5 + $0xdac] ss:$16 sps:$4 sm:$0xff]  }
 0x625   :  { %12159 = vmatpush2.bf16.msra.mxu1 %v15928_v39  ;;  %v16003_v39 = vld [vmem:[%s20963_s5 + $0xfc8] ss:$16 sps:$4 sm:$0xff]  }
 0x626   :  { %12160 = vmatprep.subr.bf16.mxu1 %v15936_v23  ;;  %v16011_v23 = vld [vmem:[%s20963_s5 + $0xfac] ss:$16 sps:$4 sm:$0xff]  }
 0x627   :  { %12200 = vmatpush2.bf16.msra.mxu0 %v15931_v49  ;;  %v16006_v49 = vld [vmem:[%s20963_s5 + $0xda8] ss:$16 sps:$4 sm:$0xff]  }
 0x628   :  { %12201 = vmatprep.subr.bf16.mxu0 %v15939_v11  ;;  %v16014_v11 = vld [vmem:[%s20963_s5 + $0xd8c] ss:$16 sps:$4 sm:$0xff]  }
 0x629   :  { %12161 = vmatpush2.bf16.msra.mxu1 %v15934_v22  ;;  %v16009_v22 = vld [vmem:[%s20963_s5 + $0xfa8] ss:$16 sps:$4 sm:$0xff]  }
 0x62a   :  { %12162 = vmatprep.subr.bf16.mxu1 %v15942_v0  ;;  %v16017_v0 = vld [vmem:[%s20963_s5 + $0xf8c] ss:$16 sps:$4 sm:$0xff]  }
 0x62b   :  { %12202 = vmatpush2.bf16.msra.mxu0 %v15937_v17  ;;  %v16012_v17 = vld [vmem:[%s20963_s5 + $0xd88] ss:$16 sps:$4 sm:$0xff]  }
 0x62c   :  { %12203 = vmatprep.subr.bf16.mxu0 %v15945_v25  ;;  %v16020_v25 = vld [vmem:[%s20963_s5 + $0xd6c] ss:$16 sps:$4 sm:$0xff]  }
 0x62d   :  { %12163 = vmatpush2.bf16.msra.mxu1 %v15940_v52  ;;  %v16015_v52 = vld [vmem:[%s20963_s5 + $0xf88] ss:$16 sps:$4 sm:$0xff]  }
 0x62e   :  { %12214 = vmatprep.subr.bf16.mxu1 %v15948_v53  ;;  %v16023_v53 = vld [vmem:[%s20963_s5 + $0xf6c] ss:$16 sps:$4 sm:$0xff]  }
 0x62f   :  { %12204 = vmatpush2.bf16.msra.mxu0 %v15943_v51  ;;  %v16018_v51 = vld [vmem:[%s20963_s5 + $0xd68] ss:$16 sps:$4 sm:$0xff]  }
 0x630   :  { %v11920_v14 = vpop.f32.mrf.mxu1  ;;  %12165 = vmatmul.mubr.bf16.vlgmr.msra.gmra.mxu1 %v19812_v15  ;;  %12255 = vmatprep.subr.bf16.mxu0 %v15951_v7  ;;  %v15960_v15 = vld [vmem:[%s20963_s5 + $0xcac] ss:$16 sps:$4 sm:$0xff]  }
 0x631   :  { %v11921_v57 = vadd.f32 %v11920_v14, %v20464_v38  ;;  %12215 = vmatpush1.bf16.msra.mxu1 %v15946_v44  ;;  %12246 = vmatprep.mubr.bf16.mxu1 %v19821_v27  ;;  %v15955_v27 = vld [vmem:[%s20963_s5 + $0xec8] ss:$16 sps:$4 sm:$0xff]   ;;  %v16026_v7 = vld [vmem:[%s20963_s5 + $0xd4c] ss:$16 sps:$4 sm:$0xff]  }
 0x632   :  { %v20661_v35 = vpop.f32.mrf.mxu1  ;;  %v11961_v56 = vpop.f32.mrf.mxu0  ;;  %12206 = vmatmul.mubr.bf16.vlgmr.msra.gmra.mxu0 %v19832_v10  ;;  %12216 = vmatprep.subr.bf16.mxu1 %v15954_v9  ;;  %v15963_v10 = vld [vmem:[%s20963_s5 + $0xeac] ss:$16 sps:$4 sm:$0xff]   ;;  %v16021_v44 = vld [vmem:[%s20963_s5 + $0xf68] ss:$16 sps:$4 sm:$0xff]  }
 0x633   :  { %v20667_v42 = vadd.f32 %v11961_v56, %v11921_v57  ;;  %12256 = vmatpush1.bf16.msra.mxu0 %v15949_v60  ;;  %12287 = vmatprep.mubr.bf16.mxu0 %v19840_v26  ;;  %v15966_v26 = vld [vmem:[%s20963_s5 + $0xc8c] ss:$16 sps:$4 sm:$0xff]   ;;  %v16024_v60 = vld [vmem:[%s20963_s5 + $0xd48] ss:$16 sps:$4 sm:$0xff]  }
 0x634   :  { %v11924_v38 = vpop.f32.mrf.mxu1  ;;  %v20673_v12 = vpop.f32.mrf.mxu0  ;;  %12257 = vmatprep.subr.bf16.mxu0 %v15957_v36  ;;  %v16029_v9 = vld [vmem:[%s20963_s5 + $0xf4c] ss:$16 sps:$4 sm:$0xff]   ;;  %v11923_v36 = vadd.f32 %v20661_v35, %v20473_v46  ;;  %v16027_v57 = vld [vmem:[%s20963_s5 + $0xf48] ss:$16 sps:$4 sm:$0xff]  }
 0x635   :  { %12217 = vmatpush1.bf16.msra.mxu1 %v15952_v48  ;;  %v16032_v14 = vld [vmem:[%s20963_s5 + $0xd2c] ss:$16 sps:$4 sm:$0xff]   ;;  %v16030_v56 = vld [vmem:[%s20963_s5 + $0xd28] ss:$16 sps:$4 sm:$0xff]  }
 0x636   :  { %v11925_v58 = vpop.f32.mrf.mxu1  ;;  %v11965_v16 = vpop.f32.mrf.mxu0  ;;  %12218 = vmatprep.subr.bf16.mxu1 %v15960_v15  ;;  %v16035_v48 = vld [vmem:[%s20963_s5 + $0xf2c] ss:$16 sps:$4 sm:$0xff]   ;;  %v11964_v35 = vadd.f32 %v20673_v12, %v11923_v36  ;;  %v16033_v15 = vld [vmem:[%s20963_s5 + $0xf28] ss:$16 sps:$4 sm:$0xff]  }
 0x637   :  { %12258 = vmatpush1.bf16.msra.mxu0 %v15955_v27  ;;  %v16038_v46 = vld [vmem:[%s20963_s5 + $0xd0c] ss:$16 sps:$4 sm:$0xff]   ;;  %v16036_v38 = vld [vmem:[%s20963_s5 + $0xd08] ss:$16 sps:$4 sm:$0xff]   ;;  %v16079_v58 = vld [vmem:[%s20964_s6] sm:$0xf] }
 0x638   :  { %v11966_v59 = vpop.f32.mrf.mxu0  ;;  %12259 = vmatprep.subr.bf16.mxu0 %v15963_v10  ;;  %v16041_v27 = vld [vmem:[%s20963_s5 + $0xf0c] ss:$16 sps:$4 sm:$0xff]   ;;  %v12297_v10 = vmax.f32 %v11964_v35, 0.0  ;;  %v21019_v16 = vsub.s32 2, %v21015_v19 }
 0x639   :  { %12219 = vmatpush1.bf16.msra.mxu1 %v15958_v6  ;;  %v16042_v12 = vld [vmem:[%s20965_s7 + $0x78] sm:$0xff]   ;;  %v16044_v59 = vld [vmem:[%s20965_s7 + $0x70] sm:$0xff]   ;;  %v16071_v35 = vld [vmem:[%s20965_s7 + $0x88] sm:$0xff]  }
 0x63a   :  { %12220 = vmatprep.subr.bf16.mxu1 %v15966_v26  ;;  %v16039_v6 = vld [vmem:[%s20963_s5 + $0xf08] ss:$16 sps:$4 sm:$0xff]   ;;  %v8955_v26 = vrot.slane %v16079_v58, %v21019_v16 }
 0x63b   :  { %12260 = vmatpush1.bf16.msra.mxu0 %v15961_v3  ;;  %v16043_v3 = vld [vmem:[%s20965_s7 + $0x38] sm:$0xff]  }
 0x63c   :  { %12261 = vmatprep.subr.bf16.mxu0 %v15969_v33  ;;  %v12301_v33 = vpack.c.bf16 %v12297_v10, %v12297_v10  ;;  %v16073_v10 = vld [vmem:[%s20965_s7 + $0x80] sm:$0xff]  }
 0x63d   :  { %12221 = vmatpush1.bf16.msra.mxu1 %v15964_v50  ;;  %v21020_v50 = vsub.s32 3, %v21015_v19  ;;  %v16046_v19 = vld [vmem:[%s20965_s7 + $0x68] sm:$0xff]  }
 0x63e   :  { %12222 = vmatprep.subr.bf16.mxu1 %v15972_v29 }
 0x63f   :  { %12262 = vmatpush1.bf16.msra.mxu0 %v15967_v2  ;;  %v8959_v29 = vrot.slane %v16079_v58, %v21020_v50 }
 0x640   :  { %12263 = vmatprep.subr.bf16.mxu0 %v15975_v40 }
 0x641   :  { %12223 = vmatpush1.bf16.msra.mxu1 %v15970_v13  ;;  %v16045_v13 = vld [vmem:[%s20965_s7 + $0x30] sm:$0xff]  }
 0x642   :  { %12224 = vmatprep.subr.bf16.mxu1 %v15978_v8 }
 0x643   :  { %12264 = vmatpush1.bf16.msra.mxu0 %v15973_v31 }
 0x644   :  { %12265 = vmatprep.subr.bf16.mxu0 %v15981_v21 }
 0x645   :  { %12225 = vmatpush1.bf16.msra.mxu1 %v15976_v24 }
 0x646   :  { %12226 = vmatprep.subr.bf16.mxu1 %v15984_v41 }
 0x647   :  { %12266 = vmatpush1.bf16.msra.mxu0 %v15979_v62 }
 0x648   :  { %12267 = vmatprep.subr.bf16.mxu0 %v15987_v28  ;;  %v16047_v28 = vld [vmem:[%s20965_s7 + $0x28] sm:$0xff]  }
 0x649   :  { %12227 = vmatpush1.bf16.msra.mxu1 %v15982_v43 }
 0x64a   :  { %12228 = vmatprep.subr.bf16.mxu1 %v15990_v20 }
 0x64b   :  { %12268 = vmatpush1.bf16.msra.mxu0 %v15985_v54 }
 0x64c   :  { %12269 = vmatprep.subr.bf16.mxu0 %v15993_v47  ;;  %v16049_v47 = vld [vmem:[%s20965_s7 + $0x20] sm:$0xff]  }
 0x64d   :  { %12229 = vmatpush1.bf16.msra.mxu1 %v15988_v32  ;;  %v16050_v32 = vld [vmem:[%s20965_s7 + $0x58] sm:$0xff]  }
 0x64e   :  { %12230 = vmatprep.subr.bf16.mxu1 %v15996_v34  ;;  %v16051_v34 = vld [vmem:[%s20965_s7 + $0x18] sm:$0xff]  }
 0x64f   :  { %12270 = vmatpush1.bf16.msra.mxu0 %v15991_v55  ;;  %v16052_v55 = vld [vmem:[%s20965_s7 + $0x50] sm:$0xff]  }
 0x650   :  { %12271 = vmatprep.subr.bf16.mxu0 %v15999_v63  ;;  %v16053_v63 = vld [vmem:[%s20965_s7 + $0x10] sm:$0xff]  }
 0x651   :  { %12231 = vmatpush2.bf16.msra.mxu1 %v15994_v45  ;;  %v16054_v45 = vld [vmem:[%s20965_s7 + $0x48] sm:$0xff]  }
 0x652   :  { %12232 = vmatprep.subr.bf16.mxu1 %v16002_v30  ;;  %v16055_v30 = vld [vmem:[%s20965_s7 + $0x8] sm:$0xff]  }
 0x653   :  { %12272 = vmatpush2.bf16.msra.mxu0 %v15997_v37  ;;  %v16056_v37 = vld [vmem:[%s20965_s7 + $0x40] sm:$0xff]  }
 0x654   :  { %12273 = vmatprep.subr.bf16.mxu0 %v16005_v61  ;;  %v16057_v61 = vld [vmem:[%s20965_s7] sm:$0xff]  }
 0x655   :  { %12233 = vmatpush2.bf16.msra.mxu1 %v16000_v1  ;;  %v12296_v1 = vmax.f32 %v20667_v42, 0.0  ;;  %v16061_v42 = vld [vmem:[%s20965_s7 + $0xb0] sm:$0xff]  }
 0x656   :  { %12234 = vmatprep.subr.bf16.mxu1 %v16008_v18  ;;  %v16058_v18 = vld [vmem:[%s20965_s7 + $0xf8] sm:$0xff]  }
 0x657   :  { %12274 = vmatpush2.bf16.msra.mxu0 %v16003_v39  ;;  %v16059_v39 = vld [vmem:[%s20965_s7 + $0xb8] sm:$0xff]  }
 0x658   :  { %12275 = vmatprep.subr.bf16.mxu0 %v16011_v23  ;;  %v12300_v23 = vpack.c.bf16 %v12296_v1, %v12296_v1 }
 0x659   :  { %12235 = vmatpush2.bf16.msra.mxu1 %v16006_v49  ;;  %v16060_v49 = vld [vmem:[%s20965_s7 + $0xf0] sm:$0xff]  }
 0x65a   :  { %12236 = vmatprep.subr.bf16.mxu1 %v16014_v11  ;;  %v16062_v11 = vld [vmem:[%s20965_s7 + $0xe8] sm:$0xff]  }
 0x65b   :  { %12276 = vmatpush2.bf16.msra.mxu0 %v16009_v22  ;;  %v16063_v22 = vld [vmem:[%s20965_s7 + $0xa8] sm:$0xff]  }
 0x65c   :  { %12277 = vmatprep.subr.bf16.mxu0 %v16017_v0  ;;  %v16064_v0 = vld [vmem:[%s20965_s7 + $0xe0] sm:$0xff]  }
 0x65d   :  { %12237 = vmatpush2.bf16.msra.mxu1 %v16012_v17  ;;  %v16065_v17 = vld [vmem:[%s20965_s7 + $0xa0] sm:$0xff]  }
 0x65e   :  { %12238 = vmatprep.subr.bf16.mxu1 %v16020_v25  ;;  %v16066_v25 = vld [vmem:[%s20965_s7 + $0xd8] sm:$0xff]  }
 0x65f   :  { %12278 = vmatpush2.bf16.msra.mxu0 %v16015_v52  ;;  %v16067_v52 = vld [vmem:[%s20965_s7 + $0x98] sm:$0xff]  }
 0x660   :  { %12279 = vmatprep.subr.bf16.mxu0 %v16023_v53 }
 0x661   :  { %12239 = vmatpush2.bf16.msra.mxu1 %v16018_v51  ;;  %v16068_v51 = vld [vmem:[%s20965_s7 + $0xd0] sm:$0xff]  }
 0x662   :  { %12240 = vmatprep.subr.bf16.mxu1 %v16026_v7 }
 0x663   :  { %12280 = vmatpush2.bf16.msra.mxu0 %v16021_v44  ;;  %v16069_v44 = vld [vmem:[%s20965_s7 + $0x90] sm:$0xff]  }
 0x664   :  { %12281 = vmatprep.subr.bf16.mxu0 %v16029_v9 }
 0x665   :  { %12241 = vmatpush2.bf16.msra.mxu1 %v16024_v60 }
 0x666   :  { %12242 = vmatprep.subr.bf16.mxu1 %v16032_v14 }
 0x667   :  { %12282 = vmatpush2.bf16.msra.mxu0 %v16027_v57 }
 0x668   :  { %12283 = vmatprep.subr.bf16.mxu0 %v16035_v48 }
 0x669   :  { %12243 = vmatpush2.bf16.msra.mxu1 %v16030_v56  ;;  %v16070_v56 = vld [vmem:[%s20965_s7 + $0xc8] sm:$0xff]  }
 0x66a   :  { %12244 = vmatprep.subr.bf16.mxu1 %v16038_v46 }
 0x66b   :  { %12284 = vmatpush2.bf16.msra.mxu0 %v16033_v15 }
 0x66c   :  { %12285 = vmatprep.subr.bf16.mxu0 %v16041_v27 }
 0x66d   :  { %12245 = vmatpush2.bf16.msra.mxu1 %v16036_v38 }
 0x66e   :  { %14624 = vmatprep.subr.bf16.mxu1 %v16042_v12  ;;  %v16072_v12 = vld [vmem:[%s20965_s7 + $0xc0] sm:$0xff]  }
 0x66f   :  { %12286 = vmatpush2.bf16.msra.mxu0 %v16039_v6 }
 0x670   :  { %v12002_v2 = vpop.f32.mrf.mxu1  ;;  %12247 = vmatmul.mubr.bf16.vlgmr.msra.gmra.mxu1 %v20026_v5 }
 0x671   :  { %v12003_v40 = vadd.f32 %v12002_v2, %v8955_v26  ;;  %14625 = vmatpush3.bf16.msra.mxu1 %v16043_v3  ;;  %12599 = vmatprep.mubr.bf16.mxu1 %v12301_v33 }
 0x672   :  { %v12004_v8 = vpop.f32.mrf.mxu1  ;;  %v12043_v31 = vpop.f32.mrf.mxu0  ;;  %12288 = vmatmul.mubr.bf16.vlgmr.msra.gmra.mxu0 %v20047_v4  ;;  %14626 = vmatprep.subr.bf16.mxu1 %v16044_v59  ;;  %v16048_v4 = vld [vmem:[%s20965_s7 + $0x60] sm:$0xff]  }
 0x673   :  { %v12005_v21 = vadd.f32 %v12004_v8, %v8959_v29  ;;  %v12044_v24 = vadd.f32 %v12043_v31, %v12003_v40 }
 0x674   :  { %v12006_v41 = vpop.f32.mrf.mxu1  ;;  %v12045_v5 = vpop.f32.mrf.mxu0 }
 0x675   :  { %v12046_v62 = vadd.f32 %v12045_v5, %v12005_v21  ;;  %14627 = vmatpush3.bf16.msra.mxu1 %v16045_v13 }
 0x676   :  { %v12007_v43 = vpop.f32.mrf.mxu1  ;;  %v12047_v20 = vpop.f32.mrf.mxu0  ;;  %14628 = vmatprep.subr.bf16.mxu1 %v16046_v19 }
 0x678   :  { %v12048_v54 = vpop.f32.mrf.mxu0 }
 0x679   :  { %14629 = vmatpush3.bf16.msra.mxu1 %v16047_v28 }
 0x67a   :  { %14630 = vmatprep.subr.bf16.mxu1 %v16048_v4 }
 0x67d   :  { %14631 = vmatpush3.bf16.msra.mxu1 %v16049_v47 }
 0x67e   :  { %14632 = vmatprep.subr.bf16.mxu1 %v16050_v32 }
 0x681   :  { %14633 = vmatpush3.bf16.msra.mxu1 %v16051_v34 }
 0x682   :  { %14634 = vmatprep.subr.bf16.mxu1 %v16052_v55 }
 0x685   :  { %14635 = vmatpush3.bf16.msra.mxu1 %v16053_v63 }
 0x686   :  { %14636 = vmatprep.subr.bf16.mxu1 %v16054_v45 }
 0x689   :  { %14637 = vmatpush3.bf16.msra.mxu1 %v16055_v30 }
 0x68a   :  { %14638 = vmatprep.subr.bf16.mxu1 %v16056_v37 }
 0x68d   :  { %14639 = vmatpush3.bf16.msra.mxu1 %v16057_v61  ;;  %v13759_v61 = vld [vmem:[%s20966_s8] ss:$0 sm:$0xff]  ;;  %s16105_s8 = smov [#allocation4]  }
 0x68e   :  { %14646 = vmatprep.subr.bf16.mxu1 %v16058_v18  ;;  %v21021_v18 = vlaneseq  ;;  %s12670_s28 = sshll.u32 %s16105_s8, 4  ;;  %s12671_s28 = int_to_ptr.vmem [resolvable:$true] %s12670_s28 }
 0x68f   :  { %s16080_s29 = scalar_lea.vmem %s12671_s28, 32  ;;  %p16085_p1 = scmp.lt.s32.totalorder %s12671_s28, %s12671_s28 }
 0x690   :  { %12600 = vmatmul.mubr.bf16.vlgmr.msra.gmra.mxu1 %v12300_v23  ;;  %p16081_p0 = scmp.ne.s32.totalorder %s12671_s28, %s16080_s29  ;;  %p16086_p2 = scmp.lt.s32.totalorder %s16080_s29, %s16080_s29 }
 0x691   :  { %14647 = vmatpush3.bf16.msra.mxu1 %v16059_v39  ;;  %v12648_v39 = vand.u32 127, %v21021_v18 }
 0x692   :  { %14648 = vmatprep.subr.bf16.mxu1 %v16060_v49  ;;  %p16087_p3 = por %p16086_p2, %p16085_p1 }
 0x693   :  { %vm12649_vm0 = vcmp.lt.s32.totalorder %v12648_v39, 10 }
 0x694   :  { %p16088_p4 = pnand %p16087_p3, %p16081_p0 }
 0x695   :  { %14649 = vmatpush3.bf16.msra.mxu1 %v16061_v42 }
 0x696   :  { %14650 = vmatprep.subr.bf16.mxu1 %v16062_v11 }
 0x699   :  { %14651 = vmatpush3.bf16.msra.mxu1 %v16063_v22 }
 0x69a   :  { %14652 = vmatprep.subr.bf16.mxu1 %v16064_v0 }
 0x69d   :  { %14653 = vmatpush3.bf16.msra.mxu1 %v16065_v17 }
 0x69e   :  { %14654 = vmatprep.subr.bf16.mxu1 %v16066_v25 }
 0x6a1   :  { %14655 = vmatpush3.bf16.msra.mxu1 %v16067_v52 }
 0x6a2   :  { %14656 = vmatprep.subr.bf16.mxu1 %v16068_v51 }
 0x6a5   :  { %14657 = vmatpush3.bf16.msra.mxu1 %v16069_v44 }
 0x6a6   :  { %14658 = vmatprep.subr.bf16.mxu1 %v16070_v56 }
 0x6a9   :  { %14659 = vmatpush3.bf16.msra.mxu1 %v16071_v35 }
 0x6aa   :  { %14660 = vmatprep.subr.bf16.mxu1 %v16072_v12 }
 0x6ad   :  { %14661 = vmatpush3.bf16.msra.mxu1 %v16073_v10 }
 0x6b0   :  { %v12084_v53 = vpop.f32.mrf.mxu1 }
 0x6b1   :  { %v12085_v7 = vadd.f32 %v12084_v53, %v12044_v24 }
 0x6b2   :  { %v12086_v9 = vpop.f32.mrf.mxu1  ;;  %v12125_v60 = vpop.f32.mrf.mxu0 }
 0x6b3   :  { %v12087_v14 = vadd.f32 %v12086_v9, %v12046_v62  ;;  %v12126_v36 = vadd.f32 %v12125_v60, %v12085_v7 }
 0x6b4   :  { %v12088_v57 = vpop.f32.mrf.mxu1  ;;  %v12127_v48 = vpop.f32.mrf.mxu0 }
 0x6b5   :  { %v12128_v46 = vadd.f32 %v12127_v48, %v12087_v14 }
 0x6b6   :  { %v12089_v15 = vpop.f32.mrf.mxu1  ;;  %v12129_v27 = vpop.f32.mrf.mxu0 }
 0x6b8   :  { %v12130_v38 = vpop.f32.mrf.mxu0 }
 0x6f0   :  { %v12166_v6 = vpop.f32.mrf.mxu1 }
 0x6f1   :  { %v12167_v29 = vadd.f32 %v12166_v6, %v12126_v36 }
 0x6f2   :  { %v12168_v58 = vpop.f32.mrf.mxu1  ;;  %v12207_v16 = vpop.f32.mrf.mxu0 }
 0x6f3   :  { %v12169_v2 = vadd.f32 %v12168_v58, %v12128_v46  ;;  %v12208_v40 = vadd.f32 %v12207_v16, %v12167_v29 }
 0x6f4   :  { %v12170_v26 = vpop.f32.mrf.mxu1  ;;  %v12209_v3 = vpop.f32.mrf.mxu0 }
 0x6f5   :  { %v12210_v8 = vadd.f32 %v12209_v3, %v12169_v2 }
 0x6f6   :  { %v12171_v59 = vpop.f32.mrf.mxu1  ;;  %v12211_v33 = vpop.f32.mrf.mxu0 }
 0x6f8   :  { %v12212_v50 = vpop.f32.mrf.mxu0 }
 0x730   :  { %v12248_v13 = vpop.f32.mrf.mxu1 }
 0x731   :  { %v12249_v31 = vadd.f32 %v12248_v13, %v12208_v40 }
 0x732   :  { %v12250_v19 = vpop.f32.mrf.mxu1  ;;  %v12289_v21 = vpop.f32.mrf.mxu0 }
 0x733   :  { %v12251_v24 = vadd.f32 %v12250_v19, %v12210_v8  ;;  %v12290_v41 = vadd.f32 %v12289_v21, %v12249_v31 }
 0x734   :  { %v12252_v5 = vpop.f32.mrf.mxu1  ;;  %v12291_v62 = vpop.f32.mrf.mxu0 }
 0x735   :  { %v12292_v28 = vadd.f32 %v12291_v62, %v12251_v24  ;;  %v12298_v43 = vmax.f32 %v12290_v41, 0.0 }
 0x736   :  { %v12253_v20 = vpop.f32.mrf.mxu1  ;;  %v12293_v4 = vpop.f32.mrf.mxu0 }
 0x737   :  { %v12299_v54 = vmax.f32 %v12292_v28, 0.0  ;;  %v12302_v34 = vpack.c.bf16 %v12298_v43, %v12298_v43 }
 0x738   :  { %v12294_v47 = vpop.f32.mrf.mxu0 }
 0x739   :  { %v12303_v32 = vpack.c.bf16 %v12299_v54, %v12299_v54 }
 0x73b   :  { %12639 = vmatprep.mubr.bf16.mxu1 %v12303_v32 }
 0x73c   :  { %12640 = vmatmul.mubr.bf16.vlgmr.msra.gmra.mxu1 %v12302_v34 }
 0x750   :  { %v14640_v55 = vpop.f32.mrf.mxu1 }
 0x752   :  { %v14641_v63 = vpop.f32.mrf.mxu1 }
 0x753   :  { %v14642_v45 = vadd.f32 %v14641_v63, %v14640_v55 }
 0x754   :  { %v14643_v30 = vpop.f32.mrf.mxu1 }
 0x755   :  { %v12602_v49 = vadd.f32 %v14642_v45, %v13759_v61 }
 0x756   :  { %v14644_v37 = vpop.f32.mrf.mxu1 }
 0x7fc   :  { %v14662_v1 = vpop.f32.mrf.mxu1 }
 0x7fe   :  { %v14663_v23 = vpop.f32.mrf.mxu1 }
 0x7ff   :  { %v14664_v42 = vadd.f32 %v14663_v23, %v14662_v1 }
 0x800   :  { %v14665_v11 = vpop.f32.mrf.mxu1 }
 0x801   :  { %v12642_v22 = vadd.f32 %v14664_v42, %v12602_v49 }
 0x802   :  { %v14666_v0 = vpop.f32.mrf.mxu1 }
 0x803   :  { %v12650_v17 = vsel %vm12649_vm0, %v12642_v22, -1e+30 }
 0x804   :  { %v12651_v25 = vsel %vm2048_vm5, %v12650_v17, -inf }
 0x805   :  { %12652 = vmax.xlane.f32.xlu0 %v12651_v25 }
 0x88e   :  { %v12653_v52 = vpop.xlane.xlu0 %12652 }
 0x88f   :  { %v12654_v53 = vsub.f32 %v12650_v17, %v12653_v52 }
 0x891   :  { %v12655_v51 = vmul.f32 1.442695, %v12654_v53 }
 0x893   :  { %16074 = vpow2.f32 %v12655_v51 }
 0x8a0   :  { %v16075_v7 = vpop.eup %16074 }
 0x8a1   :  { %v12657_v44 = vsel %vm2048_vm5, %v16075_v7, 0.0 }
 0x8a2   :  { %12658 = vadd.xlane.f32.xlu0 %v12657_v44 }
 0x92b   :  { %v12659_v9 = vpop.xlane.xlu0 %12658 }
 0x92c   :  { %16076 = vlog2.f32 %v12659_v9 }
 0x939   :  { %v16077_v60 = vpop.eup %16076 }
 0x93a   :  { %v12661_v14 = vmul.f32 0.6931472, %v16077_v60 }
 0x93c   :  { %v12662_v36 = vsub.f32 %v12654_v53, %v12661_v14 }
 0x93e   :  { %12663 = vst [vmem:[#allocation4] sm:$0x3] %v12662_v36 }
 0x93f   :  { %16091 = shalt.err (!%p16088_p4)
}
 0x940   :  { %12673 = dma.vmem_to_hbm [thread:$0]  %s12671_s28, 32, %s20967_s9, [#allocation5]  }
 0x941   :  { %16100 = dma.done.wait [#allocation5], 32  }
 0x942   :  { %16101 = vsyncadd [#allocation5], 4294967264 }
 0x943   :  { %12677 = vsyncpa [#allocation5], 1 }

</bundles_post_ra>
